<compile_context>
chip_gen: v7x
topology: tpu7x:2x2x1
jax: 0.10.0
libtpu: 0.0.40
codegen_flags: <defaults>
</compile_context>

<pallas_src>
import functools

import numpy as np
import jax
import jax.numpy as jnp
from jax.experimental import pallas as pl
from jax.experimental.pallas import tpu as pltpu

S_B = 1.0
Q_MIN = 0.5
TM = 1024     # hit tile (sublane dim)
NCORES = 2    # shard hit tiles across TensorCores (v7x megacore); harmless elsewhere


# ---------------------------------------------------------------------------
# Pallas kernel: V = sum_i q_i * sum_k V_ik(dist(x_i, x_center_k)) * q_center_k
# ---------------------------------------------------------------------------
def _v_kernel(x_ref, q_ref, lbl_ref, xcT_ref, qc_ref, out_ref, acc_ref):
    it = pl.program_id(1)

    @pl.when(it == 0)
    def _():
        acc_ref[...] = jnp.zeros_like(acc_ref)

    x = x_ref[...]          # (TM, D)   hit coordinates
    q = q_ref[...]          # (TM, 1)   hit charge q_i (0 for padded hits)
    lbl = lbl_ref[...]      # (TM, 1)   per-hit particle label (-1 = background/pad)
    xcT = xcT_ref[...]      # (D, NT)   center coordinates, lane-dense over centers
    qc = qc_ref[...]        # (1, NT)   center charge q_k (0 for padded centers)

    tm, d = x.shape
    nt = qc.shape[1]

    # ||x_i - c_k||^2 via unrolled VPU multiply-adds (D is tiny; skip the MXU;
    # this form is always >= 0, unlike x2 + c2 - 2xc which can cancel negative).
    dist = jnp.zeros((tm, nt), jnp.float32)
    for dd in range(d):
        diff = x[:, dd:dd + 1] - xcT[dd:dd + 1, :]
        dist = dist + diff * diff

    # membership mask computed in-register: hit label == center (particle) index
    # TODO(synk): assumes <=1 truth edge per hit (one-hot membership); a hit with
    # multiple particle memberships would need the explicit (int8) mask path.
    col = jax.lax.broadcasted_iota(jnp.int32, (1, nt), 1)
    m = lbl == col

    # attractive potential inside the object, hinge repulsive outside
    v = jnp.where(m, dist, jnp.maximum(1.0 - dist, 0.0))

    # un-reduced accumulation; padded hits (q=0) / centers (qc=0) contribute 0
    acc_ref[...] += q * (v * qc)

    @pl.when(it == pl.num_programs(1) - 1)
    def _():
        total = jnp.sum(acc_ref[...])
        # lane-dense unmasked store of this core's partial sum
        out_ref[...] = jnp.full(out_ref.shape, total, jnp.float32)


def _v_pallas(x, q, label, xc, qc):
    n_hit, d = x.shape
    n_true = xc.shape[0]
    # TODO(synk): for very large n_true (> a few K) tile the centers dimension
    # with a second "arbitrary" grid axis to bound VMEM temporaries.
    nt_pad = max(128, ((n_true + 127) // 128) * 128)
    step = TM * NCORES
    nh_pad = ((n_hit + step - 1) // step) * step
    n_inner = nh_pad // step

    x_p = jnp.pad(x, ((0, nh_pad - n_hit), (0, 0)))
    q_p = jnp.pad(q, ((0, nh_pad - n_hit),)).reshape(nh_pad, 1)
    lbl_p = jnp.pad(label, ((0, nh_pad - n_hit),),
                    constant_values=-1).reshape(nh_pad, 1)
    xcT_p = jnp.pad(xc, ((0, nt_pad - n_true), (0, 0))).T      # (D, nt_pad)
    qc_p = jnp.pad(qc, ((0, nt_pad - n_true),)).reshape(1, nt_pad)

    cost = pl.CostEstimate(
        flops=int(nh_pad) * int(nt_pad) * (3 * d + 7),
        transcendentals=0,
        bytes_accessed=int(nh_pad) * (d + 2) * 4
        + int(nt_pad) * (d + 1) * 4
        + NCORES * 8 * 128 * 4,
    )

    out = pl.pallas_call(
        _v_kernel,
        out_shape=jax.ShapeDtypeStruct((NCORES * 8, 128), jnp.float32),
        grid_spec=pltpu.PrefetchScalarGridSpec(
            num_scalar_prefetch=0,
            grid=(NCORES, n_inner),
            in_specs=[
                pl.BlockSpec((TM, d), lambda c, i: (c * n_inner + i, 0)),   # x
                pl.BlockSpec((TM, 1), lambda c, i: (c * n_inner + i, 0)),   # q
                pl.BlockSpec((TM, 1), lambda c, i: (c * n_inner + i, 0)),   # label
                pl.BlockSpec((d, nt_pad), lambda c, i: (0, 0)),             # centers^T
                pl.BlockSpec((1, nt_pad), lambda c, i: (0, 0)),             # q_centers
            ],
            out_specs=pl.BlockSpec((8, 128), lambda c, i: (c, 0)),
            scratch_shapes=[pltpu.VMEM((TM, nt_pad), jnp.float32)],
        ),
        compiler_params=pltpu.CompilerParams(
            dimension_semantics=("parallel", "arbitrary"),
            vmem_limit_bytes=32 * 1024 * 1024,
        ),
        cost_estimate=cost,
    )(x_p, q_p, lbl_p, xcT_p, qc_p)

    # each core's (8,128) slab is filled with its partial sum -> one entry per core
    return jnp.sum(out[::8, 0])


# ---------------------------------------------------------------------------
# Glue: scatter_max over truth edges, background terms, center gather
# ---------------------------------------------------------------------------
def _prepare(x, f, y, e_h, e_p, n_true, s_b, q_min):
    n_hit = x.shape[0]
    x = x.astype(jnp.float32)
    f = f.astype(jnp.float32)

    # scatter_max(f[e_h], e_p, out=zeros) -> per-particle max beta + argmax hit
    # TODO(synk): data-dependent scatter/argmax gather stays in plain JAX glue.
    f_edges = f[e_h]
    f_centers = jax.ops.segment_max(f_edges, e_p, num_segments=n_true)
    f_centers = jnp.maximum(f_centers, 0.0)  # matches torch out=zeros init
    is_max = f_edges >= f_centers[e_p]
    centers = jax.ops.segment_min(
        jnp.where(is_max, e_h, n_hit), e_p, num_segments=n_true)

    bkg_mask = (y == -1)
    n_bkg = jnp.sum(bkg_mask).astype(jnp.float32)
    b1 = 1.0 - jnp.sum(f_centers) / n_true
    b2 = s_b / n_bkg * jnp.sum(jnp.where(bkg_mask, f, 0.0))

    q = jnp.square(jnp.arctanh(f)) + q_min        # (n_hit,)
    xc = x[centers]                               # (n_true, D)
    qc = q[centers]                               # (n_true,)

    # per-hit particle label (-1 when the hit has no truth edge)
    label = jnp.full((n_hit,), -1, jnp.int32).at[e_h].set(e_p.astype(jnp.int32))
    return b1 + b2, x, q, xc, qc, label


@functools.partial(jax.jit, static_argnames=("n_true", "s_b", "q_min"))
def obj_condensation_loss(x, f, y, e_h, e_p, n_true, s_b=S_B, q_min=Q_MIN):
    b, x32, q, xc, qc, label = _prepare(x, f, y, e_h, e_p, n_true, s_b, q_min)
    v = _v_pallas(x32, q, label, xc, qc) / x.shape[0]
    return jnp.stack([b, v])


def obj_condensation_loss_ref(x, f, y, e_h, e_p, n_true, s_b=S_B, q_min=Q_MIN):
    """Pure-JAX reference mirroring the PyTorch forward (for verification)."""
    n_hit = x.shape[0]
    b, x32, q, xc, qc, _ = _prepare(x, f, y, e_h, e_p, n_true, s_b, q_min)
    m = jnp.zeros((n_hit, n_true), bool).at[e_h, e_p].set(True)
    dist = jnp.sum((x32[:, None, :] - xc[None, :, :]) ** 2, axis=2)
    v = jnp.where(m, dist, jnp.maximum(1.0 - dist, 0.0))
    v = jnp.sum(jnp.sum(v * qc[None, :], axis=1) * q) / n_hit
    return jnp.stack([b, v])


if __name__ == "__main__":
    key = jax.random.PRNGKey(0)
    n_hit, D, n_true = 200, 3, 12
    k1, k2, k3 = jax.random.split(key, 3)

    x = jax.random.normal(k1, (n_hit, D), jnp.float32)
    f = jax.random.uniform(k2, (n_hit,), jnp.float32, minval=0.05, maxval=0.95)

    # labels: each particle gets >=1 hit; guarantee some background (-1)
    y_np = np.array(jax.random.randint(k3, (n_hit,), -1, n_true))  # writable copy
    y_np[:n_true] = np.arange(n_true)
    y_np[-4:] = -1
    y = jnp.asarray(y_np, dtype=jnp.int32)

    # truth edge index (hit, particle) for all non-background hits
    e_h_np = np.nonzero(y_np >= 0)[0].astype(np.int32)
    e_p_np = y_np[e_h_np].astype(np.int32)
    e_h = jnp.asarray(e_h_np)
    e_p = jnp.asarray(e_p_np)

    out = jax.block_until_ready(
        obj_condensation_loss(x, f, y, e_h, e_p, n_true=n_true))
    ref = jax.block_until_ready(
        obj_condensation_loss_ref(x, f, y, e_h, e_p, n_true))
    np.testing.assert_allclose(np.asarray(out), np.asarray(ref),
                               rtol=1e-4, atol=1e-5)
    print("KERNEL_OK")
</pallas_src>

<mosaic_0001>
module attributes {stable_mosaic.version = 11 : i64} {
  func.func @_v_kernel(%arg0: i32, %arg1: i32, %arg2: memref<1024x3xf32, #tpu.memory_space<vmem>>, %arg3: memref<1024x1xf32, #tpu.memory_space<vmem>>, %arg4: memref<1024x1xi32, #tpu.memory_space<vmem>>, %arg5: memref<3x128xf32, #tpu.memory_space<vmem>>, %arg6: memref<1x128xf32, #tpu.memory_space<vmem>>, %arg7: memref<8x128xf32, #tpu.memory_space<vmem>>, %arg8: memref<1024x128xf32, #tpu.memory_space<vmem>>) attributes {dimension_semantics = [#tpu.dimension_semantics<parallel>, #tpu.dimension_semantics<arbitrary>], iteration_bounds = array<i64: 2, 1>, scalar_prefetch = 0 : i64, scratch_operands = 1 : i64, tpu.core_type = #tpu.core_type<tc>, window_params = [{transform_indices = @transform_0, window_bounds = array<i64: 1024, 3>}, {transform_indices = @transform_1, window_bounds = array<i64: 1024, 1>}, {transform_indices = @transform_2, window_bounds = array<i64: 1024, 1>}, {pipeline_mode = #tpu.pipeline_mode<synchronous>, transform_indices = @transform_3, window_bounds = array<i64: 3, 128>}, {pipeline_mode = #tpu.pipeline_mode<synchronous>, transform_indices = @transform_4, window_bounds = array<i64: 1, 128>}, {transform_indices = @transform_5, window_bounds = array<i64: 8, 128>}]} {
    %c0_i32 = arith.constant 0 : i32
    %0 = arith.cmpi eq, %arg1, %c0_i32 : i32
    %1 = arith.extui %0 : i1 to i32
    %c0_i32_0 = arith.constant 0 : i32
    %2 = arith.cmpi ne, %1, %c0_i32_0 : i32
    scf.if %2 {
      %cst_18 = arith.constant 0.000000e+00 : f32
      %49 = vector.broadcast %cst_18 : f32 to vector<1024x128xf32>
      %c0_19 = arith.constant 0 : index
      %c0_20 = arith.constant 0 : index
      %50 = vector.load %arg8[%c0_19, %c0_20] : memref<1024x128xf32, #tpu.memory_space<vmem>>, vector<1024x128xf32>
      tpu.vector_store %arg8[%c0_19, %c0_20], %49 {strides = array<i32>} : memref<1024x128xf32, #tpu.memory_space<vmem>>, vector<1024x128xf32>,
    } else {
    }
    %c0 = arith.constant 0 : index
    %c0_1 = arith.constant 0 : index
    %3 = vector.load %arg2[%c0, %c0_1] : memref<1024x3xf32, #tpu.memory_space<vmem>>, vector<1024x3xf32>
    %c0_2 = arith.constant 0 : index
    %c0_3 = arith.constant 0 : index
    %4 = vector.load %arg3[%c0_2, %c0_3] : memref<1024x1xf32, #tpu.memory_space<vmem>>, vector<1024x1xf32>
    %c0_4 = arith.constant 0 : index
    %c0_5 = arith.constant 0 : index
    %5 = vector.load %arg4[%c0_4, %c0_5] : memref<1024x1xi32, #tpu.memory_space<vmem>>, vector<1024x1xi32>
    %c0_6 = arith.constant 0 : index
    %c0_7 = arith.constant 0 : index
    %6 = vector.load %arg5[%c0_6, %c0_7] : memref<3x128xf32, #tpu.memory_space<vmem>>, vector<3x128xf32>
    %c0_8 = arith.constant 0 : index
    %c0_9 = arith.constant 0 : index
    %7 = vector.load %arg6[%c0_8, %c0_9] : memref<1x128xf32, #tpu.memory_space<vmem>>, vector<1x128xf32>
    %cst = arith.constant 0.000000e+00 : f32
    %8 = vector.broadcast %cst : f32 to vector<1024x128xf32>
    %9 = vector.extract_strided_slice %3 {offsets = [0, 0], sizes = [1024, 1], strides = [1, 1]} : vector<1024x3xf32> to vector<1024x1xf32>
    %10 = vector.extract_strided_slice %6 {offsets = [0, 0], sizes = [1, 128], strides = [1, 1]} : vector<3x128xf32> to vector<1x128xf32>
    %11 = vector.broadcast %9 : vector<1024x1xf32> to vector<1024x128xf32>
    %12 = vector.broadcast %10 : vector<1x128xf32> to vector<1024x128xf32>
    %13 = arith.subf %11, %12 : vector<1024x128xf32>
    %14 = arith.mulf %13, %13 : vector<1024x128xf32>
    %15 = arith.addf %8, %14 : vector<1024x128xf32>
    %16 = vector.extract_strided_slice %3 {offsets = [0, 1], sizes = [1024, 1], strides = [1, 1]} : vector<1024x3xf32> to vector<1024x1xf32>
    %17 = vector.extract_strided_slice %6 {offsets = [1, 0], sizes = [1, 128], strides = [1, 1]} : vector<3x128xf32> to vector<1x128xf32>
    %18 = vector.broadcast %16 : vector<1024x1xf32> to vector<1024x128xf32>
    %19 = vector.broadcast %17 : vector<1x128xf32> to vector<1024x128xf32>
    %20 = arith.subf %18, %19 : vector<1024x128xf32>
    %21 = arith.mulf %20, %20 : vector<1024x128xf32>
    %22 = arith.addf %15, %21 : vector<1024x128xf32>
    %23 = vector.extract_strided_slice %3 {offsets = [0, 2], sizes = [1024, 1], strides = [1, 1]} : vector<1024x3xf32> to vector<1024x1xf32>
    %24 = vector.extract_strided_slice %6 {offsets = [2, 0], sizes = [1, 128], strides = [1, 1]} : vector<3x128xf32> to vector<1x128xf32>
    %25 = vector.broadcast %23 : vector<1024x1xf32> to vector<1024x128xf32>
    %26 = vector.broadcast %24 : vector<1x128xf32> to vector<1024x128xf32>
    %27 = arith.subf %25, %26 : vector<1024x128xf32>
    %28 = arith.mulf %27, %27 : vector<1024x128xf32>
    %29 = arith.addf %22, %28 : vector<1024x128xf32>
    %30 = tpu.iota {dimensions = array<i32: 1>} : vector<1x128xi32>
    %31 = vector.broadcast %5 : vector<1024x1xi32> to vector<1024x128xi32>
    %32 = vector.broadcast %30 : vector<1x128xi32> to vector<1024x128xi32>
    %33 = arith.cmpi eq, %31, %32 : vector<1024x128xi32>
    %cst_10 = arith.constant 1.000000e+00 : f32
    %34 = vector.broadcast %cst_10 : f32 to vector<1024x128xf32>
    %35 = arith.subf %34, %29 : vector<1024x128xf32>
    %cst_11 = arith.constant 0.000000e+00 : f32
    %36 = vector.broadcast %cst_11 : f32 to vector<1024x128xf32>
    %37 = arith.maximumf %35, %36 : vector<1024x128xf32>
    %38 = arith.select %33, %29, %37 : vector<1024x128xi1>, vector<1024x128xf32>
    %c0_12 = arith.constant 0 : index
    %c0_13 = arith.constant 0 : index
    %39 = vector.load %arg8[%c0_12, %c0_13] : memref<1024x128xf32, #tpu.memory_space<vmem>>, vector<1024x128xf32>
    %40 = vector.broadcast %7 : vector<1x128xf32> to vector<1024x128xf32>
    %41 = arith.mulf %38, %40 : vector<1024x128xf32>
    %42 = vector.broadcast %4 : vector<1024x1xf32> to vector<1024x128xf32>
    %43 = arith.mulf %42, %41 : vector<1024x128xf32>
    %44 = arith.addf %39, %43 : vector<1024x128xf32>
    %c0_14 = arith.constant 0 : index
    %c0_15 = arith.constant 0 : index
    %45 = vector.load %arg8[%c0_14, %c0_15] : memref<1024x128xf32, #tpu.memory_space<vmem>>, vector<1024x128xf32>
    tpu.vector_store %arg8[%c0_14, %c0_15], %44 {strides = array<i32>} : memref<1024x128xf32, #tpu.memory_space<vmem>>, vector<1024x128xf32>,
    %c0_i32_16 = arith.constant 0 : i32
    %46 = arith.cmpi eq, %arg1, %c0_i32_16 : i32
    %47 = arith.extui %46 : i1 to i32
    %c0_i32_17 = arith.constant 0 : i32
    %48 = arith.cmpi ne, %47, %c0_i32_17 : i32
    scf.if %48 {
      %c0_18 = arith.constant 0 : index
      %c0_19 = arith.constant 0 : index
      %49 = vector.load %arg8[%c0_18, %c0_19] : memref<1024x128xf32, #tpu.memory_space<vmem>>, vector<1024x128xf32>
      %50 = vector.shape_cast %49 : vector<1024x128xf32> to vector<1x1024x128xf32>
      %cst_20 = arith.constant dense<0.000000e+00> : vector<1xf32>
      %51 = vector.multi_reduction <add>, %50, %cst_20 [1, 2] : vector<1x1024x128xf32> to vector<1xf32>
      %52 = vector.shape_cast %51 : vector<1xf32> to vector<1x1x1xf32>
      %53 = vector.extract %52[0, 0, 0] : f32 from vector<1x1x1xf32>
      %54 = vector.broadcast %53 : f32 to vector<8x128xf32>
      %c0_21 = arith.constant 0 : index
      %c0_22 = arith.constant 0 : index
      %55 = vector.load %arg7[%c0_21, %c0_22] : memref<8x128xf32, #tpu.memory_space<vmem>>, vector<8x128xf32>
      tpu.vector_store %arg7[%c0_21, %c0_22], %54 {strides = array<i32>} : memref<8x128xf32, #tpu.memory_space<vmem>>, vector<8x128xf32>,
    } else {
    }
    return
  }
  func.func @transform_0(%arg0: i32, %arg1: i32) -> (i32, i32) {
    %c1_i32 = arith.constant 1 : i32
    %0 = arith.muli %arg0, %c1_i32 : i32
    %1 = arith.addi %0, %arg1 : i32
    %c0_i32 = arith.constant 0 : i32
    %c0_i32_0 = arith.constant 0 : i32
    return %1, %c0_i32 : i32, i32
  }
  func.func @transform_1(%arg0: i32, %arg1: i32) -> (i32, i32) {
    %c1_i32 = arith.constant 1 : i32
    %0 = arith.muli %arg0, %c1_i32 : i32
    %1 = arith.addi %0, %arg1 : i32
    %c0_i32 = arith.constant 0 : i32
    %c0_i32_0 = arith.constant 0 : i32
    return %1, %c0_i32 : i32, i32
  }
  func.func @transform_2(%arg0: i32, %arg1: i32) -> (i32, i32) {
    %c1_i32 = arith.constant 1 : i32
    %0 = arith.muli %arg0, %c1_i32 : i32
    %1 = arith.addi %0, %arg1 : i32
    %c0_i32 = arith.constant 0 : i32
    %c0_i32_0 = arith.constant 0 : i32
    return %1, %c0_i32 : i32, i32
  }
  func.func @transform_3(%arg0: i32, %arg1: i32) -> (i32, i32) {
    %c0_i32 = arith.constant 0 : i32
    %c0_i32_0 = arith.constant 0 : i32
    %c0_i32_1 = arith.constant 0 : i32
    return %c0_i32, %c0_i32_0 : i32, i32
  }
  func.func @transform_4(%arg0: i32, %arg1: i32) -> (i32, i32) {
    %c0_i32 = arith.constant 0 : i32
    %c0_i32_0 = arith.constant 0 : i32
    %c0_i32_1 = arith.constant 0 : i32
    return %c0_i32, %c0_i32_0 : i32, i32
  }
  func.func @transform_5(%arg0: i32, %arg1: i32) -> (i32, i32) {
    %c0_i32 = arith.constant 0 : i32
    %c0_i32_0 = arith.constant 0 : i32
    return %arg0, %c0_i32 : i32, i32
  }
}

</mosaic_0001>

<bundles_post_ra>
// kernel: obj_condensation_loss.1
= control target key start
LH: loop header
LB: loop body
LE: loop exit
PB: predicated region body
PF: predicated region fallthrough
CT: control target
= control target key end

     0   :  { %s6361_s18 = smov 0   ;;  %s6363_s19 = smov 0   ;;  %s11183_s0 = inlined_call_operand.vmem [shape: f32[2048,3], index: 0, kind: input, shape index: {}]   ;;  %s11184_s1 = inlined_call_operand.vmem [shape: f32[2048,1], index: 1, kind: input, shape index: {}]   ;;  %s11185_s2 = inlined_call_operand.vmem [shape: s32[2048,1], index: 2, kind: input, shape index: {}]   ;;  %s11186_s3 = inlined_call_operand.vmem [shape: f32[3,128], index: 3, kind: input, shape index: {}]   ;;  %s11187_s4 = inlined_call_operand.vmem [shape: f32[1,128], index: 4, kind: input, shape index: {}]   ;;  %s11188_s5 = inlined_call_operand.vmem [shape: f32[16,128], index: 5, kind: output, shape index: {}]  }
   0x1   :  { %s6365_s20 = smov 0  }
   0x2 LB: > { %s27_s21 = sadd.s32 1, %s6322_s19  ;;  %p6190_p0 = scmp.ge.s32.totalorder %s6326_s20, 1  ;;  %s6326_s20 = sphi %s6365_s20, %s15_s20   ;;  %s6322_s19 = sphi %s6363_s19, %s12967_s19   ;;  %s6318_s18 = sphi %s6361_s18, %s12966_s18  }
   0x3   : > { %p29_p1 = scmp.ge.s32.totalorder %s27_s21, 2  ;;  %p234_p2 = scmp.lt.s32.totalorder %s6326_s20, 3 }
   0x5   : > { %s12969_s21 = smov (%p29_p1, %s27_s21), 0  ;;  %p235_p3 = pnand %p6190_p0, %p234_p2 }
   0x7   : > { %238 = sbr.rel (%p235_p3) target bundleno = 1661 (0x67d), region = 40 }
   0xe   : > { %s6191_s22 = sshll.u32 %s6318_s18, 7  ;;  %v11191_v0 = vmov 1   ;;  %v11189_v1 = vmov 0   ;;  %p298_p5 = scmp.lt.s32.totalorder %s6318_s18, 1 }
   0xf   : > { %6231 = vset.pattern.permute.xlu0 %v11191_v0  ;;  %6230 = vset.pattern.permute.xlu1 %v11189_v1  ;;  %p276_p4 = scmp.lt.s32.totalorder %s6191_s22, 255 }
  0x10   : > { %s12973_s18 = smov (!%p298_p5, %s6318_s18), 1 }
  0x11   : > { %s12971_s22 = smov (!%p276_p4, %s6191_s22), 255  ;;  %s6197_s16 = sshll.u32 %s12973_s18, 3 }
  0x12   : > { %s6384_s23 = sshll.u32 %s12971_s22, 3 }
  0x13   : > { %s6390_s26 = scalar_lea.vmem %s11183_s0, %s6384_s23  ;;  %s7544_s29 = scalar_lea.vmem %s11185_s2, %s6384_s23 }
  0x14   : > { %v6393_v2 = vld [vmem:[%s6390_s26 + $0x10] sm:$0xff]  ;;  %v434_v3 = vld [vmem:[%s6390_s26] sm:$0xff]  ;;  %v437_v4 = vld [vmem:[%s6390_s26 + $0x18] sm:$0xff]  ;;  %s8446_s9 = scalar_lea.vmem %s11184_s1, %s6384_s23  ;;  %s301_s23 = scalar_lea.vmem %s11188_s5, %s6197_s16 }
  0x15   : > { %832 = vperm.xlu1 %6230, %v6393_v2   ;;  %1849 = vperm.xlu0 %6231, %v434_v3   ;;  %v439_v5 = vld [vmem:[%s6390_s26 + $0x28] sm:$0xff]  ;;  %v441_v6 = vld [vmem:[%s6390_s26 + $0x38] sm:$0xff] }
  0x16   : > { %v443_v7 = vld [vmem:[%s6390_s26 + $0x48] sm:$0xff]  ;;  %v445_v8 = vld [vmem:[%s6390_s26 + $0x58] sm:$0xff] }
  0x17   : > { %v447_v9 = vld [vmem:[%s6390_s26 + $0x68] sm:$0xff]  ;;  %v449_v10 = vld [vmem:[%s6390_s26 + $0x78] sm:$0xff] }
  0x18   : > { %v451_v11 = vld [vmem:[%s6390_s26 + $0x88] sm:$0xff]  ;;  %v453_v12 = vld [vmem:[%s6390_s26 + $0x98] sm:$0xff] }
  0x19   : > { %837 = vperm.xlu1 %6230, %v437_v4   ;;  %1861 = vperm.xlu0 %6231, %v437_v4   ;;  %v455_v13 = vld [vmem:[%s6390_s26 + $0xa8] sm:$0xff]  ;;  %v457_v14 = vld [vmem:[%s6390_s26 + $0xb8] sm:$0xff] }
  0x1a   : > { %v459_v15 = vld [vmem:[%s6390_s26 + $0xc8] sm:$0xff]  ;;  %v461_v16 = vld [vmem:[%s6390_s26 + $0xd8] sm:$0xff] }
  0x1b   : > { %v463_v17 = vld [vmem:[%s6390_s26 + $0xe8] sm:$0xff]  ;;  %v465_v18 = vld [vmem:[%s6390_s26 + $0xf8] sm:$0xff] }
  0x1c   : > { %v467_v19 = vld [vmem:[%s6390_s26 + $0x108] sm:$0xff]  ;;  %v469_v20 = vld [vmem:[%s6390_s26 + $0x118] sm:$0xff] }
  0x1d   : > { %847 = vperm.xlu1 %6230, %v439_v5   ;;  %1869 = vperm.xlu0 %6231, %v439_v5   ;;  %v471_v21 = vld [vmem:[%s6390_s26 + $0x128] sm:$0xff]  ;;  %v473_v22 = vld [vmem:[%s6390_s26 + $0x138] sm:$0xff] }
  0x1e   : > { %v475_v23 = vld [vmem:[%s6390_s26 + $0x148] sm:$0xff]  ;;  %v477_v24 = vld [vmem:[%s6390_s26 + $0x158] sm:$0xff] }
  0x1f   : > { %v479_v25 = vld [vmem:[%s6390_s26 + $0x168] sm:$0xff]  ;;  %v481_v26 = vld [vmem:[%s6390_s26 + $0x178] sm:$0xff] }
  0x20   : > { %v483_v27 = vld [vmem:[%s6390_s26 + $0x188] sm:$0xff]  ;;  %v485_v28 = vld [vmem:[%s6390_s26 + $0x198] sm:$0xff] }
  0x21   : > { %857 = vperm.xlu1 %6230, %v441_v6   ;;  %1877 = vperm.xlu0 %6231, %v441_v6   ;;  %v487_v29 = vld [vmem:[%s6390_s26 + $0x1a8] sm:$0xff]  ;;  %v489_v30 = vld [vmem:[%s6390_s26 + $0x1b8] sm:$0xff] }
  0x22   : > { %v491_v31 = vld [vmem:[%s6390_s26 + $0x1c8] sm:$0xff]  ;;  %v493_v32 = vld [vmem:[%s6390_s26 + $0x1d8] sm:$0xff] }
  0x23   : > { %v495_v33 = vld [vmem:[%s6390_s26 + $0x1e8] sm:$0xff]  ;;  %v497_v34 = vld [vmem:[%s6390_s26 + $0x1f8] sm:$0xff] }
  0x24   : > { %v499_v35 = vld [vmem:[%s6390_s26 + $0x208] sm:$0xff]  ;;  %v501_v38 = vld [vmem:[%s6390_s26 + $0x218] sm:$0xff] }
  0x25   : > { %867 = vperm.xlu1 %6230, %v443_v7   ;;  %1885 = vperm.xlu0 %6231, %v443_v7   ;;  %v503_v41 = vld [vmem:[%s6390_s26 + $0x228] sm:$0xff]  ;;  %v505_v44 = vld [vmem:[%s6390_s26 + $0x238] sm:$0xff] }
  0x26   : > { %v507_v47 = vld [vmem:[%s6390_s26 + $0x248] sm:$0xff]  ;;  %v509_v50 = vld [vmem:[%s6390_s26 + $0x258] sm:$0xff] }
  0x27   : > { %v511_v53 = vld [vmem:[%s6390_s26 + $0x268] sm:$0xff]  ;;  %v513_v56 = vld [vmem:[%s6390_s26 + $0x278] sm:$0xff] }
  0x28   : > { %v515_v59 = vld [vmem:[%s6390_s26 + $0x288] sm:$0xff]  ;;  %v517_v62 = vld [vmem:[%s6390_s26 + $0x298] sm:$0xff] }
  0x29   : > { %877 = vperm.xlu1 %6230, %v445_v8   ;;  %1893 = vperm.xlu0 %6231, %v445_v8   ;;  %v519_v4 = vld [vmem:[%s6390_s26 + $0x2a8] sm:$0xff]  ;;  %v521_v7 = vld [vmem:[%s6390_s26 + $0x2b8] sm:$0xff] }
  0x2a   : > { %v557_v1 = vld [vmem:[%s6390_s26 + $0x3d8] sm:$0xff] }
  0x2d   : > { %887 = vperm.xlu1 %6230, %v447_v9   ;;  %1901 = vperm.xlu0 %6231, %v447_v9  }
  0x31   : > { %897 = vperm.xlu1 %6230, %v449_v10   ;;  %1909 = vperm.xlu0 %6231, %v449_v10   ;;  %v523_v10 = vld [vmem:[%s6390_s26 + $0x2c8] sm:$0xff] }
  0x35   : > { %907 = vperm.xlu1 %6230, %v451_v11   ;;  %1917 = vperm.xlu0 %6231, %v451_v11  }
  0x39   : > { %917 = vperm.xlu1 %6230, %v453_v12   ;;  %1925 = vperm.xlu0 %6231, %v453_v12  }
  0x3d   : > { %927 = vperm.xlu1 %6230, %v455_v13   ;;  %1933 = vperm.xlu0 %6231, %v455_v13   ;;  %v525_v13 = vld [vmem:[%s6390_s26 + $0x2d8] sm:$0xff] }
  0x41   : > { %937 = vperm.xlu1 %6230, %v457_v14   ;;  %1941 = vperm.xlu0 %6231, %v457_v14  }
  0x45   : > { %947 = vperm.xlu1 %6230, %v459_v15   ;;  %1949 = vperm.xlu0 %6231, %v459_v15  }
  0x49   : > { %957 = vperm.xlu1 %6230, %v461_v16   ;;  %1957 = vperm.xlu0 %6231, %v461_v16   ;;  %v527_v16 = vld [vmem:[%s6390_s26 + $0x2e8] sm:$0xff] }
  0x4d   : > { %967 = vperm.xlu1 %6230, %v463_v17   ;;  %1965 = vperm.xlu0 %6231, %v463_v17  }
  0x51   : > { %977 = vperm.xlu1 %6230, %v465_v18   ;;  %1973 = vperm.xlu0 %6231, %v465_v18  }
  0x55   : > { %987 = vperm.xlu1 %6230, %v467_v19   ;;  %1981 = vperm.xlu0 %6231, %v467_v19   ;;  %v529_v19 = vld [vmem:[%s6390_s26 + $0x2f8] sm:$0xff] }
  0x59   : > { %997 = vperm.xlu1 %6230, %v469_v20   ;;  %1989 = vperm.xlu0 %6231, %v469_v20  }
  0x5d   : > { %1007 = vperm.xlu1 %6230, %v471_v21   ;;  %1997 = vperm.xlu0 %6231, %v471_v21  }
  0x61   : > { %1017 = vperm.xlu1 %6230, %v473_v22   ;;  %2005 = vperm.xlu0 %6231, %v473_v22   ;;  %v531_v22 = vld [vmem:[%s6390_s26 + $0x308] sm:$0xff] }
  0x65   : > { %1027 = vperm.xlu1 %6230, %v475_v23   ;;  %2013 = vperm.xlu0 %6231, %v475_v23  }
  0x69   : > { %1037 = vperm.xlu1 %6230, %v477_v24   ;;  %2021 = vperm.xlu0 %6231, %v477_v24  }
  0x6d   : > { %1047 = vperm.xlu1 %6230, %v479_v25   ;;  %2029 = vperm.xlu0 %6231, %v479_v25   ;;  %v533_v25 = vld [vmem:[%s6390_s26 + $0x318] sm:$0xff] }
  0x71   : > { %1057 = vperm.xlu1 %6230, %v481_v26   ;;  %2037 = vperm.xlu0 %6231, %v481_v26  }
  0x75   : > { %1067 = vperm.xlu1 %6230, %v483_v27   ;;  %2045 = vperm.xlu0 %6231, %v483_v27  }
  0x79   : > { %1077 = vperm.xlu1 %6230, %v485_v28   ;;  %2053 = vperm.xlu0 %6231, %v485_v28   ;;  %v535_v28 = vld [vmem:[%s6390_s26 + $0x328] sm:$0xff] }
  0x7d   : > { %1087 = vperm.xlu1 %6230, %v487_v29   ;;  %2061 = vperm.xlu0 %6231, %v487_v29  }
  0x81   : > { %1097 = vperm.xlu1 %6230, %v489_v30   ;;  %2069 = vperm.xlu0 %6231, %v489_v30  }
  0x85   : > { %1107 = vperm.xlu1 %6230, %v491_v31   ;;  %2077 = vperm.xlu0 %6231, %v491_v31   ;;  %v537_v31 = vld [vmem:[%s6390_s26 + $0x338] sm:$0xff] }
  0x89   : > { %1117 = vperm.xlu1 %6230, %v493_v32   ;;  %2085 = vperm.xlu0 %6231, %v493_v32  }
  0x8d   : > { %1127 = vperm.xlu1 %6230, %v495_v33   ;;  %2093 = vperm.xlu0 %6231, %v495_v33  }
  0x91   : > { %1137 = vperm.xlu1 %6230, %v497_v34   ;;  %2101 = vperm.xlu0 %6231, %v497_v34   ;;  %v539_v34 = vld [vmem:[%s6390_s26 + $0x348] sm:$0xff] }
  0x94   : > { %v6429_v36 = vpop.permute.xlu1 %832  ;;  %v6431_v37 = vpop.permute.xlu0 %1849 }
  0x95   : > { %11395 = vst [vmem:[#allocation3_spill] sm:$0xff] %v6429_v36  ;;  %11396 = vst [vmem:[#allocation4_spill] sm:$0xff] %v6431_v37  ;;  %1147 = vperm.xlu1 %6230, %v499_v35   ;;  %2109 = vperm.xlu0 %6231, %v499_v35   ;;  %v7077_v37 = vld [vmem:[%s6390_s26 + $0x370] sm:$0xff]  ;;  %v7086_v36 = vld [vmem:[%s6390_s26 + $0x380] sm:$0xff] }
  0x96   : > { %11570 = vst [vmem:[#allocation177_spill] sm:$0xff] %v7086_v36 }
  0x98   : > { %v6434_v39 = vpop.permute.xlu1 %837  ;;  %v6436_v40 = vpop.permute.xlu0 %1861 }
  0x99   : > { %11397 = vst [vmem:[#allocation5_spill] sm:$0xff] %v6434_v39  ;;  %11398 = vst [vmem:[#allocation6_spill] sm:$0xff] %v6436_v40  ;;  %1157 = vperm.xlu1 %6230, %v501_v38   ;;  %2117 = vperm.xlu0 %6231, %v501_v38   ;;  %v7113_v40 = vld [vmem:[%s6390_s26 + $0x3b0] sm:$0xff]  ;;  %v7122_v39 = vld [vmem:[%s6390_s26 + $0x3c0] sm:$0xff] }
  0x9a   : > { %11579 = vst [vmem:[#allocation186_spill] sm:$0xff] %v7113_v40  ;;  %11582 = vst [vmem:[#allocation189_spill] sm:$0xff] %v7122_v39 }
  0x9c   : > { %v6439_v42 = vpop.permute.xlu1 %847  ;;  %v6441_v43 = vpop.permute.xlu0 %1869 }
  0x9d   : > { %11399 = vst [vmem:[#allocation7_spill] sm:$0xff] %v6439_v42  ;;  %11400 = vst [vmem:[#allocation8_spill] sm:$0xff] %v6441_v43  ;;  %1167 = vperm.xlu1 %6230, %v503_v41   ;;  %2125 = vperm.xlu0 %6231, %v503_v41   ;;  %v541_v41 = vld [vmem:[%s6390_s26 + $0x358] sm:$0xff]  ;;  %v7095_v43 = vld [vmem:[%s6390_s26 + $0x390] sm:$0xff] }
  0x9e   : > { %11573 = vst [vmem:[#allocation180_spill] sm:$0xff] %v7095_v43  ;;  %v7104_v42 = vld [vmem:[%s6390_s26 + $0x3a0] sm:$0xff] }
  0x9f   : > { %11576 = vst [vmem:[#allocation183_spill] sm:$0xff] %v7104_v42 }
  0xa0   : > { %v6444_v45 = vpop.permute.xlu1 %857  ;;  %v6446_v46 = vpop.permute.xlu0 %1877 }
  0xa1   : > { %11401 = vst [vmem:[#allocation9_spill] sm:$0xff] %v6444_v45  ;;  %11402 = vst [vmem:[#allocation10_spill] sm:$0xff] %v6446_v46  ;;  %1177 = vperm.xlu1 %6230, %v505_v44   ;;  %2133 = vperm.xlu0 %6231, %v505_v44   ;;  %v7059_v46 = vld [vmem:[%s6390_s26 + $0x350] sm:$0xff]  ;;  %v7068_v45 = vld [vmem:[%s6390_s26 + $0x360] sm:$0xff] }
  0xa4   : > { %v6449_v48 = vpop.permute.xlu1 %867  ;;  %v6451_v49 = vpop.permute.xlu0 %1885 }
  0xa5   : > { %11403 = vst [vmem:[#allocation11_spill] sm:$0xff] %v6449_v48  ;;  %11404 = vst [vmem:[#allocation12_spill] sm:$0xff] %v6451_v49  ;;  %1187 = vperm.xlu1 %6230, %v507_v47   ;;  %2141 = vperm.xlu0 %6231, %v507_v47   ;;  %v7041_v49 = vld [vmem:[%s6390_s26 + $0x330] sm:$0xff]  ;;  %v7050_v48 = vld [vmem:[%s6390_s26 + $0x340] sm:$0xff] }
  0xa8   : > { %v6454_v51 = vpop.permute.xlu1 %877  ;;  %v6456_v52 = vpop.permute.xlu0 %1893 }
  0xa9   : > { %11405 = vst [vmem:[#allocation13_spill] sm:$0xff] %v6454_v51  ;;  %11406 = vst [vmem:[#allocation14_spill] sm:$0xff] %v6456_v52  ;;  %1197 = vperm.xlu1 %6230, %v509_v50   ;;  %2149 = vperm.xlu0 %6231, %v509_v50   ;;  %v543_v50 = vld [vmem:[%s6390_s26 + $0x368] sm:$0xff]  ;;  %v7023_v52 = vld [vmem:[%s6390_s26 + $0x310] sm:$0xff] }
  0xaa   : > { %v7032_v51 = vld [vmem:[%s6390_s26 + $0x320] sm:$0xff] }
  0xac   : > { %v6459_v54 = vpop.permute.xlu1 %887  ;;  %v6461_v55 = vpop.permute.xlu0 %1901 }
  0xad   : > { %11407 = vst [vmem:[#allocation15_spill] sm:$0xff] %v6459_v54  ;;  %11408 = vst [vmem:[#allocation16_spill] sm:$0xff] %v6461_v55  ;;  %1207 = vperm.xlu1 %6230, %v511_v53   ;;  %2157 = vperm.xlu0 %6231, %v511_v53   ;;  %v7005_v55 = vld [vmem:[%s6390_s26 + $0x2f0] sm:$0xff]  ;;  %v7014_v54 = vld [vmem:[%s6390_s26 + $0x300] sm:$0xff] }
  0xb0   : > { %v6464_v57 = vpop.permute.xlu1 %897  ;;  %v6466_v58 = vpop.permute.xlu0 %1909 }
  0xb1   : > { %11409 = vst [vmem:[#allocation17_spill] sm:$0xff] %v6464_v57  ;;  %11410 = vst [vmem:[#allocation18_spill] sm:$0xff] %v6466_v58  ;;  %1217 = vperm.xlu1 %6230, %v513_v56   ;;  %2165 = vperm.xlu0 %6231, %v513_v56   ;;  %v6987_v58 = vld [vmem:[%s6390_s26 + $0x2d0] sm:$0xff]  ;;  %v6996_v57 = vld [vmem:[%s6390_s26 + $0x2e0] sm:$0xff] }
  0xb4   : > { %v6469_v60 = vpop.permute.xlu1 %907  ;;  %v6471_v61 = vpop.permute.xlu0 %1917 }
  0xb5   : > { %11411 = vst [vmem:[#allocation19_spill] sm:$0xff] %v6469_v60  ;;  %11412 = vst [vmem:[#allocation20_spill] sm:$0xff] %v6471_v61  ;;  %1227 = vperm.xlu1 %6230, %v515_v59   ;;  %2173 = vperm.xlu0 %6231, %v515_v59   ;;  %v545_v59 = vld [vmem:[%s6390_s26 + $0x378] sm:$0xff]  ;;  %v6969_v61 = vld [vmem:[%s6390_s26 + $0x2b0] sm:$0xff] }
  0xb6   : > { %v6978_v60 = vld [vmem:[%s6390_s26 + $0x2c0] sm:$0xff] }
  0xb8   : > { %v6474_v63 = vpop.permute.xlu1 %917  ;;  %v6476_v3 = vpop.permute.xlu0 %1925 }
  0xb9   : > { %11413 = vst [vmem:[#allocation21_spill] sm:$0xff] %v6474_v63  ;;  %11414 = vst [vmem:[#allocation22_spill] sm:$0xff] %v6476_v3  ;;  %1237 = vperm.xlu1 %6230, %v517_v62   ;;  %2181 = vperm.xlu0 %6231, %v517_v62   ;;  %v6951_v3 = vld [vmem:[%s6390_s26 + $0x290] sm:$0xff]  ;;  %v6960_v63 = vld [vmem:[%s6390_s26 + $0x2a0] sm:$0xff] }
  0xbc   : > { %v6479_v5 = vpop.permute.xlu1 %927  ;;  %v6481_v6 = vpop.permute.xlu0 %1933 }
  0xbd   : > { %11415 = vst [vmem:[#allocation23_spill] sm:$0xff] %v6479_v5  ;;  %11416 = vst [vmem:[#allocation24_spill] sm:$0xff] %v6481_v6  ;;  %1247 = vperm.xlu1 %6230, %v519_v4   ;;  %2189 = vperm.xlu0 %6231, %v519_v4   ;;  %v6933_v6 = vld [vmem:[%s6390_s26 + $0x270] sm:$0xff]  ;;  %v6942_v5 = vld [vmem:[%s6390_s26 + $0x280] sm:$0xff] }
  0xc0   : > { %v6484_v8 = vpop.permute.xlu1 %937  ;;  %v6486_v9 = vpop.permute.xlu0 %1941 }
  0xc1   : > { %11417 = vst [vmem:[#allocation25_spill] sm:$0xff] %v6484_v8  ;;  %11418 = vst [vmem:[#allocation26_spill] sm:$0xff] %v6486_v9  ;;  %1257 = vperm.xlu1 %6230, %v521_v7   ;;  %2197 = vperm.xlu0 %6231, %v521_v7   ;;  %v547_v7 = vld [vmem:[%s6390_s26 + $0x388] sm:$0xff]  ;;  %v6915_v9 = vld [vmem:[%s6390_s26 + $0x250] sm:$0xff] }
  0xc2   : > { %v6924_v8 = vld [vmem:[%s6390_s26 + $0x260] sm:$0xff] }
  0xc4   : > { %v6489_v11 = vpop.permute.xlu1 %947  ;;  %v6491_v12 = vpop.permute.xlu0 %1949 }
  0xc5   : > { %11419 = vst [vmem:[#allocation27_spill] sm:$0xff] %v6489_v11  ;;  %11420 = vst [vmem:[#allocation28_spill] sm:$0xff] %v6491_v12  ;;  %1267 = vperm.xlu1 %6230, %v523_v10   ;;  %2205 = vperm.xlu0 %6231, %v523_v10   ;;  %v6897_v12 = vld [vmem:[%s6390_s26 + $0x230] sm:$0xff]  ;;  %v6906_v11 = vld [vmem:[%s6390_s26 + $0x240] sm:$0xff] }
  0xc8   : > { %v6494_v14 = vpop.permute.xlu1 %957  ;;  %v6496_v15 = vpop.permute.xlu0 %1957 }
  0xc9   : > { %11421 = vst [vmem:[#allocation29_spill] sm:$0xff] %v6494_v14  ;;  %11422 = vst [vmem:[#allocation30_spill] sm:$0xff] %v6496_v15  ;;  %1277 = vperm.xlu1 %6230, %v525_v13   ;;  %2213 = vperm.xlu0 %6231, %v525_v13   ;;  %v6879_v15 = vld [vmem:[%s6390_s26 + $0x210] sm:$0xff]  ;;  %v6888_v14 = vld [vmem:[%s6390_s26 + $0x220] sm:$0xff] }
  0xcc   : > { %v6499_v17 = vpop.permute.xlu1 %967  ;;  %v6501_v18 = vpop.permute.xlu0 %1965 }
  0xcd   : > { %11423 = vst [vmem:[#allocation31_spill] sm:$0xff] %v6499_v17  ;;  %11424 = vst [vmem:[#allocation32_spill] sm:$0xff] %v6501_v18  ;;  %1287 = vperm.xlu1 %6230, %v527_v16   ;;  %2221 = vperm.xlu0 %6231, %v527_v16   ;;  %v549_v16 = vld [vmem:[%s6390_s26 + $0x398] sm:$0xff]  ;;  %v6861_v18 = vld [vmem:[%s6390_s26 + $0x1f0] sm:$0xff] }
  0xce   : > { %v6870_v17 = vld [vmem:[%s6390_s26 + $0x200] sm:$0xff] }
  0xd0   : > { %v6504_v20 = vpop.permute.xlu1 %977  ;;  %v6506_v21 = vpop.permute.xlu0 %1973 }
  0xd1   : > { %11425 = vst [vmem:[#allocation33_spill] sm:$0xff] %v6504_v20  ;;  %11426 = vst [vmem:[#allocation34_spill] sm:$0xff] %v6506_v21  ;;  %1297 = vperm.xlu1 %6230, %v529_v19   ;;  %2229 = vperm.xlu0 %6231, %v529_v19   ;;  %v6843_v21 = vld [vmem:[%s6390_s26 + $0x1d0] sm:$0xff]  ;;  %v6852_v20 = vld [vmem:[%s6390_s26 + $0x1e0] sm:$0xff] }
  0xd4   : > { %v6509_v23 = vpop.permute.xlu1 %987  ;;  %v6511_v24 = vpop.permute.xlu0 %1981 }
  0xd5   : > { %11427 = vst [vmem:[#allocation35_spill] sm:$0xff] %v6509_v23  ;;  %11428 = vst [vmem:[#allocation36_spill] sm:$0xff] %v6511_v24  ;;  %1307 = vperm.xlu1 %6230, %v531_v22   ;;  %2237 = vperm.xlu0 %6231, %v531_v22   ;;  %v6825_v24 = vld [vmem:[%s6390_s26 + $0x1b0] sm:$0xff]  ;;  %v6834_v23 = vld [vmem:[%s6390_s26 + $0x1c0] sm:$0xff] }
  0xd8   : > { %v6514_v26 = vpop.permute.xlu1 %997  ;;  %v6516_v27 = vpop.permute.xlu0 %1989 }
  0xd9   : > { %11429 = vst [vmem:[#allocation37_spill] sm:$0xff] %v6514_v26  ;;  %11430 = vst [vmem:[#allocation38_spill] sm:$0xff] %v6516_v27  ;;  %1317 = vperm.xlu1 %6230, %v533_v25   ;;  %2245 = vperm.xlu0 %6231, %v533_v25   ;;  %v551_v25 = vld [vmem:[%s6390_s26 + $0x3a8] sm:$0xff]  ;;  %v6807_v27 = vld [vmem:[%s6390_s26 + $0x190] sm:$0xff] }
  0xda   : > { %v6816_v26 = vld [vmem:[%s6390_s26 + $0x1a0] sm:$0xff] }
  0xdc   : > { %v6519_v29 = vpop.permute.xlu1 %1007  ;;  %v6521_v30 = vpop.permute.xlu0 %1997 }
  0xdd   : > { %11431 = vst [vmem:[#allocation39_spill] sm:$0xff] %v6519_v29  ;;  %11432 = vst [vmem:[#allocation40_spill] sm:$0xff] %v6521_v30  ;;  %1327 = vperm.xlu1 %6230, %v535_v28   ;;  %2253 = vperm.xlu0 %6231, %v535_v28   ;;  %v6789_v30 = vld [vmem:[%s6390_s26 + $0x170] sm:$0xff]  ;;  %v6798_v29 = vld [vmem:[%s6390_s26 + $0x180] sm:$0xff] }
  0xe0   : > { %v6524_v32 = vpop.permute.xlu1 %1017  ;;  %v6526_v33 = vpop.permute.xlu0 %2005 }
  0xe1   : > { %11433 = vst [vmem:[#allocation41_spill] sm:$0xff] %v6524_v32  ;;  %11434 = vst [vmem:[#allocation42_spill] sm:$0xff] %v6526_v33  ;;  %1337 = vperm.xlu1 %6230, %v537_v31   ;;  %2261 = vperm.xlu0 %6231, %v537_v31   ;;  %v6771_v33 = vld [vmem:[%s6390_s26 + $0x150] sm:$0xff]  ;;  %v6780_v32 = vld [vmem:[%s6390_s26 + $0x160] sm:$0xff] }
  0xe4   : > { %v6529_v35 = vpop.permute.xlu1 %1027  ;;  %v6531_v38 = vpop.permute.xlu0 %2013 }
  0xe5   : > { %11435 = vst [vmem:[#allocation43_spill] sm:$0xff] %v6529_v35  ;;  %11436 = vst [vmem:[#allocation44_spill] sm:$0xff] %v6531_v38  ;;  %1347 = vperm.xlu1 %6230, %v539_v34   ;;  %2269 = vperm.xlu0 %6231, %v539_v34   ;;  %v553_v34 = vld [vmem:[%s6390_s26 + $0x3b8] sm:$0xff]  ;;  %v6753_v38 = vld [vmem:[%s6390_s26 + $0x130] sm:$0xff] }
  0xe6   : > { %v6762_v35 = vld [vmem:[%s6390_s26 + $0x140] sm:$0xff] }
  0xe8   : > { %v6534_v44 = vpop.permute.xlu1 %1037  ;;  %v6536_v47 = vpop.permute.xlu0 %2021 }
  0xe9   : > { %11437 = vst [vmem:[#allocation45_spill] sm:$0xff] %v6534_v44  ;;  %11438 = vst [vmem:[#allocation46_spill] sm:$0xff] %v6536_v47  ;;  %1357 = vperm.xlu1 %6230, %v541_v41   ;;  %2277 = vperm.xlu0 %6231, %v541_v41   ;;  %v6735_v47 = vld [vmem:[%s6390_s26 + $0x110] sm:$0xff]  ;;  %v6744_v44 = vld [vmem:[%s6390_s26 + $0x120] sm:$0xff] }
  0xec   : > { %v6539_v53 = vpop.permute.xlu1 %1047  ;;  %v6541_v56 = vpop.permute.xlu0 %2029 }
  0xed   : > { %11439 = vst [vmem:[#allocation47_spill] sm:$0xff] %v6539_v53  ;;  %11440 = vst [vmem:[#allocation48_spill] sm:$0xff] %v6541_v56  ;;  %1367 = vperm.xlu1 %6230, %v543_v50   ;;  %2285 = vperm.xlu0 %6231, %v543_v50   ;;  %v6717_v56 = vld [vmem:[%s6390_s26 + $0xf0] sm:$0xff]  ;;  %v6726_v53 = vld [vmem:[%s6390_s26 + $0x100] sm:$0xff] }
  0xf0   : > { %v6544_v62 = vpop.permute.xlu1 %1057  ;;  %v6546_v4 = vpop.permute.xlu0 %2037 }
  0xf1   : > { %11441 = vst [vmem:[#allocation49_spill] sm:$0xff] %v6544_v62  ;;  %11442 = vst [vmem:[#allocation50_spill] sm:$0xff] %v6546_v4  ;;  %1377 = vperm.xlu1 %6230, %v545_v59   ;;  %2293 = vperm.xlu0 %6231, %v545_v59   ;;  %v555_v59 = vld [vmem:[%s6390_s26 + $0x3c8] sm:$0xff]  ;;  %v6699_v4 = vld [vmem:[%s6390_s26 + $0xd0] sm:$0xff] }
  0xf2   : > { %v6708_v62 = vld [vmem:[%s6390_s26 + $0xe0] sm:$0xff] }
  0xf4   : > { %v6549_v10 = vpop.permute.xlu1 %1067  ;;  %v6551_v13 = vpop.permute.xlu0 %2045 }
  0xf5   : > { %11443 = vst [vmem:[#allocation51_spill] sm:$0xff] %v6549_v10  ;;  %11444 = vst [vmem:[#allocation52_spill] sm:$0xff] %v6551_v13  ;;  %1387 = vperm.xlu1 %6230, %v547_v7   ;;  %2301 = vperm.xlu0 %6231, %v547_v7   ;;  %v6681_v13 = vld [vmem:[%s6390_s26 + $0xb0] sm:$0xff]  ;;  %v6690_v10 = vld [vmem:[%s6390_s26 + $0xc0] sm:$0xff] }
  0xf8   : > { %v6554_v19 = vpop.permute.xlu1 %1077  ;;  %v6556_v22 = vpop.permute.xlu0 %2053 }
  0xf9   : > { %11445 = vst [vmem:[#allocation53_spill] sm:$0xff] %v6554_v19  ;;  %11446 = vst [vmem:[#allocation54_spill] sm:$0xff] %v6556_v22  ;;  %1397 = vperm.xlu1 %6230, %v549_v16   ;;  %2309 = vperm.xlu0 %6231, %v549_v16   ;;  %v6663_v22 = vld [vmem:[%s6390_s26 + $0x90] sm:$0xff]  ;;  %v6672_v19 = vld [vmem:[%s6390_s26 + $0xa0] sm:$0xff] }
  0xfc   : > { %v6559_v28 = vpop.permute.xlu1 %1087  ;;  %v6561_v31 = vpop.permute.xlu0 %2061 }
  0xfd   : > { %11447 = vst [vmem:[#allocation55_spill] sm:$0xff] %v6559_v28  ;;  %11448 = vst [vmem:[#allocation56_spill] sm:$0xff] %v6561_v31  ;;  %1407 = vperm.xlu1 %6230, %v551_v25   ;;  %2317 = vperm.xlu0 %6231, %v551_v25   ;;  %v6645_v31 = vld [vmem:[%s6390_s26 + $0x70] sm:$0xff]  ;;  %v6654_v28 = vld [vmem:[%s6390_s26 + $0x80] sm:$0xff] }
 0x100   : > { %v6564_v41 = vpop.permute.xlu1 %1097  ;;  %v6566_v50 = vpop.permute.xlu0 %2069 }
 0x101   : > { %11449 = vst [vmem:[#allocation57_spill] sm:$0xff] %v6564_v41  ;;  %11450 = vst [vmem:[#allocation58_spill] sm:$0xff] %v6566_v50  ;;  %1417 = vperm.xlu1 %6230, %v553_v34   ;;  %2325 = vperm.xlu0 %6231, %v553_v34   ;;  %v559_v41 = vld [vmem:[%s6390_s26 + $0x3e8] sm:$0xff] }
 0x104   : > { %v6569_v7 = vpop.permute.xlu1 %1107  ;;  %v6571_v16 = vpop.permute.xlu0 %2077 }
 0x105   : > { %11451 = vst [vmem:[#allocation59_spill] sm:$0xff] %v6569_v7  ;;  %11452 = vst [vmem:[#allocation60_spill] sm:$0xff] %v6571_v16  ;;  %1427 = vperm.xlu1 %6230, %v555_v59   ;;  %2333 = vperm.xlu0 %6231, %v555_v59   ;;  %v561_v7 = vld [vmem:[%s6390_s26 + $0x3f8] sm:$0xff] }
 0x108   : > { %v6574_v0 = vpop.permute.xlu1 %1117  ;;  %v6576_v25 = vpop.permute.xlu0 %2085 }
 0x109   : > { %11453 = vst [vmem:[#allocation61_spill] sm:$0xff] %v6574_v0  ;;  %11454 = vst [vmem:[#allocation62_spill] sm:$0xff] %v6576_v25  ;;  %1437 = vperm.xlu1 %6230, %v557_v1   ;;  %2341 = vperm.xlu0 %6231, %v557_v1   ;;  %v6589_v0 = vld [vmem:[%s6390_s26 + $0x8] sm:$0xff] }
 0x10c   : > { %v6579_v50 = vpop.permute.xlu1 %1127  ;;  %v6581_v34 = vpop.permute.xlu0 %2093 }
 0x10d   : > { %11455 = vst [vmem:[#allocation63_spill] sm:$0xff] %v6579_v50  ;;  %11456 = vst [vmem:[#allocation64_spill] sm:$0xff] %v6581_v34  ;;  %1447 = vperm.xlu1 %6230, %v559_v41   ;;  %2349 = vperm.xlu0 %6231, %v559_v41   ;;  %v11461_v50 = vmov 1   ;;  %v11192_v34 = vmov 2   ;;  %v6600_v41 = vld [vmem:[%s6390_s26 + $0x20] sm:$0xff] }
 0x110   : > { %v6584_v16 = vpop.permute.xlu1 %1137  ;;  %v6586_v59 = vpop.permute.xlu0 %2101 }
 0x111   : > { %11457 = vst [vmem:[#allocation65_spill] sm:$0xff] %v6584_v16  ;;  %11458 = vst [vmem:[#allocation66_spill] sm:$0xff] %v6586_v59  ;;  %1457 = vperm.xlu1 %6230, %v561_v7   ;;  %2357 = vperm.xlu0 %6231, %v561_v7   ;;  %v6636_v16 = vld [vmem:[%s6390_s26 + $0x60] sm:$0xff] }
 0x114   : > { %v6591_v25 = vpop.permute.xlu1 %1147  ;;  %v6593_v1 = vpop.permute.xlu0 %2109 }
 0x115   : > { %11459 = vst [vmem:[#allocation67_spill] sm:$0xff] %v6591_v25  ;;  %11460 = vst [vmem:[#allocation68_spill] sm:$0xff] %v6593_v1  ;;  %6232 = vset.pattern.permute.xlu1 %v11461_v50  ;;  %6234 = vset.pattern.permute.xlu0 %v11192_v34  ;;  %v6609_v50 = vld [vmem:[%s6390_s26 + $0x30] sm:$0xff]  ;;  %v6618_v25 = vld [vmem:[%s6390_s26 + $0x40] sm:$0xff] }
 0x116   : > { %1853 = vperm.xlu1 %6232, %v6589_v0   ;;  %2753 = vperm.xlu0 %6234, %v6589_v0  }
 0x118   : > { %v6602_v7 = vpop.permute.xlu1 %1157  ;;  %v6604_v59 = vpop.permute.xlu0 %2117 }
 0x119   : > { %11462 = vst [vmem:[#allocation69_spill] sm:$0xff] %v6602_v7  ;;  %11463 = vst [vmem:[#allocation70_spill] sm:$0xff] %v6604_v59 }
 0x11a   : > { %1857 = vperm.xlu1 %6232, %v6393_v2   ;;  %2765 = vperm.xlu0 %6234, %v6600_v41   ;;  %v6627_v2 = vld [vmem:[%s6390_s26 + $0x50] sm:$0xff] }
 0x11c   : > { %v6611_v1 = vpop.permute.xlu1 %1167  ;;  %v6613_v34 = vpop.permute.xlu0 %2125 }
 0x11d   : > { %11464 = vst [vmem:[#allocation71_spill] sm:$0xff] %v6611_v1  ;;  %11465 = vst [vmem:[#allocation72_spill] sm:$0xff] %v6613_v34 }
 0x11e   : > { %1865 = vperm.xlu1 %6232, %v6600_v41   ;;  %2773 = vperm.xlu0 %6234, %v6609_v50  }
 0x120   : > { %v6620_v7 = vpop.permute.xlu1 %1177  ;;  %v6622_v59 = vpop.permute.xlu0 %2133 }
 0x121   : > { %11466 = vst [vmem:[#allocation73_spill] sm:$0xff] %v6620_v7  ;;  %11467 = vst [vmem:[#allocation74_spill] sm:$0xff] %v6622_v59 }
 0x122   : > { %1873 = vperm.xlu1 %6232, %v6609_v50   ;;  %2781 = vperm.xlu0 %6234, %v6618_v25  }
 0x124   : > { %v6629_v1 = vpop.permute.xlu1 %1187  ;;  %v6631_v34 = vpop.permute.xlu0 %2141 }
 0x125   : > { %11468 = vst [vmem:[#allocation75_spill] sm:$0xff] %v6629_v1  ;;  %11469 = vst [vmem:[#allocation76_spill] sm:$0xff] %v6631_v34 }
 0x126   : > { %1881 = vperm.xlu1 %6232, %v6618_v25   ;;  %2789 = vperm.xlu0 %6234, %v6627_v2  }
 0x128   : > { %v6638_v7 = vpop.permute.xlu1 %1197  ;;  %v6640_v59 = vpop.permute.xlu0 %2149 }
 0x129   : > { %11470 = vst [vmem:[#allocation77_spill] sm:$0xff] %v6638_v7  ;;  %11471 = vst [vmem:[#allocation78_spill] sm:$0xff] %v6640_v59 }
 0x12a   : > { %1889 = vperm.xlu1 %6232, %v6627_v2   ;;  %2797 = vperm.xlu0 %6234, %v6636_v16  }
 0x12c   : > { %v6647_v1 = vpop.permute.xlu1 %1207  ;;  %v6649_v34 = vpop.permute.xlu0 %2157 }
 0x12d   : > { %11472 = vst [vmem:[#allocation79_spill] sm:$0xff] %v6647_v1  ;;  %11473 = vst [vmem:[#allocation80_spill] sm:$0xff] %v6649_v34 }
 0x12e   : > { %1897 = vperm.xlu1 %6232, %v6636_v16   ;;  %2805 = vperm.xlu0 %6234, %v6645_v31  }
 0x130   : > { %v6656_v7 = vpop.permute.xlu1 %1217  ;;  %v6658_v59 = vpop.permute.xlu0 %2165 }
 0x131   : > { %11474 = vst [vmem:[#allocation81_spill] sm:$0xff] %v6656_v7  ;;  %11475 = vst [vmem:[#allocation82_spill] sm:$0xff] %v6658_v59 }
 0x132   : > { %1905 = vperm.xlu1 %6232, %v6645_v31   ;;  %2813 = vperm.xlu0 %6234, %v6654_v28  }
 0x134   : > { %v6665_v1 = vpop.permute.xlu1 %1227  ;;  %v6667_v34 = vpop.permute.xlu0 %2173 }
 0x135   : > { %11476 = vst [vmem:[#allocation83_spill] sm:$0xff] %v6665_v1  ;;  %11477 = vst [vmem:[#allocation84_spill] sm:$0xff] %v6667_v34 }
 0x136   : > { %1913 = vperm.xlu1 %6232, %v6654_v28   ;;  %2821 = vperm.xlu0 %6234, %v6663_v22  }
 0x138   : > { %v6674_v7 = vpop.permute.xlu1 %1237  ;;  %v6676_v59 = vpop.permute.xlu0 %2181 }
 0x139   : > { %11478 = vst [vmem:[#allocation85_spill] sm:$0xff] %v6674_v7  ;;  %11479 = vst [vmem:[#allocation86_spill] sm:$0xff] %v6676_v59 }
 0x13a   : > { %1921 = vperm.xlu1 %6232, %v6663_v22   ;;  %2829 = vperm.xlu0 %6234, %v6672_v19  }
 0x13c   : > { %v6683_v1 = vpop.permute.xlu1 %1247  ;;  %v6685_v34 = vpop.permute.xlu0 %2189 }
 0x13d   : > { %11480 = vst [vmem:[#allocation87_spill] sm:$0xff] %v6683_v1  ;;  %11481 = vst [vmem:[#allocation88_spill] sm:$0xff] %v6685_v34 }
 0x13e   : > { %1929 = vperm.xlu1 %6232, %v6672_v19   ;;  %2837 = vperm.xlu0 %6234, %v6681_v13  }
 0x140   : > { %v6692_v7 = vpop.permute.xlu1 %1257  ;;  %v6694_v59 = vpop.permute.xlu0 %2197 }
 0x141   : > { %11482 = vst [vmem:[#allocation89_spill] sm:$0xff] %v6692_v7  ;;  %11483 = vst [vmem:[#allocation90_spill] sm:$0xff] %v6694_v59 }
 0x142   : > { %1937 = vperm.xlu1 %6232, %v6681_v13   ;;  %2845 = vperm.xlu0 %6234, %v6690_v10  }
 0x144   : > { %v6701_v1 = vpop.permute.xlu1 %1267  ;;  %v6703_v34 = vpop.permute.xlu0 %2205 }
 0x145   : > { %11484 = vst [vmem:[#allocation91_spill] sm:$0xff] %v6701_v1  ;;  %11485 = vst [vmem:[#allocation92_spill] sm:$0xff] %v6703_v34 }
 0x146   : > { %1945 = vperm.xlu1 %6232, %v6690_v10   ;;  %2853 = vperm.xlu0 %6234, %v6699_v4  }
 0x148   : > { %v6710_v7 = vpop.permute.xlu1 %1277  ;;  %v6712_v59 = vpop.permute.xlu0 %2213 }
 0x149   : > { %11486 = vst [vmem:[#allocation93_spill] sm:$0xff] %v6710_v7  ;;  %11487 = vst [vmem:[#allocation94_spill] sm:$0xff] %v6712_v59 }
 0x14a   : > { %1953 = vperm.xlu1 %6232, %v6699_v4   ;;  %2861 = vperm.xlu0 %6234, %v6708_v62  }
 0x14c   : > { %v6719_v1 = vpop.permute.xlu1 %1287  ;;  %v6721_v34 = vpop.permute.xlu0 %2221 }
 0x14d   : > { %11488 = vst [vmem:[#allocation95_spill] sm:$0xff] %v6719_v1  ;;  %11489 = vst [vmem:[#allocation96_spill] sm:$0xff] %v6721_v34 }
 0x14e   : > { %1961 = vperm.xlu1 %6232, %v6708_v62   ;;  %2869 = vperm.xlu0 %6234, %v6717_v56  }
 0x150   : > { %v6728_v7 = vpop.permute.xlu1 %1297  ;;  %v6730_v59 = vpop.permute.xlu0 %2229 }
 0x151   : > { %11490 = vst [vmem:[#allocation97_spill] sm:$0xff] %v6728_v7  ;;  %11491 = vst [vmem:[#allocation98_spill] sm:$0xff] %v6730_v59 }
 0x152   : > { %1969 = vperm.xlu1 %6232, %v6717_v56   ;;  %2877 = vperm.xlu0 %6234, %v6726_v53  }
 0x154   : > { %v6737_v1 = vpop.permute.xlu1 %1307  ;;  %v6739_v34 = vpop.permute.xlu0 %2237 }
 0x155   : > { %11492 = vst [vmem:[#allocation99_spill] sm:$0xff] %v6737_v1  ;;  %11493 = vst [vmem:[#allocation100_spill] sm:$0xff] %v6739_v34 }
 0x156   : > { %1977 = vperm.xlu1 %6232, %v6726_v53   ;;  %2885 = vperm.xlu0 %6234, %v6735_v47  }
 0x158   : > { %v6746_v7 = vpop.permute.xlu1 %1317  ;;  %v6748_v59 = vpop.permute.xlu0 %2245 }
 0x159   : > { %11494 = vst [vmem:[#allocation101_spill] sm:$0xff] %v6746_v7  ;;  %11495 = vst [vmem:[#allocation102_spill] sm:$0xff] %v6748_v59 }
 0x15a   : > { %1985 = vperm.xlu1 %6232, %v6735_v47   ;;  %2893 = vperm.xlu0 %6234, %v6744_v44  }
 0x15c   : > { %v6755_v1 = vpop.permute.xlu1 %1327  ;;  %v6757_v34 = vpop.permute.xlu0 %2253 }
 0x15d   : > { %11496 = vst [vmem:[#allocation103_spill] sm:$0xff] %v6755_v1  ;;  %11497 = vst [vmem:[#allocation104_spill] sm:$0xff] %v6757_v34 }
 0x15e   : > { %1993 = vperm.xlu1 %6232, %v6744_v44   ;;  %2901 = vperm.xlu0 %6234, %v6753_v38  }
 0x160   : > { %v6764_v7 = vpop.permute.xlu1 %1337  ;;  %v6766_v59 = vpop.permute.xlu0 %2261 }
 0x161   : > { %11498 = vst [vmem:[#allocation105_spill] sm:$0xff] %v6764_v7  ;;  %11499 = vst [vmem:[#allocation106_spill] sm:$0xff] %v6766_v59 }
 0x162   : > { %2001 = vperm.xlu1 %6232, %v6753_v38   ;;  %2909 = vperm.xlu0 %6234, %v6762_v35  }
 0x164   : > { %v6773_v1 = vpop.permute.xlu1 %1347  ;;  %v6775_v34 = vpop.permute.xlu0 %2269 }
 0x165   : > { %11500 = vst [vmem:[#allocation107_spill] sm:$0xff] %v6773_v1  ;;  %11501 = vst [vmem:[#allocation108_spill] sm:$0xff] %v6775_v34 }
 0x166   : > { %2009 = vperm.xlu1 %6232, %v6762_v35   ;;  %2917 = vperm.xlu0 %6234, %v6771_v33  }
 0x168   : > { %v6782_v7 = vpop.permute.xlu1 %1357  ;;  %v6784_v59 = vpop.permute.xlu0 %2277 }
 0x169   : > { %11502 = vst [vmem:[#allocation109_spill] sm:$0xff] %v6782_v7  ;;  %11503 = vst [vmem:[#allocation110_spill] sm:$0xff] %v6784_v59 }
 0x16a   : > { %2017 = vperm.xlu1 %6232, %v6771_v33   ;;  %2925 = vperm.xlu0 %6234, %v6780_v32  }
 0x16c   : > { %v6791_v1 = vpop.permute.xlu1 %1367  ;;  %v6793_v34 = vpop.permute.xlu0 %2285 }
 0x16d   : > { %11504 = vst [vmem:[#allocation111_spill] sm:$0xff] %v6791_v1  ;;  %11505 = vst [vmem:[#allocation112_spill] sm:$0xff] %v6793_v34 }
 0x16e   : > { %2025 = vperm.xlu1 %6232, %v6780_v32   ;;  %2933 = vperm.xlu0 %6234, %v6789_v30  }
 0x170   : > { %v6800_v7 = vpop.permute.xlu1 %1377  ;;  %v6802_v59 = vpop.permute.xlu0 %2293 }
 0x171   : > { %11506 = vst [vmem:[#allocation113_spill] sm:$0xff] %v6800_v7  ;;  %11507 = vst [vmem:[#allocation114_spill] sm:$0xff] %v6802_v59 }
 0x172   : > { %2033 = vperm.xlu1 %6232, %v6789_v30   ;;  %2941 = vperm.xlu0 %6234, %v6798_v29  }
 0x174   : > { %v6809_v1 = vpop.permute.xlu1 %1387  ;;  %v6811_v34 = vpop.permute.xlu0 %2301 }
 0x175   : > { %11508 = vst [vmem:[#allocation115_spill] sm:$0xff] %v6809_v1  ;;  %11509 = vst [vmem:[#allocation116_spill] sm:$0xff] %v6811_v34 }
 0x176   : > { %2041 = vperm.xlu1 %6232, %v6798_v29   ;;  %2949 = vperm.xlu0 %6234, %v6807_v27  }
 0x178   : > { %v6818_v7 = vpop.permute.xlu1 %1397  ;;  %v6820_v59 = vpop.permute.xlu0 %2309 }
 0x179   : > { %11510 = vst [vmem:[#allocation117_spill] sm:$0xff] %v6818_v7  ;;  %11511 = vst [vmem:[#allocation118_spill] sm:$0xff] %v6820_v59 }
 0x17a   : > { %2049 = vperm.xlu1 %6232, %v6807_v27   ;;  %2957 = vperm.xlu0 %6234, %v6816_v26  }
 0x17c   : > { %v6827_v1 = vpop.permute.xlu1 %1407  ;;  %v6829_v34 = vpop.permute.xlu0 %2317 }
 0x17d   : > { %11512 = vst [vmem:[#allocation119_spill] sm:$0xff] %v6827_v1  ;;  %11513 = vst [vmem:[#allocation120_spill] sm:$0xff] %v6829_v34 }
 0x17e   : > { %2057 = vperm.xlu1 %6232, %v6816_v26   ;;  %2965 = vperm.xlu0 %6234, %v6825_v24  }
 0x180   : > { %v6836_v7 = vpop.permute.xlu1 %1417  ;;  %v6838_v59 = vpop.permute.xlu0 %2325 }
 0x181   : > { %11514 = vst [vmem:[#allocation121_spill] sm:$0xff] %v6836_v7  ;;  %11515 = vst [vmem:[#allocation122_spill] sm:$0xff] %v6838_v59 }
 0x182   : > { %2065 = vperm.xlu1 %6232, %v6825_v24   ;;  %2973 = vperm.xlu0 %6234, %v6834_v23  }
 0x184   : > { %v6845_v1 = vpop.permute.xlu1 %1427  ;;  %v6847_v34 = vpop.permute.xlu0 %2333 }
 0x185   : > { %11516 = vst [vmem:[#allocation123_spill] sm:$0xff] %v6845_v1  ;;  %11517 = vst [vmem:[#allocation124_spill] sm:$0xff] %v6847_v34 }
 0x186   : > { %2073 = vperm.xlu1 %6232, %v6834_v23   ;;  %2981 = vperm.xlu0 %6234, %v6843_v21  }
 0x188   : > { %v6854_v7 = vpop.permute.xlu1 %1437  ;;  %v6856_v59 = vpop.permute.xlu0 %2341 }
 0x189   : > { %11518 = vst [vmem:[#allocation125_spill] sm:$0xff] %v6854_v7  ;;  %11519 = vst [vmem:[#allocation126_spill] sm:$0xff] %v6856_v59 }
 0x18a   : > { %2081 = vperm.xlu1 %6232, %v6843_v21   ;;  %2989 = vperm.xlu0 %6234, %v6852_v20  }
 0x18c   : > { %v6863_v1 = vpop.permute.xlu1 %1447  ;;  %v6865_v34 = vpop.permute.xlu0 %2349 }
 0x18d   : > { %11520 = vst [vmem:[#allocation127_spill] sm:$0xff] %v6863_v1  ;;  %11521 = vst [vmem:[#allocation128_spill] sm:$0xff] %v6865_v34 }
 0x18e   : > { %2089 = vperm.xlu1 %6232, %v6852_v20   ;;  %2997 = vperm.xlu0 %6234, %v6861_v18  }
 0x190   : > { %v6872_v7 = vpop.permute.xlu1 %1457  ;;  %v6874_v59 = vpop.permute.xlu0 %2357 }
 0x191   : > { %11522 = vst [vmem:[#allocation129_spill] sm:$0xff] %v6872_v7  ;;  %11523 = vst [vmem:[#allocation130_spill] sm:$0xff] %v6874_v59 }
 0x192   : > { %2097 = vperm.xlu1 %6232, %v6861_v18   ;;  %3005 = vperm.xlu0 %6234, %v6870_v17  }
 0x195   : > { %v6881_v1 = vpop.permute.xlu1 %1853  ;;  %v6883_v34 = vpop.permute.xlu0 %2753 }
 0x196   : > { %11524 = vst [vmem:[#allocation131_spill] sm:$0xff] %v6881_v1  ;;  %11525 = vst [vmem:[#allocation132_spill] sm:$0xff] %v6883_v34  ;;  %2105 = vperm.xlu1 %6232, %v6870_v17   ;;  %3013 = vperm.xlu0 %6234, %v6879_v15  }
 0x199   : > { %v6890_v7 = vpop.permute.xlu1 %1857  ;;  %v6892_v59 = vpop.permute.xlu0 %2765 }
 0x19a   : > { %11526 = vst [vmem:[#allocation133_spill] sm:$0xff] %v6890_v7  ;;  %11527 = vst [vmem:[#allocation134_spill] sm:$0xff] %v6892_v59  ;;  %2113 = vperm.xlu1 %6232, %v6879_v15   ;;  %3021 = vperm.xlu0 %6234, %v6888_v14  }
 0x19d   : > { %v6899_v1 = vpop.permute.xlu1 %1865  ;;  %v6901_v34 = vpop.permute.xlu0 %2773 }
 0x19e   : > { %11528 = vst [vmem:[#allocation135_spill] sm:$0xff] %v6899_v1  ;;  %11529 = vst [vmem:[#allocation136_spill] sm:$0xff] %v6901_v34  ;;  %2121 = vperm.xlu1 %6232, %v6888_v14   ;;  %3029 = vperm.xlu0 %6234, %v6897_v12  }
 0x1a1   : > { %v6908_v7 = vpop.permute.xlu1 %1873  ;;  %v6910_v59 = vpop.permute.xlu0 %2781 }
 0x1a2   : > { %11530 = vst [vmem:[#allocation137_spill] sm:$0xff] %v6908_v7  ;;  %11531 = vst [vmem:[#allocation138_spill] sm:$0xff] %v6910_v59  ;;  %2129 = vperm.xlu1 %6232, %v6897_v12   ;;  %3037 = vperm.xlu0 %6234, %v6906_v11  }
 0x1a5   : > { %v6917_v1 = vpop.permute.xlu1 %1881  ;;  %v6919_v34 = vpop.permute.xlu0 %2789 }
 0x1a6   : > { %11532 = vst [vmem:[#allocation139_spill] sm:$0xff] %v6917_v1  ;;  %11533 = vst [vmem:[#allocation140_spill] sm:$0xff] %v6919_v34  ;;  %2137 = vperm.xlu1 %6232, %v6906_v11   ;;  %3045 = vperm.xlu0 %6234, %v6915_v9  }
 0x1a9   : > { %v6926_v7 = vpop.permute.xlu1 %1889  ;;  %v6928_v59 = vpop.permute.xlu0 %2797 }
 0x1aa   : > { %11534 = vst [vmem:[#allocation141_spill] sm:$0xff] %v6926_v7  ;;  %11535 = vst [vmem:[#allocation142_spill] sm:$0xff] %v6928_v59  ;;  %2145 = vperm.xlu1 %6232, %v6915_v9   ;;  %3053 = vperm.xlu0 %6234, %v6924_v8  }
 0x1ad   : > { %v6935_v1 = vpop.permute.xlu1 %1897  ;;  %v6937_v34 = vpop.permute.xlu0 %2805 }
 0x1ae   : > { %11536 = vst [vmem:[#allocation143_spill] sm:$0xff] %v6935_v1  ;;  %11537 = vst [vmem:[#allocation144_spill] sm:$0xff] %v6937_v34  ;;  %2153 = vperm.xlu1 %6232, %v6924_v8   ;;  %3061 = vperm.xlu0 %6234, %v6933_v6  }
 0x1b1   : > { %v6944_v7 = vpop.permute.xlu1 %1905  ;;  %v6946_v59 = vpop.permute.xlu0 %2813 }
 0x1b2   : > { %11538 = vst [vmem:[#allocation145_spill] sm:$0xff] %v6944_v7  ;;  %11539 = vst [vmem:[#allocation146_spill] sm:$0xff] %v6946_v59  ;;  %2161 = vperm.xlu1 %6232, %v6933_v6   ;;  %3069 = vperm.xlu0 %6234, %v6942_v5  }
 0x1b5   : > { %v6953_v1 = vpop.permute.xlu1 %1913  ;;  %v6955_v34 = vpop.permute.xlu0 %2821 }
 0x1b6   : > { %11540 = vst [vmem:[#allocation147_spill] sm:$0xff] %v6953_v1  ;;  %11541 = vst [vmem:[#allocation148_spill] sm:$0xff] %v6955_v34  ;;  %2169 = vperm.xlu1 %6232, %v6942_v5   ;;  %3077 = vperm.xlu0 %6234, %v6951_v3  }
 0x1b9   : > { %v6962_v7 = vpop.permute.xlu1 %1921  ;;  %v6964_v59 = vpop.permute.xlu0 %2829 }
 0x1ba   : > { %11542 = vst [vmem:[#allocation149_spill] sm:$0xff] %v6962_v7  ;;  %11543 = vst [vmem:[#allocation150_spill] sm:$0xff] %v6964_v59  ;;  %2177 = vperm.xlu1 %6232, %v6951_v3   ;;  %3085 = vperm.xlu0 %6234, %v6960_v63  }
 0x1bd   : > { %v6971_v1 = vpop.permute.xlu1 %1929  ;;  %v6973_v34 = vpop.permute.xlu0 %2837 }
 0x1be   : > { %11544 = vst [vmem:[#allocation151_spill] sm:$0xff] %v6971_v1  ;;  %11545 = vst [vmem:[#allocation152_spill] sm:$0xff] %v6973_v34  ;;  %2185 = vperm.xlu1 %6232, %v6960_v63   ;;  %3093 = vperm.xlu0 %6234, %v6969_v61  }
 0x1c1   : > { %v6980_v7 = vpop.permute.xlu1 %1937  ;;  %v6982_v59 = vpop.permute.xlu0 %2845 }
 0x1c2   : > { %11546 = vst [vmem:[#allocation153_spill] sm:$0xff] %v6980_v7  ;;  %11547 = vst [vmem:[#allocation154_spill] sm:$0xff] %v6982_v59  ;;  %2193 = vperm.xlu1 %6232, %v6969_v61   ;;  %3101 = vperm.xlu0 %6234, %v6978_v60  }
 0x1c5   : > { %v6989_v1 = vpop.permute.xlu1 %1945  ;;  %v6991_v34 = vpop.permute.xlu0 %2853 }
 0x1c6   : > { %11548 = vst [vmem:[#allocation155_spill] sm:$0xff] %v6989_v1  ;;  %11549 = vst [vmem:[#allocation156_spill] sm:$0xff] %v6991_v34  ;;  %2201 = vperm.xlu1 %6232, %v6978_v60   ;;  %3109 = vperm.xlu0 %6234, %v6987_v58  }
 0x1c9   : > { %v6998_v7 = vpop.permute.xlu1 %1953  ;;  %v7000_v59 = vpop.permute.xlu0 %2861 }
 0x1ca   : > { %11550 = vst [vmem:[#allocation157_spill] sm:$0xff] %v6998_v7  ;;  %11551 = vst [vmem:[#allocation158_spill] sm:$0xff] %v7000_v59  ;;  %2209 = vperm.xlu1 %6232, %v6987_v58   ;;  %3117 = vperm.xlu0 %6234, %v6996_v57  }
 0x1cd   : > { %v7007_v1 = vpop.permute.xlu1 %1961  ;;  %v7009_v34 = vpop.permute.xlu0 %2869 }
 0x1ce   : > { %11552 = vst [vmem:[#allocation159_spill] sm:$0xff] %v7007_v1  ;;  %11553 = vst [vmem:[#allocation160_spill] sm:$0xff] %v7009_v34  ;;  %2217 = vperm.xlu1 %6232, %v6996_v57   ;;  %3125 = vperm.xlu0 %6234, %v7005_v55  }
 0x1d1   : > { %v7016_v7 = vpop.permute.xlu1 %1969  ;;  %v7018_v59 = vpop.permute.xlu0 %2877 }
 0x1d2   : > { %11554 = vst [vmem:[#allocation161_spill] sm:$0xff] %v7016_v7  ;;  %11555 = vst [vmem:[#allocation162_spill] sm:$0xff] %v7018_v59  ;;  %2225 = vperm.xlu1 %6232, %v7005_v55   ;;  %3133 = vperm.xlu0 %6234, %v7014_v54  }
 0x1d5   : > { %v7025_v1 = vpop.permute.xlu1 %1977  ;;  %v7027_v34 = vpop.permute.xlu0 %2885 }
 0x1d6   : > { %11556 = vst [vmem:[#allocation163_spill] sm:$0xff] %v7025_v1  ;;  %11557 = vst [vmem:[#allocation164_spill] sm:$0xff] %v7027_v34  ;;  %2233 = vperm.xlu1 %6232, %v7014_v54   ;;  %3141 = vperm.xlu0 %6234, %v7023_v52  }
 0x1d9   : > { %v7034_v7 = vpop.permute.xlu1 %1985  ;;  %v7036_v59 = vpop.permute.xlu0 %2893 }
 0x1da   : > { %11558 = vst [vmem:[#allocation165_spill] sm:$0xff] %v7034_v7  ;;  %11559 = vst [vmem:[#allocation166_spill] sm:$0xff] %v7036_v59  ;;  %2241 = vperm.xlu1 %6232, %v7023_v52   ;;  %3149 = vperm.xlu0 %6234, %v7032_v51  }
 0x1dd   : > { %v7043_v1 = vpop.permute.xlu1 %1993  ;;  %v7045_v34 = vpop.permute.xlu0 %2901 }
 0x1de   : > { %11560 = vst [vmem:[#allocation167_spill] sm:$0xff] %v7043_v1  ;;  %11561 = vst [vmem:[#allocation168_spill] sm:$0xff] %v7045_v34  ;;  %2249 = vperm.xlu1 %6232, %v7032_v51   ;;  %3157 = vperm.xlu0 %6234, %v7041_v49  }
 0x1e1   : > { %v7052_v7 = vpop.permute.xlu1 %2001  ;;  %v7054_v59 = vpop.permute.xlu0 %2909 }
 0x1e2   : > { %11562 = vst [vmem:[#allocation169_spill] sm:$0xff] %v7052_v7  ;;  %11563 = vst [vmem:[#allocation170_spill] sm:$0xff] %v7054_v59  ;;  %2257 = vperm.xlu1 %6232, %v7041_v49   ;;  %3165 = vperm.xlu0 %6234, %v7050_v48  }
 0x1e5   : > { %v7061_v1 = vpop.permute.xlu1 %2009  ;;  %v7063_v34 = vpop.permute.xlu0 %2917 }
 0x1e6   : > { %11564 = vst [vmem:[#allocation171_spill] sm:$0xff] %v7061_v1  ;;  %11565 = vst [vmem:[#allocation172_spill] sm:$0xff] %v7063_v34  ;;  %2265 = vperm.xlu1 %6232, %v7050_v48   ;;  %3173 = vperm.xlu0 %6234, %v7059_v46  }
 0x1e9   : > { %v7070_v7 = vpop.permute.xlu1 %2017  ;;  %v7072_v59 = vpop.permute.xlu0 %2925 }
 0x1ea   : > { %11566 = vst [vmem:[#allocation173_spill] sm:$0xff] %v7070_v7  ;;  %11567 = vst [vmem:[#allocation174_spill] sm:$0xff] %v7072_v59  ;;  %2273 = vperm.xlu1 %6232, %v7059_v46   ;;  %3181 = vperm.xlu0 %6234, %v7068_v45  }
 0x1ed   : > { %v7079_v1 = vpop.permute.xlu1 %2025  ;;  %v7081_v34 = vpop.permute.xlu0 %2933 }
 0x1ee   : > { %11568 = vst [vmem:[#allocation175_spill] sm:$0xff] %v7079_v1  ;;  %11569 = vst [vmem:[#allocation176_spill] sm:$0xff] %v7081_v34  ;;  %2281 = vperm.xlu1 %6232, %v7068_v45   ;;  %3189 = vperm.xlu0 %6234, %v7077_v37  }
 0x1f1   : > { %v7088_v7 = vpop.permute.xlu1 %2033  ;;  %v7090_v59 = vpop.permute.xlu0 %2941 }
 0x1f2   : > { %11571 = vst [vmem:[#allocation178_spill] sm:$0xff] %v7088_v7  ;;  %11572 = vst [vmem:[#allocation179_spill] sm:$0xff] %v7090_v59  ;;  %2289 = vperm.xlu1 %6232, %v7077_v37   ;;  %3197 = vperm.xlu0 %6234, %v7086_v36  }
 0x1f5   : > { %v7097_v1 = vpop.permute.xlu1 %2041  ;;  %v7099_v34 = vpop.permute.xlu0 %2949 }
 0x1f6   : > { %11574 = vst [vmem:[#allocation181_spill] sm:$0xff] %v7097_v1  ;;  %11575 = vst [vmem:[#allocation182_spill] sm:$0xff] %v7099_v34  ;;  %2297 = vperm.xlu1 %6232, %v7086_v36   ;;  %3205 = vperm.xlu0 %6234, %v7095_v43  }
 0x1f9   : > { %v7106_v7 = vpop.permute.xlu1 %2049  ;;  %v7108_v59 = vpop.permute.xlu0 %2957 }
 0x1fa   : > { %11577 = vst [vmem:[#allocation184_spill] sm:$0xff] %v7106_v7  ;;  %11578 = vst [vmem:[#allocation185_spill] sm:$0xff] %v7108_v59  ;;  %2305 = vperm.xlu1 %6232, %v7095_v43   ;;  %3213 = vperm.xlu0 %6234, %v7104_v42   ;;  %v7131_v43 = vld [vmem:[%s6390_s26 + $0x3d0] sm:$0xff] }
 0x1fb   : > { %11585 = vst [vmem:[#allocation192_spill] sm:$0xff] %v7131_v43 }
 0x1fd   : > { %v7115_v1 = vpop.permute.xlu1 %2057  ;;  %v7117_v34 = vpop.permute.xlu0 %2965 }
 0x1fe   : > { %11580 = vst [vmem:[#allocation187_spill] sm:$0xff] %v7115_v1  ;;  %11581 = vst [vmem:[#allocation188_spill] sm:$0xff] %v7117_v34  ;;  %2313 = vperm.xlu1 %6232, %v7104_v42   ;;  %3221 = vperm.xlu0 %6234, %v7113_v40   ;;  %v7140_v42 = vld [vmem:[%s6390_s26 + $0x3e0] sm:$0xff] }
 0x201   : > { %v7124_v7 = vpop.permute.xlu1 %2065  ;;  %v7126_v59 = vpop.permute.xlu0 %2973 }
 0x202   : > { %11583 = vst [vmem:[#allocation190_spill] sm:$0xff] %v7124_v7  ;;  %11584 = vst [vmem:[#allocation191_spill] sm:$0xff] %v7126_v59  ;;  %2321 = vperm.xlu1 %6232, %v7113_v40   ;;  %3229 = vperm.xlu0 %6234, %v7122_v39   ;;  %v7149_v40 = vld [vmem:[%s6390_s26 + $0x3f0] sm:$0xff] }
 0x203   : > { %11590 = vst [vmem:[#allocation197_spill] sm:$0xff] %v7149_v40 }
 0x205   : > { %v7133_v1 = vpop.permute.xlu1 %2073  ;;  %v7135_v34 = vpop.permute.xlu0 %2981 }
 0x206   : > { %11586 = vst [vmem:[#allocation193_spill] sm:$0xff] %v7133_v1  ;;  %11587 = vst [vmem:[#allocation194_spill] sm:$0xff] %v7135_v34  ;;  %2329 = vperm.xlu1 %6232, %v7122_v39   ;;  %3237 = vperm.xlu0 %6234, %v7131_v43  }
 0x209   : > { %v7142_v7 = vpop.permute.xlu1 %2081  ;;  %v7144_v59 = vpop.permute.xlu0 %2989 }
 0x20a   : > { %11588 = vst [vmem:[#allocation195_spill] sm:$0xff] %v7142_v7  ;;  %11589 = vst [vmem:[#allocation196_spill] sm:$0xff] %v7144_v59  ;;  %2337 = vperm.xlu1 %6232, %v7131_v43   ;;  %3245 = vperm.xlu0 %6234, %v7140_v42   ;;  %v11595_v59 = vmov 0   ;;  %v6237_v43 = vld [vmem:[%s6390_s26] sm:$0xff] }
 0x20d   : > { %v7151_v1 = vpop.permute.xlu1 %2089  ;;  %v7153_v34 = vpop.permute.xlu0 %2997 }
 0x20e   : > { %11591 = vst [vmem:[#allocation198_spill] sm:$0xff] %v7151_v1  ;;  %11592 = vst [vmem:[#allocation199_spill] sm:$0xff] %v7153_v34  ;;  %2345 = vperm.xlu1 %6232, %v7140_v42   ;;  %3253 = vperm.xlu0 %6234, %v7149_v40   ;;  %v11598_v34 = vmov 2  }
 0x211   : > { %v7157_v39 = vpop.permute.xlu1 %2097  ;;  %v7159_v7 = vpop.permute.xlu0 %3005 }
 0x212   : > { %11593 = vst [vmem:[#allocation200_spill] sm:$0xff] %v7157_v39  ;;  %11594 = vst [vmem:[#allocation201_spill] sm:$0xff] %v7159_v7  ;;  %2353 = vperm.xlu1 %6232, %v7149_v40   ;;  %6235 = vset.pattern.permute.xlu0 %v11595_v59  ;;  %v6238_v40 = vld [vmem:[%s6390_s26 + $0x10] sm:$0xff] }
 0x213   : > { %822 = vperm.xlu0 %6235, %v6237_v43  }
 0x215   : > { %v7164_v36 = vpop.permute.xlu1 %2105  ;;  %v7166_v1 = vpop.permute.xlu0 %3013 }
 0x216   : > { %11596 = vst [vmem:[#allocation202_spill] sm:$0xff] %v7164_v36  ;;  %11597 = vst [vmem:[#allocation203_spill] sm:$0xff] %v7166_v1  ;;  %6233 = vset.pattern.permute.xlu1 %v11598_v34  ;;  %v6239_v1 = vld [vmem:[%s6390_s26 + $0x18] sm:$0xff]  ;;  %v6240_v34 = vld [vmem:[%s6390_s26 + $0x28] sm:$0xff] }
 0x217   : > { %2749 = vperm.xlu1 %6233, %v6237_v43   ;;  %827 = vperm.xlu0 %6235, %v6589_v0  }
 0x219   : > { %v7170_v39 = vpop.permute.xlu1 %2113  ;;  %v7172_v7 = vpop.permute.xlu0 %3021 }
 0x21b   : > { %2757 = vperm.xlu1 %6233, %v6238_v40   ;;  %842 = vperm.xlu0 %6235, %v6600_v41  }
 0x21d   : > { %v7176_v59 = vpop.permute.xlu1 %2121  ;;  %v7178_v36 = vpop.permute.xlu0 %3029 }
 0x21e   : > { %11599 = vst [vmem:[#allocation204_spill] sm:$0xff] %v7178_v36  ;;  %v6241_v36 = vld [vmem:[%s6390_s26 + $0x38] sm:$0xff] }
 0x21f   : > { %2761 = vperm.xlu1 %6233, %v6239_v1   ;;  %852 = vperm.xlu0 %6235, %v6609_v50  }
 0x221   : > { %v7182_v43 = vpop.permute.xlu1 %2129  ;;  %v7184_v0 = vpop.permute.xlu0 %3037 }
 0x222   : > { %11600 = vst [vmem:[#allocation205_spill] sm:$0xff] %v7184_v0  ;;  %v6242_v0 = vld [vmem:[%s6390_s26 + $0x48] sm:$0xff] }
 0x223   : > { %2769 = vperm.xlu1 %6233, %v6240_v34   ;;  %862 = vperm.xlu0 %6235, %v6618_v25  }
 0x225   : > { %v7188_v40 = vpop.permute.xlu1 %2137  ;;  %v7190_v41 = vpop.permute.xlu0 %3045 }
 0x226   : > { %11601 = vst [vmem:[#allocation206_spill] sm:$0xff] %v7190_v41  ;;  %v6243_v41 = vld [vmem:[%s6390_s26 + $0x58] sm:$0xff] }
 0x227   : > { %2777 = vperm.xlu1 %6233, %v6241_v36   ;;  %872 = vperm.xlu0 %6235, %v6627_v2  }
 0x229   : > { %v7194_v1 = vpop.permute.xlu1 %2145  ;;  %v7196_v50 = vpop.permute.xlu0 %3053 }
 0x22a   : > { %11602 = vst [vmem:[#allocation207_spill] sm:$0xff] %v7196_v50  ;;  %v6244_v50 = vld [vmem:[%s6390_s26 + $0x68] sm:$0xff] }
 0x22b   : > { %2785 = vperm.xlu1 %6233, %v6242_v0   ;;  %882 = vperm.xlu0 %6235, %v6636_v16  }
 0x22d   : > { %v7200_v34 = vpop.permute.xlu1 %2153  ;;  %v7202_v25 = vpop.permute.xlu0 %3061 }
 0x22e   : > { %11603 = vst [vmem:[#allocation208_spill] sm:$0xff] %v7202_v25  ;;  %v6245_v25 = vld [vmem:[%s6390_s26 + $0x78] sm:$0xff] }
 0x22f   : > { %2793 = vperm.xlu1 %6233, %v6243_v41   ;;  %892 = vperm.xlu0 %6235, %v6645_v31  }
 0x231   : > { %v7206_v36 = vpop.permute.xlu1 %2161  ;;  %v7208_v2 = vpop.permute.xlu0 %3069 }
 0x232   : > { %11604 = vst [vmem:[#allocation209_spill] sm:$0xff] %v7208_v2  ;;  %v6246_v2 = vld [vmem:[%s6390_s26 + $0x88] sm:$0xff] }
 0x233   : > { %2801 = vperm.xlu1 %6233, %v6244_v50   ;;  %902 = vperm.xlu0 %6235, %v6654_v28  }
 0x235   : > { %v7212_v0 = vpop.permute.xlu1 %2169  ;;  %v7214_v16 = vpop.permute.xlu0 %3077 }
 0x236   : > { %11605 = vst [vmem:[#allocation210_spill] sm:$0xff] %v7214_v16  ;;  %v6247_v16 = vld [vmem:[%s6390_s26 + $0x98] sm:$0xff] }
 0x237   : > { %2809 = vperm.xlu1 %6233, %v6245_v25   ;;  %912 = vperm.xlu0 %6235, %v6663_v22  }
 0x239   : > { %v7218_v41 = vpop.permute.xlu1 %2177  ;;  %v7220_v31 = vpop.permute.xlu0 %3085 }
 0x23a   : > { %11606 = vst [vmem:[#allocation211_spill] sm:$0xff] %v7220_v31  ;;  %v6248_v31 = vld [vmem:[%s6390_s26 + $0xa8] sm:$0xff] }
 0x23b   : > { %2817 = vperm.xlu1 %6233, %v6246_v2   ;;  %922 = vperm.xlu0 %6235, %v6672_v19  }
 0x23d   : > { %v7224_v50 = vpop.permute.xlu1 %2185  ;;  %v7226_v28 = vpop.permute.xlu0 %3093 }
 0x23e   : > { %11607 = vst [vmem:[#allocation212_spill] sm:$0xff] %v7226_v28  ;;  %v6249_v28 = vld [vmem:[%s6390_s26 + $0xb8] sm:$0xff] }
 0x23f   : > { %2825 = vperm.xlu1 %6233, %v6247_v16   ;;  %932 = vperm.xlu0 %6235, %v6681_v13  }
 0x241   : > { %v7230_v25 = vpop.permute.xlu1 %2193  ;;  %v7232_v22 = vpop.permute.xlu0 %3101 }
 0x242   : > { %11608 = vst [vmem:[#allocation213_spill] sm:$0xff] %v7232_v22  ;;  %v6250_v22 = vld [vmem:[%s6390_s26 + $0xc8] sm:$0xff] }
 0x243   : > { %2833 = vperm.xlu1 %6233, %v6248_v31   ;;  %942 = vperm.xlu0 %6235, %v6690_v10  }
 0x245   : > { %v7236_v2 = vpop.permute.xlu1 %2201  ;;  %v7238_v19 = vpop.permute.xlu0 %3109 }
 0x246   : > { %11609 = vst [vmem:[#allocation214_spill] sm:$0xff] %v7238_v19  ;;  %v6251_v19 = vld [vmem:[%s6390_s26 + $0xd8] sm:$0xff] }
 0x247   : > { %2841 = vperm.xlu1 %6233, %v6249_v28   ;;  %952 = vperm.xlu0 %6235, %v6699_v4  }
 0x249   : > { %v7242_v16 = vpop.permute.xlu1 %2209  ;;  %v7244_v13 = vpop.permute.xlu0 %3117 }
 0x24a   : > { %11610 = vst [vmem:[#allocation215_spill] sm:$0xff] %v7244_v13  ;;  %v6252_v13 = vld [vmem:[%s6390_s26 + $0xe8] sm:$0xff] }
 0x24b   : > { %2849 = vperm.xlu1 %6233, %v6250_v22   ;;  %962 = vperm.xlu0 %6235, %v6708_v62  }
 0x24d   : > { %v7248_v31 = vpop.permute.xlu1 %2217  ;;  %v7250_v10 = vpop.permute.xlu0 %3125 }
 0x24e   : > { %11611 = vst [vmem:[#allocation216_spill] sm:$0xff] %v7250_v10  ;;  %v6253_v10 = vld [vmem:[%s6390_s26 + $0xf8] sm:$0xff] }
 0x24f   : > { %2857 = vperm.xlu1 %6233, %v6251_v19   ;;  %972 = vperm.xlu0 %6235, %v6717_v56  }
 0x251   : > { %v7254_v28 = vpop.permute.xlu1 %2225  ;;  %v7256_v4 = vpop.permute.xlu0 %3133 }
 0x252   : > { %11612 = vst [vmem:[#allocation217_spill] sm:$0xff] %v7256_v4  ;;  %v6254_v4 = vld [vmem:[%s6390_s26 + $0x108] sm:$0xff] }
 0x253   : > { %2865 = vperm.xlu1 %6233, %v6252_v13   ;;  %982 = vperm.xlu0 %6235, %v6726_v53  }
 0x255   : > { %v7260_v22 = vpop.permute.xlu1 %2233  ;;  %v7262_v62 = vpop.permute.xlu0 %3141 }
 0x256   : > { %11613 = vst [vmem:[#allocation218_spill] sm:$0xff] %v7260_v22  ;;  %11614 = vst [vmem:[#allocation219_spill] sm:$0xff] %v7262_v62  ;;  %v6255_v62 = vld [vmem:[%s6390_s26 + $0x118] sm:$0xff] }
 0x257   : > { %2873 = vperm.xlu1 %6233, %v6253_v10   ;;  %992 = vperm.xlu0 %6235, %v6735_v47  }
 0x259   : > { %v7266_v19 = vpop.permute.xlu1 %2241  ;;  %v7268_v56 = vpop.permute.xlu0 %3149 }
 0x25a   : > { %11615 = vst [vmem:[#allocation220_spill] sm:$0xff] %v7266_v19  ;;  %11616 = vst [vmem:[#allocation221_spill] sm:$0xff] %v7268_v56  ;;  %v6256_v56 = vld [vmem:[%s6390_s26 + $0x128] sm:$0xff] }
 0x25b   : > { %2881 = vperm.xlu1 %6233, %v6254_v4   ;;  %1002 = vperm.xlu0 %6235, %v6744_v44  }
 0x25d   : > { %v7272_v13 = vpop.permute.xlu1 %2249  ;;  %v7274_v53 = vpop.permute.xlu0 %3157 }
 0x25e   : > { %11617 = vst [vmem:[#allocation222_spill] sm:$0xff] %v7272_v13  ;;  %11618 = vst [vmem:[#allocation223_spill] sm:$0xff] %v7274_v53  ;;  %v6257_v53 = vld [vmem:[%s6390_s26 + $0x138] sm:$0xff] }
 0x25f   : > { %2889 = vperm.xlu1 %6233, %v6255_v62   ;;  %1012 = vperm.xlu0 %6235, %v6753_v38  }
 0x261   : > { %v7278_v10 = vpop.permute.xlu1 %2257  ;;  %v7280_v47 = vpop.permute.xlu0 %3165 }
 0x262   : > { %11619 = vst [vmem:[#allocation224_spill] sm:$0xff] %v7278_v10  ;;  %11620 = vst [vmem:[#allocation225_spill] sm:$0xff] %v7280_v47  ;;  %v6258_v47 = vld [vmem:[%s6390_s26 + $0x148] sm:$0xff] }
 0x263   : > { %2897 = vperm.xlu1 %6233, %v6256_v56   ;;  %1022 = vperm.xlu0 %6235, %v6762_v35  }
 0x265   : > { %v7284_v4 = vpop.permute.xlu1 %2265  ;;  %v7286_v44 = vpop.permute.xlu0 %3173 }
 0x266   : > { %11621 = vst [vmem:[#allocation226_spill] sm:$0xff] %v7284_v4  ;;  %11622 = vst [vmem:[#allocation227_spill] sm:$0xff] %v7286_v44  ;;  %v6259_v44 = vld [vmem:[%s6390_s26 + $0x158] sm:$0xff]  ;;  %v776_v4 = vld [vmem:[%s7544_s29 + $0x2b0] sm:$0xff] }
 0x267   : > { %2905 = vperm.xlu1 %6233, %v6257_v53   ;;  %1032 = vperm.xlu0 %6235, %v6771_v33  }
 0x269   : > { %v7290_v62 = vpop.permute.xlu1 %2273  ;;  %v7292_v38 = vpop.permute.xlu0 %3181 }
 0x26a   : > { %11623 = vst [vmem:[#allocation228_spill] sm:$0xff] %v7290_v62  ;;  %11624 = vst [vmem:[#allocation229_spill] sm:$0xff] %v7292_v38  ;;  %v6260_v38 = vld [vmem:[%s6390_s26 + $0x168] sm:$0xff] }
 0x26b   : > { %2913 = vperm.xlu1 %6233, %v6258_v47   ;;  %1042 = vperm.xlu0 %6235, %v6780_v32  }
 0x26d   : > { %v7296_v56 = vpop.permute.xlu1 %2281  ;;  %v7298_v35 = vpop.permute.xlu0 %3189 }
 0x26e   : > { %11625 = vst [vmem:[#allocation230_spill] sm:$0xff] %v7296_v56  ;;  %11626 = vst [vmem:[#allocation231_spill] sm:$0xff] %v7298_v35  ;;  %v6261_v35 = vld [vmem:[%s6390_s26 + $0x178] sm:$0xff] }
 0x26f   : > { %2921 = vperm.xlu1 %6233, %v6259_v44   ;;  %1052 = vperm.xlu0 %6235, %v6789_v30  }
 0x271   : > { %v7302_v53 = vpop.permute.xlu1 %2289  ;;  %v7304_v33 = vpop.permute.xlu0 %3197 }
 0x272   : > { %11627 = vst [vmem:[#allocation232_spill] sm:$0xff] %v7302_v53  ;;  %11628 = vst [vmem:[#allocation233_spill] sm:$0xff] %v7304_v33  ;;  %v6262_v33 = vld [vmem:[%s6390_s26 + $0x188] sm:$0xff] }
 0x273   : > { %2929 = vperm.xlu1 %6233, %v6260_v38   ;;  %1062 = vperm.xlu0 %6235, %v6798_v29  }
 0x275   : > { %v7308_v47 = vpop.permute.xlu1 %2297  ;;  %v7310_v32 = vpop.permute.xlu0 %3205 }
 0x276   : > { %11629 = vst [vmem:[#allocation234_spill] sm:$0xff] %v7308_v47  ;;  %11630 = vst [vmem:[#allocation235_spill] sm:$0xff] %v7310_v32  ;;  %v6263_v32 = vld [vmem:[%s6390_s26 + $0x198] sm:$0xff] }
 0x277   : > { %2937 = vperm.xlu1 %6233, %v6261_v35   ;;  %1072 = vperm.xlu0 %6235, %v6807_v27  }
 0x279   : > { %v7314_v44 = vpop.permute.xlu1 %2305  ;;  %v7316_v30 = vpop.permute.xlu0 %3213 }
 0x27a   : > { %11631 = vst [vmem:[#allocation236_spill] sm:$0xff] %v7314_v44  ;;  %11632 = vst [vmem:[#allocation237_spill] sm:$0xff] %v7316_v30  ;;  %v6264_v30 = vld [vmem:[%s6390_s26 + $0x1a8] sm:$0xff] }
 0x27b   : > { %2945 = vperm.xlu1 %6233, %v6262_v33   ;;  %1082 = vperm.xlu0 %6235, %v6816_v26  }
 0x27d   : > { %v7320_v38 = vpop.permute.xlu1 %2313  ;;  %v7322_v29 = vpop.permute.xlu0 %3221 }
 0x27e   : > { %11633 = vst [vmem:[#allocation238_spill] sm:$0xff] %v7320_v38  ;;  %11634 = vst [vmem:[#allocation239_spill] sm:$0xff] %v7322_v29  ;;  %v6265_v29 = vld [vmem:[%s6390_s26 + $0x1b8] sm:$0xff] }
 0x27f   : > { %2953 = vperm.xlu1 %6233, %v6263_v32   ;;  %1092 = vperm.xlu0 %6235, %v6825_v24  }
 0x281   : > { %v7326_v35 = vpop.permute.xlu1 %2321  ;;  %v7328_v27 = vpop.permute.xlu0 %3229 }
 0x282   : > { %11635 = vst [vmem:[#allocation240_spill] sm:$0xff] %v7326_v35  ;;  %11636 = vst [vmem:[#allocation241_spill] sm:$0xff] %v7328_v27  ;;  %v6266_v27 = vld [vmem:[%s6390_s26 + $0x1c8] sm:$0xff] }
 0x283   : > { %2961 = vperm.xlu1 %6233, %v6264_v30   ;;  %1102 = vperm.xlu0 %6235, %v6834_v23  }
 0x285   : > { %v7332_v33 = vpop.permute.xlu1 %2329  ;;  %v7334_v26 = vpop.permute.xlu0 %3237 }
 0x286   : > { %11637 = vst [vmem:[#allocation242_spill] sm:$0xff] %v7332_v33  ;;  %11638 = vst [vmem:[#allocation243_spill] sm:$0xff] %v7334_v26  ;;  %v6267_v26 = vld [vmem:[%s6390_s26 + $0x1d8] sm:$0xff] }
 0x287   : > { %2969 = vperm.xlu1 %6233, %v6265_v29   ;;  %1112 = vperm.xlu0 %6235, %v6843_v21  }
 0x289   : > { %v7338_v32 = vpop.permute.xlu1 %2337  ;;  %v7340_v24 = vpop.permute.xlu0 %3245 }
 0x28a   : > { %11639 = vst [vmem:[#allocation244_spill] sm:$0xff] %v7338_v32  ;;  %11640 = vst [vmem:[#allocation245_spill] sm:$0xff] %v7340_v24  ;;  %v6268_v24 = vld [vmem:[%s6390_s26 + $0x1e8] sm:$0xff] }
 0x28b   : > { %2977 = vperm.xlu1 %6233, %v6266_v27   ;;  %1122 = vperm.xlu0 %6235, %v6852_v20   ;;  %v6272_v32 = vld [vmem:[%s6390_s26 + $0x228] sm:$0xff] }
 0x28d   : > { %v7344_v30 = vpop.permute.xlu1 %2345  ;;  %v7346_v23 = vpop.permute.xlu0 %3253 }
 0x28e   : > { %11641 = vst [vmem:[#allocation246_spill] sm:$0xff] %v7344_v30  ;;  %11642 = vst [vmem:[#allocation247_spill] sm:$0xff] %v7346_v23  ;;  %v6269_v23 = vld [vmem:[%s6390_s26 + $0x1f8] sm:$0xff] }
 0x28f   : > { %2985 = vperm.xlu1 %6233, %v6267_v26   ;;  %1132 = vperm.xlu0 %6235, %v6861_v18   ;;  %v6271_v30 = vld [vmem:[%s6390_s26 + $0x218] sm:$0xff] }
 0x291   : > { %v7350_v29 = vpop.permute.xlu1 %2353 }
 0x292   : > { %11643 = vst [vmem:[#allocation248_spill] sm:$0xff] %v7350_v29  ;;  %v7352_v21 = vpop.permute.xlu0 %822  ;;  %v6270_v29 = vld [vmem:[%s6390_s26 + $0x208] sm:$0xff] }
 0x293   : > { %11644 = vst [vmem:[#allocation249_spill] sm:$0xff] %v7352_v21  ;;  %2993 = vperm.xlu1 %6233, %v6268_v24   ;;  %1142 = vperm.xlu0 %6235, %v6870_v17   ;;  %v777_v21 = vld [vmem:[%s7544_s29 + $0x2b8] sm:$0xff] }
 0x296   : > { %v7356_v27 = vpop.permute.xlu1 %2749  ;;  %v7358_v20 = vpop.permute.xlu0 %827 }
 0x297   : > { %11645 = vst [vmem:[#allocation250_spill] sm:$0xff] %v7356_v27  ;;  %11646 = vst [vmem:[#allocation251_spill] sm:$0xff] %v7358_v20  ;;  %3001 = vperm.xlu1 %6233, %v6269_v23   ;;  %1152 = vperm.xlu0 %6235, %v6879_v15  }
 0x29a   : > { %v7362_v26 = vpop.permute.xlu1 %2757  ;;  %v7364_v18 = vpop.permute.xlu0 %842 }
 0x29b   : > { %11647 = vst [vmem:[#allocation252_spill] sm:$0xff] %v7362_v26  ;;  %11648 = vst [vmem:[#allocation253_spill] sm:$0xff] %v7364_v18  ;;  %3009 = vperm.xlu1 %6233, %v6270_v29   ;;  %1162 = vperm.xlu0 %6235, %v6888_v14   ;;  %v773_v18 = vld [vmem:[%s7544_s29 + $0x298] sm:$0xff] }
 0x29e   : > { %v7368_v24 = vpop.permute.xlu1 %2761  ;;  %v7370_v17 = vpop.permute.xlu0 %852 }
 0x29f   : > { %11649 = vst [vmem:[#allocation254_spill] sm:$0xff] %v7368_v24  ;;  %11650 = vst [vmem:[#allocation255_spill] sm:$0xff] %v7370_v17  ;;  %3017 = vperm.xlu1 %6233, %v6271_v30   ;;  %1172 = vperm.xlu0 %6235, %v6897_v12   ;;  %v6273_v24 = vld [vmem:[%s6390_s26 + $0x238] sm:$0xff] }
 0x2a2   : > { %v7374_v23 = vpop.permute.xlu1 %2769  ;;  %v7376_v15 = vpop.permute.xlu0 %862 }
 0x2a3   : > { %11651 = vst [vmem:[#allocation256_spill] sm:$0xff] %v7374_v23  ;;  %11652 = vst [vmem:[#allocation257_spill] sm:$0xff] %v7376_v15  ;;  %3025 = vperm.xlu1 %6233, %v6272_v32   ;;  %1182 = vperm.xlu0 %6235, %v6906_v11   ;;  %v6274_v23 = vld [vmem:[%s6390_s26 + $0x248] sm:$0xff] }
 0x2a6   : > { %v7380_v29 = vpop.permute.xlu1 %2777  ;;  %v7382_v14 = vpop.permute.xlu0 %872 }
 0x2a7   : > { %11653 = vst [vmem:[#allocation258_spill] sm:$0xff] %v7380_v29  ;;  %11654 = vst [vmem:[#allocation259_spill] sm:$0xff] %v7382_v14  ;;  %3033 = vperm.xlu1 %6233, %v6273_v24   ;;  %1192 = vperm.xlu0 %6235, %v6915_v9   ;;  %v6275_v29 = vld [vmem:[%s6390_s26 + $0x258] sm:$0xff] }
 0x2aa   : > { %v7386_v30 = vpop.permute.xlu1 %2785  ;;  %v7388_v12 = vpop.permute.xlu0 %882 }
 0x2ab   : > { %11655 = vst [vmem:[#allocation260_spill] sm:$0xff] %v7386_v30  ;;  %11656 = vst [vmem:[#allocation261_spill] sm:$0xff] %v7388_v12  ;;  %3041 = vperm.xlu1 %6233, %v6274_v23   ;;  %1202 = vperm.xlu0 %6235, %v6924_v8   ;;  %v6276_v30 = vld [vmem:[%s6390_s26 + $0x268] sm:$0xff] }
 0x2ae   : > { %v7392_v32 = vpop.permute.xlu1 %2793  ;;  %v7394_v11 = vpop.permute.xlu0 %892 }
 0x2af   : > { %11657 = vst [vmem:[#allocation262_spill] sm:$0xff] %v7392_v32  ;;  %11658 = vst [vmem:[#allocation263_spill] sm:$0xff] %v7394_v11  ;;  %3049 = vperm.xlu1 %6233, %v6275_v29   ;;  %1212 = vperm.xlu0 %6235, %v6933_v6   ;;  %v6277_v32 = vld [vmem:[%s6390_s26 + $0x278] sm:$0xff] }
 0x2b2   : > { %v7398_v24 = vpop.permute.xlu1 %2801  ;;  %v7400_v9 = vpop.permute.xlu0 %902 }
 0x2b3   : > { %11659 = vst [vmem:[#allocation264_spill] sm:$0xff] %v7398_v24  ;;  %11660 = vst [vmem:[#allocation265_spill] sm:$0xff] %v7400_v9  ;;  %3057 = vperm.xlu1 %6233, %v6276_v30   ;;  %1222 = vperm.xlu0 %6235, %v6942_v5   ;;  %v6278_v24 = vld [vmem:[%s6390_s26 + $0x288] sm:$0xff] }
 0x2b6   : > { %v7404_v23 = vpop.permute.xlu1 %2809  ;;  %v7406_v8 = vpop.permute.xlu0 %912 }
 0x2b7   : > { %11661 = vst [vmem:[#allocation266_spill] sm:$0xff] %v7404_v23  ;;  %11662 = vst [vmem:[#allocation267_spill] sm:$0xff] %v7406_v8  ;;  %3065 = vperm.xlu1 %6233, %v6277_v32   ;;  %1232 = vperm.xlu0 %6235, %v6951_v3   ;;  %v6279_v23 = vld [vmem:[%s6390_s26 + $0x298] sm:$0xff]  ;;  %v11801_v8 = vld [vmem:[#allocation11_spill] sm:$0xff] }
 0x2ba   : > { %v7410_v29 = vpop.permute.xlu1 %2817  ;;  %v7412_v6 = vpop.permute.xlu0 %922 }
 0x2bb   : > { %11663 = vst [vmem:[#allocation268_spill] sm:$0xff] %v7410_v29  ;;  %11664 = vst [vmem:[#allocation269_spill] sm:$0xff] %v7412_v6  ;;  %3073 = vperm.xlu1 %6233, %v6278_v24   ;;  %1242 = vperm.xlu0 %6235, %v6960_v63   ;;  %v6280_v29 = vld [vmem:[%s6390_s26 + $0x2a8] sm:$0xff]  ;;  %v11800_v6 = vld [vmem:[#allocation10_spill] sm:$0xff] }
 0x2be   : > { %v7416_v30 = vpop.permute.xlu1 %2825  ;;  %v7418_v5 = vpop.permute.xlu0 %932 }
 0x2bf   : > { %11665 = vst [vmem:[#allocation270_spill] sm:$0xff] %v7416_v30  ;;  %11666 = vst [vmem:[#allocation271_spill] sm:$0xff] %v7418_v5  ;;  %3081 = vperm.xlu1 %6233, %v6279_v23   ;;  %1252 = vperm.xlu0 %6235, %v6969_v61   ;;  %v6281_v30 = vld [vmem:[%s6390_s26 + $0x2b8] sm:$0xff] }
 0x2c2   : > { %v7422_v32 = vpop.permute.xlu1 %2833  ;;  %v7424_v3 = vpop.permute.xlu0 %942 }
 0x2c3   : > { %11667 = vst [vmem:[#allocation272_spill] sm:$0xff] %v7422_v32  ;;  %11668 = vst [vmem:[#allocation273_spill] sm:$0xff] %v7424_v3  ;;  %3089 = vperm.xlu1 %6233, %v6280_v29   ;;  %1262 = vperm.xlu0 %6235, %v6978_v60   ;;  %v6282_v32 = vld [vmem:[%s6390_s26 + $0x2c8] sm:$0xff] }
 0x2c6   : > { %v7428_v24 = vpop.permute.xlu1 %2841  ;;  %v7430_v63 = vpop.permute.xlu0 %952 }
 0x2c7   : > { %11669 = vst [vmem:[#allocation274_spill] sm:$0xff] %v7428_v24  ;;  %11670 = vst [vmem:[#allocation275_spill] sm:$0xff] %v7430_v63  ;;  %3097 = vperm.xlu1 %6233, %v6281_v30   ;;  %1272 = vperm.xlu0 %6235, %v6987_v58   ;;  %v6283_v24 = vld [vmem:[%s6390_s26 + $0x2d8] sm:$0xff] }
 0x2ca   : > { %v7434_v23 = vpop.permute.xlu1 %2849  ;;  %v7436_v61 = vpop.permute.xlu0 %962 }
 0x2cb   : > { %11671 = vst [vmem:[#allocation276_spill] sm:$0xff] %v7434_v23  ;;  %11672 = vst [vmem:[#allocation277_spill] sm:$0xff] %v7436_v61  ;;  %3105 = vperm.xlu1 %6233, %v6282_v32   ;;  %1282 = vperm.xlu0 %6235, %v6996_v57   ;;  %v6284_v61 = vld [vmem:[%s6390_s26 + $0x2e8] sm:$0xff]  ;;  %v11795_v23 = vld [vmem:[#allocation3_spill] sm:$0xff] }
 0x2ce   : > { %v7440_v29 = vpop.permute.xlu1 %2857  ;;  %v7442_v60 = vpop.permute.xlu0 %972 }
 0x2cf   : > { %11673 = vst [vmem:[#allocation278_spill] sm:$0xff] %v7440_v29  ;;  %11674 = vst [vmem:[#allocation279_spill] sm:$0xff] %v7442_v60  ;;  %3113 = vperm.xlu1 %6233, %v6283_v24   ;;  %1292 = vperm.xlu0 %6235, %v7005_v55   ;;  %v6285_v29 = vld [vmem:[%s6390_s26 + $0x2f8] sm:$0xff]  ;;  %v762_v60 = vld [vmem:[%s7544_s29 + $0x240] sm:$0xff] }
 0x2d2   : > { %v7446_v30 = vpop.permute.xlu1 %2865  ;;  %v7448_v58 = vpop.permute.xlu0 %982 }
 0x2d3   : > { %11675 = vst [vmem:[#allocation280_spill] sm:$0xff] %v7446_v30  ;;  %11676 = vst [vmem:[#allocation281_spill] sm:$0xff] %v7448_v58  ;;  %3121 = vperm.xlu1 %6233, %v6284_v61   ;;  %1302 = vperm.xlu0 %6235, %v7014_v54   ;;  %v6286_v30 = vld [vmem:[%s6390_s26 + $0x308] sm:$0xff] }
 0x2d6   : > { %v7452_v32 = vpop.permute.xlu1 %2873  ;;  %v7454_v57 = vpop.permute.xlu0 %992 }
 0x2d7   : > { %11677 = vst [vmem:[#allocation282_spill] sm:$0xff] %v7452_v32  ;;  %11678 = vst [vmem:[#allocation283_spill] sm:$0xff] %v7454_v57  ;;  %3129 = vperm.xlu1 %6233, %v6285_v29   ;;  %1312 = vperm.xlu0 %6235, %v7023_v52   ;;  %v6287_v32 = vld [vmem:[%s6390_s26 + $0x318] sm:$0xff] }
 0x2da   : > { %v7458_v24 = vpop.permute.xlu1 %2881  ;;  %v7460_v55 = vpop.permute.xlu0 %1002 }
 0x2db   : > { %11679 = vst [vmem:[#allocation284_spill] sm:$0xff] %v7458_v24  ;;  %11680 = vst [vmem:[#allocation285_spill] sm:$0xff] %v7460_v55  ;;  %3137 = vperm.xlu1 %6233, %v6286_v30   ;;  %1322 = vperm.xlu0 %6235, %v7032_v51   ;;  %v6288_v24 = vld [vmem:[%s6390_s26 + $0x328] sm:$0xff]  ;;  %v11790_v55 = vld [vmem:[#allocation6_spill] sm:$0xff] }
 0x2de   : > { %v7464_v61 = vpop.permute.xlu1 %2889  ;;  %v7466_v54 = vpop.permute.xlu0 %1012 }
 0x2df   : > { %11681 = vst [vmem:[#allocation286_spill] sm:$0xff] %v7464_v61  ;;  %11682 = vst [vmem:[#allocation287_spill] sm:$0xff] %v7466_v54  ;;  %3145 = vperm.xlu1 %6233, %v6287_v32   ;;  %1332 = vperm.xlu0 %6235, %v7041_v49   ;;  %v6289_v61 = vld [vmem:[%s6390_s26 + $0x338] sm:$0xff] }
 0x2e2   : > { %v7470_v29 = vpop.permute.xlu1 %2897  ;;  %v7472_v52 = vpop.permute.xlu0 %1022 }
 0x2e3   : > { %11683 = vst [vmem:[#allocation288_spill] sm:$0xff] %v7470_v29  ;;  %11684 = vst [vmem:[#allocation289_spill] sm:$0xff] %v7472_v52  ;;  %3153 = vperm.xlu1 %6233, %v6288_v24   ;;  %1342 = vperm.xlu0 %6235, %v7050_v48   ;;  %v6290_v29 = vld [vmem:[%s6390_s26 + $0x348] sm:$0xff]  ;;  %v11789_v52 = vld [vmem:[#allocation5_spill] sm:$0xff] }
 0x2e6   : > { %v7476_v30 = vpop.permute.xlu1 %2905  ;;  %v7478_v51 = vpop.permute.xlu0 %1032 }
 0x2e7   : > { %11685 = vst [vmem:[#allocation290_spill] sm:$0xff] %v7476_v30  ;;  %11686 = vst [vmem:[#allocation291_spill] sm:$0xff] %v7478_v51  ;;  %3161 = vperm.xlu1 %6233, %v6289_v61   ;;  %1352 = vperm.xlu0 %6235, %v7059_v46   ;;  %v6291_v51 = vld [vmem:[%s6390_s26 + $0x358] sm:$0xff] }
 0x2ea   : > { %v7482_v32 = vpop.permute.xlu1 %2913  ;;  %v7484_v49 = vpop.permute.xlu0 %1042 }
 0x2eb   : > { %11687 = vst [vmem:[#allocation292_spill] sm:$0xff] %v7482_v32  ;;  %11688 = vst [vmem:[#allocation293_spill] sm:$0xff] %v7484_v49  ;;  %3169 = vperm.xlu1 %6233, %v6290_v29   ;;  %1362 = vperm.xlu0 %6235, %v7068_v45   ;;  %v6292_v32 = vld [vmem:[%s6390_s26 + $0x368] sm:$0xff]  ;;  %v11693_v49 = vld [vmem:[#allocation177_spill] sm:$0xff] }
 0x2ee   : > { %v7488_v24 = vpop.permute.xlu1 %2921  ;;  %v7490_v48 = vpop.permute.xlu0 %1052 }
 0x2ef   : > { %11689 = vst [vmem:[#allocation294_spill] sm:$0xff] %v7488_v24  ;;  %11690 = vst [vmem:[#allocation295_spill] sm:$0xff] %v7490_v48  ;;  %3177 = vperm.xlu1 %6233, %v6291_v51   ;;  %1372 = vperm.xlu0 %6235, %v7077_v37   ;;  %v6293_v24 = vld [vmem:[%s6390_s26 + $0x378] sm:$0xff]  ;;  %v11696_v48 = vld [vmem:[#allocation180_spill] sm:$0xff] }
 0x2f2   : > { %v7494_v61 = vpop.permute.xlu1 %2929  ;;  %v7496_v46 = vpop.permute.xlu0 %1062 }
 0x2f3   : > { %11691 = vst [vmem:[#allocation296_spill] sm:$0xff] %v7494_v61  ;;  %11692 = vst [vmem:[#allocation297_spill] sm:$0xff] %v7496_v46  ;;  %3185 = vperm.xlu1 %6233, %v6292_v32   ;;  %1382 = vperm.xlu0 %6235, %v11693_v49   ;;  %v6294_v61 = vld [vmem:[%s6390_s26 + $0x388] sm:$0xff]  ;;  %v11699_v46 = vld [vmem:[#allocation183_spill] sm:$0xff] }
 0x2f6   : > { %v7500_v29 = vpop.permute.xlu1 %2937  ;;  %v7502_v45 = vpop.permute.xlu0 %1072 }
 0x2f7   : > { %11694 = vst [vmem:[#allocation177_spill] sm:$0xff] %v7500_v29  ;;  %11695 = vst [vmem:[#allocation298_spill] sm:$0xff] %v7502_v45  ;;  %3193 = vperm.xlu1 %6233, %v6293_v24   ;;  %1392 = vperm.xlu0 %6235, %v11696_v48   ;;  %v6295_v29 = vld [vmem:[%s6390_s26 + $0x398] sm:$0xff] }
 0x2f8   : > { %v11702_v45 = vld [vmem:[#allocation186_spill] sm:$0xff] }
 0x2fa   : > { %v7506_v51 = vpop.permute.xlu1 %2945  ;;  %v7508_v37 = vpop.permute.xlu0 %1082 }
 0x2fb   : > { %11697 = vst [vmem:[#allocation180_spill] sm:$0xff] %v7506_v51  ;;  %11698 = vst [vmem:[#allocation299_spill] sm:$0xff] %v7508_v37  ;;  %3201 = vperm.xlu1 %6233, %v6294_v61   ;;  %1402 = vperm.xlu0 %6235, %v11699_v46   ;;  %v6296_v51 = vld [vmem:[%s6390_s26 + $0x3a8] sm:$0xff]  ;;  %v11705_v61 = vld [vmem:[#allocation189_spill] sm:$0xff] }
 0x2fc   : > { %v11708_v37 = vld [vmem:[#allocation192_spill] sm:$0xff] }
 0x2fe   : > { %v7512_v32 = vpop.permute.xlu1 %2953  ;;  %v7514_v49 = vpop.permute.xlu0 %1092 }
 0x2ff   : > { %11700 = vst [vmem:[#allocation183_spill] sm:$0xff] %v7512_v32  ;;  %11701 = vst [vmem:[#allocation300_spill] sm:$0xff] %v7514_v49  ;;  %3209 = vperm.xlu1 %6233, %v6295_v29   ;;  %1412 = vperm.xlu0 %6235, %v11702_v45   ;;  %v6297_v49 = vld [vmem:[%s6390_s26 + $0x3b8] sm:$0xff] }
 0x302   : > { %v7518_v24 = vpop.permute.xlu1 %2961  ;;  %v7520_v48 = vpop.permute.xlu0 %1102 }
 0x303   : > { %11703 = vst [vmem:[#allocation186_spill] sm:$0xff] %v7518_v24  ;;  %11704 = vst [vmem:[#allocation301_spill] sm:$0xff] %v7520_v48  ;;  %3217 = vperm.xlu1 %6233, %v6296_v51   ;;  %1422 = vperm.xlu0 %6235, %v11705_v61   ;;  %v6298_v24 = vld [vmem:[%s6390_s26 + $0x3c8] sm:$0xff]  ;;  %v11720_v48 = vmov 0  }
 0x306   : > { %v7524_v46 = vpop.permute.xlu1 %2969  ;;  %v7526_v32 = vpop.permute.xlu0 %1112 }
 0x307   : > { %11706 = vst [vmem:[#allocation189_spill] sm:$0xff] %v7524_v46  ;;  %11707 = vst [vmem:[#allocation302_spill] sm:$0xff] %v7526_v32  ;;  %3225 = vperm.xlu1 %6233, %v6297_v49   ;;  %1432 = vperm.xlu0 %6235, %v11708_v37   ;;  %v6299_v37 = vld [vmem:[%s6390_s26 + $0x3d8] sm:$0xff]  ;;  %v11713_v49 = vld [vmem:[#allocation197_spill] sm:$0xff] }
 0x308   : > { %v6301_v32 = vld [vmem:[%s6390_s26 + $0x3f8] sm:$0xff] }
 0x30a   : > { %v7530_v29 = vpop.permute.xlu1 %2977  ;;  %v7532_v45 = vpop.permute.xlu0 %1122 }
 0x30b   : > { %11709 = vst [vmem:[#allocation192_spill] sm:$0xff] %v7530_v29  ;;  %11710 = vst [vmem:[#allocation303_spill] sm:$0xff] %v7532_v45  ;;  %3233 = vperm.xlu1 %6233, %v6298_v24   ;;  %1442 = vperm.xlu0 %6235, %v7140_v42   ;;  %v690_v24 = vld [vmem:[%s7544_s29] sm:$0xff] }
 0x30e   : > { %v7536_v51 = vpop.permute.xlu1 %2985  ;;  %v7538_v61 = vpop.permute.xlu0 %1132 }
 0x30f   : > { %11711 = vst [vmem:[#allocation304_spill] sm:$0xff] %v7536_v51  ;;  %11712 = vst [vmem:[#allocation305_spill] sm:$0xff] %v7538_v61  ;;  %3241 = vperm.xlu1 %6233, %v6299_v37   ;;  %1452 = vperm.xlu0 %6235, %v11713_v49   ;;  %v6300_v51 = vld [vmem:[%s6390_s26 + $0x3e8] sm:$0xff]  ;;  %v693_v61 = vld [vmem:[%s7544_s29 + $0x18] sm:$0xff] }
 0x310   : > { %v695_v37 = vld [vmem:[%s7544_s29 + $0x28] sm:$0xff] }
 0x311   : > { %v691_v49 = vld [vmem:[%s7544_s29 + $0x8] sm:$0xff] }
 0x312   : > { %v7549_v42 = vpop.permute.xlu1 %2993  ;;  %v7551_v45 = vpop.permute.xlu0 %1142 }
 0x313   : > { %11714 = vst [vmem:[#allocation197_spill] sm:$0xff] %v7549_v42  ;;  %11715 = vst [vmem:[#allocation306_spill] sm:$0xff] %v7551_v45  ;;  %3249 = vperm.xlu1 %6233, %v6300_v51   ;;  %3651 = vperm.xlu0 %6235, %v690_v24   ;;  %v697_v51 = vld [vmem:[%s7544_s29 + $0x38] sm:$0xff]  ;;  %v692_v24 = vld [vmem:[%s7544_s29 + $0x10] sm:$0xff] }
 0x316   : > { %v7555_v29 = vpop.permute.xlu1 %3001  ;;  %v7557_v46 = vpop.permute.xlu0 %1152 }
 0x317   : > { %11716 = vst [vmem:[#allocation307_spill] sm:$0xff] %v7555_v29  ;;  %11717 = vst [vmem:[#allocation308_spill] sm:$0xff] %v7557_v46  ;;  %3257 = vperm.xlu1 %6233, %v6301_v32   ;;  %3660 = vperm.xlu0 %6235, %v693_v61   ;;  %v699_v61 = vld [vmem:[%s7544_s29 + $0x48] sm:$0xff] }
 0x31a   : > { %v7562_v42 = vpop.permute.xlu1 %3009  ;;  %v7564_v45 = vpop.permute.xlu0 %1162 }
 0x31b   : > { %11718 = vst [vmem:[#allocation309_spill] sm:$0xff] %v7562_v42  ;;  %11719 = vst [vmem:[#allocation310_spill] sm:$0xff] %v7564_v45  ;;  %6236 = vset.pattern.permute.xlu1 %v11720_v48  ;;  %3666 = vperm.xlu0 %6235, %v695_v37   ;;  %v694_v42 = vld [vmem:[%s7544_s29 + $0x20] sm:$0xff]  ;;  %v701_v48 = vld [vmem:[%s7544_s29 + $0x58] sm:$0xff] }
 0x31c   : > { %3654 = vperm.xlu1 %6236, %v691_v49   ;;  %v696_v37 = vld [vmem:[%s7544_s29 + $0x30] sm:$0xff] }
 0x31e   : > { %v7569_v46 = vpop.permute.xlu1 %3017  ;;  %v7571_v32 = vpop.permute.xlu0 %1172 }
 0x31f   : > { %11721 = vst [vmem:[#allocation311_spill] sm:$0xff] %v7569_v46  ;;  %11722 = vst [vmem:[#allocation312_spill] sm:$0xff] %v7571_v32  ;;  %3672 = vperm.xlu0 %6235, %v697_v51   ;;  %v703_v51 = vld [vmem:[%s7544_s29 + $0x68] sm:$0xff] }
 0x320   : > { %3657 = vperm.xlu1 %6236, %v692_v24   ;;  %v698_v24 = vld [vmem:[%s7544_s29 + $0x40] sm:$0xff] }
 0x322   : > { %v7575_v29 = vpop.permute.xlu1 %3025  ;;  %v7577_v45 = vpop.permute.xlu0 %1182 }
 0x323   : > { %11723 = vst [vmem:[#allocation313_spill] sm:$0xff] %v7575_v29  ;;  %11724 = vst [vmem:[#allocation314_spill] sm:$0xff] %v7577_v45  ;;  %3678 = vperm.xlu0 %6235, %v699_v61   ;;  %v700_v61 = vld [vmem:[%s7544_s29 + $0x50] sm:$0xff] }
 0x324   : > { %3663 = vperm.xlu1 %6236, %v694_v42   ;;  %v705_v42 = vld [vmem:[%s7544_s29 + $0x78] sm:$0xff] }
 0x326   : > { %v7581_v49 = vpop.permute.xlu1 %3033  ;;  %v7583_v46 = vpop.permute.xlu0 %1192 }
 0x327   : > { %11725 = vst [vmem:[#allocation315_spill] sm:$0xff] %v7581_v49  ;;  %11726 = vst [vmem:[#allocation316_spill] sm:$0xff] %v7583_v46  ;;  %3684 = vperm.xlu0 %6235, %v701_v48   ;;  %v707_v48 = vld [vmem:[%s7544_s29 + $0x88] sm:$0xff] }
 0x328   : > { %3669 = vperm.xlu1 %6236, %v696_v37   ;;  %v702_v37 = vld [vmem:[%s7544_s29 + $0x60] sm:$0xff] }
 0x32a   : > { %v7587_v32 = vpop.permute.xlu1 %3041  ;;  %v7589_v29 = vpop.permute.xlu0 %1202 }
 0x32b   : > { %11727 = vst [vmem:[#allocation317_spill] sm:$0xff] %v7587_v32  ;;  %11728 = vst [vmem:[#allocation318_spill] sm:$0xff] %v7589_v29  ;;  %3690 = vperm.xlu0 %6235, %v703_v51   ;;  %v709_v51 = vld [vmem:[%s7544_s29 + $0x98] sm:$0xff] }
 0x32c   : > { %3675 = vperm.xlu1 %6236, %v698_v24   ;;  %v704_v24 = vld [vmem:[%s7544_s29 + $0x70] sm:$0xff] }
 0x32e   : > { %v7593_v45 = vpop.permute.xlu1 %3049  ;;  %v7595_v49 = vpop.permute.xlu0 %1212 }
 0x32f   : > { %11729 = vst [vmem:[#allocation319_spill] sm:$0xff] %v7593_v45  ;;  %11730 = vst [vmem:[#allocation320_spill] sm:$0xff] %v7595_v49  ;;  %3696 = vperm.xlu0 %6235, %v705_v42   ;;  %v711_v42 = vld [vmem:[%s7544_s29 + $0xa8] sm:$0xff] }
 0x330   : > { %3681 = vperm.xlu1 %6236, %v700_v61   ;;  %v706_v61 = vld [vmem:[%s7544_s29 + $0x80] sm:$0xff] }
 0x332   : > { %v7599_v46 = vpop.permute.xlu1 %3057  ;;  %v7601_v32 = vpop.permute.xlu0 %1222 }
 0x333   : > { %11731 = vst [vmem:[#allocation321_spill] sm:$0xff] %v7599_v46  ;;  %11732 = vst [vmem:[#allocation322_spill] sm:$0xff] %v7601_v32  ;;  %3702 = vperm.xlu0 %6235, %v707_v48   ;;  %v713_v48 = vld [vmem:[%s7544_s29 + $0xb8] sm:$0xff] }
 0x334   : > { %3687 = vperm.xlu1 %6236, %v702_v37   ;;  %v708_v37 = vld [vmem:[%s7544_s29 + $0x90] sm:$0xff] }
 0x336   : > { %v7605_v29 = vpop.permute.xlu1 %3065  ;;  %v7607_v45 = vpop.permute.xlu0 %1232 }
 0x337   : > { %11733 = vst [vmem:[#allocation323_spill] sm:$0xff] %v7605_v29  ;;  %11734 = vst [vmem:[#allocation324_spill] sm:$0xff] %v7607_v45  ;;  %3708 = vperm.xlu0 %6235, %v709_v51   ;;  %v715_v51 = vld [vmem:[%s7544_s29 + $0xc8] sm:$0xff] }
 0x338   : > { %3693 = vperm.xlu1 %6236, %v704_v24   ;;  %v710_v24 = vld [vmem:[%s7544_s29 + $0xa0] sm:$0xff] }
 0x33a   : > { %v7611_v49 = vpop.permute.xlu1 %3073  ;;  %v7613_v46 = vpop.permute.xlu0 %1242 }
 0x33b   : > { %11735 = vst [vmem:[#allocation325_spill] sm:$0xff] %v7611_v49  ;;  %11736 = vst [vmem:[#allocation326_spill] sm:$0xff] %v7613_v46  ;;  %3714 = vperm.xlu0 %6235, %v711_v42   ;;  %v717_v42 = vld [vmem:[%s7544_s29 + $0xd8] sm:$0xff] }
 0x33c   : > { %3699 = vperm.xlu1 %6236, %v706_v61   ;;  %v712_v61 = vld [vmem:[%s7544_s29 + $0xb0] sm:$0xff] }
 0x33e   : > { %v7617_v32 = vpop.permute.xlu1 %3081  ;;  %v7619_v29 = vpop.permute.xlu0 %1252 }
 0x33f   : > { %11737 = vst [vmem:[#allocation327_spill] sm:$0xff] %v7617_v32  ;;  %11738 = vst [vmem:[#allocation328_spill] sm:$0xff] %v7619_v29  ;;  %3720 = vperm.xlu0 %6235, %v713_v48   ;;  %v719_v48 = vld [vmem:[%s7544_s29 + $0xe8] sm:$0xff] }
 0x340   : > { %3705 = vperm.xlu1 %6236, %v708_v37   ;;  %v714_v37 = vld [vmem:[%s7544_s29 + $0xc0] sm:$0xff] }
 0x342   : > { %v7623_v45 = vpop.permute.xlu1 %3089  ;;  %v7625_v49 = vpop.permute.xlu0 %1262 }
 0x343   : > { %11739 = vst [vmem:[#allocation329_spill] sm:$0xff] %v7623_v45  ;;  %11740 = vst [vmem:[#allocation330_spill] sm:$0xff] %v7625_v49  ;;  %3726 = vperm.xlu0 %6235, %v715_v51   ;;  %v721_v51 = vld [vmem:[%s7544_s29 + $0xf8] sm:$0xff] }
 0x344   : > { %3711 = vperm.xlu1 %6236, %v710_v24   ;;  %v716_v24 = vld [vmem:[%s7544_s29 + $0xd0] sm:$0xff] }
 0x346   : > { %v7629_v46 = vpop.permute.xlu1 %3097  ;;  %v7631_v32 = vpop.permute.xlu0 %1272 }
 0x347   : > { %11741 = vst [vmem:[#allocation331_spill] sm:$0xff] %v7629_v46  ;;  %11742 = vst [vmem:[#allocation332_spill] sm:$0xff] %v7631_v32  ;;  %3732 = vperm.xlu0 %6235, %v717_v42   ;;  %v723_v42 = vld [vmem:[%s7544_s29 + $0x108] sm:$0xff] }
 0x348   : > { %3717 = vperm.xlu1 %6236, %v712_v61   ;;  %v718_v61 = vld [vmem:[%s7544_s29 + $0xe0] sm:$0xff] }
 0x34a   : > { %v7635_v29 = vpop.permute.xlu1 %3105  ;;  %v7637_v45 = vpop.permute.xlu0 %1282 }
 0x34b   : > { %11743 = vst [vmem:[#allocation333_spill] sm:$0xff] %v7635_v29  ;;  %11744 = vst [vmem:[#allocation334_spill] sm:$0xff] %v7637_v45  ;;  %3738 = vperm.xlu0 %6235, %v719_v48   ;;  %v725_v48 = vld [vmem:[%s7544_s29 + $0x118] sm:$0xff] }
 0x34c   : > { %3723 = vperm.xlu1 %6236, %v714_v37   ;;  %v720_v37 = vld [vmem:[%s7544_s29 + $0xf0] sm:$0xff] }
 0x34e   : > { %v7641_v49 = vpop.permute.xlu1 %3113  ;;  %v7643_v46 = vpop.permute.xlu0 %1292 }
 0x34f   : > { %11745 = vst [vmem:[#allocation335_spill] sm:$0xff] %v7641_v49  ;;  %11746 = vst [vmem:[#allocation336_spill] sm:$0xff] %v7643_v46  ;;  %3744 = vperm.xlu0 %6235, %v721_v51   ;;  %v727_v51 = vld [vmem:[%s7544_s29 + $0x128] sm:$0xff] }
 0x350   : > { %3729 = vperm.xlu1 %6236, %v716_v24   ;;  %v722_v24 = vld [vmem:[%s7544_s29 + $0x100] sm:$0xff] }
 0x352   : > { %v7647_v32 = vpop.permute.xlu1 %3121  ;;  %v7649_v29 = vpop.permute.xlu0 %1302 }
 0x353   : > { %11747 = vst [vmem:[#allocation337_spill] sm:$0xff] %v7647_v32  ;;  %11748 = vst [vmem:[#allocation338_spill] sm:$0xff] %v7649_v29  ;;  %3750 = vperm.xlu0 %6235, %v723_v42   ;;  %v729_v42 = vld [vmem:[%s7544_s29 + $0x138] sm:$0xff] }
 0x354   : > { %3735 = vperm.xlu1 %6236, %v718_v61   ;;  %v724_v61 = vld [vmem:[%s7544_s29 + $0x110] sm:$0xff] }
 0x356   : > { %v7653_v45 = vpop.permute.xlu1 %3129  ;;  %v7655_v49 = vpop.permute.xlu0 %1312 }
 0x357   : > { %11749 = vst [vmem:[#allocation339_spill] sm:$0xff] %v7653_v45  ;;  %11750 = vst [vmem:[#allocation340_spill] sm:$0xff] %v7655_v49  ;;  %3756 = vperm.xlu0 %6235, %v725_v48   ;;  %v731_v48 = vld [vmem:[%s7544_s29 + $0x148] sm:$0xff] }
 0x358   : > { %3741 = vperm.xlu1 %6236, %v720_v37   ;;  %v726_v37 = vld [vmem:[%s7544_s29 + $0x120] sm:$0xff] }
 0x35a   : > { %v7659_v46 = vpop.permute.xlu1 %3137  ;;  %v7661_v32 = vpop.permute.xlu0 %1322 }
 0x35b   : > { %11751 = vst [vmem:[#allocation341_spill] sm:$0xff] %v7659_v46  ;;  %11752 = vst [vmem:[#allocation342_spill] sm:$0xff] %v7661_v32  ;;  %3762 = vperm.xlu0 %6235, %v727_v51   ;;  %v733_v51 = vld [vmem:[%s7544_s29 + $0x158] sm:$0xff] }
 0x35c   : > { %3747 = vperm.xlu1 %6236, %v722_v24   ;;  %v728_v24 = vld [vmem:[%s7544_s29 + $0x130] sm:$0xff] }
 0x35e   : > { %v7665_v29 = vpop.permute.xlu1 %3145  ;;  %v7667_v45 = vpop.permute.xlu0 %1332 }
 0x35f   : > { %11753 = vst [vmem:[#allocation343_spill] sm:$0xff] %v7665_v29  ;;  %11754 = vst [vmem:[#allocation344_spill] sm:$0xff] %v7667_v45  ;;  %3768 = vperm.xlu0 %6235, %v729_v42   ;;  %v735_v42 = vld [vmem:[%s7544_s29 + $0x168] sm:$0xff] }
 0x360   : > { %3753 = vperm.xlu1 %6236, %v724_v61   ;;  %v730_v61 = vld [vmem:[%s7544_s29 + $0x140] sm:$0xff] }
 0x362   : > { %v7671_v49 = vpop.permute.xlu1 %3153  ;;  %v7673_v46 = vpop.permute.xlu0 %1342 }
 0x363   : > { %11755 = vst [vmem:[#allocation345_spill] sm:$0xff] %v7671_v49  ;;  %11756 = vst [vmem:[#allocation346_spill] sm:$0xff] %v7673_v46  ;;  %3774 = vperm.xlu0 %6235, %v731_v48   ;;  %v737_v48 = vld [vmem:[%s7544_s29 + $0x178] sm:$0xff] }
 0x364   : > { %3759 = vperm.xlu1 %6236, %v726_v37   ;;  %v732_v37 = vld [vmem:[%s7544_s29 + $0x150] sm:$0xff] }
 0x366   : > { %v7677_v32 = vpop.permute.xlu1 %3161  ;;  %v7679_v29 = vpop.permute.xlu0 %1352 }
 0x367   : > { %11757 = vst [vmem:[#allocation347_spill] sm:$0xff] %v7677_v32  ;;  %11758 = vst [vmem:[#allocation348_spill] sm:$0xff] %v7679_v29  ;;  %3780 = vperm.xlu0 %6235, %v733_v51   ;;  %v739_v51 = vld [vmem:[%s7544_s29 + $0x188] sm:$0xff] }
 0x368   : > { %3765 = vperm.xlu1 %6236, %v728_v24   ;;  %v734_v24 = vld [vmem:[%s7544_s29 + $0x160] sm:$0xff] }
 0x36a   : > { %v7683_v45 = vpop.permute.xlu1 %3169  ;;  %v7685_v49 = vpop.permute.xlu0 %1362 }
 0x36b   : > { %11759 = vst [vmem:[#allocation349_spill] sm:$0xff] %v7683_v45  ;;  %11760 = vst [vmem:[#allocation350_spill] sm:$0xff] %v7685_v49  ;;  %3786 = vperm.xlu0 %6235, %v735_v42   ;;  %v741_v42 = vld [vmem:[%s7544_s29 + $0x198] sm:$0xff] }
 0x36c   : > { %3771 = vperm.xlu1 %6236, %v730_v61   ;;  %v736_v61 = vld [vmem:[%s7544_s29 + $0x170] sm:$0xff] }
 0x36e   : > { %v7689_v46 = vpop.permute.xlu1 %3177  ;;  %v7691_v32 = vpop.permute.xlu0 %1372 }
 0x36f   : > { %11761 = vst [vmem:[#allocation351_spill] sm:$0xff] %v7689_v46  ;;  %11762 = vst [vmem:[#allocation352_spill] sm:$0xff] %v7691_v32  ;;  %3792 = vperm.xlu0 %6235, %v737_v48   ;;  %v743_v48 = vld [vmem:[%s7544_s29 + $0x1a8] sm:$0xff] }
 0x370   : > { %3777 = vperm.xlu1 %6236, %v732_v37   ;;  %v738_v37 = vld [vmem:[%s7544_s29 + $0x180] sm:$0xff] }
 0x372   : > { %v7695_v29 = vpop.permute.xlu1 %3185  ;;  %v7697_v45 = vpop.permute.xlu0 %1382 }
 0x373   : > { %11763 = vst [vmem:[#allocation353_spill] sm:$0xff] %v7695_v29  ;;  %11764 = vst [vmem:[#allocation354_spill] sm:$0xff] %v7697_v45  ;;  %3798 = vperm.xlu0 %6235, %v739_v51   ;;  %v745_v51 = vld [vmem:[%s7544_s29 + $0x1b8] sm:$0xff] }
 0x374   : > { %3783 = vperm.xlu1 %6236, %v734_v24   ;;  %v740_v24 = vld [vmem:[%s7544_s29 + $0x190] sm:$0xff] }
 0x376   : > { %v7701_v49 = vpop.permute.xlu1 %3193  ;;  %v7703_v46 = vpop.permute.xlu0 %1392 }
 0x377   : > { %11765 = vst [vmem:[#allocation355_spill] sm:$0xff] %v7701_v49  ;;  %11766 = vst [vmem:[#allocation356_spill] sm:$0xff] %v7703_v46  ;;  %3804 = vperm.xlu0 %6235, %v741_v42   ;;  %v747_v42 = vld [vmem:[%s7544_s29 + $0x1c8] sm:$0xff] }
 0x378   : > { %3789 = vperm.xlu1 %6236, %v736_v61   ;;  %v742_v61 = vld [vmem:[%s7544_s29 + $0x1a0] sm:$0xff] }
 0x37a   : > { %v7707_v32 = vpop.permute.xlu1 %3201  ;;  %v7709_v29 = vpop.permute.xlu0 %1402 }
 0x37b   : > { %11767 = vst [vmem:[#allocation357_spill] sm:$0xff] %v7707_v32  ;;  %11768 = vst [vmem:[#allocation358_spill] sm:$0xff] %v7709_v29  ;;  %3810 = vperm.xlu0 %6235, %v743_v48   ;;  %v749_v48 = vld [vmem:[%s7544_s29 + $0x1d8] sm:$0xff] }
 0x37c   : > { %3795 = vperm.xlu1 %6236, %v738_v37   ;;  %v744_v37 = vld [vmem:[%s7544_s29 + $0x1b0] sm:$0xff] }
 0x37e   : > { %v7713_v45 = vpop.permute.xlu1 %3209  ;;  %v7715_v49 = vpop.permute.xlu0 %1412 }
 0x37f   : > { %11769 = vst [vmem:[#allocation359_spill] sm:$0xff] %v7713_v45  ;;  %11770 = vst [vmem:[#allocation360_spill] sm:$0xff] %v7715_v49  ;;  %3816 = vperm.xlu0 %6235, %v745_v51   ;;  %v751_v51 = vld [vmem:[%s7544_s29 + $0x1e8] sm:$0xff] }
 0x380   : > { %3801 = vperm.xlu1 %6236, %v740_v24   ;;  %v746_v24 = vld [vmem:[%s7544_s29 + $0x1c0] sm:$0xff] }
 0x382   : > { %v7719_v46 = vpop.permute.xlu1 %3217  ;;  %v7721_v32 = vpop.permute.xlu0 %1422 }
 0x383   : > { %11771 = vst [vmem:[#allocation361_spill] sm:$0xff] %v7719_v46  ;;  %11772 = vst [vmem:[#allocation362_spill] sm:$0xff] %v7721_v32  ;;  %3822 = vperm.xlu0 %6235, %v747_v42   ;;  %v753_v42 = vld [vmem:[%s7544_s29 + $0x1f8] sm:$0xff] }
 0x384   : > { %3807 = vperm.xlu1 %6236, %v742_v61   ;;  %v748_v61 = vld [vmem:[%s7544_s29 + $0x1d0] sm:$0xff] }
 0x386   : > { %v7725_v29 = vpop.permute.xlu1 %3225  ;;  %v7727_v45 = vpop.permute.xlu0 %1432 }
 0x387   : > { %11773 = vst [vmem:[#allocation363_spill] sm:$0xff] %v7725_v29  ;;  %11774 = vst [vmem:[#allocation364_spill] sm:$0xff] %v7727_v45  ;;  %3828 = vperm.xlu0 %6235, %v749_v48   ;;  %v755_v48 = vld [vmem:[%s7544_s29 + $0x208] sm:$0xff] }
 0x388   : > { %3813 = vperm.xlu1 %6236, %v744_v37   ;;  %v750_v37 = vld [vmem:[%s7544_s29 + $0x1e0] sm:$0xff] }
 0x38a   : > { %v7731_v49 = vpop.permute.xlu1 %3233  ;;  %v7733_v46 = vpop.permute.xlu0 %1442 }
 0x38b   : > { %11775 = vst [vmem:[#allocation365_spill] sm:$0xff] %v7731_v49  ;;  %11776 = vst [vmem:[#allocation366_spill] sm:$0xff] %v7733_v46  ;;  %3834 = vperm.xlu0 %6235, %v751_v51   ;;  %v757_v51 = vld [vmem:[%s7544_s29 + $0x218] sm:$0xff] }
 0x38c   : > { %3819 = vperm.xlu1 %6236, %v746_v24   ;;  %v752_v24 = vld [vmem:[%s7544_s29 + $0x1f0] sm:$0xff] }
 0x38e   : > { %v7737_v32 = vpop.permute.xlu1 %3241  ;;  %v7739_v29 = vpop.permute.xlu0 %1452 }
 0x38f   : > { %11777 = vst [vmem:[#allocation367_spill] sm:$0xff] %v7737_v32  ;;  %11778 = vst [vmem:[#allocation368_spill] sm:$0xff] %v7739_v29  ;;  %3840 = vperm.xlu0 %6235, %v753_v42   ;;  %v11203_v42 = vlaneseq  ;;  %v754_v29 = vld [vmem:[%s7544_s29 + $0x200] sm:$0xff] }
 0x390   : > { %3825 = vperm.xlu1 %6236, %v748_v61   ;;  %v759_v61 = vld [vmem:[%s7544_s29 + $0x228] sm:$0xff] }
 0x392   : > { %v7743_v45 = vpop.permute.xlu1 %3249  ;;  %v7745_v49 = vpop.permute.xlu0 %3651 }
 0x393   : > { %11779 = vst [vmem:[#allocation369_spill] sm:$0xff] %v7743_v45  ;;  %11780 = vst [vmem:[#allocation370_spill] sm:$0xff] %v7745_v49  ;;  %3846 = vperm.xlu0 %6235, %v755_v48   ;;  %v7760_v48 = vshrl.u32 %v11203_v42, 7 }
 0x394   : > { %3831 = vperm.xlu1 %6236, %v750_v37   ;;  %v761_v37 = vld [vmem:[%s7544_s29 + $0x238] sm:$0xff] }
 0x396   : > { %v7749_v46 = vpop.permute.xlu1 %3257  ;;  %v7751_v32 = vpop.permute.xlu0 %3660 }
 0x397   : > { %11781 = vst [vmem:[#allocation371_spill] sm:$0xff] %v7749_v46  ;;  %11782 = vst [vmem:[#allocation372_spill] sm:$0xff] %v7751_v32  ;;  %3852 = vperm.xlu0 %6235, %v757_v51   ;;  %v756_v46 = vld [vmem:[%s7544_s29 + $0x210] sm:$0xff]  ;;  %v2362_v51 = vsub.s32 1, %v7760_v48 }
 0x398   : > { %3837 = vperm.xlu1 %6236, %v752_v24  }
 0x39a   : > { %v7755_v45 = vpop.permute.xlu0 %3666 }
 0x39b   : > { %11783 = vst [vmem:[#allocation373_spill] sm:$0xff] %v7755_v45  ;;  %v7757_v49 = vpop.permute.xlu1 %3654  ;;  %3858 = vperm.xlu0 %6235, %v759_v61   ;;  %v1462_v45 = vsub.s32 0, %v7760_v48  ;;  %v758_v61 = vld [vmem:[%s7544_s29 + $0x220] sm:$0xff] }
 0x39c   : > { %11784 = vst [vmem:[#allocation374_spill] sm:$0xff] %v7757_v49  ;;  %3843 = vperm.xlu1 %6236, %v754_v29   ;;  %v763_v49 = vld [vmem:[%s7544_s29 + $0x248] sm:$0xff]  ;;  %v7775_v29 = vld [vmem:[%s11186_s3] sm:$0x7] }
 0x39d   : > { %v7778_v42 = vrot.slane %v7775_v29, %v2362_v51 }
 0x39e   : > { %v7765_v24 = vpop.permute.xlu0 %3672 }
 0x39f   : > { %11785 = vst [vmem:[#allocation375_spill] sm:$0xff] %v7765_v24  ;;  %v7767_v32 = vpop.permute.xlu1 %3657  ;;  %3864 = vperm.xlu0 %6235, %v761_v37   ;;  %v765_v37 = vld [vmem:[%s7544_s29 + $0x258] sm:$0xff]  ;;  %v2367_v51 = vsub.f32 %v11790_v55, %v7778_v42  ;;  %v11796_v55 = vld [vmem:[#allocation4_spill] sm:$0xff] }
 0x3a0   : > { %11786 = vst [vmem:[#allocation376_spill] sm:$0xff] %v7767_v32  ;;  %3849 = vperm.xlu1 %6236, %v756_v46   ;;  %v7785_v46 = vrot.slane %v7775_v29, %v1462_v45  ;;  %v760_v32 = vld [vmem:[%s7544_s29 + $0x230] sm:$0xff]  ;;  %v767_v45 = vld [vmem:[%s7544_s29 + $0x268] sm:$0xff] }
 0x3a2   : > { %v7780_v30 = vpop.permute.xlu0 %3678  ;;  %v1467_v54 = vsub.f32 %v11789_v52, %v7785_v46  ;;  %v1466_v52 = vsub.f32 %v11795_v23, %v7785_v46  ;;  %v2371_v23 = vsub.f32 %v11800_v6, %v7778_v42  ;;  %v1473_v9 = vsub.f32 %v11801_v8, %v7785_v46 }
 0x3a3   : > { %11787 = vst [vmem:[#allocation377_spill] sm:$0xff] %v7780_v30  ;;  %v7782_v24 = vpop.permute.xlu1 %3663  ;;  %3870 = vperm.xlu0 %6235, %v763_v49   ;;  %v11793_v30 = vld [vmem:[#allocation7_spill] sm:$0xff]  ;;  %v11794_v49 = vld [vmem:[#allocation8_spill] sm:$0xff] }
 0x3a4   : > { %11788 = vst [vmem:[#allocation378_spill] sm:$0xff] %v7782_v24  ;;  %3855 = vperm.xlu1 %6236, %v758_v61   ;;  %v1469_v24 = vsub.f32 %v11793_v30, %v7785_v46  ;;  %v2369_v61 = vsub.f32 %v11794_v49, %v7778_v42  ;;  %v1595_v63 = vmul.f32 %v1467_v54, %v1467_v54  ;;  %v11802_v54 = vld [vmem:[#allocation12_spill] sm:$0xff] }
 0x3a5   : > { %v2499_v12 = vmul.f32 %v2371_v23, %v2371_v23  ;;  %v1601_v14 = vmul.f32 %v1473_v9, %v1473_v9  ;;  %v11814_v9 = vld [vmem:[#allocation19_spill] sm:$0xff]  ;;  %v11816_v23 = vld [vmem:[#allocation21_spill] sm:$0xff] }
 0x3a6   : > { %v7793_v57 = vpop.permute.xlu0 %3684  ;;  %v1597_v5 = vmul.f32 %v1469_v24, %v1469_v24  ;;  %v2497_v49 = vmul.f32 %v2369_v61, %v2369_v61  ;;  %v764_v24 = vld [vmem:[%s7544_s29 + $0x250] sm:$0xff]  ;;  %v11804_v61 = vld [vmem:[#allocation14_spill] sm:$0xff] }
 0x3a7   : > { %11791 = vst [vmem:[#allocation5_spill] sm:$0xff] %v7793_v57  ;;  %v7795_v58 = vpop.permute.xlu1 %3669  ;;  %3876 = vperm.xlu0 %6235, %v765_v37   ;;  %v2364_v57 = vsub.f32 %v11796_v55, %v7778_v42  ;;  %v11803_v55 = vld [vmem:[#allocation13_spill] sm:$0xff] }
 0x3a8   : > { %11792 = vst [vmem:[#allocation6_spill] sm:$0xff] %v7795_v58  ;;  %3861 = vperm.xlu1 %6236, %v760_v32   ;;  %v2495_v58 = vmul.f32 %v2367_v51, %v2367_v51  ;;  %v11799_v32 = vld [vmem:[#allocation9_spill] sm:$0xff]  ;;  %v2373_v51 = vsub.f32 %v11802_v54, %v7778_v42  ;;  %v7835_v54 = vadd.f32 %v2497_v49, %v1597_v5  ;;  %v11815_v49 = vld [vmem:[#allocation20_spill] sm:$0xff] }
 0x3a9   : > { %v1471_v37 = vsub.f32 %v11799_v32, %v7785_v46  ;;  %v7827_v32 = vmul.f32 %v2364_v57, %v2364_v57  ;;  %v11810_v57 = vld [vmem:[#allocation15_spill] sm:$0xff] }
 0x3aa   : > { %v7807_v3 = vpop.permute.xlu0 %3690  ;;  %v7833_v11 = vadd.f32 %v2495_v58, %v1595_v63  ;;  %11809 = vst [vmem:[#allocation11_spill] sm:$0xff] %v7835_v54  ;;  %v2501_v15 = vmul.f32 %v2373_v51, %v2373_v51  ;;  %v11812_v63 = vld [vmem:[#allocation17_spill] sm:$0xff]  ;;  %v11813_v58 = vld [vmem:[#allocation18_spill] sm:$0xff]  ;;  %v1483_v51 = vsub.f32 %v11816_v23, %v7785_v46  ;;  %v11821_v54 = vld [vmem:[#allocation24_spill] sm:$0xff] }
 0x3ab   : > { %11797 = vst [vmem:[#allocation7_spill] sm:$0xff] %v7807_v3  ;;  %v7809_v30 = vpop.permute.xlu1 %3675  ;;  %3882 = vperm.xlu0 %6235, %v767_v45   ;;  %v1475_v3 = vsub.f32 %v11803_v55, %v7785_v46  ;;  %v2375_v45 = vsub.f32 %v11804_v61, %v7778_v42  ;;  %11805 = vst [vmem:[#allocation3_spill] sm:$0xff] %v7827_v32  ;;  %v1599_v55 = vmul.f32 %v1471_v37, %v1471_v37  ;;  %v771_v61 = vld [vmem:[%s7544_s29 + $0x288] sm:$0xff]  ;;  %v11824_v23 = vld [vmem:[#allocation25_spill] sm:$0xff] }
 0x3ac   : > { %11798 = vst [vmem:[#allocation8_spill] sm:$0xff] %v7809_v30  ;;  %3867 = vperm.xlu1 %6236, %v762_v60   ;;  %v769_v30 = vld [vmem:[%s7544_s29 + $0x278] sm:$0xff]  ;;  %v7825_v60 = vmul.f32 %v1466_v52, %v1466_v52  ;;  %11808 = vst [vmem:[#allocation10_spill] sm:$0xff] %v7833_v11  ;;  %v766_v52 = vld [vmem:[%s7544_s29 + $0x260] sm:$0xff]  ;;  %v1477_v32 = vsub.f32 %v11810_v57, %v7785_v46  ;;  %v1479_v5 = vsub.f32 %v11812_v63, %v7785_v46 }
 0x3ad   : > { %v1603_v17 = vmul.f32 %v1475_v3, %v1475_v3  ;;  %v2503_v26 = vmul.f32 %v2375_v45, %v2375_v45  ;;  %v1481_v3 = vsub.f32 %v11814_v9, %v7785_v46  ;;  %v2381_v37 = vsub.f32 %v11815_v49, %v7778_v42  ;;  %v11820_v63 = vld [vmem:[#allocation23_spill] sm:$0xff] }
 0x3ae   : > { %v7829_v6 = vpop.permute.xlu0 %3696  ;;  %v2385_v11 = vsub.f32 %v11821_v54, %v7778_v42  ;;  %v7863_v9 = vadd.f32 %v2499_v12, %v1599_v55  ;;  %v7865_v49 = vadd.f32 %v2501_v15, %v1601_v14  ;;  %v1607_v20 = vmul.f32 %v1479_v5, %v1479_v5  ;;  %v11830_v5 = vld [vmem:[#allocation28_spill] sm:$0xff] }
 0x3af   : > { %11806 = vst [vmem:[#allocation4_spill] sm:$0xff] %v7829_v6  ;;  %v7831_v8 = vpop.permute.xlu1 %3681  ;;  %3888 = vperm.xlu0 %6235, %v769_v30   ;;  %v11811_v6 = vld [vmem:[#allocation16_spill] sm:$0xff]  ;;  %v2379_v30 = vsub.f32 %v11813_v58, %v7778_v42  ;;  %v1485_v58 = vsub.f32 %v11820_v63, %v7785_v46  ;;  %v7873_v27 = vadd.f32 %v2503_v26, %v1603_v17 }
 0x3b0   : > { %11807 = vst [vmem:[#allocation9_spill] sm:$0xff] %v7831_v8  ;;  %3873 = vperm.xlu1 %6236, %v764_v24   ;;  %v2377_v8 = vsub.f32 %v11811_v6, %v7778_v42  ;;  %v11819_v6 = vld [vmem:[#allocation22_spill] sm:$0xff]  ;;  %11822 = vst [vmem:[#allocation14_spill] sm:$0xff] %v7863_v9  ;;  %v1605_v63 = vmul.f32 %v1477_v32, %v1477_v32  ;;  %v1609_v12 = vmul.f32 %v1481_v3, %v1481_v3  ;;  %v11829_v32 = vld [vmem:[#allocation27_spill] sm:$0xff] }
 0x3b1   : > { %v2383_v57 = vsub.f32 %v11819_v6, %v7778_v42  ;;  %11823 = vst [vmem:[#allocation15_spill] sm:$0xff] %v7865_v49  ;;  %v768_v6 = vld [vmem:[%s7544_s29 + $0x270] sm:$0xff]  ;;  %11826 = vst [vmem:[#allocation16_spill] sm:$0xff] %v7873_v27  ;;  %v2507_v54 = vmul.f32 %v2379_v30, %v2379_v30  ;;  %v2509_v55 = vmul.f32 %v2381_v37, %v2381_v37  ;;  %v775_v3 = vld [vmem:[%s7544_s29 + $0x2a8] sm:$0xff] }
 0x3b2   : > { %v7853_v24 = vpop.permute.xlu0 %3702  ;;  %v2505_v35 = vmul.f32 %v2377_v8, %v2377_v8  ;;  %v1611_v15 = vmul.f32 %v1483_v51, %v1483_v51  ;;  %v1489_v8 = vsub.f32 %v11829_v32, %v7785_v46  ;;  %v2389_v30 = vsub.f32 %v11830_v5, %v7778_v42  ;;  %v770_v37 = vld [vmem:[%s7544_s29 + $0x280] sm:$0xff]  ;;  %v11831_v51 = vld [vmem:[#allocation29_spill] sm:$0xff]  ;;  %v11837_v5 = vld [vmem:[#allocation34_spill] sm:$0xff] }
 0x3b3   : > { %11817 = vst [vmem:[#allocation12_spill] sm:$0xff] %v7853_v24  ;;  %v7855_v45 = vpop.permute.xlu1 %3687  ;;  %3894 = vperm.xlu0 %6235, %v771_v61   ;;  %v1487_v24 = vsub.f32 %v11824_v23, %v7785_v46  ;;  %v1613_v23 = vmul.f32 %v1485_v58, %v1485_v58  ;;  %v2395_v27 = vsub.f32 %v11837_v5, %v7778_v42 }
 0x3b4   : > { %11818 = vst [vmem:[#allocation13_spill] sm:$0xff] %v7855_v45  ;;  %3879 = vperm.xlu1 %6236, %v766_v52   ;;  %v11825_v45 = vld [vmem:[#allocation26_spill] sm:$0xff]  ;;  %v2511_v52 = vmul.f32 %v2383_v57, %v2383_v57  ;;  %v7893_v58 = vadd.f32 %v2505_v35, %v1605_v63  ;;  %v1617_v5 = vmul.f32 %v1489_v8, %v1489_v8  ;;  %v11851_v8 = vld [vmem:[#allocation39_spill] sm:$0xff] }
 0x3b5   : > { %v2387_v33 = vsub.f32 %v11825_v45, %v7778_v42  ;;  %v2513_v45 = vmul.f32 %v2385_v11, %v2385_v11  ;;  %v1615_v26 = vmul.f32 %v1487_v24, %v1487_v24  ;;  %v11833_v11 = vld [vmem:[#allocation31_spill] sm:$0xff]  ;;  %v11834_v24 = vld [vmem:[#allocation32_spill] sm:$0xff] }
 0x3b6   : > { %v7875_v14 = vpop.permute.xlu0 %3708  ;;  %11835 = vst [vmem:[#allocation19_spill] sm:$0xff] %v7893_v58  ;;  %v7909_v35 = vadd.f32 %v2511_v52, %v1611_v15  ;;  %v2517_v58 = vmul.f32 %v2389_v30, %v2389_v30  ;;  %v1501_v30 = vsub.f32 %v11851_v8, %v7785_v46  ;;  %v11858_v8 = vld [vmem:[#allocation46_spill] sm:$0xff] }
 0x3b7   : > { %11827 = vst [vmem:[#allocation17_spill] sm:$0xff] %v7875_v14  ;;  %v7877_v61 = vpop.permute.xlu1 %3693  ;;  %3900 = vperm.xlu0 %6235, %v773_v18   ;;  %v2515_v17 = vmul.f32 %v2387_v33, %v2387_v33  ;;  %v1491_v14 = vsub.f32 %v11831_v51, %v7785_v46  ;;  %v1493_v18 = vsub.f32 %v11833_v11, %v7785_v46  ;;  %v11838_v51 = vld [vmem:[#allocation35_spill] sm:$0xff] }
 0x3b8   : > { %11828 = vst [vmem:[#allocation18_spill] sm:$0xff] %v7877_v61  ;;  %3885 = vperm.xlu1 %6236, %v768_v6   ;;  %v11832_v61 = vld [vmem:[#allocation30_spill] sm:$0xff]  ;;  %v2393_v33 = vsub.f32 %v11834_v24, %v7778_v42  ;;  %v11836_v6 = vld [vmem:[#allocation33_spill] sm:$0xff]  ;;  %v1497_v49 = vsub.f32 %v11838_v51, %v7785_v46  ;;  %v7905_v11 = vadd.f32 %v2507_v54, %v1607_v20  ;;  %11843 = vst [vmem:[#allocation24_spill] sm:$0xff] %v7909_v35 }
 0x3b9   : > { %v2391_v57 = vsub.f32 %v11832_v61, %v7778_v42  ;;  %v1495_v32 = vsub.f32 %v11836_v6, %v7785_v46  ;;  %v7907_v24 = vadd.f32 %v2509_v55, %v1609_v12  ;;  %v7911_v63 = vadd.f32 %v2513_v45, %v1613_v23  ;;  %v772_v51 = vld [vmem:[%s7544_s29 + $0x290] sm:$0xff]  ;;  %v11846_v55 = vld [vmem:[#allocation36_spill] sm:$0xff] }
 0x3ba   : > { %v7901_v61 = vpop.permute.xlu0 %3714  ;;  %11841 = vst [vmem:[#allocation22_spill] sm:$0xff] %v7905_v11  ;;  %v7913_v6 = vadd.f32 %v2515_v17, %v1615_v26  ;;  %v1619_v38 = vmul.f32 %v1491_v14, %v1491_v14  ;;  %v1621_v44 = vmul.f32 %v1493_v18, %v1493_v18  ;;  %v2523_v54 = vmul.f32 %v2395_v27, %v2395_v27  ;;  %v11849_v45 = vld [vmem:[#allocation37_spill] sm:$0xff]  ;;  %v11850_v14 = vld [vmem:[#allocation38_spill] sm:$0xff]  ;;  %v11852_v27 = vld [vmem:[#allocation40_spill] sm:$0xff] }
 0x3bb   : > { %11839 = vst [vmem:[#allocation20_spill] sm:$0xff] %v7901_v61  ;;  %v7903_v9 = vpop.permute.xlu1 %3699  ;;  %11842 = vst [vmem:[#allocation23_spill] sm:$0xff] %v7907_v24  ;;  %3906 = vperm.xlu0 %6235, %v775_v3   ;;  %v2519_v61 = vmul.f32 %v2391_v57, %v2391_v57  ;;  %v1623_v20 = vmul.f32 %v1495_v32, %v1495_v32  ;;  %v1625_v12 = vmul.f32 %v1497_v49, %v1497_v49  ;;  %v11853_v3 = vld [vmem:[#allocation41_spill] sm:$0xff]  ;;  %v11854_v57 = vld [vmem:[#allocation42_spill] sm:$0xff] }
 0x3bc   : > { %11840 = vst [vmem:[#allocation21_spill] sm:$0xff] %v7903_v9  ;;  %3891 = vperm.xlu1 %6236, %v770_v37   ;;  %11844 = vst [vmem:[#allocation25_spill] sm:$0xff] %v7911_v63  ;;  %v2521_v9 = vmul.f32 %v2393_v33, %v2393_v33  ;;  %v2397_v15 = vsub.f32 %v11846_v55, %v7778_v42  ;;  %v1499_v26 = vsub.f32 %v11849_v45, %v7785_v46  ;;  %v11855_v33 = vld [vmem:[#allocation43_spill] sm:$0xff]  ;;  %v779_v55 = vld [vmem:[%s7544_s29 + $0x2c8] sm:$0xff] }
 0x3bd   : > { %11845 = vst [vmem:[#allocation26_spill] sm:$0xff] %v7913_v6  ;;  %v2399_v17 = vsub.f32 %v11850_v14, %v7778_v42  ;;  %v2401_v49 = vsub.f32 %v11852_v27, %v7778_v42  ;;  %v1503_v37 = vsub.f32 %v11853_v3, %v7785_v46  ;;  %v2403_v18 = vsub.f32 %v11854_v57, %v7778_v42  ;;  %v774_v45 = vld [vmem:[%s7544_s29 + $0x2a0] sm:$0xff]  ;;  %v11856_v14 = vld [vmem:[#allocation44_spill] sm:$0xff]  ;;  %v11861_v63 = vld [vmem:[#allocation49_spill] sm:$0xff] }
 0x3be   : > { %v7919_v52 = vpop.permute.xlu0 %3720  ;;  %v1505_v32 = vsub.f32 %v11855_v33, %v7785_v46  ;;  %v2407_v27 = vsub.f32 %v11858_v8, %v7778_v42  ;;  %v2525_v6 = vmul.f32 %v2397_v15, %v2397_v15  ;;  %v11860_v57 = vld [vmem:[#allocation48_spill] sm:$0xff]  ;;  %v1511_v35 = vsub.f32 %v11861_v63, %v7785_v46 }
 0x3bf   : > { %11847 = vst [vmem:[#allocation27_spill] sm:$0xff] %v7919_v52  ;;  %v7921_v23 = vpop.permute.xlu1 %3705  ;;  %3912 = vperm.xlu0 %6235, %v777_v21   ;;  %v2405_v52 = vsub.f32 %v11856_v14, %v7778_v42  ;;  %v11857_v21 = vld [vmem:[#allocation45_spill] sm:$0xff]  ;;  %v2409_v33 = vsub.f32 %v11860_v57, %v7778_v42  ;;  %v11862_v14 = vld [vmem:[#allocation50_spill] sm:$0xff]  ;;  %v1627_v8 = vmul.f32 %v1499_v26, %v1499_v26  ;;  %v11865_v26 = vld [vmem:[#allocation51_spill] sm:$0xff] }
 0x3c0   : > { %11848 = vst [vmem:[#allocation28_spill] sm:$0xff] %v7921_v23  ;;  %3897 = vperm.xlu1 %6236, %v772_v51   ;;  %v1507_v51 = vsub.f32 %v11857_v21, %v7785_v46  ;;  %v11859_v23 = vld [vmem:[#allocation47_spill] sm:$0xff]  ;;  %v2411_v24 = vsub.f32 %v11862_v14, %v7778_v42  ;;  %v2527_v47 = vmul.f32 %v2399_v17, %v2399_v17  ;;  %v781_v57 = vld [vmem:[%s7544_s29 + $0x2d8] sm:$0xff] }
 0x3c1   : > { %v1509_v3 = vsub.f32 %v11859_v23, %v7785_v46  ;;  %v1629_v53 = vmul.f32 %v1501_v30, %v1501_v30  ;;  %v2529_v15 = vmul.f32 %v2401_v49, %v2401_v49  ;;  %v1631_v23 = vmul.f32 %v1503_v37, %v1503_v37 }
 0x3c2   : > { %v7953_v11 = vpop.permute.xlu0 %3726  ;;  %v2531_v56 = vmul.f32 %v2403_v18, %v2403_v18  ;;  %v1633_v62 = vmul.f32 %v1505_v32, %v1505_v32  ;;  %v2533_v10 = vmul.f32 %v2405_v52, %v2405_v52  ;;  %v1635_v63 = vmul.f32 %v1507_v51, %v1507_v51  ;;  %v11869_v18 = vld [vmem:[#allocation52_spill] sm:$0xff]  ;;  %v11870_v32 = vld [vmem:[#allocation53_spill] sm:$0xff] }
 0x3c3   : > { %11863 = vst [vmem:[#allocation29_spill] sm:$0xff] %v7953_v11  ;;  %v7955_v21 = vpop.permute.xlu1 %3711  ;;  %3918 = vperm.xlu0 %6235, %v779_v55   ;;  %v2535_v13 = vmul.f32 %v2407_v27, %v2407_v27  ;;  %v1637_v19 = vmul.f32 %v1509_v3, %v1509_v3  ;;  %v2537_v14 = vmul.f32 %v2409_v33, %v2409_v33  ;;  %v783_v27 = vld [vmem:[%s7544_s29 + $0x2e8] sm:$0xff]  ;;  %v778_v3 = vld [vmem:[%s7544_s29 + $0x2c0] sm:$0xff] }
 0x3c4   : > { %11864 = vst [vmem:[#allocation30_spill] sm:$0xff] %v7955_v21  ;;  %3903 = vperm.xlu1 %6236, %v774_v45   ;;  %v1639_v11 = vmul.f32 %v1511_v35, %v1511_v35  ;;  %v2539_v21 = vmul.f32 %v2411_v24, %v2411_v24  ;;  %v1513_v17 = vsub.f32 %v11865_v26, %v7785_v46 }
 0x3c5   : > { %v7965_v37 = vadd.f32 %v2517_v58, %v1617_v5  ;;  %v2413_v52 = vsub.f32 %v11869_v18, %v7778_v42  ;;  %v1515_v55 = vsub.f32 %v11870_v32, %v7785_v46  ;;  %v7971_v45 = vadd.f32 %v2519_v61, %v1619_v38 }
 0x3c6   : > { %v7961_v30 = vpop.permute.xlu0 %3732  ;;  %v7973_v24 = vadd.f32 %v2521_v9, %v1621_v44  ;;  %v7975_v35 = vadd.f32 %v2523_v54, %v1623_v20  ;;  %v7977_v51 = vadd.f32 %v2525_v6, %v1625_v12  ;;  %v7981_v58 = vadd.f32 %v2527_v47, %v1627_v8  ;;  %v11888_v12 = vld [vmem:[#allocation58_spill] sm:$0xff] }
 0x3c7   : > { %11866 = vst [vmem:[#allocation31_spill] sm:$0xff] %v7961_v30  ;;  %v7963_v49 = vpop.permute.xlu1 %3717  ;;  %11868 = vst [vmem:[#allocation33_spill] sm:$0xff] %v7965_v37  ;;  %3924 = vperm.xlu0 %6235, %v781_v57   ;;  %v7983_v5 = vadd.f32 %v2529_v15, %v1629_v53  ;;  %v7985_v33 = vadd.f32 %v2531_v56, %v1631_v23  ;;  %v7987_v26 = vadd.f32 %v2533_v10, %v1633_v62  ;;  %v11884_v56 = vld [vmem:[#allocation54_spill] sm:$0xff]  ;;  %v780_v15 = vld [vmem:[%s7544_s29 + $0x2d0] sm:$0xff] }
 0x3c8   : > { %11867 = vst [vmem:[#allocation32_spill] sm:$0xff] %v7963_v49  ;;  %3909 = vperm.xlu1 %6236, %v776_v4   ;;  %11871 = vst [vmem:[#allocation34_spill] sm:$0xff] %v7971_v45  ;;  %v7989_v4 = vadd.f32 %v2535_v13, %v1635_v63  ;;  %v7991_v44 = vadd.f32 %v2537_v14, %v1637_v19  ;;  %v7993_v38 = vadd.f32 %v2539_v21, %v1639_v11  ;;  %v11885_v13 = vld [vmem:[#allocation55_spill] sm:$0xff]  ;;  %v11886_v19 = vld [vmem:[#allocation56_spill] sm:$0xff] }
 0x3c9   : > { %11872 = vst [vmem:[#allocation35_spill] sm:$0xff] %v7973_v24  ;;  %11873 = vst [vmem:[#allocation36_spill] sm:$0xff] %v7975_v35  ;;  %v1641_v9 = vmul.f32 %v1513_v17, %v1513_v17  ;;  %v2541_v47 = vmul.f32 %v2413_v52, %v2413_v52  ;;  %v1643_v53 = vmul.f32 %v1515_v55, %v1515_v55  ;;  %v11887_v11 = vld [vmem:[#allocation57_spill] sm:$0xff]  ;;  %v785_v8 = vld [vmem:[%s7544_s29 + $0x2f8] sm:$0xff] }
 0x3ca   : > { %11874 = vst [vmem:[#allocation37_spill] sm:$0xff] %v7977_v51  ;;  %11875 = vst [vmem:[#allocation38_spill] sm:$0xff] %v7981_v58  ;;  %v7995_v61 = vpop.permute.xlu0 %3738  ;;  %v2415_v20 = vsub.f32 %v11884_v56, %v7778_v42  ;;  %v1517_v10 = vsub.f32 %v11885_v13, %v7785_v46  ;;  %v2417_v62 = vsub.f32 %v11886_v19, %v7778_v42  ;;  %v11889_v23 = vld [vmem:[#allocation59_spill] sm:$0xff]  ;;  %v11890_v63 = vld [vmem:[#allocation60_spill] sm:$0xff] }
 0x3cb   : > { %11876 = vst [vmem:[#allocation39_spill] sm:$0xff] %v7983_v5  ;;  %11877 = vst [vmem:[#allocation40_spill] sm:$0xff] %v7985_v33  ;;  %v7997_v6 = vpop.permute.xlu1 %3723  ;;  %3930 = vperm.xlu0 %6235, %v783_v27   ;;  %v1519_v54 = vsub.f32 %v11887_v11, %v7785_v46  ;;  %v2419_v21 = vsub.f32 %v11888_v12, %v7778_v42  ;;  %v1521_v57 = vsub.f32 %v11889_v23, %v7785_v46  ;;  %v11891_v17 = vld [vmem:[#allocation61_spill] sm:$0xff]  ;;  %v11892_v52 = vld [vmem:[#allocation62_spill] sm:$0xff] }
 0x3cc   : > { %11878 = vst [vmem:[#allocation41_spill] sm:$0xff] %v7987_v26  ;;  %11879 = vst [vmem:[#allocation42_spill] sm:$0xff] %v7989_v4  ;;  %3915 = vperm.xlu1 %6236, %v778_v3   ;;  %v2421_v14 = vsub.f32 %v11890_v63, %v7778_v42  ;;  %v1523_v18 = vsub.f32 %v11891_v17, %v7785_v46  ;;  %v2423_v32 = vsub.f32 %v11892_v52, %v7778_v42  ;;  %v11893_v55 = vld [vmem:[#allocation63_spill] sm:$0xff]  ;;  %v11894_v3 = vld [vmem:[#allocation64_spill] sm:$0xff] }
 0x3cd   : > { %11880 = vst [vmem:[#allocation43_spill] sm:$0xff] %v7991_v44  ;;  %11881 = vst [vmem:[#allocation44_spill] sm:$0xff] %v7993_v38  ;;  %v1525_v27 = vsub.f32 %v11893_v55, %v7785_v46  ;;  %v2425_v56 = vsub.f32 %v11894_v3, %v7778_v42  ;;  %v11895_v13 = vld [vmem:[#allocation65_spill] sm:$0xff]  ;;  %v11896_v11 = vld [vmem:[#allocation66_spill] sm:$0xff]  ;;  %v2543_v17 = vmul.f32 %v2415_v20, %v2415_v20 }
 0x3ce   : > { %11882 = vst [vmem:[#allocation45_spill] sm:$0xff] %v7995_v61  ;;  %11883 = vst [vmem:[#allocation46_spill] sm:$0xff] %v7997_v6  ;;  %v1527_v19 = vsub.f32 %v11895_v13, %v7785_v46  ;;  %v2427_v12 = vsub.f32 %v11896_v11, %v7778_v42  ;;  %v8027_v23 = vpop.permute.xlu0 %3744  ;;  %v11899_v52 = vld [vmem:[#allocation67_spill] sm:$0xff]  ;;  %v11900_v55 = vld [vmem:[#allocation68_spill] sm:$0xff]  ;;  %v1645_v3 = vmul.f32 %v1517_v10, %v1517_v10 }
 0x3cf   : > { %11897 = vst [vmem:[#allocation47_spill] sm:$0xff] %v8027_v23  ;;  %v8029_v63 = vpop.permute.xlu1 %3729  ;;  %v1529_v61 = vsub.f32 %v11899_v52, %v7785_v46  ;;  %v2429_v30 = vsub.f32 %v11900_v55, %v7778_v42  ;;  %3936 = vperm.xlu0 %6235, %v785_v8   ;;  %v2545_v6 = vmul.f32 %v2417_v62, %v2417_v62  ;;  %v787_v38 = vld [vmem:[%s7544_s29 + $0x308] sm:$0xff]  ;;  %v782_v44 = vld [vmem:[%s7544_s29 + $0x2e0] sm:$0xff] }
 0x3d0   : > { %11898 = vst [vmem:[#allocation48_spill] sm:$0xff] %v8029_v63  ;;  %3921 = vperm.xlu1 %6236, %v780_v15   ;;  %v1647_v49 = vmul.f32 %v1519_v54, %v1519_v54  ;;  %v2547_v13 = vmul.f32 %v2419_v21, %v2419_v21  ;;  %v1649_v11 = vmul.f32 %v1521_v57, %v1521_v57  ;;  %v11903_v54 = vld [vmem:[#allocation69_spill] sm:$0xff]  ;;  %v11982_v51 = vld [vmem:[#allocation115_spill] sm:$0xff]  ;;  %v11983_v35 = vld [vmem:[#allocation116_spill] sm:$0xff] }
 0x3d1   : > { %v2549_v4 = vmul.f32 %v2421_v14, %v2421_v14  ;;  %v1651_v23 = vmul.f32 %v1523_v18, %v1523_v18  ;;  %v2551_v26 = vmul.f32 %v2423_v32, %v2423_v32  ;;  %v1653_v20 = vmul.f32 %v1525_v27, %v1525_v27  ;;  %v789_v32 = vld [vmem:[%s7544_s29 + $0x318] sm:$0xff]  ;;  %v784_v27 = vld [vmem:[%s7544_s29 + $0x2f0] sm:$0xff] }
 0x3d2   : > { %v2553_v63 = vmul.f32 %v2425_v56, %v2425_v56  ;;  %v1655_v52 = vmul.f32 %v1527_v19, %v1527_v19  ;;  %v2555_v33 = vmul.f32 %v2427_v12, %v2427_v12  ;;  %v8037_v5 = vpop.permute.xlu0 %3750  ;;  %v1657_v10 = vmul.f32 %v1529_v61, %v1529_v61 }
 0x3d3   : > { %11901 = vst [vmem:[#allocation49_spill] sm:$0xff] %v8037_v5  ;;  %v8039_v8 = vpop.permute.xlu1 %3735  ;;  %v2557_v62 = vmul.f32 %v2429_v30, %v2429_v30  ;;  %v1531_v21 = vsub.f32 %v11903_v54, %v7785_v46  ;;  %3942 = vperm.xlu0 %6235, %v787_v38   ;;  %v8043_v15 = vadd.f32 %v2541_v47, %v1641_v9  ;;  %v11910_v30 = vld [vmem:[#allocation70_spill] sm:$0xff]  ;;  %v11911_v38 = vld [vmem:[#allocation71_spill] sm:$0xff]  ;;  %v11913_v47 = vld [vmem:[#allocation72_spill] sm:$0xff] }
 0x3d4   : > { %11902 = vst [vmem:[#allocation50_spill] sm:$0xff] %v8039_v8  ;;  %3927 = vperm.xlu1 %6236, %v782_v44   ;;  %v8045_v57 = vadd.f32 %v2543_v17, %v1643_v53  ;;  %v8047_v14 = vadd.f32 %v2545_v6, %v1645_v3  ;;  %v8049_v18 = vadd.f32 %v2547_v13, %v1647_v49  ;;  %v11914_v49 = vld [vmem:[#allocation73_spill] sm:$0xff]  ;;  %v3262_v3 = vsub.s32 2, %v7760_v48  ;;  %v11920_v13 = vld [vmem:[#allocation75_spill] sm:$0xff] }
 0x3d5   : > { %11904 = vst [vmem:[#allocation51_spill] sm:$0xff] %v8043_v15  ;;  %v8053_v56 = vadd.f32 %v2549_v4, %v1649_v11  ;;  %v8055_v19 = vadd.f32 %v2551_v26, %v1651_v23  ;;  %v2431_v61 = vsub.f32 %v11910_v30, %v7778_v42  ;;  %v1533_v44 = vsub.f32 %v11911_v38, %v7785_v46  ;;  %v11915_v4 = vld [vmem:[#allocation74_spill] sm:$0xff]  ;;  %v11922_v30 = vld [vmem:[#allocation77_spill] sm:$0xff]  ;;  %v11924_v48 = vld [vmem:[#allocation79_spill] sm:$0xff] }
 0x3d6   : > { %11905 = vst [vmem:[#allocation52_spill] sm:$0xff] %v8045_v57  ;;  %11906 = vst [vmem:[#allocation53_spill] sm:$0xff] %v8047_v14  ;;  %v8061_v9 = vadd.f32 %v2553_v63, %v1653_v20  ;;  %v2433_v6 = vsub.f32 %v11913_v47, %v7778_v42  ;;  %v1535_v53 = vsub.f32 %v11914_v49, %v7785_v46  ;;  %v8069_v12 = vpop.permute.xlu0 %3756  ;;  %v11921_v20 = vld [vmem:[#allocation76_spill] sm:$0xff]  ;;  %v11923_v47 = vld [vmem:[#allocation78_spill] sm:$0xff] }
 0x3d7   : > { %11907 = vst [vmem:[#allocation54_spill] sm:$0xff] %v8049_v18  ;;  %11908 = vst [vmem:[#allocation55_spill] sm:$0xff] %v8053_v56  ;;  %v2435_v26 = vsub.f32 %v11915_v4, %v7778_v42  ;;  %v8071_v23 = vpop.permute.xlu1 %3741  ;;  %v8073_v17 = vadd.f32 %v2555_v33, %v1655_v52  ;;  %v8075_v55 = vadd.f32 %v2557_v62, %v1657_v10  ;;  %3948 = vperm.xlu0 %6235, %v789_v32   ;;  %v791_v52 = vld [vmem:[%s7544_s29 + $0x328] sm:$0xff]  ;;  %v786_v10 = vld [vmem:[%s7544_s29 + $0x300] sm:$0xff] }
 0x3d8   : > { %11909 = vst [vmem:[#allocation56_spill] sm:$0xff] %v8055_v19  ;;  %11912 = vst [vmem:[#allocation57_spill] sm:$0xff] %v8061_v9  ;;  %v1659_v63 = vmul.f32 %v1531_v21, %v1531_v21  ;;  %3933 = vperm.xlu1 %6236, %v784_v27   ;;  %v1537_v11 = vsub.f32 %v11920_v13, %v7785_v46  ;;  %v2437_v54 = vsub.f32 %v11921_v20, %v7778_v42  ;;  %v11925_v27 = vld [vmem:[#allocation80_spill] sm:$0xff] }
 0x3d9   : > { %11916 = vst [vmem:[#allocation58_spill] sm:$0xff] %v8069_v12  ;;  %11917 = vst [vmem:[#allocation59_spill] sm:$0xff] %v8071_v23  ;;  %v1539_v38 = vsub.f32 %v11922_v30, %v7785_v46  ;;  %v2439_v33 = vsub.f32 %v11923_v47, %v7778_v42  ;;  %v2559_v62 = vmul.f32 %v2431_v61, %v2431_v61  ;;  %v11926_v30 = vld [vmem:[#allocation81_spill] sm:$0xff]  ;;  %v11929_v61 = vld [vmem:[#allocation82_spill] sm:$0xff] }
 0x3da   : > { %11918 = vst [vmem:[#allocation60_spill] sm:$0xff] %v8073_v17  ;;  %11919 = vst [vmem:[#allocation61_spill] sm:$0xff] %v8075_v55  ;;  %v1661_v21 = vmul.f32 %v1533_v44, %v1533_v44  ;;  %v1541_v32 = vsub.f32 %v11924_v48, %v7785_v46  ;;  %v2441_v49 = vsub.f32 %v11925_v27, %v7778_v42  ;;  %v8094_v5 = vpop.permute.xlu0 %3762  ;;  %v11930_v48 = vld [vmem:[#allocation83_spill] sm:$0xff]  ;;  %v11931_v27 = vld [vmem:[#allocation84_spill] sm:$0xff] }
 0x3db   : > { %v2561_v4 = vmul.f32 %v2433_v6, %v2433_v6  ;;  %v1663_v13 = vmul.f32 %v1535_v53, %v1535_v53  ;;  %v2563_v20 = vmul.f32 %v2435_v26, %v2435_v26  ;;  %v1543_v12 = vsub.f32 %v11926_v30, %v7785_v46  ;;  %11927 = vst [vmem:[#allocation62_spill] sm:$0xff] %v8094_v5  ;;  %v8096_v47 = vpop.permute.xlu1 %3747  ;;  %v793_v30 = vld [vmem:[%s7544_s29 + $0x338] sm:$0xff]  ;;  %v788_v17 = vld [vmem:[%s7544_s29 + $0x310] sm:$0xff] }
 0x3dc   : > { %11928 = vst [vmem:[#allocation63_spill] sm:$0xff] %v8096_v47  ;;  %v2443_v44 = vsub.f32 %v11929_v61, %v7778_v42  ;;  %v1545_v23 = vsub.f32 %v11930_v48, %v7785_v46  ;;  %v2445_v8 = vsub.f32 %v11931_v27, %v7778_v42  ;;  %3954 = vperm.xlu0 %6235, %v791_v52   ;;  %v11932_v47 = vld [vmem:[#allocation85_spill] sm:$0xff]  ;;  %v11933_v61 = vld [vmem:[#allocation86_spill] sm:$0xff]  ;;  %v11934_v27 = vld [vmem:[#allocation87_spill] sm:$0xff] }
 0x3dd   : > { %3939 = vperm.xlu1 %6236, %v786_v10   ;;  %v1665_v6 = vmul.f32 %v1537_v11, %v1537_v11  ;;  %v2565_v53 = vmul.f32 %v2437_v54, %v2437_v54  ;;  %v1667_v26 = vmul.f32 %v1539_v38, %v1539_v38  ;;  %v2567_v55 = vmul.f32 %v2439_v33, %v2439_v33  ;;  %v11935_v11 = vld [vmem:[#allocation88_spill] sm:$0xff] }
 0x3de   : > { %v1669_v5 = vmul.f32 %v1541_v32, %v1541_v32  ;;  %v2569_v9 = vmul.f32 %v2441_v49, %v2441_v49  ;;  %v1547_v19 = vsub.f32 %v11932_v47, %v7785_v46  ;;  %v2447_v56 = vsub.f32 %v11933_v61, %v7778_v42  ;;  %v8117_v33 = vpop.permute.xlu0 %3768 }
 0x3df   : > { %v1671_v48 = vmul.f32 %v1543_v12, %v1543_v12  ;;  %v1549_v52 = vsub.f32 %v11934_v27, %v7785_v46  ;;  %v2449_v54 = vsub.f32 %v11935_v11, %v7778_v42  ;;  %v8115_v38 = vrot.slane %v7775_v29, %v3262_v3  ;;  %11936 = vst [vmem:[#allocation64_spill] sm:$0xff] %v8117_v33  ;;  %v8119_v10 = vpop.permute.xlu1 %3753  ;;  %v795_v11 = vld [vmem:[%s7544_s29 + $0x348] sm:$0xff]  ;;  %v790_v29 = vld [vmem:[%s7544_s29 + $0x320] sm:$0xff] }
 0x3e0   : > { %11937 = vst [vmem:[#allocation65_spill] sm:$0xff] %v8119_v10  ;;  %v2571_v32 = vmul.f32 %v2443_v44, %v2443_v44  ;;  %v1673_v49 = vmul.f32 %v1545_v23, %v1545_v23  ;;  %v2573_v47 = vmul.f32 %v2445_v8, %v2445_v8  ;;  %3960 = vperm.xlu0 %6235, %v793_v30  }
 0x3e1   : > { %3945 = vperm.xlu1 %6236, %v788_v17   ;;  %v8121_v12 = vadd.f32 %v2559_v62, %v1659_v63  ;;  %v8123_v61 = vadd.f32 %v2561_v4, %v1661_v21  ;;  %v8125_v27 = vadd.f32 %v2563_v20, %v1663_v13  ;;  %v8127_v18 = vadd.f32 %v2565_v53, %v1665_v6  ;;  %v11944_v17 = vld [vmem:[#allocation89_spill] sm:$0xff]  ;;  %v11945_v62 = vld [vmem:[#allocation90_spill] sm:$0xff] }
 0x3e2   : > { %v8131_v3 = vadd.f32 %v2567_v55, %v1667_v26  ;;  %v8133_v33 = vadd.f32 %v2569_v9, %v1669_v5  ;;  %v1675_v10 = vmul.f32 %v1547_v19, %v1547_v19  ;;  %v2575_v44 = vmul.f32 %v2447_v56, %v2447_v56  ;;  %v8139_v4 = vpop.permute.xlu0 %3774  ;;  %v11950_v56 = vld [vmem:[#allocation91_spill] sm:$0xff]  ;;  %v11951_v9 = vld [vmem:[#allocation92_spill] sm:$0xff]  ;;  %v11952_v6 = vld [vmem:[#allocation93_spill] sm:$0xff] }
 0x3e3   : > { %11938 = vst [vmem:[#allocation66_spill] sm:$0xff] %v8121_v12  ;;  %11939 = vst [vmem:[#allocation67_spill] sm:$0xff] %v8123_v61  ;;  %v1677_v8 = vmul.f32 %v1549_v52, %v1549_v52  ;;  %v2577_v23 = vmul.f32 %v2449_v54, %v2449_v54  ;;  %v1551_v63 = vsub.f32 %v11944_v17, %v7785_v46  ;;  %v8141_v13 = vpop.permute.xlu1 %3759  ;;  %v11953_v26 = vld [vmem:[#allocation94_spill] sm:$0xff]  ;;  %v11954_v52 = vld [vmem:[#allocation95_spill] sm:$0xff] }
 0x3e4   : > { %11940 = vst [vmem:[#allocation68_spill] sm:$0xff] %v8125_v27  ;;  %11941 = vst [vmem:[#allocation69_spill] sm:$0xff] %v8127_v18  ;;  %v2451_v21 = vsub.f32 %v11945_v62, %v7778_v42  ;;  %v8143_v55 = vadd.f32 %v2571_v32, %v1671_v48  ;;  %v8145_v5 = vadd.f32 %v2573_v47, %v1673_v49  ;;  %3966 = vperm.xlu0 %6235, %v795_v11   ;;  %v797_v54 = vld [vmem:[%s7544_s29 + $0x358] sm:$0xff]  ;;  %v792_v32 = vld [vmem:[%s7544_s29 + $0x330] sm:$0xff] }
 0x3e5   : > { %11942 = vst [vmem:[#allocation70_spill] sm:$0xff] %v8131_v3  ;;  %11943 = vst [vmem:[#allocation71_spill] sm:$0xff] %v8133_v33  ;;  %v1553_v19 = vsub.f32 %v11950_v56, %v7785_v46  ;;  %3951 = vperm.xlu1 %6236, %v790_v29   ;;  %v2453_v20 = vsub.f32 %v11951_v9, %v7778_v42  ;;  %v1555_v53 = vsub.f32 %v11952_v6, %v7785_v46  ;;  %v11955_v49 = vld [vmem:[#allocation96_spill] sm:$0xff]  ;;  %v11956_v11 = vld [vmem:[#allocation97_spill] sm:$0xff] }
 0x3e6   : > { %11946 = vst [vmem:[#allocation72_spill] sm:$0xff] %v8139_v4  ;;  %11947 = vst [vmem:[#allocation73_spill] sm:$0xff] %v8141_v13  ;;  %v2455_v30 = vsub.f32 %v11953_v26, %v7778_v42  ;;  %v1557_v48 = vsub.f32 %v11954_v52, %v7785_v46  ;;  %v2457_v47 = vsub.f32 %v11955_v49, %v7778_v42  ;;  %v11957_v17 = vld [vmem:[#allocation98_spill] sm:$0xff]  ;;  %v11958_v56 = vld [vmem:[#allocation99_spill] sm:$0xff] }
 0x3e7   : > { %11948 = vst [vmem:[#allocation74_spill] sm:$0xff] %v8143_v55  ;;  %11949 = vst [vmem:[#allocation75_spill] sm:$0xff] %v8145_v5  ;;  %v1559_v29 = vsub.f32 %v11956_v11, %v7785_v46  ;;  %v2459_v62 = vsub.f32 %v11957_v17, %v7778_v42  ;;  %v1561_v9 = vsub.f32 %v11958_v56, %v7785_v46  ;;  %v8171_v55 = vpop.permute.xlu0 %3780  ;;  %v8173_v49 = vpop.permute.xlu1 %3765  ;;  %v11963_v11 = vld [vmem:[#allocation100_spill] sm:$0xff]  ;;  %v11964_v17 = vld [vmem:[#allocation101_spill] sm:$0xff] }
 0x3e8   : > { %v8167_v6 = vadd.f32 %v2575_v44, %v1675_v10  ;;  %v8169_v26 = vadd.f32 %v2577_v23, %v1677_v8  ;;  %v1679_v52 = vmul.f32 %v1551_v63, %v1551_v63  ;;  %v2579_v5 = vmul.f32 %v2451_v21, %v2451_v21  ;;  %11961 = vst [vmem:[#allocation78_spill] sm:$0xff] %v8171_v55  ;;  %v799_v23 = vld [vmem:[%s7544_s29 + $0x368] sm:$0xff]  ;;  %v794_v63 = vld [vmem:[%s7544_s29 + $0x340] sm:$0xff]  ;;  %v11974_v18 = vld [vmem:[#allocation109_spill] sm:$0xff] }
 0x3e9   : > { %11962 = vst [vmem:[#allocation79_spill] sm:$0xff] %v8173_v49  ;;  %v1681_v4 = vmul.f32 %v1553_v19, %v1553_v19  ;;  %v2461_v13 = vsub.f32 %v11963_v11, %v7778_v42  ;;  %v1563_v33 = vsub.f32 %v11964_v17, %v7785_v46  ;;  %3972 = vperm.xlu0 %6235, %v797_v54   ;;  %v11965_v19 = vld [vmem:[#allocation102_spill] sm:$0xff]  ;;  %v11966_v11 = vld [vmem:[#allocation103_spill] sm:$0xff]  ;;  %v11967_v54 = vld [vmem:[#allocation104_spill] sm:$0xff] }
 0x3ea   : > { %11959 = vst [vmem:[#allocation76_spill] sm:$0xff] %v8167_v6  ;;  %11960 = vst [vmem:[#allocation77_spill] sm:$0xff] %v8169_v26  ;;  %3957 = vperm.xlu1 %6236, %v792_v32   ;;  %v2581_v10 = vmul.f32 %v2453_v20, %v2453_v20  ;;  %v1683_v44 = vmul.f32 %v1555_v53, %v1555_v53  ;;  %v2583_v56 = vmul.f32 %v2455_v30, %v2455_v30  ;;  %v11968_v53 = vld [vmem:[#allocation105_spill] sm:$0xff]  ;;  %v11973_v3 = vld [vmem:[#allocation108_spill] sm:$0xff] }
 0x3eb   : > { %v1685_v8 = vmul.f32 %v1557_v48, %v1557_v48  ;;  %v2585_v21 = vmul.f32 %v2457_v47, %v2457_v47  ;;  %v1687_v26 = vmul.f32 %v1559_v29, %v1559_v29  ;;  %v2587_v6 = vmul.f32 %v2459_v62, %v2459_v62  ;;  %v8189_v48 = vpop.permute.xlu0 %3786  ;;  %v8191_v32 = vpop.permute.xlu1 %3771  ;;  %v11971_v62 = vld [vmem:[#allocation106_spill] sm:$0xff] }
 0x3ec   : > { %v1689_v55 = vmul.f32 %v1561_v9, %v1561_v9  ;;  %v2463_v49 = vsub.f32 %v11965_v19, %v7778_v42  ;;  %v1565_v17 = vsub.f32 %v11966_v11, %v7785_v46  ;;  %v2465_v20 = vsub.f32 %v11967_v54, %v7778_v42  ;;  %11969 = vst [vmem:[#allocation80_spill] sm:$0xff] %v8189_v48  ;;  %v11972_v19 = vld [vmem:[#allocation107_spill] sm:$0xff]  ;;  %v11975_v48 = vld [vmem:[#allocation110_spill] sm:$0xff] }
 0x3ed   : > { %v1567_v30 = vsub.f32 %v11968_v53, %v7785_v46  ;;  %11970 = vst [vmem:[#allocation81_spill] sm:$0xff] %v8191_v32  ;;  %v2589_v47 = vmul.f32 %v2461_v13, %v2461_v13  ;;  %v1691_v29 = vmul.f32 %v1563_v33, %v1563_v33  ;;  %v2467_v9 = vsub.f32 %v11971_v62, %v7778_v42  ;;  %v801_v32 = vld [vmem:[%s7544_s29 + $0x378] sm:$0xff]  ;;  %v796_v13 = vld [vmem:[%s7544_s29 + $0x350] sm:$0xff]  ;;  %v11976_v33 = vld [vmem:[#allocation111_spill] sm:$0xff] }
 0x3ee   : > { %3978 = vperm.xlu0 %6235, %v799_v23   ;;  %3963 = vperm.xlu1 %6236, %v794_v63   ;;  %v1569_v11 = vsub.f32 %v11972_v19, %v7785_v46  ;;  %v2469_v54 = vsub.f32 %v11973_v3, %v7778_v42  ;;  %v1571_v53 = vsub.f32 %v11974_v18, %v7785_v46  ;;  %v11977_v23 = vld [vmem:[#allocation112_spill] sm:$0xff]  ;;  %v11978_v62 = vld [vmem:[#allocation113_spill] sm:$0xff]  ;;  %v11979_v12 = vld [vmem:[#allocation114_spill] sm:$0xff] }
 0x3ef   : > { %v2471_v27 = vsub.f32 %v11975_v48, %v7778_v42  ;;  %v1573_v61 = vsub.f32 %v11976_v33, %v7785_v46  ;;  %v2473_v63 = vsub.f32 %v11977_v23, %v7778_v42  ;;  %v1575_v19 = vsub.f32 %v11978_v62, %v7785_v46  ;;  %v8213_v15 = vpop.permute.xlu0 %3792  ;;  %v8215_v58 = vpop.permute.xlu1 %3777 }
 0x3f0   : > { %v2475_v3 = vsub.f32 %v11979_v12, %v7778_v42  ;;  %v2591_v14 = vmul.f32 %v2463_v49, %v2463_v49  ;;  %v1693_v18 = vmul.f32 %v1565_v17, %v1565_v17  ;;  %v2593_v57 = vmul.f32 %v2465_v20, %v2465_v20  ;;  %11980 = vst [vmem:[#allocation82_spill] sm:$0xff] %v8213_v15  ;;  %v803_v17 = vld [vmem:[%s7544_s29 + $0x388] sm:$0xff]  ;;  %v798_v20 = vld [vmem:[%s7544_s29 + $0x360] sm:$0xff] }
 0x3f1   : > { %v1695_v48 = vmul.f32 %v1567_v30, %v1567_v30  ;;  %11981 = vst [vmem:[#allocation83_spill] sm:$0xff] %v8215_v58  ;;  %v2595_v33 = vmul.f32 %v2467_v9, %v2467_v9  ;;  %v1577_v23 = vsub.f32 %v11982_v51, %v7785_v46  ;;  %v2477_v62 = vsub.f32 %v11983_v35, %v7778_v42 }
 0x3f2   : > { %3984 = vperm.xlu0 %6235, %v801_v32   ;;  %3969 = vperm.xlu1 %6236, %v796_v13   ;;  %v1697_v12 = vmul.f32 %v1569_v11, %v1569_v11  ;;  %v2597_v24 = vmul.f32 %v2469_v54, %v2469_v54  ;;  %v1699_v49 = vmul.f32 %v1571_v53, %v1571_v53 }
 0x3f3   : > { %v2599_v45 = vmul.f32 %v2471_v27, %v2471_v27  ;;  %v1701_v30 = vmul.f32 %v1573_v61, %v1573_v61  ;;  %v2601_v37 = vmul.f32 %v2473_v63, %v2473_v63  ;;  %v1703_v15 = vmul.f32 %v1575_v19, %v1575_v19  ;;  %v8231_v32 = vpop.permute.xlu0 %3798  ;;  %v8233_v11 = vpop.permute.xlu1 %3783  ;;  %v12007_v19 = vld [vmem:[#allocation122_spill] sm:$0xff] }
 0x3f4   : > { %v2603_v22 = vmul.f32 %v2475_v3, %v2475_v3  ;;  %v8223_v9 = vadd.f32 %v2579_v5, %v1679_v52  ;;  %v8225_v51 = vadd.f32 %v2581_v10, %v1681_v4  ;;  %v8227_v58 = vadd.f32 %v2583_v56, %v1683_v44  ;;  %11988 = vst [vmem:[#allocation88_spill] sm:$0xff] %v8231_v32  ;;  %v805_v10 = vld [vmem:[%s7544_s29 + $0x398] sm:$0xff]  ;;  %v800_v44 = vld [vmem:[%s7544_s29 + $0x370] sm:$0xff] }
 0x3f5   : > { %v8229_v35 = vadd.f32 %v2585_v21, %v1685_v8  ;;  %11989 = vst [vmem:[#allocation89_spill] sm:$0xff] %v8233_v11  ;;  %v8235_v27 = vadd.f32 %v2587_v6, %v1687_v26  ;;  %v1705_v61 = vmul.f32 %v1577_v23, %v1577_v23  ;;  %v2605_v54 = vmul.f32 %v2477_v62, %v2477_v62  ;;  %v11999_v21 = vld [vmem:[#allocation117_spill] sm:$0xff] }
 0x3f6   : > { %11984 = vst [vmem:[#allocation84_spill] sm:$0xff] %v8223_v9  ;;  %11985 = vst [vmem:[#allocation85_spill] sm:$0xff] %v8225_v51  ;;  %3990 = vperm.xlu0 %6235, %v803_v17   ;;  %3975 = vperm.xlu1 %6236, %v798_v20   ;;  %v8237_v53 = vadd.f32 %v2589_v47, %v1689_v55  ;;  %v8239_v5 = vadd.f32 %v2591_v14, %v1691_v29  ;;  %v12000_v14 = vld [vmem:[#allocation118_spill] sm:$0xff]  ;;  %v12001_v47 = vld [vmem:[#allocation119_spill] sm:$0xff] }
 0x3f7   : > { %11986 = vst [vmem:[#allocation86_spill] sm:$0xff] %v8227_v58  ;;  %11987 = vst [vmem:[#allocation87_spill] sm:$0xff] %v8229_v35  ;;  %v8241_v4 = vadd.f32 %v2593_v57, %v1693_v18  ;;  %v8243_v52 = vadd.f32 %v2595_v33, %v1695_v48  ;;  %v8247_v56 = vadd.f32 %v2597_v24, %v1697_v12  ;;  %v12002_v24 = vld [vmem:[#allocation120_spill] sm:$0xff]  ;;  %v12008_v18 = vld [vmem:[#allocation123_spill] sm:$0xff] }
 0x3f8   : > { %11990 = vst [vmem:[#allocation90_spill] sm:$0xff] %v8235_v27  ;;  %11991 = vst [vmem:[#allocation91_spill] sm:$0xff] %v8237_v53  ;;  %v8249_v8 = vadd.f32 %v2599_v45, %v1699_v49  ;;  %v8251_v6 = vadd.f32 %v2601_v37, %v1701_v30  ;;  %v8253_v26 = vadd.f32 %v2603_v22, %v1703_v15  ;;  %v8263_v45 = vpop.permute.xlu0 %3804  ;;  %v8265_v37 = vpop.permute.xlu1 %3789  ;;  %v12006_v15 = vld [vmem:[#allocation121_spill] sm:$0xff]  ;;  %v12009_v33 = vld [vmem:[#allocation124_spill] sm:$0xff] }
 0x3f9   : > { %11992 = vst [vmem:[#allocation92_spill] sm:$0xff] %v8239_v5  ;;  %11993 = vst [vmem:[#allocation93_spill] sm:$0xff] %v8241_v4  ;;  %v1579_v55 = vsub.f32 %v11999_v21, %v7785_v46  ;;  %v2479_v57 = vsub.f32 %v12000_v14, %v7778_v42  ;;  %v1581_v29 = vsub.f32 %v12001_v47, %v7785_v46  ;;  %v12010_v62 = vld [vmem:[#allocation125_spill] sm:$0xff]  ;;  %v12011_v49 = vld [vmem:[#allocation126_spill] sm:$0xff] }
 0x3fa   : > { %11994 = vst [vmem:[#allocation94_spill] sm:$0xff] %v8243_v52  ;;  %11995 = vst [vmem:[#allocation95_spill] sm:$0xff] %v8247_v56  ;;  %v2481_v13 = vsub.f32 %v12002_v24, %v7778_v42  ;;  %v8267_v22 = vadd.f32 %v2605_v54, %v1705_v61  ;;  %v1583_v63 = vsub.f32 %v12006_v15, %v7785_v46  ;;  %3996 = vperm.xlu0 %6235, %v805_v10   ;;  %v807_v20 = vld [vmem:[%s7544_s29 + $0x3a8] sm:$0xff]  ;;  %v802_v30 = vld [vmem:[%s7544_s29 + $0x380] sm:$0xff] }
 0x3fb   : > { %11996 = vst [vmem:[#allocation96_spill] sm:$0xff] %v8249_v8  ;;  %11997 = vst [vmem:[#allocation97_spill] sm:$0xff] %v8251_v6  ;;  %v2483_v3 = vsub.f32 %v12007_v19, %v7778_v42  ;;  %3981 = vperm.xlu1 %6236, %v800_v44   ;;  %v1585_v48 = vsub.f32 %v12008_v18, %v7785_v46  ;;  %v2485_v23 = vsub.f32 %v12009_v33, %v7778_v42  ;;  %v12012_v61 = vld [vmem:[#allocation127_spill] sm:$0xff]  ;;  %v12013_v10 = vld [vmem:[#allocation128_spill] sm:$0xff] }
 0x3fc   : > { %11998 = vst [vmem:[#allocation98_spill] sm:$0xff] %v8253_v26  ;;  %12003 = vst [vmem:[#allocation99_spill] sm:$0xff] %v8263_v45  ;;  %v1587_v12 = vsub.f32 %v12010_v62, %v7785_v46  ;;  %v2487_v17 = vsub.f32 %v12011_v49, %v7778_v42  ;;  %v1589_v54 = vsub.f32 %v12012_v61, %v7785_v46  ;;  %v12014_v21 = vld [vmem:[#allocation129_spill] sm:$0xff]  ;;  %v12015_v47 = vld [vmem:[#allocation130_spill] sm:$0xff]  ;;  %v8291_v62 = vpop.permute.xlu0 %3810  ;;  %v8293_v49 = vpop.permute.xlu1 %3795 }
 0x3fd   : > { %12004 = vst [vmem:[#allocation100_spill] sm:$0xff] %v8265_v37  ;;  %12005 = vst [vmem:[#allocation101_spill] sm:$0xff] %v8267_v22  ;;  %v2489_v44 = vsub.f32 %v12013_v10, %v7778_v42  ;;  %v1591_v14 = vsub.f32 %v12014_v21, %v7785_v46  ;;  %v2491_v24 = vsub.f32 %v12015_v47, %v7778_v42  ;;  %v12018_v10 = vld [vmem:[#allocation133_spill] sm:$0xff]  ;;  %v12051_v27 = vld [vmem:[#allocation151_spill] sm:$0xff] }
 0x3fe   : > { %v1707_v15 = vmul.f32 %v1579_v55, %v1579_v55  ;;  %v2607_v19 = vmul.f32 %v2479_v57, %v2479_v57  ;;  %v1709_v18 = vmul.f32 %v1581_v29, %v1581_v29  ;;  %v2609_v33 = vmul.f32 %v2481_v13, %v2481_v13  ;;  %12016 = vst [vmem:[#allocation102_spill] sm:$0xff] %v8291_v62  ;;  %v809_v55 = vld [vmem:[%s7544_s29 + $0x3b8] sm:$0xff]  ;;  %v804_v56 = vld [vmem:[%s7544_s29 + $0x390] sm:$0xff]  ;;  %v815_v58 = vld [vmem:[%s7544_s29 + $0x3e8] sm:$0xff] }
 0x3ff   : > { %12017 = vst [vmem:[#allocation103_spill] sm:$0xff] %v8293_v49  ;;  %v1711_v61 = vmul.f32 %v1583_v63, %v1583_v63  ;;  %v2611_v22 = vmul.f32 %v2483_v3, %v2483_v3  ;;  %v2366_v26 = vsub.f32 %v12018_v10, %v7778_v42  ;;  %4002 = vperm.xlu0 %6235, %v807_v20   ;;  %v12020_v63 = vld [vmem:[#allocation131_spill] sm:$0xff]  ;;  %v12021_v20 = vld [vmem:[#allocation132_spill] sm:$0xff] }
 0x400   : > { %3987 = vperm.xlu1 %6236, %v802_v30   ;;  %v1713_v21 = vmul.f32 %v1585_v48, %v1585_v48  ;;  %v2613_v6 = vmul.f32 %v2485_v23, %v2485_v23  ;;  %v1715_v47 = vmul.f32 %v1587_v12, %v1587_v12  ;;  %v2615_v8 = vmul.f32 %v2487_v17, %v2487_v17  ;;  %v12022_v48 = vld [vmem:[#allocation134_spill] sm:$0xff]  ;;  %v8307_v12 = vpop.permute.xlu0 %3816  ;;  %v8309_v17 = vpop.permute.xlu1 %3801 }
 0x401   : > { %v1717_v57 = vmul.f32 %v1589_v54, %v1589_v54  ;;  %v2617_v29 = vmul.f32 %v2489_v44, %v2489_v44  ;;  %v1719_v13 = vmul.f32 %v1591_v14, %v1591_v14  ;;  %v2619_v52 = vmul.f32 %v2491_v24, %v2491_v24  ;;  %12023 = vst [vmem:[#allocation105_spill] sm:$0xff] %v8307_v12 }
 0x402   : > { %v8299_v4 = vadd.f32 %v2607_v19, %v1707_v15  ;;  %v2365_v3 = vsub.f32 %v12020_v63, %v7778_v42  ;;  %v3265_v30 = vsub.f32 %v12021_v20, %v8115_v38  ;;  %v3268_v23 = vsub.f32 %v12022_v48, %v8115_v38  ;;  %12024 = vst [vmem:[#allocation106_spill] sm:$0xff] %v8309_v17  ;;  %v12029_v19 = vld [vmem:[#allocation135_spill] sm:$0xff]  ;;  %v12030_v63 = vld [vmem:[#allocation136_spill] sm:$0xff] }
 0x403   : > { %v8311_v54 = vadd.f32 %v2609_v33, %v1709_v18  ;;  %v8313_v44 = vadd.f32 %v2611_v22, %v1711_v61  ;;  %v2494_v14 = vmul.f32 %v2366_v26, %v2366_v26  ;;  %4008 = vperm.xlu0 %6235, %v809_v55   ;;  %v8315_v24 = vadd.f32 %v2613_v6, %v1713_v21  ;;  %v811_v48 = vld [vmem:[%s7544_s29 + $0x3c8] sm:$0xff]  ;;  %v12033_v26 = vld [vmem:[#allocation137_spill] sm:$0xff]  ;;  %v12035_v21 = vld [vmem:[#allocation139_spill] sm:$0xff] }
 0x404   : > { %12019 = vst [vmem:[#allocation104_spill] sm:$0xff] %v8299_v4  ;;  %3993 = vperm.xlu1 %6236, %v804_v56   ;;  %v8317_v15 = vadd.f32 %v2615_v8, %v1715_v47  ;;  %v2368_v10 = vsub.f32 %v12029_v19, %v7778_v42  ;;  %v3270_v20 = vsub.f32 %v12030_v63, %v8115_v38  ;;  %v806_v4 = vld [vmem:[%s7544_s29 + $0x3a0] sm:$0xff]  ;;  %v12034_v56 = vld [vmem:[#allocation138_spill] sm:$0xff]  ;;  %v8341_v55 = vpop.permute.xlu0 %3822 }
 0x405   : > { %12025 = vst [vmem:[#allocation107_spill] sm:$0xff] %v8311_v54  ;;  %12026 = vst [vmem:[#allocation108_spill] sm:$0xff] %v8313_v44  ;;  %v8325_v5 = vadd.f32 %v2617_v29, %v1717_v57  ;;  %v8327_v18 = vadd.f32 %v2619_v52, %v1719_v13  ;;  %v2370_v22 = vsub.f32 %v12033_v26, %v7778_v42  ;;  %v8343_v52 = vpop.permute.xlu1 %3807  ;;  %v12038_v29 = vld [vmem:[#allocation140_spill] sm:$0xff]  ;;  %v12040_v63 = vld [vmem:[#allocation142_spill] sm:$0xff] }
 0x406   : > { %12027 = vst [vmem:[#allocation109_spill] sm:$0xff] %v8315_v24  ;;  %12028 = vst [vmem:[#allocation110_spill] sm:$0xff] %v8317_v15  ;;  %v3272_v6 = vsub.f32 %v12034_v56, %v8115_v38  ;;  %v8333_v8 = vmul.f32 %v2365_v3, %v2365_v3  ;;  %v8335_v33 = vmul.f32 %v3265_v30, %v3265_v30  ;;  %v12039_v3 = vld [vmem:[#allocation141_spill] sm:$0xff]  ;;  %v12041_v56 = vld [vmem:[#allocation143_spill] sm:$0xff] }
 0x407   : > { %12031 = vst [vmem:[#allocation111_spill] sm:$0xff] %v8325_v5  ;;  %12032 = vst [vmem:[#allocation112_spill] sm:$0xff] %v8327_v18  ;;  %v8337_v61 = vmul.f32 %v3268_v23, %v3268_v23  ;;  %v2372_v47 = vsub.f32 %v12035_v21, %v7778_v42  ;;  %v8346_v57 = vadd.f32 %v2494_v14, %v7825_v60  ;;  %4014 = vperm.xlu0 %6235, %v811_v48   ;;  %v813_v60 = vld [vmem:[%s7544_s29 + $0x3d8] sm:$0xff]  ;;  %v808_v14 = vld [vmem:[%s7544_s29 + $0x3b0] sm:$0xff] }
 0x408   : > { %12036 = vst [vmem:[#allocation113_spill] sm:$0xff] %v8341_v55  ;;  %12037 = vst [vmem:[#allocation114_spill] sm:$0xff] %v8343_v52  ;;  %v3274_v13 = vsub.f32 %v12038_v29, %v8115_v38  ;;  %v2374_v19 = vsub.f32 %v12039_v3, %v7778_v42  ;;  %3999 = vperm.xlu1 %6236, %v806_v4   ;;  %v8352_v30 = vmul.f32 %v2368_v10, %v2368_v10  ;;  %v12042_v3 = vld [vmem:[#allocation144_spill] sm:$0xff]  ;;  %v12043_v4 = vld [vmem:[#allocation145_spill] sm:$0xff]  ;;  %v8378_v24 = vpop.permute.xlu0 %3828 }
 0x409   : > { %v8354_v23 = vmul.f32 %v3270_v20, %v3270_v20  ;;  %v3276_v26 = vsub.f32 %v12040_v63, %v8115_v38  ;;  %v2376_v21 = vsub.f32 %v12041_v56, %v7778_v42  ;;  %v8362_v18 = vmul.f32 %v2370_v22, %v2370_v22  ;;  %v12044_v63 = vld [vmem:[#allocation146_spill] sm:$0xff]  ;;  %v12045_v56 = vld [vmem:[#allocation147_spill] sm:$0xff]  ;;  %v12046_v22 = vld [vmem:[#allocation148_spill] sm:$0xff]  ;;  %12047 = vst [vmem:[#allocation115_spill] sm:$0xff] %v8378_v24  ;;  %v8380_v44 = vpop.permute.xlu1 %3813 }
 0x40a   : > { %v8364_v29 = vmul.f32 %v3272_v6, %v3272_v6  ;;  %v3278_v48 = vsub.f32 %v12042_v3, %v8115_v38  ;;  %v2378_v10 = vsub.f32 %v12043_v4, %v7778_v42  ;;  %v8370_v20 = vmul.f32 %v2372_v47, %v2372_v47  ;;  %12048 = vst [vmem:[#allocation116_spill] sm:$0xff] %v8380_v44  ;;  %v12049_v47 = vld [vmem:[#allocation149_spill] sm:$0xff] }
 0x40b   : > { %v3280_v5 = vsub.f32 %v12044_v63, %v8115_v38  ;;  %v2380_v15 = vsub.f32 %v12045_v56, %v7778_v42  ;;  %v3282_v6 = vsub.f32 %v12046_v22, %v8115_v38  ;;  %v8382_v3 = vmul.f32 %v3274_v13, %v3274_v13  ;;  %4020 = vperm.xlu0 %6235, %v813_v60   ;;  %v12050_v56 = vld [vmem:[#allocation150_spill] sm:$0xff]  ;;  %v810_v13 = vld [vmem:[%s7544_s29 + $0x3c0] sm:$0xff]  ;;  %v812_v52 = vld [vmem:[%s7544_s29 + $0x3d0] sm:$0xff] }
 0x40c   : > { %v8384_v4 = vmul.f32 %v2374_v19, %v2374_v19  ;;  %v2382_v54 = vsub.f32 %v12049_v47, %v7778_v42  ;;  %4005 = vperm.xlu1 %6236, %v808_v14   ;;  %v8388_v63 = vmul.f32 %v3276_v26, %v3276_v26  ;;  %v8390_v53 = vmul.f32 %v2376_v21, %v2376_v21  ;;  %v12052_v47 = vld [vmem:[#allocation152_spill] sm:$0xff]  ;;  %v12053_v26 = vld [vmem:[#allocation153_spill] sm:$0xff]  ;;  %v8414_v55 = vpop.permute.xlu0 %3834 }
 0x40d   : > { %v3284_v22 = vsub.f32 %v12050_v56, %v8115_v38  ;;  %v2384_v35 = vsub.f32 %v12051_v27, %v7778_v42  ;;  %v8398_v51 = vmul.f32 %v3278_v48, %v3278_v48  ;;  %v8400_v19 = vmul.f32 %v2378_v10, %v2378_v10  ;;  %v12054_v27 = vld [vmem:[#allocation154_spill] sm:$0xff]  ;;  %12055 = vst [vmem:[#allocation117_spill] sm:$0xff] %v8414_v55  ;;  %v8416_v10 = vpop.permute.xlu1 %3819 }
 0x40e   : > { %v3286_v60 = vsub.f32 %v12052_v47, %v8115_v38  ;;  %v2386_v14 = vsub.f32 %v12053_v26, %v7778_v42  ;;  %v8406_v21 = vmul.f32 %v3280_v5, %v3280_v5  ;;  %v8408_v56 = vmul.f32 %v2380_v15, %v2380_v15  ;;  %12056 = vst [vmem:[#allocation118_spill] sm:$0xff] %v8416_v10  ;;  %v12057_v26 = vld [vmem:[#allocation155_spill] sm:$0xff]  ;;  %v12058_v5 = vld [vmem:[#allocation156_spill] sm:$0xff]  ;;  %v12060_v10 = vld [vmem:[#allocation158_spill] sm:$0xff] }
 0x40f   : > { %v8410_v24 = vmul.f32 %v3282_v6, %v3282_v6  ;;  %v3288_v48 = vsub.f32 %v12054_v27, %v8115_v38  ;;  %v8418_v47 = vmul.f32 %v2382_v54, %v2382_v54  ;;  %v2388_v44 = vsub.f32 %v12057_v26, %v7778_v42  ;;  %4026 = vperm.xlu0 %6235, %v815_v58   ;;  %v12059_v27 = vld [vmem:[#allocation157_spill] sm:$0xff]  ;;  %v817_v54 = vld [vmem:[%s7544_s29 + $0x3f8] sm:$0xff] }
 0x410   : > { %v3290_v12 = vsub.f32 %v12058_v5, %v8115_v38  ;;  %4011 = vperm.xlu1 %6236, %v810_v13   ;;  %v8424_v15 = vmul.f32 %v3284_v22, %v3284_v22  ;;  %v8426_v6 = vmul.f32 %v2384_v35, %v2384_v35  ;;  %v2390_v55 = vsub.f32 %v12059_v27, %v7778_v42  ;;  %v12062_v5 = vld [vmem:[#allocation159_spill] sm:$0xff]  ;;  %v12063_v22 = vld [vmem:[#allocation160_spill] sm:$0xff]  ;;  %v8456_v45 = vpop.permute.xlu0 %3840 }
 0x411   : > { %v3292_v9 = vsub.f32 %v12060_v10, %v8115_v38  ;;  %v8434_v62 = vmul.f32 %v3286_v60, %v3286_v60  ;;  %v8436_v26 = vmul.f32 %v2386_v14, %v2386_v14  ;;  %v2392_v58 = vsub.f32 %v12062_v5, %v7778_v42  ;;  %v12065_v10 = vld [vmem:[#allocation161_spill] sm:$0xff]  ;;  %v12066_v14 = vld [vmem:[#allocation162_spill] sm:$0xff]  ;;  %v12067_v5 = vld [vmem:[#allocation163_spill] sm:$0xff]  ;;  %12068 = vst [vmem:[#allocation121_spill] sm:$0xff] %v8456_v45 }
 0x412   : > { %v3294_v13 = vsub.f32 %v12063_v22, %v8115_v38  ;;  %v8448_v35 = vmul.f32 %v3288_v48, %v3288_v48  ;;  %v2394_v60 = vsub.f32 %v12065_v10, %v7778_v42  ;;  %v3296_v27 = vsub.f32 %v12066_v14, %v8115_v38  ;;  %v8458_v22 = vpop.permute.xlu1 %3825  ;;  %v12071_v48 = vld [vmem:[#allocation164_spill] sm:$0xff]  ;;  %v12074_v14 = vld [vmem:[#allocation165_spill] sm:$0xff]  ;;  %v12075_v45 = vld [vmem:[#allocation166_spill] sm:$0xff] }
 0x413   : > { %12061 = vst [vmem:[#allocation119_spill] sm:$0xff] %v8434_v62  ;;  %v2396_v17 = vsub.f32 %v12067_v5, %v7778_v42  ;;  %12069 = vst [vmem:[#allocation122_spill] sm:$0xff] %v8458_v22  ;;  %v8460_v49 = vmul.f32 %v2388_v44, %v2388_v44  ;;  %v8462_v32 = vmul.f32 %v3290_v12, %v3290_v12  ;;  %4032 = vperm.xlu0 %6235, %v817_v54   ;;  %v563_v22 = vld [vmem:[%s8446_s9 + $0x8] sm:$0xff]  ;;  %v814_v44 = vld [vmem:[%s7544_s29 + $0x3e0] sm:$0xff] }
 0x414   : > { %12064 = vst [vmem:[#allocation120_spill] sm:$0xff] %v8448_v35  ;;  %v3298_v37 = vsub.f32 %v12071_v48, %v8115_v38  ;;  %4017 = vperm.xlu1 %6236, %v812_v52   ;;  %v8466_v10 = vmul.f32 %v2390_v55, %v2390_v55  ;;  %v8468_v11 = vmul.f32 %v3292_v9, %v3292_v9  ;;  %v12078_v48 = vld [vmem:[#allocation167_spill] sm:$0xff]  ;;  %v12079_v55 = vld [vmem:[#allocation168_spill] sm:$0xff] }
 0x415   : > { %12070 = vst [vmem:[#allocation123_spill] sm:$0xff] %v8462_v32  ;;  %v2398_v5 = vsub.f32 %v12074_v14, %v7778_v42  ;;  %v3300_v35 = vsub.f32 %v12075_v45, %v8115_v38  ;;  %v8476_v62 = vmul.f32 %v2392_v58, %v2392_v58  ;;  %v8478_v12 = vmul.f32 %v3294_v13, %v3294_v13  ;;  %v12083_v45 = vld [vmem:[#allocation169_spill] sm:$0xff] }
 0x416   : > { %12072 = vst [vmem:[#allocation124_spill] sm:$0xff] %v8466_v10  ;;  %12073 = vst [vmem:[#allocation125_spill] sm:$0xff] %v8468_v11  ;;  %v2400_v54 = vsub.f32 %v12078_v48, %v7778_v42  ;;  %v3302_v52 = vsub.f32 %v12079_v55, %v8115_v38  ;;  %v8484_v9 = vmul.f32 %v2394_v60, %v2394_v60  ;;  %v8494_v13 = vpop.permute.xlu1 %3831  ;;  %v12087_v48 = vld [vmem:[#allocation170_spill] sm:$0xff]  ;;  %v12088_v60 = vld [vmem:[#allocation171_spill] sm:$0xff] }
 0x417   : > { %12076 = vst [vmem:[#allocation126_spill] sm:$0xff] %v8476_v62  ;;  %12077 = vst [vmem:[#allocation127_spill] sm:$0xff] %v8478_v12  ;;  %v8486_v14 = vmul.f32 %v3296_v27, %v3296_v27  ;;  %v8488_v11 = vmul.f32 %v2396_v17, %v2396_v17  ;;  %v2402_v58 = vsub.f32 %v12083_v45, %v7778_v42  ;;  %v8492_v62 = vpop.permute.xlu0 %3846  ;;  %4815 = vperm.xlu0 %6235, %v563_v22   ;;  %v12091_v45 = vld [vmem:[#allocation172_spill] sm:$0xff] }
 0x418   : > { %12080 = vst [vmem:[#allocation128_spill] sm:$0xff] %v8484_v9  ;;  %12084 = vst [vmem:[#allocation133_spill] sm:$0xff] %v8492_v62  ;;  %v8496_v12 = vmul.f32 %v3298_v37, %v3298_v37  ;;  %v3304_v55 = vsub.f32 %v12087_v48, %v8115_v38  ;;  %v2404_v9 = vsub.f32 %v12088_v60, %v7778_v42  ;;  %4023 = vperm.xlu1 %6236, %v814_v44   ;;  %v12092_v62 = vld [vmem:[#allocation173_spill] sm:$0xff]  ;;  %v565_v37 = vld [vmem:[%s8446_s9 + $0x18] sm:$0xff] }
 0x419   : > { %12081 = vst [vmem:[#allocation129_spill] sm:$0xff] %v8486_v14  ;;  %12082 = vst [vmem:[#allocation130_spill] sm:$0xff] %v8488_v11  ;;  %v8502_v27 = vmul.f32 %v2398_v5, %v2398_v5  ;;  %v8504_v17 = vmul.f32 %v3300_v35, %v3300_v35  ;;  %v3306_v14 = vsub.f32 %v12091_v45, %v8115_v38  ;;  %v12095_v60 = vld [vmem:[#allocation174_spill] sm:$0xff]  ;;  %v12096_v5 = vld [vmem:[#allocation175_spill] sm:$0xff] }
 0x41a   : > { %12085 = vst [vmem:[#allocation131_spill] sm:$0xff] %v8494_v13  ;;  %12086 = vst [vmem:[#allocation132_spill] sm:$0xff] %v8496_v12  ;;  %v2406_v13 = vsub.f32 %v12092_v62, %v7778_v42  ;;  %v816_v12 = vld [vmem:[%s7544_s29 + $0x3f0] sm:$0xff]  ;;  %v8512_v11 = vmul.f32 %v2400_v54, %v2400_v54  ;;  %v8514_v48 = vmul.f32 %v3302_v52, %v3302_v52  ;;  %v12098_v45 = vld [vmem:[#allocation176_spill] sm:$0xff] }
 0x41b   : > { %12089 = vst [vmem:[#allocation134_spill] sm:$0xff] %v8502_v27  ;;  %12090 = vst [vmem:[#allocation135_spill] sm:$0xff] %v8504_v17  ;;  %v3308_v22 = vsub.f32 %v12095_v60, %v8115_v38  ;;  %v2408_v44 = vsub.f32 %v12096_v5, %v7778_v42  ;;  %v8520_v35 = vmul.f32 %v2402_v58, %v2402_v58  ;;  %v12099_v62 = vld [vmem:[#allocation178_spill] sm:$0xff]  ;;  %v12100_v54 = vld [vmem:[#allocation179_spill] sm:$0xff]  ;;  %4825 = vperm.xlu0 %6235, %v565_v37  }
 0x41c   : > { %12093 = vst [vmem:[#allocation136_spill] sm:$0xff] %v8512_v11  ;;  %12094 = vst [vmem:[#allocation137_spill] sm:$0xff] %v8514_v48  ;;  %v3310_v17 = vsub.f32 %v12098_v45, %v8115_v38  ;;  %v2410_v27 = vsub.f32 %v12099_v62, %v7778_v42  ;;  %v3312_v52 = vsub.f32 %v12100_v54, %v8115_v38  ;;  %v8528_v48 = vpop.permute.xlu0 %3852  ;;  %v8530_v11 = vpop.permute.xlu1 %3837  ;;  %v12105_v58 = vld [vmem:[#allocation181_spill] sm:$0xff]  ;;  %4029 = vperm.xlu1 %6236, %v816_v12   ;;  %v12108_v62 = vld [vmem:[#allocation182_spill] sm:$0xff] }
 0x41d   : > { %12097 = vst [vmem:[#allocation138_spill] sm:$0xff] %v8520_v35  ;;  %12101 = vst [vmem:[#allocation139_spill] sm:$0xff] %v8528_v48  ;;  %v8532_v60 = vmul.f32 %v3304_v55, %v3304_v55  ;;  %v8534_v5 = vmul.f32 %v2404_v9, %v2404_v9  ;;  %v2412_v35 = vsub.f32 %v12105_v58, %v7778_v42  ;;  %v12109_v48 = vld [vmem:[#allocation184_spill] sm:$0xff]  ;;  %v562_v55 = vld [vmem:[%s8446_s9] sm:$0xff] }
 0x41e   : > { %12102 = vst [vmem:[#allocation140_spill] sm:$0xff] %v8530_v11  ;;  %v8538_v45 = vmul.f32 %v3306_v14, %v3306_v14  ;;  %v8540_v32 = vmul.f32 %v2406_v13, %v2406_v13  ;;  %v3314_v54 = vsub.f32 %v12108_v62, %v8115_v38  ;;  %v2414_v10 = vsub.f32 %v12109_v48, %v7778_v42  ;;  %v567_v11 = vld [vmem:[%s8446_s9 + $0x28] sm:$0xff]  ;;  %v12112_v58 = vld [vmem:[#allocation185_spill] sm:$0xff]  ;;  %v12113_v12 = vld [vmem:[#allocation187_spill] sm:$0xff] }
 0x41f   : > { %12103 = vst [vmem:[#allocation141_spill] sm:$0xff] %v8532_v60  ;;  %12104 = vst [vmem:[#allocation142_spill] sm:$0xff] %v8534_v5  ;;  %v8548_v60 = vmul.f32 %v3308_v22, %v3308_v22  ;;  %v8550_v9 = vmul.f32 %v2408_v44, %v2408_v44  ;;  %v3316_v37 = vsub.f32 %v12112_v58, %v8115_v38  ;;  %v12117_v48 = vld [vmem:[#allocation188_spill] sm:$0xff]  ;;  %v12121_v58 = vld [vmem:[#allocation190_spill] sm:$0xff]  ;;  %4835 = vperm.xlu0 %6235, %v567_v11  }
 0x420   : > { %12106 = vst [vmem:[#allocation143_spill] sm:$0xff] %v8538_v45  ;;  %12107 = vst [vmem:[#allocation144_spill] sm:$0xff] %v8540_v32  ;;  %v2416_v14 = vsub.f32 %v12113_v12, %v7778_v42  ;;  %v8556_v13 = vmul.f32 %v3310_v17, %v3310_v17  ;;  %v8558_v62 = vmul.f32 %v2410_v27, %v2410_v27  ;;  %v8566_v44 = vpop.permute.xlu1 %3843  ;;  %v12122_v17 = vld [vmem:[#allocation191_spill] sm:$0xff]  ;;  %4810 = vperm.xlu1 %6236, %v562_v55  }
 0x421   : > { %12110 = vst [vmem:[#allocation145_spill] sm:$0xff] %v8548_v60  ;;  %12111 = vst [vmem:[#allocation146_spill] sm:$0xff] %v8550_v9  ;;  %v8560_v45 = vmul.f32 %v3312_v52, %v3312_v52  ;;  %v3318_v22 = vsub.f32 %v12117_v48, %v8115_v38  ;;  %v8564_v60 = vpop.permute.xlu0 %3858  ;;  %v8568_v9 = vmul.f32 %v2412_v35, %v2412_v35  ;;  %v12125_v48 = vld [vmem:[#allocation193_spill] sm:$0xff]  ;;  %v569_v35 = vld [vmem:[%s8446_s9 + $0x38] sm:$0xff] }
 0x422   : > { %12114 = vst [vmem:[#allocation147_spill] sm:$0xff] %v8556_v13  ;;  %12115 = vst [vmem:[#allocation148_spill] sm:$0xff] %v8558_v62  ;;  %v2418_v12 = vsub.f32 %v12121_v58, %v7778_v42  ;;  %v3320_v13 = vsub.f32 %v12122_v17, %v8115_v38  ;;  %v8574_v27 = vmul.f32 %v3314_v54, %v3314_v54  ;;  %v12129_v17 = vld [vmem:[#allocation195_spill] sm:$0xff]  ;;  %v12130_v54 = vld [vmem:[#allocation196_spill] sm:$0xff] }
 0x423   : > { %12116 = vst [vmem:[#allocation149_spill] sm:$0xff] %v8560_v45  ;;  %12118 = vst [vmem:[#allocation150_spill] sm:$0xff] %v8564_v60  ;;  %v8576_v52 = vmul.f32 %v2414_v10, %v2414_v10  ;;  %v2420_v45 = vsub.f32 %v12125_v48, %v7778_v42  ;;  %v12126_v60 = vld [vmem:[#allocation194_spill] sm:$0xff]  ;;  %v8584_v62 = vmul.f32 %v3316_v37, %v3316_v37  ;;  %v12134_v37 = vld [vmem:[#allocation200_spill] sm:$0xff]  ;;  %4845 = vperm.xlu0 %6235, %v569_v35  }
 0x424   : > { %12119 = vst [vmem:[#allocation151_spill] sm:$0xff] %v8566_v44  ;;  %12120 = vst [vmem:[#allocation152_spill] sm:$0xff] %v8568_v9  ;;  %v3322_v44 = vsub.f32 %v12126_v60, %v8115_v38  ;;  %v564_v9 = vld [vmem:[%s8446_s9 + $0x10] sm:$0xff]  ;;  %v8586_v58 = vmul.f32 %v2416_v14, %v2416_v14  ;;  %v2422_v11 = vsub.f32 %v12129_v17, %v7778_v42  ;;  %v12132_v48 = vld [vmem:[#allocation198_spill] sm:$0xff] }
 0x425   : > { %12123 = vst [vmem:[#allocation153_spill] sm:$0xff] %v8574_v27  ;;  %12124 = vst [vmem:[#allocation154_spill] sm:$0xff] %v8576_v52  ;;  %v3324_v55 = vsub.f32 %v12130_v54, %v8115_v38  ;;  %v8592_v10 = vmul.f32 %v3318_v22, %v3318_v22  ;;  %v2424_v27 = vsub.f32 %v12132_v48, %v7778_v42  ;;  %v12133_v60 = vld [vmem:[#allocation199_spill] sm:$0xff]  ;;  %v12138_v22 = vld [vmem:[#allocation201_spill] sm:$0xff]  ;;  %4820 = vperm.xlu1 %6236, %v564_v9  }
 0x426   : > { %12127 = vst [vmem:[#allocation155_spill] sm:$0xff] %v8584_v62  ;;  %12128 = vst [vmem:[#allocation156_spill] sm:$0xff] %v8586_v58  ;;  %v3326_v52 = vsub.f32 %v12133_v60, %v8115_v38  ;;  %v2426_v14 = vsub.f32 %v12134_v37, %v7778_v42  ;;  %v8600_v62 = vpop.permute.xlu0 %3864  ;;  %v8602_v58 = vpop.permute.xlu1 %3849  ;;  %v8604_v17 = vmul.f32 %v2418_v12, %v2418_v12  ;;  %v12139_v60 = vld [vmem:[#allocation202_spill] sm:$0xff]  ;;  %v566_v12 = vld [vmem:[%s8446_s9 + $0x20] sm:$0xff] }
 0x427   : > { %12131 = vst [vmem:[#allocation157_spill] sm:$0xff] %v8592_v10  ;;  %12135 = vst [vmem:[#allocation158_spill] sm:$0xff] %v8600_v62  ;;  %v8606_v54 = vmul.f32 %v3320_v13, %v3320_v13  ;;  %v3328_v10 = vsub.f32 %v12138_v22, %v8115_v38  ;;  %v8610_v48 = vmul.f32 %v2420_v45, %v2420_v45  ;;  %v12140_v62 = vld [vmem:[#allocation203_spill] sm:$0xff] }
 0x428   : > { %12136 = vst [vmem:[#allocation159_spill] sm:$0xff] %v8602_v58  ;;  %12137 = vst [vmem:[#allocation160_spill] sm:$0xff] %v8604_v17  ;;  %v8612_v32 = vmul.f32 %v3322_v44, %v3322_v44  ;;  %v2428_v37 = vsub.f32 %v12139_v60, %v7778_v42  ;;  %v3330_v5 = vsub.f32 %v12140_v62, %v8115_v38  ;;  %v571_v58 = vld [vmem:[%s8446_s9 + $0x48] sm:$0xff] }
 0x429   : > { %v8620_v17 = vmul.f32 %v2422_v11, %v2422_v11  ;;  %v8622_v13 = vmul.f32 %v3324_v55, %v3324_v55  ;;  %v2430_v35 = vsub.f32 %v7170_v39, %v7778_v42  ;;  %v3332_v45 = vsub.f32 %v7172_v7, %v8115_v38  ;;  %v12145_v39 = vld [vmem:[#allocation204_spill] sm:$0xff]  ;;  %4855 = vperm.xlu0 %6235, %v571_v58  }
 0x42a   : > { %v8628_v9 = vmul.f32 %v2424_v27, %v2424_v27  ;;  %v8630_v44 = vmul.f32 %v3326_v52, %v3326_v52  ;;  %v8632_v22 = vmul.f32 %v2426_v14, %v2426_v14  ;;  %v2432_v62 = vsub.f32 %v7176_v59, %v7778_v42  ;;  %v8636_v11 = vpop.permute.xlu0 %3870  ;;  %v8638_v55 = vpop.permute.xlu1 %3855  ;;  %4830 = vperm.xlu1 %6236, %v566_v12   ;;  %v12147_v59 = vld [vmem:[#allocation205_spill] sm:$0xff]  ;;  %v12151_v12 = vld [vmem:[#allocation207_spill] sm:$0xff] }
 0x42b   : > { %12142 = vst [vmem:[#allocation162_spill] sm:$0xff] %v8636_v11  ;;  %12143 = vst [vmem:[#allocation163_spill] sm:$0xff] %v8638_v55  ;;  %v8640_v60 = vmul.f32 %v3328_v10, %v3328_v10  ;;  %v3334_v7 = vsub.f32 %v12145_v39, %v8115_v38  ;;  %v2434_v27 = vsub.f32 %v7182_v43, %v7778_v42  ;;  %v573_v10 = vld [vmem:[%s8446_s9 + $0x58] sm:$0xff]  ;;  %v568_v55 = vld [vmem:[%s8446_s9 + $0x30] sm:$0xff] }
 0x42c   : > { %12141 = vst [vmem:[#allocation161_spill] sm:$0xff] %v8630_v44  ;;  %v8646_v52 = vmul.f32 %v2428_v37, %v2428_v37  ;;  %v8648_v14 = vmul.f32 %v3330_v5, %v3330_v5  ;;  %v3336_v44 = vsub.f32 %v12147_v59, %v8115_v38  ;;  %v2436_v11 = vsub.f32 %v7188_v40, %v7778_v42  ;;  %v12149_v43 = vld [vmem:[#allocation206_spill] sm:$0xff] }
 0x42d   : > { %12144 = vst [vmem:[#allocation164_spill] sm:$0xff] %v8640_v60  ;;  %v8656_v60 = vmul.f32 %v2430_v35, %v2430_v35  ;;  %v8658_v39 = vmul.f32 %v3332_v45, %v3332_v45  ;;  %v3338_v58 = vsub.f32 %v12149_v43, %v8115_v38  ;;  %v2438_v37 = vsub.f32 %v7194_v1, %v7778_v42  ;;  %v12152_v35 = vld [vmem:[#allocation208_spill] sm:$0xff] }
 0x42e   : > { %12146 = vst [vmem:[#allocation165_spill] sm:$0xff] %v8648_v14  ;;  %v8664_v5 = vmul.f32 %v2432_v62, %v2432_v62  ;;  %v3340_v59 = vsub.f32 %v12151_v12, %v8115_v38  ;;  %v2440_v40 = vsub.f32 %v7200_v34, %v7778_v42  ;;  %v3342_v45 = vsub.f32 %v12152_v35, %v8115_v38  ;;  %v8674_v14 = vpop.permute.xlu1 %3861  ;;  %v12159_v34 = vld [vmem:[#allocation209_spill] sm:$0xff] }
 0x42f   : > { %12148 = vst [vmem:[#allocation166_spill] sm:$0xff] %v8658_v39  ;;  %v8672_v39 = vpop.permute.xlu0 %3876  ;;  %12154 = vst [vmem:[#allocation169_spill] sm:$0xff] %v8674_v14  ;;  %v8676_v43 = vmul.f32 %v3334_v7, %v3334_v7  ;;  %v8678_v1 = vmul.f32 %v2434_v27, %v2434_v27  ;;  %v2442_v62 = vsub.f32 %v7206_v36, %v7778_v42  ;;  %4865 = vperm.xlu0 %6235, %v573_v10   ;;  %v575_v14 = vld [vmem:[%s8446_s9 + $0x68] sm:$0xff]  ;;  %v570_v7 = vld [vmem:[%s8446_s9 + $0x40] sm:$0xff] }
 0x430   : > { %12150 = vst [vmem:[#allocation167_spill] sm:$0xff] %v8664_v5  ;;  %12153 = vst [vmem:[#allocation168_spill] sm:$0xff] %v8672_v39  ;;  %4840 = vperm.xlu1 %6236, %v568_v55   ;;  %v8682_v12 = vmul.f32 %v3336_v44, %v3336_v44  ;;  %v8684_v5 = vmul.f32 %v2436_v11, %v2436_v11  ;;  %v3344_v35 = vsub.f32 %v12159_v34, %v8115_v38  ;;  %v12162_v36 = vld [vmem:[#allocation210_spill] sm:$0xff] }
 0x431   : > { %12155 = vst [vmem:[#allocation170_spill] sm:$0xff] %v8676_v43  ;;  %12156 = vst [vmem:[#allocation171_spill] sm:$0xff] %v8678_v1  ;;  %v2444_v39 = vsub.f32 %v7212_v0, %v7778_v42  ;;  %v8692_v43 = vmul.f32 %v3338_v58, %v3338_v58  ;;  %v8694_v27 = vmul.f32 %v2438_v37, %v2438_v37  ;;  %v12166_v0 = vld [vmem:[#allocation211_spill] sm:$0xff] }
 0x432   : > { %12157 = vst [vmem:[#allocation172_spill] sm:$0xff] %v8682_v12  ;;  %12158 = vst [vmem:[#allocation173_spill] sm:$0xff] %v8684_v5  ;;  %v3346_v10 = vsub.f32 %v12162_v36, %v8115_v38  ;;  %v2446_v44 = vsub.f32 %v7218_v41, %v7778_v42  ;;  %v8700_v11 = vmul.f32 %v3340_v59, %v3340_v59  ;;  %v8710_v37 = vpop.permute.xlu1 %3867  ;;  %v12170_v59 = vld [vmem:[#allocation212_spill] sm:$0xff]  ;;  %v594_v5 = vld [vmem:[%s8446_s9 + $0x100] sm:$0xff] }
 0x433   : > { %12160 = vst [vmem:[#allocation174_spill] sm:$0xff] %v8692_v43  ;;  %12161 = vst [vmem:[#allocation175_spill] sm:$0xff] %v8694_v27  ;;  %v8702_v55 = vmul.f32 %v2440_v40, %v2440_v40  ;;  %v8704_v34 = vmul.f32 %v3342_v45, %v3342_v45  ;;  %v3348_v58 = vsub.f32 %v12166_v0, %v8115_v38  ;;  %v8708_v43 = vpop.permute.xlu0 %3882  ;;  %4875 = vperm.xlu0 %6235, %v575_v14  }
 0x434   : > { %12163 = vst [vmem:[#allocation176_spill] sm:$0xff] %v8700_v11  ;;  %12167 = vst [vmem:[#allocation181_spill] sm:$0xff] %v8708_v43  ;;  %v8712_v27 = vmul.f32 %v2442_v62, %v2442_v62  ;;  %v2448_v41 = vsub.f32 %v7224_v50, %v7778_v42  ;;  %v3350_v36 = vsub.f32 %v12170_v59, %v8115_v38  ;;  %4850 = vperm.xlu1 %6236, %v570_v7   ;;  %v12173_v43 = vld [vmem:[#allocation213_spill] sm:$0xff]  ;;  %v577_v62 = vld [vmem:[%s8446_s9 + $0x78] sm:$0xff] }
 0x435   : > { %12164 = vst [vmem:[#allocation178_spill] sm:$0xff] %v8702_v55  ;;  %12165 = vst [vmem:[#allocation179_spill] sm:$0xff] %v8704_v34  ;;  %v8718_v40 = vmul.f32 %v3344_v35, %v3344_v35  ;;  %v8720_v45 = vmul.f32 %v2444_v39, %v2444_v39  ;;  %v2450_v0 = vsub.f32 %v7230_v25, %v7778_v42  ;;  %v572_v34 = vld [vmem:[%s8446_s9 + $0x50] sm:$0xff]  ;;  %v12176_v35 = vld [vmem:[#allocation214_spill] sm:$0xff] }
 0x436   : > { %12168 = vst [vmem:[#allocation182_spill] sm:$0xff] %v8710_v37  ;;  %12169 = vst [vmem:[#allocation184_spill] sm:$0xff] %v8712_v27  ;;  %v3352_v37 = vsub.f32 %v12173_v43, %v8115_v38  ;;  %v8728_v27 = vmul.f32 %v3346_v10, %v3346_v10  ;;  %v8730_v50 = vmul.f32 %v2446_v44, %v2446_v44  ;;  %v12178_v43 = vld [vmem:[#allocation215_spill] sm:$0xff] }
 0x437   : > { %12171 = vst [vmem:[#allocation185_spill] sm:$0xff] %v8718_v40  ;;  %12172 = vst [vmem:[#allocation187_spill] sm:$0xff] %v8720_v45  ;;  %v2452_v14 = vsub.f32 %v7236_v2, %v7778_v42  ;;  %v3354_v7 = vsub.f32 %v12176_v35, %v8115_v38  ;;  %v8736_v39 = vmul.f32 %v3348_v58, %v3348_v58  ;;  %v8744_v44 = vpop.permute.xlu0 %3888  ;;  %v12183_v58 = vld [vmem:[#allocation216_spill] sm:$0xff]  ;;  %4885 = vperm.xlu0 %6235, %v577_v62  }
 0x438   : > { %12174 = vst [vmem:[#allocation188_spill] sm:$0xff] %v8728_v27  ;;  %12175 = vst [vmem:[#allocation190_spill] sm:$0xff] %v8730_v50  ;;  %v2454_v25 = vsub.f32 %v7242_v16, %v7778_v42  ;;  %v3356_v59 = vsub.f32 %v12178_v43, %v8115_v38  ;;  %v2456_v10 = vsub.f32 %v7248_v31, %v7778_v42  ;;  %v8746_v27 = vpop.permute.xlu1 %3873  ;;  %4860 = vperm.xlu1 %6236, %v572_v34   ;;  %v12186_v43 = vld [vmem:[#allocation217_spill] sm:$0xff]  ;;  %v12190_v34 = vld [vmem:[#allocation219_spill] sm:$0xff] }
 0x439   : > { %12177 = vst [vmem:[#allocation191_spill] sm:$0xff] %v8736_v39  ;;  %12179 = vst [vmem:[#allocation193_spill] sm:$0xff] %v8744_v44  ;;  %v8748_v2 = vmul.f32 %v2448_v41, %v2448_v41  ;;  %v8750_v35 = vmul.f32 %v3350_v36, %v3350_v36  ;;  %v3358_v39 = vsub.f32 %v12183_v58, %v8115_v38  ;;  %v574_v41 = vld [vmem:[%s8446_s9 + $0x60] sm:$0xff]  ;;  %v12189_v58 = vld [vmem:[#allocation218_spill] sm:$0xff] }
 0x43a   : > { %12180 = vst [vmem:[#allocation194_spill] sm:$0xff] %v8746_v27  ;;  %v8754_v16 = vmul.f32 %v2450_v0, %v2450_v0  ;;  %v8756_v50 = vmul.f32 %v3352_v37, %v3352_v37  ;;  %v2458_v31 = vsub.f32 %v7254_v28, %v7778_v42  ;;  %v3360_v44 = vsub.f32 %v12186_v43, %v8115_v38  ;;  %v579_v27 = vld [vmem:[%s8446_s9 + $0x88] sm:$0xff] }
 0x43b   : > { %12181 = vst [vmem:[#allocation195_spill] sm:$0xff] %v8748_v2  ;;  %12182 = vst [vmem:[#allocation196_spill] sm:$0xff] %v8750_v35  ;;  %v8764_v2 = vmul.f32 %v2452_v14, %v2452_v14  ;;  %v8766_v36 = vmul.f32 %v3354_v7, %v3354_v7  ;;  %v2460_v62 = vsub.f32 %v12189_v58, %v7778_v42  ;;  %v12194_v43 = vld [vmem:[#allocation220_spill] sm:$0xff]  ;;  %v12198_v58 = vld [vmem:[#allocation221_spill] sm:$0xff]  ;;  %4895 = vperm.xlu0 %6235, %v579_v27  }
 0x43c   : > { %12184 = vst [vmem:[#allocation198_spill] sm:$0xff] %v8754_v16  ;;  %12185 = vst [vmem:[#allocation199_spill] sm:$0xff] %v8756_v50  ;;  %v3362_v0 = vsub.f32 %v12190_v34, %v8115_v38  ;;  %v8772_v37 = vmul.f32 %v2454_v25, %v2454_v25  ;;  %v8774_v28 = vmul.f32 %v3356_v59, %v3356_v59  ;;  %v8782_v7 = vpop.permute.xlu1 %3879  ;;  %v12199_v25 = vld [vmem:[#allocation222_spill] sm:$0xff]  ;;  %4870 = vperm.xlu1 %6236, %v574_v41   ;;  %v587_v40 = vld [vmem:[%s8446_s9 + $0xc8] sm:$0xff] }
 0x43d   : > { %12187 = vst [vmem:[#allocation200_spill] sm:$0xff] %v8764_v2  ;;  %12188 = vst [vmem:[#allocation201_spill] sm:$0xff] %v8766_v36  ;;  %v8776_v50 = vmul.f32 %v2456_v10, %v2456_v10  ;;  %v2462_v14 = vsub.f32 %v12194_v43, %v7778_v42  ;;  %v8780_v2 = vpop.permute.xlu0 %3894  ;;  %v8784_v36 = vmul.f32 %v3358_v39, %v3358_v39  ;;  %v12202_v43 = vld [vmem:[#allocation223_spill] sm:$0xff]  ;;  %v581_v39 = vld [vmem:[%s8446_s9 + $0x98] sm:$0xff] }
 0x43e   : > { %12191 = vst [vmem:[#allocation202_spill] sm:$0xff] %v8772_v37  ;;  %12192 = vst [vmem:[#allocation203_spill] sm:$0xff] %v8774_v28  ;;  %v3364_v34 = vsub.f32 %v12198_v58, %v8115_v38  ;;  %v2464_v37 = vsub.f32 %v12199_v25, %v7778_v42  ;;  %v8790_v59 = vmul.f32 %v2458_v31, %v2458_v31  ;;  %v12206_v25 = vld [vmem:[#allocation225_spill] sm:$0xff]  ;;  %v12207_v31 = vld [vmem:[#allocation226_spill] sm:$0xff] }
 0x43f   : > { %12193 = vst [vmem:[#allocation204_spill] sm:$0xff] %v8776_v50  ;;  %12195 = vst [vmem:[#allocation205_spill] sm:$0xff] %v8780_v2  ;;  %v8792_v10 = vmul.f32 %v3360_v44, %v3360_v44  ;;  %v3366_v28 = vsub.f32 %v12202_v43, %v8115_v38  ;;  %v12203_v2 = vld [vmem:[#allocation224_spill] sm:$0xff]  ;;  %v8800_v50 = vmul.f32 %v2460_v62, %v2460_v62  ;;  %v12209_v43 = vld [vmem:[#allocation227_spill] sm:$0xff]  ;;  %4905 = vperm.xlu0 %6235, %v581_v39  }
 0x440   : > { %12196 = vst [vmem:[#allocation206_spill] sm:$0xff] %v8782_v7  ;;  %12197 = vst [vmem:[#allocation207_spill] sm:$0xff] %v8784_v36  ;;  %v2466_v7 = vsub.f32 %v12203_v2, %v7778_v42  ;;  %v576_v36 = vld [vmem:[%s8446_s9 + $0x70] sm:$0xff]  ;;  %v8802_v58 = vmul.f32 %v3362_v0, %v3362_v0  ;;  %v3368_v27 = vsub.f32 %v12206_v25, %v8115_v38  ;;  %v12210_v2 = vld [vmem:[#allocation228_spill] sm:$0xff] }
 0x441   : > { %12200 = vst [vmem:[#allocation208_spill] sm:$0xff] %v8790_v59  ;;  %12201 = vst [vmem:[#allocation209_spill] sm:$0xff] %v8792_v10  ;;  %v2468_v41 = vsub.f32 %v12207_v31, %v7778_v42  ;;  %v8808_v44 = vmul.f32 %v2462_v14, %v2462_v14  ;;  %v3370_v10 = vsub.f32 %v12209_v43, %v8115_v38  ;;  %v12211_v62 = vld [vmem:[#allocation229_spill] sm:$0xff]  ;;  %v12216_v14 = vld [vmem:[#allocation230_spill] sm:$0xff]  ;;  %4880 = vperm.xlu1 %6236, %v576_v36  }
 0x442   : > { %12204 = vst [vmem:[#allocation210_spill] sm:$0xff] %v8800_v50  ;;  %12205 = vst [vmem:[#allocation211_spill] sm:$0xff] %v8802_v58  ;;  %v2470_v59 = vsub.f32 %v12210_v2, %v7778_v42  ;;  %v3372_v0 = vsub.f32 %v12211_v62, %v8115_v38  ;;  %v8816_v58 = vpop.permute.xlu0 %3900  ;;  %v8818_v50 = vpop.permute.xlu1 %3885  ;;  %v8820_v25 = vmul.f32 %v3364_v34, %v3364_v34  ;;  %v12219_v2 = vld [vmem:[#allocation231_spill] sm:$0xff]  ;;  %v12224_v36 = vld [vmem:[#allocation234_spill] sm:$0xff] }
 0x443   : > { %12208 = vst [vmem:[#allocation212_spill] sm:$0xff] %v8808_v44  ;;  %12212 = vst [vmem:[#allocation213_spill] sm:$0xff] %v8816_v58  ;;  %v8822_v31 = vmul.f32 %v2464_v37, %v2464_v37  ;;  %v2472_v44 = vsub.f32 %v12216_v14, %v7778_v42  ;;  %v8826_v43 = vmul.f32 %v3366_v28, %v3366_v28  ;;  %v12220_v58 = vld [vmem:[#allocation232_spill] sm:$0xff]  ;;  %v578_v34 = vld [vmem:[%s8446_s9 + $0x80] sm:$0xff] }
 0x444   : > { %12213 = vst [vmem:[#allocation214_spill] sm:$0xff] %v8818_v50  ;;  %12214 = vst [vmem:[#allocation215_spill] sm:$0xff] %v8820_v25  ;;  %v8828_v35 = vmul.f32 %v2466_v7, %v2466_v7  ;;  %v3374_v62 = vsub.f32 %v12219_v2, %v8115_v38  ;;  %v2474_v16 = vsub.f32 %v12220_v58, %v7778_v42  ;;  %v583_v50 = vld [vmem:[%s8446_s9 + $0xa8] sm:$0xff]  ;;  %v12223_v14 = vld [vmem:[#allocation233_spill] sm:$0xff] }
 0x445   : > { %12215 = vst [vmem:[#allocation216_spill] sm:$0xff] %v8822_v31  ;;  %12217 = vst [vmem:[#allocation217_spill] sm:$0xff] %v8826_v43  ;;  %v8836_v25 = vmul.f32 %v3368_v27, %v3368_v27  ;;  %v8838_v37 = vmul.f32 %v2468_v41, %v2468_v41  ;;  %v3376_v39 = vsub.f32 %v12223_v14, %v8115_v38  ;;  %v12228_v58 = vld [vmem:[#allocation235_spill] sm:$0xff]  ;;  %v12232_v14 = vld [vmem:[#allocation236_spill] sm:$0xff]  ;;  %4915 = vperm.xlu0 %6235, %v583_v50  }
 0x446   : > { %12218 = vst [vmem:[#allocation218_spill] sm:$0xff] %v8828_v35  ;;  %v2476_v28 = vsub.f32 %v12224_v36, %v7778_v42  ;;  %v8844_v7 = vmul.f32 %v3370_v10, %v3370_v10  ;;  %v8846_v2 = vmul.f32 %v2470_v59, %v2470_v59  ;;  %v8848_v43 = vmul.f32 %v3372_v0, %v3372_v0  ;;  %v8854_v41 = vpop.permute.xlu1 %3891  ;;  %v12233_v10 = vld [vmem:[#allocation237_spill] sm:$0xff] }
 0x447   : > { %12221 = vst [vmem:[#allocation219_spill] sm:$0xff] %v8836_v25  ;;  %12222 = vst [vmem:[#allocation220_spill] sm:$0xff] %v8838_v37  ;;  %v3378_v27 = vsub.f32 %v12228_v58, %v8115_v38  ;;  %v8852_v25 = vpop.permute.xlu0 %3906  ;;  %v8856_v37 = vmul.f32 %v2472_v44, %v2472_v44  ;;  %v2478_v36 = vsub.f32 %v12232_v14, %v7778_v42  ;;  %4890 = vperm.xlu1 %6236, %v578_v34   ;;  %v12236_v58 = vld [vmem:[#allocation238_spill] sm:$0xff] }
 0x448   : > { %12225 = vst [vmem:[#allocation221_spill] sm:$0xff] %v8844_v7  ;;  %12226 = vst [vmem:[#allocation222_spill] sm:$0xff] %v8846_v2  ;;  %v3380_v7 = vsub.f32 %v12233_v10, %v8115_v38  ;;  %v8862_v59 = vmul.f32 %v3374_v62, %v3374_v62  ;;  %v8864_v0 = vmul.f32 %v2474_v16, %v2474_v16  ;;  %v585_v44 = vld [vmem:[%s8446_s9 + $0xb8] sm:$0xff]  ;;  %v12240_v10 = vld [vmem:[#allocation239_spill] sm:$0xff] }
 0x449   : > { %12227 = vst [vmem:[#allocation223_spill] sm:$0xff] %v8848_v43  ;;  %12229 = vst [vmem:[#allocation224_spill] sm:$0xff] %v8852_v25  ;;  %v2480_v43 = vsub.f32 %v12236_v58, %v7778_v42  ;;  %v12237_v25 = vld [vmem:[#allocation249_spill] sm:$0xff]  ;;  %v8874_v14 = vmul.f32 %v2476_v28, %v2476_v28  ;;  %v3382_v50 = vsub.f32 %v12240_v10, %v8115_v38  ;;  %v12241_v62 = vld [vmem:[#allocation251_spill] sm:$0xff]  ;;  %4925 = vperm.xlu0 %6235, %v585_v44  }
 0x44a   : > { %12230 = vst [vmem:[#allocation225_spill] sm:$0xff] %v8854_v41  ;;  %12231 = vst [vmem:[#allocation226_spill] sm:$0xff] %v8856_v37  ;;  %v1464_v2 = vsub.f32 %v12237_v25, %v7785_v46  ;;  %v580_v37 = vld [vmem:[%s8446_s9 + $0x90] sm:$0xff]  ;;  %v8872_v41 = vmul.f32 %v3376_v39, %v3376_v39  ;;  %v1465_v34 = vsub.f32 %v12241_v62, %v7785_v46  ;;  %v12243_v58 = vld [vmem:[#allocation240_spill] sm:$0xff] }
 0x44b   : > { %12234 = vst [vmem:[#allocation227_spill] sm:$0xff] %v8862_v59  ;;  %12235 = vst [vmem:[#allocation228_spill] sm:$0xff] %v8864_v0  ;;  %v8880_v16 = vmul.f32 %v3378_v27, %v3378_v27  ;;  %v2482_v59 = vsub.f32 %v12243_v58, %v7778_v42  ;;  %v12244_v25 = vld [vmem:[#allocation250_spill] sm:$0xff]  ;;  %v12245_v39 = vld [vmem:[#allocation253_spill] sm:$0xff]  ;;  %v8892_v10 = vmul.f32 %v2478_v36, %v2478_v36  ;;  %4900 = vperm.xlu1 %6236, %v580_v37  }
 0x44c   : > { %12238 = vst [vmem:[#allocation229_spill] sm:$0xff] %v8872_v41  ;;  %12239 = vst [vmem:[#allocation230_spill] sm:$0xff] %v8874_v14  ;;  %v3264_v0 = vsub.f32 %v12244_v25, %v8115_v38  ;;  %v1468_v28 = vsub.f32 %v12245_v39, %v7785_v46  ;;  %v8888_v41 = vpop.permute.xlu0 %3912  ;;  %v8890_v14 = vpop.permute.xlu1 %3897  ;;  %v8894_v62 = vmul.f32 %v3380_v7, %v3380_v7  ;;  %v12250_v27 = vld [vmem:[#allocation241_spill] sm:$0xff]  ;;  %v12252_v25 = vld [vmem:[#allocation242_spill] sm:$0xff] }
 0x44d   : > { %12242 = vst [vmem:[#allocation231_spill] sm:$0xff] %v8880_v16  ;;  %12246 = vst [vmem:[#allocation232_spill] sm:$0xff] %v8888_v41  ;;  %v3384_v16 = vsub.f32 %v12250_v27, %v8115_v38  ;;  %v8898_v58 = vmul.f32 %v2480_v43, %v2480_v43  ;;  %v2484_v35 = vsub.f32 %v12252_v25, %v7778_v42  ;;  %v12253_v39 = vld [vmem:[#allocation243_spill] sm:$0xff]  ;;  %v12258_v27 = vld [vmem:[#allocation244_spill] sm:$0xff]  ;;  %4935 = vperm.xlu0 %6235, %v587_v40  }
 0x44e   : > { %12247 = vst [vmem:[#allocation233_spill] sm:$0xff] %v8890_v14  ;;  %12248 = vst [vmem:[#allocation234_spill] sm:$0xff] %v8892_v10  ;;  %v3386_v31 = vsub.f32 %v12253_v39, %v8115_v38  ;;  %v1592_v41 = vmul.f32 %v1464_v2, %v1464_v2  ;;  %v582_v14 = vld [vmem:[%s8446_s9 + $0xa0] sm:$0xff]  ;;  %v8906_v36 = vmul.f32 %v3382_v50, %v3382_v50 }
 0x44f   : > { %12249 = vst [vmem:[#allocation235_spill] sm:$0xff] %v8894_v62  ;;  %12251 = vst [vmem:[#allocation236_spill] sm:$0xff] %v8898_v58  ;;  %v1593_v7 = vmul.f32 %v1465_v34, %v1465_v34  ;;  %v12255_v62 = vld [vmem:[#allocation252_spill] sm:$0xff]  ;;  %v12256_v44 = vld [vmem:[#allocation255_spill] sm:$0xff]  ;;  %v8912_v43 = vmul.f32 %v2482_v59, %v2482_v59  ;;  %v2486_v25 = vsub.f32 %v12258_v27, %v7778_v42  ;;  %4910 = vperm.xlu1 %6236, %v582_v14  }
 0x450   : > { %12254 = vst [vmem:[#allocation237_spill] sm:$0xff] %v8906_v36  ;;  %v3266_v10 = vsub.f32 %v12255_v62, %v8115_v38  ;;  %v1470_v37 = vsub.f32 %v12256_v44, %v7785_v46  ;;  %v3392_v39 = vmul.f32 %v3264_v0, %v3264_v0  ;;  %v1596_v2 = vmul.f32 %v1468_v28, %v1468_v28  ;;  %v8916_v58 = vpop.permute.xlu0 %3918  ;;  %v8918_v50 = vpop.permute.xlu1 %3903  ;;  %v12262_v62 = vld [vmem:[#allocation254_spill] sm:$0xff]  ;;  %v12263_v44 = vld [vmem:[#allocation257_spill] sm:$0xff]  ;;  %v12267_v27 = vld [vmem:[#allocation3_spill] sm:$0xff] }
 0x451   : > { %12257 = vst [vmem:[#allocation238_spill] sm:$0xff] %v8912_v43  ;;  %12259 = vst [vmem:[#allocation249_spill] sm:$0xff] %v8916_v58  ;;  %v8920_v34 = vmul.f32 %v3384_v16, %v3384_v16  ;;  %v3267_v36 = vsub.f32 %v12262_v62, %v8115_v38  ;;  %v1472_v45 = vsub.f32 %v12263_v44, %v7785_v46  ;;  %v12266_v0 = vld [vmem:[#allocation245_spill] sm:$0xff]  ;;  %v12270_v14 = vld [vmem:[#allocation256_spill] sm:$0xff] }
 0x452   : > { %12260 = vst [vmem:[#allocation239_spill] sm:$0xff] %v8918_v50  ;;  %v8926_v59 = vmul.f32 %v2484_v35, %v2484_v35  ;;  %v8928_v43 = vmul.f32 %v3386_v31, %v3386_v31  ;;  %v3388_v28 = vsub.f32 %v12266_v0, %v8115_v38  ;;  %v2620_v58 = vadd.f32 %v12267_v27, %v1592_v41  ;;  %v589_v50 = vld [vmem:[%s8446_s9 + $0xd8] sm:$0xff]  ;;  %v584_v16 = vld [vmem:[%s8446_s9 + $0xb0] sm:$0xff] }
 0x453   : > { %12261 = vst [vmem:[#allocation251_spill] sm:$0xff] %v8920_v34  ;;  %v12268_v34 = vld [vmem:[#allocation246_spill] sm:$0xff]  ;;  %v2621_v62 = vadd.f32 %v8333_v8, %v1593_v7  ;;  %v3394_v55 = vmul.f32 %v3266_v10, %v3266_v10  ;;  %v1598_v44 = vmul.f32 %v1470_v37, %v1470_v37  ;;  %v8938_v40 = vmul.f32 %v2486_v25, %v2486_v25  ;;  %v12273_v8 = vld [vmem:[#allocation259_spill] sm:$0xff] }
 0x454   : > { %12264 = vst [vmem:[#allocation240_spill] sm:$0xff] %v8926_v59  ;;  %12265 = vst [vmem:[#allocation250_spill] sm:$0xff] %v8928_v43  ;;  %v2488_v11 = vsub.f32 %v12268_v34, %v7778_v42  ;;  %v8940_v35 = vadd.f32 %v3392_v39, %v2620_v58  ;;  %v2624_v31 = vadd.f32 %v8352_v30, %v1596_v2  ;;  %v8945_v0 = vpop.permute.xlu0 %3924  ;;  %v8947_v27 = vpop.permute.xlu1 %3909  ;;  %4945 = vperm.xlu0 %6235, %v589_v50   ;;  %v12275_v58 = vld [vmem:[#allocation247_spill] sm:$0xff]  ;;  %v12276_v30 = vld [vmem:[#allocation258_spill] sm:$0xff] }
 0x455   : > { %12269 = vst [vmem:[#allocation253_spill] sm:$0xff] %v8938_v40  ;;  %v3269_v41 = vsub.f32 %v12270_v14, %v8115_v38  ;;  %12271 = vst [vmem:[#allocation241_spill] sm:$0xff] %v8945_v0  ;;  %v3395_v34 = vmul.f32 %v3267_v36, %v3267_v36  ;;  %v1600_v43 = vmul.f32 %v1472_v45, %v1472_v45  ;;  %4920 = vperm.xlu1 %6236, %v584_v16   ;;  %v12277_v39 = vld [vmem:[#allocation261_spill] sm:$0xff]  ;;  %v591_v14 = vld [vmem:[%s8446_s9 + $0xe8] sm:$0xff] }
 0x456   : > { %12272 = vst [vmem:[#allocation242_spill] sm:$0xff] %v8947_v27  ;;  %v1474_v10 = vsub.f32 %v12273_v8, %v7785_v46  ;;  %v8951_v7 = vmul.f32 %v3388_v28, %v3388_v28  ;;  %v3390_v37 = vsub.f32 %v12275_v58, %v8115_v38  ;;  %v3271_v25 = vsub.f32 %v12276_v30, %v8115_v38  ;;  %v586_v40 = vld [vmem:[%s8446_s9 + $0xc0] sm:$0xff]  ;;  %v12279_v16 = vld [vmem:[#allocation248_spill] sm:$0xff]  ;;  %v12300_v27 = vld [vmem:[#allocation266_spill] sm:$0xff] }
 0x457   : > { %v1476_v2 = vsub.f32 %v12277_v39, %v7785_v46  ;;  %v8961_v36 = vmul.f32 %v2488_v11, %v2488_v11  ;;  %v8964_v45 = vadd.f32 %v8335_v33, %v2621_v62  ;;  %v8967_v50 = vadd.f32 %v3394_v55, %v8346_v57  ;;  %v12282_v62 = vld [vmem:[#allocation10_spill] sm:$0xff]  ;;  %v590_v0 = vld [vmem:[%s8446_s9 + $0xe0] sm:$0xff] }
 0x458   : > { %12274 = vst [vmem:[#allocation243_spill] sm:$0xff] %v8951_v7  ;;  %v2626_v28 = vadd.f32 %v8362_v18, %v1598_v44  ;;  %v2490_v8 = vsub.f32 %v12279_v16, %v7778_v42  ;;  %v4162_v58 = vsub.f32 1.0, %v8940_v35  ;;  %v8974_v30 = vadd.f32 %v8337_v61, %v2624_v31  ;;  %v8976_v39 = vpop.permute.xlu0 %3930  ;;  %v8978_v33 = vpop.permute.xlu1 %3915  ;;  %4955 = vperm.xlu0 %6235, %v591_v14   ;;  %v12284_v16 = vld [vmem:[#allocation260_spill] sm:$0xff]  ;;  %v588_v7 = vld [vmem:[%s8446_s9 + $0xd0] sm:$0xff] }
 0x459   : > { %12278 = vst [vmem:[#allocation252_spill] sm:$0xff] %v8961_v36  ;;  %v3397_v11 = vmul.f32 %v3269_v41, %v3269_v41  ;;  %12280 = vst [vmem:[#allocation255_spill] sm:$0xff] %v8976_v39  ;;  %v8981_v57 = vadd.f32 %v3395_v34, %v12282_v62  ;;  %v2628_v18 = vadd.f32 %v8370_v20, %v1600_v43  ;;  %4930 = vperm.xlu1 %6236, %v586_v40   ;;  %v593_v41 = vld [vmem:[%s8446_s9 + $0xf8] sm:$0xff]  ;;  %v12285_v20 = vld [vmem:[#allocation263_spill] sm:$0xff] }
 0x45a   : > { %12281 = vst [vmem:[#allocation244_spill] sm:$0xff] %v8978_v33  ;;  %v1602_v55 = vmul.f32 %v1474_v10, %v1474_v10  ;;  %v8984_v42 = vmul.f32 %v3390_v37, %v3390_v37  ;;  %v3399_v44 = vmul.f32 %v3271_v25, %v3271_v25  ;;  %v3273_v61 = vsub.f32 %v12284_v16, %v8115_v38  ;;  %v12287_v25 = vld [vmem:[#allocation11_spill] sm:$0xff]  ;;  %v595_v39 = vld [vmem:[%s8446_s9 + $0x108] sm:$0xff] }
 0x45b   : > { %v1604_v31 = vmul.f32 %v1476_v2, %v1476_v2  ;;  %v4163_v36 = vsub.f32 1.0, %v8964_v45  ;;  %v4164_v59 = vsub.f32 1.0, %v8967_v50  ;;  %v8993_v34 = vadd.f32 %v8354_v23, %v2626_v28 }
 0x45c   : > { %12283 = vst [vmem:[#allocation254_spill] sm:$0xff] %v8984_v42  ;;  %v1478_v43 = vsub.f32 %v12285_v20, %v7785_v46  ;;  %v8997_v40 = vmul.f32 %v2490_v8, %v2490_v8  ;;  %v8999_v10 = vmax.f32 %v4162_v58, 0.0  ;;  %v4166_v37 = vsub.f32 1.0, %v8974_v30  ;;  %v9005_v14 = vpop.permute.xlu0 %3936  ;;  %v9007_v62 = vpop.permute.xlu1 %3921  ;;  %v12290_v58 = vld [vmem:[#allocation262_spill] sm:$0xff]  ;;  %4965 = vperm.xlu0 %6235, %v593_v41  }
 0x45d   : > { %v9003_v2 = vadd.f32 %v3397_v11, %v12287_v25  ;;  %12288 = vst [vmem:[#allocation245_spill] sm:$0xff] %v9005_v14  ;;  %12289 = vst [vmem:[#allocation3_spill] sm:$0xff] %v9007_v62  ;;  %v4165_v23 = vsub.f32 1.0, %v8981_v57  ;;  %v9011_v28 = vadd.f32 %v8364_v29, %v2628_v18  ;;  %v2630_v8 = vadd.f32 %v8384_v4, %v1602_v55  ;;  %v12291_v20 = vld [vmem:[#allocation14_spill] sm:$0xff]  ;;  %v12298_v62 = vld [vmem:[#allocation15_spill] sm:$0xff] }
 0x45e   : > { %12286 = vst [vmem:[#allocation257_spill] sm:$0xff] %v8997_v40  ;;  %v3275_v16 = vsub.f32 %v12290_v58, %v8115_v38  ;;  %4940 = vperm.xlu1 %6236, %v588_v7   ;;  %v9017_v42 = vadd.f32 %v3399_v44, %v12291_v20  ;;  %v3401_v11 = vmul.f32 %v3273_v61, %v3273_v61  ;;  %v12292_v40 = vld [vmem:[#allocation265_spill] sm:$0xff]  ;;  %v9024_v29 = vmax.f32 %v4164_v59, 0.0  ;;  %v12293_v44 = vld [vmem:[#allocation264_spill] sm:$0xff] }
 0x45f   : > { %v2632_v25 = vadd.f32 %v8390_v53, %v1604_v31  ;;  %v1480_v14 = vsub.f32 %v12292_v40, %v7785_v46  ;;  %v4168_v4 = vsub.f32 1.0, %v8993_v34  ;;  %v1606_v18 = vmul.f32 %v1478_v43, %v1478_v43  ;;  %v12294_v53 = vld [vmem:[#allocation267_spill] sm:$0xff] }
 0x460   : > { %v9027_v55 = vmax.f32 %v4163_v36, 0.0  ;;  %v4167_v7 = vsub.f32 1.0, %v9003_v2  ;;  %v3277_v61 = vsub.f32 %v12293_v44, %v8115_v38  ;;  %v1482_v31 = vsub.f32 %v12294_v53, %v7785_v46  ;;  %v9036_v40 = vpop.permute.xlu0 %3942  ;;  %v9038_v59 = vpop.permute.xlu1 %3927  ;;  %4975 = vperm.xlu0 %6235, %v595_v39  }
 0x461   : > { %v9034_v41 = vmax.f32 %v4166_v37, 0.0  ;;  %12295 = vst [vmem:[#allocation246_spill] sm:$0xff] %v9036_v40  ;;  %12296 = vst [vmem:[#allocation256_spill] sm:$0xff] %v9038_v59  ;;  %v9040_v58 = vmax.f32 %v4165_v23, 0.0  ;;  %v4170_v36 = vsub.f32 1.0, %v9011_v28  ;;  %v9044_v43 = vadd.f32 %v8382_v3, %v2630_v8  ;;  %v597_v59 = vld [vmem:[%s8446_s9 + $0x118] sm:$0xff] }
 0x462   : > { %v3403_v20 = vmul.f32 %v3275_v16, %v3275_v16  ;;  %4950 = vperm.xlu1 %6236, %v590_v0   ;;  %v4169_v44 = vsub.f32 1.0, %v9017_v42  ;;  %v9048_v53 = vadd.f32 %v3401_v11, %v12298_v62  ;;  %v9051_v37 = vadd.f32 %v8388_v63, %v2632_v25  ;;  %v592_v23 = vld [vmem:[%s8446_s9 + $0xf0] sm:$0xff] }
 0x463   : > { %12297 = vst [vmem:[#allocation259_spill] sm:$0xff] %v9044_v43  ;;  %v1608_v40 = vmul.f32 %v1480_v14, %v1480_v14  ;;  %v2634_v33 = vadd.f32 %v8400_v19, %v1606_v18  ;;  %v3279_v3 = vsub.f32 %v12300_v27, %v8115_v38  ;;  %v12301_v8 = vld [vmem:[#allocation269_spill] sm:$0xff]  ;;  %v9060_v0 = vmax.f32 %v4168_v4, 0.0  ;;  %v12302_v14 = vld [vmem:[#allocation271_spill] sm:$0xff]  ;;  %v12305_v18 = vld [vmem:[#allocation16_spill] sm:$0xff] }
 0x464   : > { %12299 = vst [vmem:[#allocation247_spill] sm:$0xff] %v9051_v37  ;;  %v1484_v39 = vsub.f32 %v12301_v8, %v7785_v46  ;;  %v9062_v16 = vmax.f32 %v4167_v7, 0.0  ;;  %v3405_v62 = vmul.f32 %v3277_v61, %v3277_v61  ;;  %v1610_v63 = vmul.f32 %v1482_v31, %v1482_v31  ;;  %v9066_v25 = vpop.permute.xlu0 %3948  ;;  %v9068_v19 = vpop.permute.xlu1 %3933  ;;  %v12307_v4 = vld [vmem:[#allocation268_spill] sm:$0xff]  ;;  %4985 = vperm.xlu0 %6235, %v597_v59   ;;  %v12310_v59 = vld [vmem:[#allocation19_spill] sm:$0xff] }
 0x465   : > { %v1486_v11 = vsub.f32 %v12302_v14, %v7785_v46  ;;  %12303 = vst [vmem:[#allocation258_spill] sm:$0xff] %v9066_v25  ;;  %12304 = vst [vmem:[#allocation261_spill] sm:$0xff] %v9068_v19  ;;  %v4172_v27 = vsub.f32 1.0, %v9044_v43  ;;  %v9072_v12 = vadd.f32 %v3403_v20, %v12305_v18  ;;  %v3281_v7 = vsub.f32 %v12307_v4, %v8115_v38  ;;  %v599_v19 = vld [vmem:[%s8446_s9 + $0x128] sm:$0xff] }
 0x466   : > { %v9076_v8 = vmax.f32 %v4170_v36, 0.0  ;;  %4960 = vperm.xlu1 %6236, %v592_v23   ;;  %v9078_v61 = vmax.f32 %v4169_v44, 0.0  ;;  %v4171_v31 = vsub.f32 1.0, %v9048_v53  ;;  %v4174_v14 = vsub.f32 1.0, %v9051_v37  ;;  %v12309_v36 = vld [vmem:[#allocation273_spill] sm:$0xff]  ;;  %v12312_v37 = vld [vmem:[#allocation270_spill] sm:$0xff] }
 0x467   : > { %12306 = vst [vmem:[#allocation248_spill] sm:$0xff] %v9072_v12  ;;  %v2636_v25 = vadd.f32 %v8408_v56, %v1608_v40  ;;  %v9086_v20 = vadd.f32 %v8398_v51, %v2634_v33  ;;  %v3407_v18 = vmul.f32 %v3279_v3, %v3279_v3  ;;  %v1612_v1 = vmul.f32 %v1484_v39, %v1484_v39  ;;  %v12315_v39 = vld [vmem:[#allocation275_spill] sm:$0xff] }
 0x468   : > { %v1488_v4 = vsub.f32 %v12309_v36, %v7785_v46  ;;  %v9091_v23 = vadd.f32 %v3405_v62, %v12310_v59  ;;  %v2638_v44 = vadd.f32 %v8418_v47, %v1610_v63  ;;  %v3283_v56 = vsub.f32 %v12312_v37, %v8115_v38  ;;  %v9096_v43 = vpop.permute.xlu0 %3954  ;;  %v9098_v51 = vpop.permute.xlu1 %3939  ;;  %4995 = vperm.xlu0 %6235, %v599_v19   ;;  %v12317_v37 = vld [vmem:[#allocation272_spill] sm:$0xff] }
 0x469   : > { %12308 = vst [vmem:[#allocation10_spill] sm:$0xff] %v9086_v20  ;;  %v1614_v40 = vmul.f32 %v1486_v11, %v1486_v11  ;;  %12313 = vst [vmem:[#allocation263_spill] sm:$0xff] %v9096_v43  ;;  %v4173_v33 = vsub.f32 1.0, %v9072_v12  ;;  %v3409_v3 = vmul.f32 %v3281_v7, %v3281_v7  ;;  %v1490_v36 = vsub.f32 %v12315_v39, %v7785_v46  ;;  %v601_v43 = vld [vmem:[%s8446_s9 + $0x138] sm:$0xff] }
 0x46a   : > { %12311 = vst [vmem:[#allocation260_spill] sm:$0xff] %v9091_v23  ;;  %12314 = vst [vmem:[#allocation11_spill] sm:$0xff] %v9098_v51  ;;  %v9103_v62 = vmax.f32 %v4172_v27, 0.0  ;;  %4970 = vperm.xlu1 %6236, %v594_v5   ;;  %v9105_v47 = vmax.f32 %v4171_v31, 0.0  ;;  %v9108_v63 = vadd.f32 %v8406_v21, %v2636_v25  ;;  %v3285_v11 = vsub.f32 %v12317_v37, %v8115_v38  ;;  %v596_v51 = vld [vmem:[%s8446_s9 + $0x110] sm:$0xff]  ;;  %v12319_v12 = vld [vmem:[#allocation22_spill] sm:$0xff] }
 0x46b   : > { %v9112_v59 = vmax.f32 %v4174_v14, 0.0  ;;  %v4176_v7 = vsub.f32 1.0, %v9086_v20  ;;  %v9118_v39 = vadd.f32 %v3407_v18, %v12319_v12  ;;  %v2640_v19 = vadd.f32 %v8426_v6, %v1612_v1  ;;  %v12324_v12 = vld [vmem:[#allocation23_spill] sm:$0xff]  ;;  %v12326_v6 = vld [vmem:[#allocation274_spill] sm:$0xff] }
 0x46c   : > { %12316 = vst [vmem:[#allocation262_spill] sm:$0xff] %v9108_v63  ;;  %v1616_v5 = vmul.f32 %v1488_v4, %v1488_v4  ;;  %v4175_v27 = vsub.f32 1.0, %v9091_v23  ;;  %v9123_v21 = vadd.f32 %v8410_v24, %v2638_v44  ;;  %v3411_v25 = vmul.f32 %v3283_v56, %v3283_v56  ;;  %v9126_v14 = vpop.permute.xlu0 %3960  ;;  %v9128_v37 = vpop.permute.xlu1 %3945  ;;  %5005 = vperm.xlu0 %6235, %v601_v43  }
 0x46d   : > { %12318 = vst [vmem:[#allocation14_spill] sm:$0xff] %v9112_v59  ;;  %12320 = vst [vmem:[#allocation265_spill] sm:$0xff] %v9118_v39  ;;  %v2642_v31 = vadd.f32 %v8436_v26, %v1614_v40  ;;  %v9130_v20 = vmax.f32 %v4173_v33, 0.0  ;;  %v9133_v18 = vadd.f32 %v3409_v3, %v12324_v12  ;;  %v3287_v1 = vsub.f32 %v12326_v6, %v8115_v38  ;;  %v12327_v26 = vld [vmem:[#allocation276_spill] sm:$0xff]  ;;  %v12328_v40 = vld [vmem:[#allocation277_spill] sm:$0xff] }
 0x46e   : > { %12321 = vst [vmem:[#allocation264_spill] sm:$0xff] %v9123_v21  ;;  %12322 = vst [vmem:[#allocation267_spill] sm:$0xff] %v9126_v14  ;;  %v1618_v4 = vmul.f32 %v1490_v36, %v1490_v36  ;;  %4980 = vperm.xlu1 %6236, %v596_v51   ;;  %v4178_v24 = vsub.f32 1.0, %v9108_v63  ;;  %v3413_v44 = vmul.f32 %v3285_v11, %v3285_v11  ;;  %v603_v33 = vld [vmem:[%s8446_s9 + $0x148] sm:$0xff]  ;;  %v4177_v3 = vsub.f32 1.0, %v9118_v39  ;;  %v600_v59 = vld [vmem:[%s8446_s9 + $0x130] sm:$0xff] }
 0x46f   : > { %12323 = vst [vmem:[#allocation15_spill] sm:$0xff] %v9128_v37  ;;  %12325 = vst [vmem:[#allocation266_spill] sm:$0xff] %v9133_v18  ;;  %v3289_v56 = vsub.f32 %v12327_v26, %v8115_v38  ;;  %v1492_v14 = vsub.f32 %v12328_v40, %v7785_v46  ;;  %v598_v37 = vld [vmem:[%s8446_s9 + $0x120] sm:$0xff]  ;;  %v9146_v12 = vadd.f32 %v8424_v15, %v2640_v19  ;;  %v9149_v43 = vmax.f32 %v4176_v7, 0.0  ;;  %v12332_v6 = vld [vmem:[#allocation24_spill] sm:$0xff] }
 0x470   : > { %v2644_v36 = vadd.f32 %v8460_v49, %v1616_v5  ;;  %v9151_v51 = vmax.f32 %v4175_v27, 0.0  ;;  %v4180_v11 = vsub.f32 1.0, %v9123_v21  ;;  %v9155_v26 = vadd.f32 %v3411_v25, %v12332_v6  ;;  %v12334_v40 = vld [vmem:[#allocation119_spill] sm:$0xff]  ;;  %v9160_v39 = vpop.permute.xlu0 %3966  ;;  %v9162_v15 = vpop.permute.xlu1 %3951  ;;  %v12338_v19 = vld [vmem:[#allocation124_spill] sm:$0xff]  ;;  %5015 = vperm.xlu0 %6235, %v603_v33   ;;  %v12340_v21 = vld [vmem:[#allocation25_spill] sm:$0xff] }
 0x471   : > { %12329 = vst [vmem:[#allocation269_spill] sm:$0xff] %v9146_v12  ;;  %12330 = vst [vmem:[#allocation271_spill] sm:$0xff] %v9149_v43  ;;  %v9158_v63 = vadd.f32 %v12334_v40, %v2642_v31  ;;  %v4179_v49 = vsub.f32 1.0, %v9133_v18  ;;  %v3415_v7 = vmul.f32 %v3287_v1, %v3287_v1  ;;  %v2646_v5 = vadd.f32 %v12338_v19, %v1618_v4  ;;  %v12339_v27 = vld [vmem:[#allocation279_spill] sm:$0xff]  ;;  %v12344_v18 = vld [vmem:[#allocation120_spill] sm:$0xff] }
 0x472   : > { %12331 = vst [vmem:[#allocation16_spill] sm:$0xff] %v9151_v51  ;;  %12333 = vst [vmem:[#allocation268_spill] sm:$0xff] %v9155_v26  ;;  %v1494_v43 = vsub.f32 %v12339_v27, %v7785_v46  ;;  %4990 = vperm.xlu1 %6236, %v598_v37   ;;  %v9169_v25 = vadd.f32 %v3413_v44, %v12340_v21  ;;  %v3417_v6 = vmul.f32 %v3289_v56, %v3289_v56  ;;  %v12346_v19 = vld [vmem:[#allocation278_spill] sm:$0xff] }
 0x473   : > { %12335 = vst [vmem:[#allocation273_spill] sm:$0xff] %v9158_v63  ;;  %12336 = vst [vmem:[#allocation19_spill] sm:$0xff] %v9160_v39  ;;  %v1620_v31 = vmul.f32 %v1492_v14, %v1492_v14  ;;  %v9171_v40 = vmax.f32 %v4178_v24, 0.0  ;;  %v605_v39 = vld [vmem:[%s8446_s9 + $0x158] sm:$0xff]  ;;  %v4182_v1 = vsub.f32 1.0, %v9146_v12  ;;  %v9179_v4 = vadd.f32 %v12344_v18, %v2644_v36  ;;  %v12347_v14 = vld [vmem:[#allocation281_spill] sm:$0xff] }
 0x474   : > { %12337 = vst [vmem:[#allocation270_spill] sm:$0xff] %v9162_v15  ;;  %12341 = vst [vmem:[#allocation275_spill] sm:$0xff] %v9169_v25  ;;  %v9175_v15 = vmax.f32 %v4177_v3, 0.0  ;;  %v3291_v33 = vsub.f32 %v12346_v19, %v8115_v38  ;;  %v4181_v37 = vsub.f32 1.0, %v9155_v26  ;;  %v4184_v21 = vsub.f32 1.0, %v9158_v63  ;;  %v9189_v56 = vpop.permute.xlu0 %3972  ;;  %v9191_v3 = vpop.permute.xlu1 %3957  ;;  %v12352_v36 = vld [vmem:[#allocation26_spill] sm:$0xff]  ;;  %5025 = vperm.xlu0 %6235, %v605_v39  }
 0x475   : > { %12342 = vst [vmem:[#allocation272_spill] sm:$0xff] %v9171_v40  ;;  %12345 = vst [vmem:[#allocation23_spill] sm:$0xff] %v9179_v4  ;;  %v1496_v24 = vsub.f32 %v12347_v14, %v7785_v46  ;;  %v9187_v44 = vmax.f32 %v4180_v11, 0.0  ;;  %v9193_v18 = vmax.f32 %v4179_v49, 0.0  ;;  %v9196_v27 = vadd.f32 %v3415_v7, %v12352_v36  ;;  %v12354_v19 = vld [vmem:[#allocation123_spill] sm:$0xff]  ;;  %v12356_v14 = vld [vmem:[#allocation33_spill] sm:$0xff] }
 0x476   : > { %12343 = vst [vmem:[#allocation22_spill] sm:$0xff] %v9175_v15  ;;  %12349 = vst [vmem:[#allocation276_spill] sm:$0xff] %v9189_v56  ;;  %v9199_v12 = vadd.f32 %v12354_v19, %v2646_v5  ;;  %v1622_v26 = vmul.f32 %v1494_v43, %v1494_v43  ;;  %5000 = vperm.xlu1 %6236, %v600_v59   ;;  %v4183_v63 = vsub.f32 1.0, %v9169_v25  ;;  %v607_v40 = vld [vmem:[%s8446_s9 + $0x168] sm:$0xff]  ;;  %v4186_v7 = vsub.f32 1.0, %v9179_v4  ;;  %v12363_v19 = vld [vmem:[#allocation285_spill] sm:$0xff] }
 0x477   : > { %12348 = vst [vmem:[#allocation274_spill] sm:$0xff] %v9187_v44  ;;  %12350 = vst [vmem:[#allocation277_spill] sm:$0xff] %v9191_v3  ;;  %v9203_v11 = vadd.f32 %v3417_v6, %v12356_v14  ;;  %v12358_v44 = vld [vmem:[#allocation126_spill] sm:$0xff]  ;;  %v12359_v3 = vld [vmem:[#allocation283_spill] sm:$0xff]  ;;  %v3419_v36 = vmul.f32 %v3291_v33, %v3291_v33  ;;  %v9213_v39 = vmax.f32 %v4182_v1, 0.0  ;;  %v9215_v59 = vmax.f32 %v4181_v37, 0.0 }
 0x478   : > { %12351 = vst [vmem:[#allocation24_spill] sm:$0xff] %v9193_v18  ;;  %12353 = vst [vmem:[#allocation119_spill] sm:$0xff] %v9196_v27  ;;  %v2648_v56 = vadd.f32 %v12358_v44, %v1620_v31  ;;  %v1498_v49 = vsub.f32 %v12359_v3, %v7785_v46  ;;  %v602_v18 = vld [vmem:[%s8446_s9 + $0x140] sm:$0xff]  ;;  %v12360_v5 = vld [vmem:[#allocation280_spill] sm:$0xff]  ;;  %v1624_v6 = vmul.f32 %v1496_v24, %v1496_v24  ;;  %v9219_v44 = vmax.f32 %v4184_v21, 0.0  ;;  %v9221_v3 = vpop.permute.xlu0 %3978  ;;  %v9223_v14 = vpop.permute.xlu1 %3963 }
 0x479   : > { %12355 = vst [vmem:[#allocation124_spill] sm:$0xff] %v9199_v12  ;;  %12357 = vst [vmem:[#allocation279_spill] sm:$0xff] %v9203_v11  ;;  %v3293_v43 = vsub.f32 %v12360_v5, %v8115_v38  ;;  %v1500_v31 = vsub.f32 %v12363_v19, %v7785_v46  ;;  %v4185_v33 = vsub.f32 1.0, %v9196_v27  ;;  %v4188_v5 = vsub.f32 1.0, %v9199_v12  ;;  %v12367_v1 = vld [vmem:[#allocation128_spill] sm:$0xff]  ;;  %v12368_v37 = vld [vmem:[#allocation282_spill] sm:$0xff]  ;;  %5035 = vperm.xlu0 %6235, %v607_v40  }
 0x47a   : > { %12361 = vst [vmem:[#allocation25_spill] sm:$0xff] %v9213_v39  ;;  %12362 = vst [vmem:[#allocation120_spill] sm:$0xff] %v9215_v59  ;;  %v2650_v4 = vadd.f32 %v12367_v1, %v1622_v26  ;;  %v3295_v39 = vsub.f32 %v12368_v37, %v8115_v38  ;;  %5010 = vperm.xlu1 %6236, %v602_v18   ;;  %v9230_v24 = vmax.f32 %v4183_v63, 0.0  ;;  %v4187_v21 = vsub.f32 1.0, %v9203_v11  ;;  %v12370_v19 = vld [vmem:[#allocation125_spill] sm:$0xff]  ;;  %v12372_v27 = vld [vmem:[#allocation34_spill] sm:$0xff] }
 0x47b   : > { %12364 = vst [vmem:[#allocation278_spill] sm:$0xff] %v9219_v44  ;;  %12365 = vst [vmem:[#allocation281_spill] sm:$0xff] %v9221_v3  ;;  %v9234_v44 = vadd.f32 %v12370_v19, %v2648_v56  ;;  %v1626_v3 = vmul.f32 %v1498_v49, %v1498_v49  ;;  %v604_v25 = vld [vmem:[%s8446_s9 + $0x150] sm:$0xff]  ;;  %v9239_v59 = vadd.f32 %v3419_v36, %v12372_v27  ;;  %v12374_v26 = vld [vmem:[#allocation287_spill] sm:$0xff]  ;;  %v9243_v37 = vmax.f32 %v4186_v7, 0.0 }
 0x47c   : > { %12366 = vst [vmem:[#allocation26_spill] sm:$0xff] %v9223_v14  ;;  %12369 = vst [vmem:[#allocation123_spill] sm:$0xff] %v9230_v24  ;;  %v609_v14 = vld [vmem:[%s8446_s9 + $0x178] sm:$0xff]  ;;  %v3421_v12 = vmul.f32 %v3293_v43, %v3293_v43  ;;  %v1502_v1 = vsub.f32 %v12374_v26, %v7785_v46  ;;  %v12377_v18 = vld [vmem:[#allocation284_spill] sm:$0xff]  ;;  %v1628_v56 = vmul.f32 %v1500_v31, %v1500_v31  ;;  %v9250_v24 = vpop.permute.xlu0 %3984  ;;  %v9252_v27 = vpop.permute.xlu1 %3969  ;;  %v9254_v36 = vmax.f32 %v4185_v33, 0.0 }
 0x47d   : > { %12371 = vst [vmem:[#allocation33_spill] sm:$0xff] %v9234_v44  ;;  %12373 = vst [vmem:[#allocation126_spill] sm:$0xff] %v9239_v59  ;;  %v12376_v40 = vld [vmem:[#allocation130_spill] sm:$0xff]  ;;  %v3297_v11 = vsub.f32 %v12377_v18, %v8115_v38  ;;  %v12378_v49 = vld [vmem:[#allocation289_spill] sm:$0xff]  ;;  %v3423_v26 = vmul.f32 %v3295_v39, %v3295_v39  ;;  %5045 = vperm.xlu0 %6235, %v609_v14   ;;  %v4190_v31 = vsub.f32 1.0, %v9234_v44 }
 0x47e   : > { %12375 = vst [vmem:[#allocation283_spill] sm:$0xff] %v9243_v37  ;;  %v2652_v63 = vadd.f32 %v12376_v40, %v1624_v6  ;;  %v1504_v19 = vsub.f32 %v12378_v49, %v7785_v46  ;;  %12379 = vst [vmem:[#allocation280_spill] sm:$0xff] %v9250_v24  ;;  %v12382_v43 = vld [vmem:[#allocation127_spill] sm:$0xff]  ;;  %v9259_v6 = vmax.f32 %v4188_v5, 0.0  ;;  %5020 = vperm.xlu1 %6236, %v604_v25   ;;  %v9261_v40 = vmax.f32 %v4187_v21, 0.0  ;;  %v12386_v18 = vld [vmem:[#allocation134_spill] sm:$0xff] }
 0x47f   : > { %12380 = vst [vmem:[#allocation285_spill] sm:$0xff] %v9252_v27  ;;  %12381 = vst [vmem:[#allocation128_spill] sm:$0xff] %v9254_v36  ;;  %v9257_v7 = vadd.f32 %v12382_v43, %v2650_v4  ;;  %v2654_v49 = vadd.f32 %v12386_v18, %v1626_v3  ;;  %v12387_v24 = vld [vmem:[#allocation286_spill] sm:$0xff]  ;;  %v611_v27 = vld [vmem:[%s8446_s9 + $0x188] sm:$0xff]  ;;  %v4189_v36 = vsub.f32 1.0, %v9239_v59  ;;  %v1630_v39 = vmul.f32 %v1502_v1, %v1502_v1 }
 0x480   : > { %12384 = vst [vmem:[#allocation125_spill] sm:$0xff] %v9259_v6  ;;  %12385 = vst [vmem:[#allocation34_spill] sm:$0xff] %v9261_v40  ;;  %v3299_v37 = vsub.f32 %v12387_v24, %v8115_v38  ;;  %v606_v33 = vld [vmem:[%s8446_s9 + $0x160] sm:$0xff]  ;;  %v12390_v14 = vld [vmem:[#allocation288_spill] sm:$0xff]  ;;  %v3425_v44 = vmul.f32 %v3297_v11, %v3297_v11  ;;  %v1632_v24 = vmul.f32 %v1504_v19, %v1504_v19  ;;  %v9279_v6 = vpop.permute.xlu0 %3990  ;;  %v9281_v40 = vpop.permute.xlu1 %3975 }
 0x481   : > { %12383 = vst [vmem:[#allocation282_spill] sm:$0xff] %v9257_v7  ;;  %v12388_v4 = vld [vmem:[#allocation35_spill] sm:$0xff]  ;;  %v3301_v25 = vsub.f32 %v12390_v14, %v8115_v38  ;;  %v12391_v5 = vld [vmem:[#allocation129_spill] sm:$0xff]  ;;  %v12393_v3 = vld [vmem:[#allocation136_spill] sm:$0xff]  ;;  %5055 = vperm.xlu0 %6235, %v611_v27  }
 0x482   : > { %v9271_v43 = vadd.f32 %v3421_v12, %v12388_v4  ;;  %v9276_v21 = vadd.f32 %v12391_v5, %v2652_v63  ;;  %v2656_v18 = vadd.f32 %v12393_v3, %v1628_v56  ;;  %12394 = vst [vmem:[#allocation284_spill] sm:$0xff] %v9279_v6  ;;  %12395 = vst [vmem:[#allocation289_spill] sm:$0xff] %v9281_v40  ;;  %v4192_v12 = vsub.f32 1.0, %v9257_v7  ;;  %v12396_v4 = vld [vmem:[#allocation36_spill] sm:$0xff]  ;;  %v12398_v14 = vld [vmem:[#allocation290_spill] sm:$0xff] }
 0x483   : > { %v9285_v1 = vadd.f32 %v3423_v26, %v12396_v4  ;;  %v3303_v59 = vsub.f32 %v12398_v14, %v8115_v38  ;;  %v12399_v63 = vld [vmem:[#allocation291_spill] sm:$0xff]  ;;  %5030 = vperm.xlu1 %6236, %v606_v33   ;;  %v12400_v11 = vld [vmem:[#allocation132_spill] sm:$0xff]  ;;  %v3427_v19 = vmul.f32 %v3299_v37, %v3299_v37  ;;  %v12402_v3 = vld [vmem:[#allocation293_spill] sm:$0xff]  ;;  %v9296_v40 = vmax.f32 %v4190_v31, 0.0 }
 0x484   : > { %12389 = vst [vmem:[#allocation287_spill] sm:$0xff] %v9271_v43  ;;  %12392 = vst [vmem:[#allocation130_spill] sm:$0xff] %v9276_v21  ;;  %v1506_v5 = vsub.f32 %v12399_v63, %v7785_v46  ;;  %v9292_v56 = vadd.f32 %v12400_v11, %v2654_v49  ;;  %v1508_v6 = vsub.f32 %v12402_v3, %v7785_v46  ;;  %v613_v7 = vld [vmem:[%s8446_s9 + $0x198] sm:$0xff]  ;;  %v608_v26 = vld [vmem:[%s8446_s9 + $0x170] sm:$0xff]  ;;  %v9300_v4 = vmax.f32 %v4189_v36, 0.0  ;;  %v9314_v36 = vpop.permute.xlu1 %3981 }
 0x485   : > { %12397 = vst [vmem:[#allocation127_spill] sm:$0xff] %v9285_v1  ;;  %12403 = vst [vmem:[#allocation286_spill] sm:$0xff] %v9296_v40  ;;  %v4191_v14 = vsub.f32 1.0, %v9271_v43  ;;  %v12405_v15 = vld [vmem:[#allocation138_spill] sm:$0xff]  ;;  %v3429_v63 = vmul.f32 %v3301_v25, %v3301_v25  ;;  %v4194_v27 = vsub.f32 1.0, %v9276_v21  ;;  %v12406_v33 = vld [vmem:[#allocation37_spill] sm:$0xff]  ;;  %v9312_v40 = vpop.permute.xlu0 %3996  ;;  %5065 = vperm.xlu0 %6235, %v613_v7  }
 0x486   : > { %12401 = vst [vmem:[#allocation134_spill] sm:$0xff] %v9292_v56  ;;  %12404 = vst [vmem:[#allocation35_spill] sm:$0xff] %v9300_v4  ;;  %v2658_v23 = vadd.f32 %v12405_v15, %v1630_v39  ;;  %v9306_v49 = vadd.f32 %v3425_v44, %v12406_v33  ;;  %v12408_v37 = vld [vmem:[#allocation135_spill] sm:$0xff]  ;;  %v12410_v31 = vld [vmem:[#allocation142_spill] sm:$0xff]  ;;  %v4193_v43 = vsub.f32 1.0, %v9285_v1  ;;  %v3431_v15 = vmul.f32 %v3303_v59, %v3303_v59 }
 0x487   : > { %v9309_v11 = vadd.f32 %v12408_v37, %v2656_v18  ;;  %v2660_v3 = vadd.f32 %v12410_v31, %v1632_v24  ;;  %12411 = vst [vmem:[#allocation136_spill] sm:$0xff] %v9312_v40  ;;  %12412 = vst [vmem:[#allocation36_spill] sm:$0xff] %v9314_v36  ;;  %v1634_v39 = vmul.f32 %v1506_v5, %v1506_v5  ;;  %v9317_v25 = vmax.f32 %v4192_v12, 0.0  ;;  %v12414_v33 = vld [vmem:[#allocation38_spill] sm:$0xff]  ;;  %v12416_v18 = vld [vmem:[#allocation292_spill] sm:$0xff] }
 0x488   : > { %12407 = vst [vmem:[#allocation288_spill] sm:$0xff] %v9306_v49  ;;  %5040 = vperm.xlu1 %6236, %v608_v26   ;;  %v4196_v44 = vsub.f32 1.0, %v9292_v56  ;;  %v9321_v21 = vadd.f32 %v3427_v19, %v12414_v33  ;;  %v3305_v24 = vsub.f32 %v12416_v18, %v8115_v38  ;;  %v1636_v37 = vmul.f32 %v1508_v6, %v1508_v6  ;;  %v615_v31 = vld [vmem:[%s8446_s9 + $0x1a8] sm:$0xff]  ;;  %v610_v40 = vld [vmem:[%s8446_s9 + $0x180] sm:$0xff]  ;;  %v12418_v1 = vld [vmem:[#allocation137_spill] sm:$0xff]  ;;  %v9344_v56 = vpop.permute.xlu1 %3987 }
 0x489   : > { %12409 = vst [vmem:[#allocation129_spill] sm:$0xff] %v9309_v11  ;;  %12413 = vst [vmem:[#allocation290_spill] sm:$0xff] %v9317_v25  ;;  %v9327_v36 = vmax.f32 %v4191_v14, 0.0  ;;  %v9330_v59 = vadd.f32 %v12418_v1, %v2658_v23  ;;  %v12420_v12 = vld [vmem:[#allocation39_spill] sm:$0xff]  ;;  %v4195_v19 = vsub.f32 1.0, %v9306_v49  ;;  %v4198_v33 = vsub.f32 1.0, %v9309_v11  ;;  %v9342_v14 = vpop.permute.xlu0 %4002  ;;  %5075 = vperm.xlu0 %6235, %v615_v31  }
 0x48a   : > { %12415 = vst [vmem:[#allocation291_spill] sm:$0xff] %v9321_v21  ;;  %v9333_v5 = vadd.f32 %v3429_v63, %v12420_v12  ;;  %v12422_v7 = vld [vmem:[#allocation295_spill] sm:$0xff]  ;;  %v12423_v6 = vld [vmem:[#allocation141_spill] sm:$0xff]  ;;  %12425 = vst [vmem:[#allocation135_spill] sm:$0xff] %v9342_v14  ;;  %v9346_v23 = vmax.f32 %v4194_v27, 0.0  ;;  %v9348_v1 = vmax.f32 %v4193_v43, 0.0 }
 0x48b   : > { %12417 = vst [vmem:[#allocation132_spill] sm:$0xff] %v9327_v36  ;;  %12419 = vst [vmem:[#allocation293_spill] sm:$0xff] %v9330_v59  ;;  %v1510_v26 = vsub.f32 %v12422_v7, %v7785_v46  ;;  %v9340_v18 = vadd.f32 %v12423_v6, %v2660_v3  ;;  %v12429_v63 = vld [vmem:[#allocation40_spill] sm:$0xff]  ;;  %v12432_v49 = vld [vmem:[#allocation294_spill] sm:$0xff]  ;;  %v4197_v3 = vsub.f32 1.0, %v9321_v21  ;;  %v3433_v6 = vmul.f32 %v3305_v24, %v3305_v24 }
 0x48c   : > { %12421 = vst [vmem:[#allocation138_spill] sm:$0xff] %v9333_v5  ;;  %12426 = vst [vmem:[#allocation142_spill] sm:$0xff] %v9344_v56  ;;  %v9351_v12 = vadd.f32 %v3431_v15, %v12429_v63  ;;  %v12431_v7 = vld [vmem:[#allocation144_spill] sm:$0xff]  ;;  %v3307_v36 = vsub.f32 %v12432_v49, %v8115_v38  ;;  %5050 = vperm.xlu1 %6236, %v610_v40   ;;  %v12433_v14 = vld [vmem:[#allocation146_spill] sm:$0xff]  ;;  %v4200_v43 = vsub.f32 1.0, %v9330_v59  ;;  %v4199_v15 = vsub.f32 1.0, %v9333_v5 }
 0x48d   : > { %12424 = vst [vmem:[#allocation37_spill] sm:$0xff] %v9340_v18  ;;  %12427 = vst [vmem:[#allocation38_spill] sm:$0xff] %v9346_v23  ;;  %v2662_v25 = vadd.f32 %v12431_v7, %v1634_v39  ;;  %v2664_v11 = vadd.f32 %v12433_v14, %v1636_v37  ;;  %v617_v56 = vld [vmem:[%s8446_s9 + $0x1b8] sm:$0xff]  ;;  %v612_v27 = vld [vmem:[%s8446_s9 + $0x190] sm:$0xff]  ;;  %v9360_v23 = vmax.f32 %v4196_v44, 0.0  ;;  %v1638_v63 = vmul.f32 %v1510_v26, %v1510_v26  ;;  %v9371_v31 = vpop.permute.xlu0 %4008  ;;  %v9373_v44 = vpop.permute.xlu1 %3993 }
 0x48e   : > { %12428 = vst [vmem:[#allocation292_spill] sm:$0xff] %v9348_v1  ;;  %12430 = vst [vmem:[#allocation137_spill] sm:$0xff] %v9351_v12  ;;  %v12435_v39 = vld [vmem:[#allocation297_spill] sm:$0xff]  ;;  %v9366_v49 = vmax.f32 %v4195_v19, 0.0  ;;  %v4202_v40 = vsub.f32 1.0, %v9340_v18  ;;  %v12437_v24 = vld [vmem:[#allocation296_spill] sm:$0xff]  ;;  %v3435_v19 = vmul.f32 %v3307_v36, %v3307_v36  ;;  %5085 = vperm.xlu0 %6235, %v617_v56  }
 0x48f   : > { %12434 = vst [vmem:[#allocation39_spill] sm:$0xff] %v9360_v23  ;;  %v1512_v7 = vsub.f32 %v12435_v39, %v7785_v46  ;;  %v3309_v37 = vsub.f32 %v12437_v24, %v8115_v38  ;;  %12438 = vst [vmem:[#allocation141_spill] sm:$0xff] %v9371_v31  ;;  %v9375_v14 = vmax.f32 %v4198_v33, 0.0  ;;  %v4201_v26 = vsub.f32 1.0, %v9351_v12  ;;  %v12441_v59 = vld [vmem:[#allocation143_spill] sm:$0xff]  ;;  %v12443_v39 = vld [vmem:[#allocation298_spill] sm:$0xff] }
 0x490   : > { %12436 = vst [vmem:[#allocation295_spill] sm:$0xff] %v9366_v49  ;;  %12439 = vst [vmem:[#allocation40_spill] sm:$0xff] %v9373_v44  ;;  %v9379_v5 = vadd.f32 %v12441_v59, %v2662_v25  ;;  %v1514_v23 = vsub.f32 %v12443_v39, %v7785_v46  ;;  %5060 = vperm.xlu1 %6236, %v612_v27   ;;  %v9383_v18 = vmax.f32 %v4197_v3, 0.0  ;;  %v12445_v24 = vld [vmem:[#allocation41_spill] sm:$0xff]  ;;  %v12449_v33 = vld [vmem:[#allocation299_spill] sm:$0xff]  ;;  %v9395_v59 = vmax.f32 %v4199_v15, 0.0 }
 0x491   : > { %12440 = vst [vmem:[#allocation144_spill] sm:$0xff] %v9375_v14  ;;  %v9386_v21 = vadd.f32 %v3433_v6, %v12445_v24  ;;  %v12447_v31 = vld [vmem:[#allocation145_spill] sm:$0xff]  ;;  %v1516_v12 = vsub.f32 %v12449_v33, %v7785_v46  ;;  %v619_v14 = vld [vmem:[%s8446_s9 + $0x1c8] sm:$0xff]  ;;  %v614_v25 = vld [vmem:[%s8446_s9 + $0x1a0] sm:$0xff]  ;;  %v1640_v39 = vmul.f32 %v1512_v7, %v1512_v7  ;;  %v9398_v56 = vmax.f32 %v4200_v43, 0.0  ;;  %v9404_v24 = vpop.permute.xlu0 %4014  ;;  %v9406_v33 = vpop.permute.xlu1 %3999 }
 0x492   : > { %12442 = vst [vmem:[#allocation294_spill] sm:$0xff] %v9379_v5  ;;  %12444 = vst [vmem:[#allocation146_spill] sm:$0xff] %v9383_v18  ;;  %v9389_v44 = vadd.f32 %v12447_v31, %v2664_v11  ;;  %v12451_v36 = vld [vmem:[#allocation148_spill] sm:$0xff]  ;;  %v3437_v3 = vmul.f32 %v3309_v37, %v3309_v37  ;;  %v12453_v27 = vld [vmem:[#allocation177_spill] sm:$0xff]  ;;  %v9408_v15 = vmax.f32 %v4202_v40, 0.0  ;;  %v4204_v43 = vsub.f32 1.0, %v9379_v5  ;;  %5095 = vperm.xlu0 %6235, %v619_v14  }
 0x493   : > { %12446 = vst [vmem:[#allocation297_spill] sm:$0xff] %v9386_v21  ;;  %12450 = vst [vmem:[#allocation143_spill] sm:$0xff] %v9395_v59  ;;  %v2666_v49 = vadd.f32 %v12451_v36, %v1638_v63  ;;  %v3311_v6 = vsub.f32 %v12453_v27, %v8115_v38  ;;  %v12454_v11 = vld [vmem:[#allocation300_spill] sm:$0xff]  ;;  %v9410_v59 = vmax.f32 %v4201_v26, 0.0  ;;  %v12459_v63 = vld [vmem:[#allocation42_spill] sm:$0xff]  ;;  %v1642_v37 = vmul.f32 %v1514_v23, %v1514_v23 }
 0x494   : > { %12448 = vst [vmem:[#allocation296_spill] sm:$0xff] %v9389_v44  ;;  %12452 = vst [vmem:[#allocation298_spill] sm:$0xff] %v9398_v56  ;;  %v1518_v31 = vsub.f32 %v12454_v11, %v7785_v46  ;;  %v9414_v7 = vadd.f32 %v3435_v19, %v12459_v63  ;;  %5070 = vperm.xlu1 %6236, %v614_v25   ;;  %v4203_v36 = vsub.f32 1.0, %v9386_v21  ;;  %v4206_v27 = vsub.f32 1.0, %v9389_v44  ;;  %v12461_v11 = vld [vmem:[#allocation180_spill] sm:$0xff]  ;;  %v621_v40 = vld [vmem:[%s8446_s9 + $0x1d8] sm:$0xff] }
 0x495   : > { %12455 = vst [vmem:[#allocation41_spill] sm:$0xff] %v9404_v24  ;;  %12456 = vst [vmem:[#allocation145_spill] sm:$0xff] %v9406_v33  ;;  %v3313_v24 = vsub.f32 %v12461_v11, %v8115_v38  ;;  %v1644_v33 = vmul.f32 %v1516_v12, %v1516_v12  ;;  %v12462_v26 = vld [vmem:[#allocation147_spill] sm:$0xff]  ;;  %v12464_v5 = vld [vmem:[#allocation152_spill] sm:$0xff]  ;;  %v3439_v11 = vmul.f32 %v3311_v6, %v3311_v6 }
 0x496   : > { %12457 = vst [vmem:[#allocation299_spill] sm:$0xff] %v9408_v15  ;;  %12458 = vst [vmem:[#allocation148_spill] sm:$0xff] %v9410_v59  ;;  %v616_v15 = vld [vmem:[%s8446_s9 + $0x1b0] sm:$0xff]  ;;  %v9423_v56 = vadd.f32 %v12462_v26, %v2666_v49  ;;  %v2668_v59 = vadd.f32 %v12464_v5, %v1640_v39  ;;  %v12465_v19 = vld [vmem:[#allocation183_spill] sm:$0xff]  ;;  %v1646_v12 = vmul.f32 %v1518_v31, %v1518_v31  ;;  %v9435_v49 = vpop.permute.xlu0 %4020  ;;  %v9437_v26 = vpop.permute.xlu1 %4005  ;;  %v4205_v5 = vsub.f32 1.0, %v9414_v7 }
 0x497   : > { %12460 = vst [vmem:[#allocation177_spill] sm:$0xff] %v9414_v7  ;;  %v3315_v23 = vsub.f32 %v12465_v19, %v8115_v38  ;;  %v12466_v14 = vld [vmem:[#allocation301_spill] sm:$0xff]  ;;  %v12467_v63 = vld [vmem:[#allocation43_spill] sm:$0xff]  ;;  %v12469_v21 = vld [vmem:[#allocation186_spill] sm:$0xff]  ;;  %5105 = vperm.xlu0 %6235, %v621_v40   ;;  %v9445_v6 = vmax.f32 %v4203_v36, 0.0  ;;  %v3441_v31 = vmul.f32 %v3313_v24, %v3313_v24  ;;  %v9450_v51 = vmax.f32 %v4206_v27, 0.0 }
 0x498   : > { %12463 = vst [vmem:[#allocation300_spill] sm:$0xff] %v9423_v56  ;;  %v1520_v25 = vsub.f32 %v12466_v14, %v7785_v46  ;;  %v9431_v44 = vadd.f32 %v3437_v3, %v12467_v63  ;;  %v3317_v18 = vsub.f32 %v12469_v21, %v8115_v38  ;;  %12470 = vst [vmem:[#allocation180_spill] sm:$0xff] %v9435_v49  ;;  %v12472_v39 = vld [vmem:[#allocation154_spill] sm:$0xff]  ;;  %5080 = vperm.xlu1 %6236, %v616_v15   ;;  %v12474_v63 = vld [vmem:[#allocation156_spill] sm:$0xff] }
 0x499   : > { %12471 = vst [vmem:[#allocation147_spill] sm:$0xff] %v9437_v26  ;;  %v2670_v19 = vadd.f32 %v12472_v39, %v1642_v37  ;;  %v12473_v14 = vld [vmem:[#allocation302_spill] sm:$0xff]  ;;  %v9443_v3 = vmax.f32 %v4204_v43, 0.0  ;;  %v2672_v21 = vadd.f32 %v12474_v63, %v1644_v33  ;;  %v623_v4 = vld [vmem:[%s8446_s9 + $0x1e8] sm:$0xff]  ;;  %v618_v49 = vld [vmem:[%s8446_s9 + $0x1c0] sm:$0xff]  ;;  %v4208_v26 = vsub.f32 1.0, %v9423_v56 }
 0x49a   : > { %12468 = vst [vmem:[#allocation42_spill] sm:$0xff] %v9431_v44  ;;  %v1522_v1 = vsub.f32 %v12473_v14, %v7785_v46  ;;  %12475 = vst [vmem:[#allocation152_spill] sm:$0xff] %v9450_v51  ;;  %v12476_v7 = vld [vmem:[#allocation149_spill] sm:$0xff]  ;;  %v3443_v39 = vmul.f32 %v3315_v23, %v3315_v23  ;;  %v1648_v14 = vmul.f32 %v1520_v25, %v1520_v25  ;;  %v4207_v15 = vsub.f32 1.0, %v9431_v44  ;;  %v12478_v43 = vld [vmem:[#allocation44_spill] sm:$0xff]  ;;  %v9461_v63 = vpop.permute.xlu0 %4026  ;;  %v9463_v27 = vpop.permute.xlu1 %4011 }
 0x49b   : > { %v9454_v37 = vadd.f32 %v12476_v7, %v2668_v59  ;;  %v9458_v36 = vadd.f32 %v3439_v11, %v12478_v43  ;;  %v12479_v24 = vld [vmem:[#allocation160_spill] sm:$0xff]  ;;  %v3445_v40 = vmul.f32 %v3317_v18, %v3317_v18  ;;  %12480 = vst [vmem:[#allocation301_spill] sm:$0xff] %v9461_v63  ;;  %12481 = vst [vmem:[#allocation43_spill] sm:$0xff] %v9463_v27  ;;  %v9465_v56 = vmax.f32 %v4205_v5, 0.0  ;;  %v12482_v59 = vld [vmem:[#allocation153_spill] sm:$0xff] }
 0x49c   : > { %v2674_v33 = vadd.f32 %v12479_v24, %v1646_v12  ;;  %v9468_v7 = vadd.f32 %v12482_v59, %v2670_v19  ;;  %v12484_v23 = vld [vmem:[#allocation189_spill] sm:$0xff]  ;;  %v1650_v51 = vmul.f32 %v1522_v1, %v1522_v1  ;;  %5115 = vperm.xlu0 %6235, %v623_v4   ;;  %5090 = vperm.xlu1 %6236, %v618_v49   ;;  %v12485_v11 = vld [vmem:[#allocation51_spill] sm:$0xff]  ;;  %v12489_v24 = vld [vmem:[#allocation192_spill] sm:$0xff]  ;;  %v9489_v49 = vmax.f32 %v4208_v26, 0.0 }
 0x49d   : > { %12477 = vst [vmem:[#allocation183_spill] sm:$0xff] %v9454_v37  ;;  %v3319_v25 = vsub.f32 %v12484_v23, %v8115_v38  ;;  %v9473_v43 = vadd.f32 %v3441_v31, %v12485_v11  ;;  %v12487_v12 = vld [vmem:[#allocation155_spill] sm:$0xff]  ;;  %v3321_v63 = vsub.f32 %v12489_v24, %v8115_v38  ;;  %v625_v19 = vld [vmem:[%s8446_s9 + $0x1f8] sm:$0xff]  ;;  %v620_v59 = vld [vmem:[%s8446_s9 + $0x1d0] sm:$0xff]  ;;  %v4210_v44 = vsub.f32 1.0, %v9454_v37 }
 0x49e   : > { %12483 = vst [vmem:[#allocation186_spill] sm:$0xff] %v9468_v7  ;;  %v9476_v18 = vadd.f32 %v12487_v12, %v2672_v21  ;;  %v12490_v5 = vld [vmem:[#allocation303_spill] sm:$0xff]  ;;  %v12491_v23 = vld [vmem:[#allocation52_spill] sm:$0xff]  ;;  %v2676_v4 = vadd.f32 %v8610_v48, %v1648_v14  ;;  %12493 = vst [vmem:[#allocation149_spill] sm:$0xff] %v9489_v49  ;;  %v9491_v31 = vmax.f32 %v4207_v15, 0.0  ;;  %v4209_v21 = vsub.f32 1.0, %v9458_v36  ;;  %v9500_v37 = vpop.permute.xlu0 %4032 }
 0x49f   : > { %12486 = vst [vmem:[#allocation154_spill] sm:$0xff] %v9473_v43  ;;  %v1524_v27 = vsub.f32 %v12490_v5, %v7785_v46  ;;  %v9486_v1 = vadd.f32 %v3443_v39, %v12491_v23  ;;  %v12494_v11 = vld [vmem:[#allocation157_spill] sm:$0xff]  ;;  %12498 = vst [vmem:[#allocation153_spill] sm:$0xff] %v9500_v37  ;;  %v9502_v39 = vpop.permute.xlu1 %4017  ;;  %v4212_v48 = vsub.f32 1.0, %v9468_v7  ;;  %v3447_v26 = vmul.f32 %v3319_v25, %v3319_v25  ;;  %v627_v49 = vld [vmem:[%s8446_s9 + $0x208] sm:$0xff] }
 0x4a0   : > { %12488 = vst [vmem:[#allocation302_spill] sm:$0xff] %v9476_v18  ;;  %v9495_v12 = vadd.f32 %v12494_v11, %v2674_v33  ;;  %v12496_v24 = vld [vmem:[#allocation53_spill] sm:$0xff]  ;;  %12499 = vst [vmem:[#allocation189_spill] sm:$0xff] %v9502_v39  ;;  %v2678_v14 = vadd.f32 %v8620_v17, %v1650_v51  ;;  %v12500_v15 = vlaneseq  ;;  %5125 = vperm.xlu0 %6235, %v625_v19   ;;  %5100 = vperm.xlu1 %6236, %v620_v59   ;;  %v4211_v33 = vsub.f32 1.0, %v9473_v43  ;;  %v622_v37 = vld [vmem:[%s8446_s9 + $0x1e0] sm:$0xff] }
 0x4a1   : > { %12492 = vst [vmem:[#allocation156_spill] sm:$0xff] %v9486_v1  ;;  %v9498_v5 = vadd.f32 %v3445_v40, %v12496_v24  ;;  %v4214_v11 = vsub.f32 1.0, %v9476_v18  ;;  %v3449_v40 = vmul.f32 %v3321_v63, %v3321_v63  ;;  %v1652_v24 = vmul.f32 %v1524_v27, %v1524_v27  ;;  %v12502_v17 = vld [vmem:[#allocation305_spill] sm:$0xff]  ;;  %v12504_v27 = vld [vmem:[#allocation304_spill] sm:$0xff] }
 0x4a2   : > { %12495 = vst [vmem:[#allocation44_spill] sm:$0xff] %v9495_v12  ;;  %v9507_v23 = vand.u32 127, %v12500_v15  ;;  %v4213_v39 = vsub.f32 1.0, %v9486_v1  ;;  %v9515_v7 = vadd.f32 %v8606_v54, %v2676_v4  ;;  %v1526_v51 = vsub.f32 %v12502_v17, %v7785_v46  ;;  %v4816_v18 = vpop.permute.xlu0 %4815  ;;  %v12506_v54 = vld [vmem:[#allocation54_spill] sm:$0xff] }
 0x4a3   : > { %12497 = vst [vmem:[#allocation160_spill] sm:$0xff] %v9498_v5  ;;  %v9519_v25 = vmax.f32 %v4210_v44, 0.0  ;;  %v9521_v19 = vmax.f32 %v4209_v21, 0.0  ;;  %v4216_v59 = vsub.f32 1.0, %v9495_v12  ;;  %v4215_v63 = vsub.f32 1.0, %v9498_v5  ;;  %v9527_v1 = vpop.permute.xlu1 %4023  ;;  %v12509_v21 = vld [vmem:[#allocation370_spill] sm:$0xff] }
 0x4a4   : > { %12501 = vst [vmem:[#allocation51_spill] sm:$0xff] %v9515_v7  ;;  %v3323_v15 = vsub.f32 %v12504_v27, %v8115_v38  ;;  %12505 = vst [vmem:[#allocation192_spill] sm:$0xff] %v9527_v1  ;;  %v9530_v4 = vadd.f32 %v3447_v26, %v12506_v54  ;;  %v9533_v44 = vadd.f32 %v8612_v32, %v2678_v14  ;;  %5135 = vperm.xlu0 %6235, %v627_v49   ;;  %v12510_v5 = vld [vmem:[#allocation55_spill] sm:$0xff]  ;;  %v624_v26 = vld [vmem:[%s8446_s9 + $0x1f0] sm:$0xff] }
 0x4a5   : > { %12503 = vst [vmem:[#allocation155_spill] sm:$0xff] %v9519_v25  ;;  %vm4034_vm0 = vcmp.eq.s32.totalorder %v12509_v21, %v9507_v23  ;;  %5110 = vperm.xlu1 %6236, %v622_v37   ;;  %v9537_v17 = vmax.f32 %v4212_v48, 0.0  ;;  %v9539_v12 = vmax.f32 %v4211_v33, 0.0  ;;  %v9542_v27 = vadd.f32 %v3449_v40, %v12510_v5  ;;  %v629_v25 = vld [vmem:[%s8446_s9 + $0x218] sm:$0xff]  ;;  %v9564_v5 = vld [vmem:[%s11187_s4] ss:$0 sm:$0xff] }
 0x4a6   : > { %12507 = vst [vmem:[#allocation303_spill] sm:$0xff] %v9530_v4  ;;  %12508 = vst [vmem:[#allocation52_spill] sm:$0xff] %v9533_v44  ;;  %v2680_v1 = vadd.f32 %v8628_v9, %v1652_v24  ;;  %v9547_v54 = vmax.f32 %v4214_v11, 0.0  ;;  %v9549_v32 = vmax.f32 %v4213_v39, 0.0  ;;  %v4218_v14 = vsub.f32 1.0, %v9515_v7  ;;  %v12512_v37 = vld [vmem:[#allocation374_spill] sm:$0xff]  ;;  %v4826_v39 = vpop.permute.xlu0 %4825 }
 0x4a7   : > { %12511 = vst [vmem:[#allocation157_spill] sm:$0xff] %v9542_v27  ;;  %v1654_v43 = vmul.f32 %v1526_v51, %v1526_v51  ;;  %vm4035_vm1 = vcmp.eq.s32.totalorder %v12512_v37, %v9507_v23  ;;  %v9554_v49 = vmax.f32 %v4215_v63, 0.0  ;;  %v3451_v48 = vmul.f32 %v3323_v15, %v3323_v15  ;;  %v9566_v33 = vpop.permute.xlu1 %4029  ;;  %v12515_v51 = vld [vmem:[#allocation372_spill] sm:$0xff] }
 0x4a8   : > { %v4418_v9 = vsel %vm4034_vm0, %v8940_v35, %v8999_v10  ;;  %12513 = vst [vmem:[#allocation53_spill] sm:$0xff] %v9566_v33  ;;  %v9568_v11 = vmax.f32 %v4216_v59, 0.0  ;;  %v4217_v40 = vsub.f32 1.0, %v9530_v4  ;;  %v4220_v24 = vsub.f32 1.0, %v9533_v44  ;;  %v12516_v35 = vld [vmem:[#allocation376_spill] sm:$0xff]  ;;  %5145 = vperm.xlu0 %6235, %v629_v25   ;;  %v12517_v59 = vld [vmem:[#allocation197_spill] sm:$0xff] }
 0x4a9   : > { %vm4037_vm2 = vcmp.eq.s32.totalorder %v12515_v51, %v9507_v23  ;;  %vm4036_vm3 = vcmp.eq.s32.totalorder %v12516_v35, %v9507_v23  ;;  %5120 = vperm.xlu1 %6236, %v624_v26   ;;  %v4219_v10 = vsub.f32 1.0, %v9542_v27  ;;  %v9578_v63 = vadd.f32 %v8622_v13, %v2680_v1  ;;  %v631_v51 = vld [vmem:[%s8446_s9 + $0x228] sm:$0xff]  ;;  %v626_v33 = vld [vmem:[%s8446_s9 + $0x200] sm:$0xff]  ;;  %v12518_v25 = vld [vmem:[#allocation306_spill] sm:$0xff] }
 0x4aa   : > { %12514 = vst [vmem:[#allocation305_spill] sm:$0xff] %v9568_v11  ;;  %v3325_v15 = vsub.f32 %v12517_v59, %v8115_v38  ;;  %v4419_v21 = vsel %vm4035_vm1, %v8964_v45, %v9027_v55  ;;  %v2682_v44 = vadd.f32 %v8632_v22, %v1654_v43  ;;  %v1528_v26 = vsub.f32 %v12518_v25, %v7785_v46  ;;  %v12520_v1 = vld [vmem:[#allocation56_spill] sm:$0xff]  ;;  %v12521_v45 = vld [vmem:[#allocation373_spill] sm:$0xff]  ;;  %v4836_v55 = vpop.permute.xlu0 %4835 }
 0x4ab   : > { %v4680_v7 = vmul.f32 %v9564_v5, %v4418_v9  ;;  %v9593_v13 = vmax.f32 %v4218_v14, 0.0  ;;  %v9596_v59 = vadd.f32 %v3451_v48, %v12520_v1  ;;  %v4421_v37 = vsel %vm4037_vm2, %v8981_v57, %v9040_v58  ;;  %v4811_v43 = vpop.permute.xlu1 %4810  ;;  %v12522_v48 = vld [vmem:[#allocation378_spill] sm:$0xff]  ;;  %v628_v35 = vld [vmem:[%s8446_s9 + $0x210] sm:$0xff] }
 0x4ac   : > { %vm4039_vm4 = vcmp.eq.s32.totalorder %v12521_v45, %v9507_v23  ;;  %v4420_v22 = vsel %vm4036_vm3, %v8967_v50, %v9024_v29  ;;  %v9607_v14 = vmax.f32 %v4217_v40, 0.0  ;;  %vm4038_vm5 = vcmp.eq.s32.totalorder %v12522_v48, %v9507_v23  ;;  %5155 = vperm.xlu0 %6235, %v631_v51   ;;  %v12523_v29 = vld [vmem:[#allocation161_spill] sm:$0xff]  ;;  %v12527_v45 = vld [vmem:[#allocation307_spill] sm:$0xff] }
 0x4ad   : > { %12519 = vst [vmem:[#allocation304_spill] sm:$0xff] %v9593_v13  ;;  %v4681_v9 = vmul.f32 %v9564_v5, %v4419_v21  ;;  %v5448_v25 = vmul.f32 %v4811_v43, %v4680_v7  ;;  %5130 = vperm.xlu1 %6236, %v626_v33   ;;  %v9612_v57 = vmax.f32 %v4219_v10, 0.0  ;;  %v4222_v58 = vsub.f32 1.0, %v9578_v63  ;;  %v633_v13 = vld [vmem:[%s8446_s9 + $0x238] sm:$0xff]  ;;  %v12524_v33 = vld [vmem:[#allocation375_spill] sm:$0xff]  ;;  %v12526_v51 = vld [vmem:[#allocation57_spill] sm:$0xff] }
 0x4ae   : > { %v3453_v1 = vmul.f32 %v3325_v15, %v3325_v15  ;;  %v9617_v50 = vmax.f32 %v4220_v24, 0.0  ;;  %v9620_v40 = vadd.f32 %v12523_v29, %v2682_v44  ;;  %v1656_v27 = vmul.f32 %v1528_v26, %v1528_v26  ;;  %v4846_v24 = vpop.permute.xlu0 %4845  ;;  %v12525_v21 = vld [vmem:[#allocation6_spill] sm:$0xff]  ;;  %v630_v43 = vld [vmem:[%s8446_s9 + $0x220] sm:$0xff] }
 0x4af   : > { %v5449_v11 = vmul.f32 %v4816_v18, %v4681_v9  ;;  %v4682_v4 = vmul.f32 %v9564_v5, %v4420_v22  ;;  %v4423_v7 = vsel %vm4039_vm4, %v9003_v2, %v9062_v16  ;;  %vm4041_vm6 = vcmp.eq.s32.totalorder %v12524_v33, %v9507_v23  ;;  %v4821_v10 = vpop.permute.xlu1 %4820 }
 0x4b0   : > { %v4422_v44 = vsel %vm4038_vm5, %v8974_v30, %v9034_v41  ;;  %v4683_v18 = vmul.f32 %v9564_v5, %v4421_v37  ;;  %v4221_v15 = vsub.f32 1.0, %v9596_v59  ;;  %vm4040_vm7 = vcmp.eq.s32.totalorder %v12525_v21, %v9507_v23  ;;  %5165 = vperm.xlu0 %6235, %v633_v13   ;;  %v12528_v30 = vld [vmem:[#allocation308_spill] sm:$0xff] }
 0x4b1   : > { %v5963_v2 = vadd.f32 %v5449_v11, %v5448_v25  ;;  %v5450_v16 = vmul.f32 %v4821_v10, %v4682_v4  ;;  %5140 = vperm.xlu1 %6236, %v628_v35   ;;  %v9640_v26 = vadd.f32 %v3453_v1, %v12526_v51  ;;  %v3327_v22 = vsub.f32 %v12527_v45, %v8115_v38  ;;  %v635_v37 = vld [vmem:[%s8446_s9 + $0x248] sm:$0xff]  ;;  %v12529_v25 = vld [vmem:[#allocation377_spill] sm:$0xff] }
 0x4b2   : > { %v1530_v41 = vsub.f32 %v12528_v30, %v7785_v46  ;;  %v9648_v48 = vmax.f32 %v4222_v58, 0.0  ;;  %v2684_v9 = vadd.f32 %v8646_v52, %v1656_v27  ;;  %v5451_v29 = vmul.f32 %v4826_v39, %v4683_v18  ;;  %v4856_v39 = vpop.permute.xlu0 %4855  ;;  %v12530_v35 = vld [vmem:[#allocation8_spill] sm:$0xff]  ;;  %v12533_v45 = vld [vmem:[#allocation5_spill] sm:$0xff] }
 0x4b3   : > { %v5964_v11 = vadd.f32 %v5963_v2, %v5450_v16  ;;  %v4684_v4 = vmul.f32 %v9564_v5, %v4422_v44  ;;  %v4425_v13 = vsel %vm4041_vm6, %v9017_v42, %v9078_v61  ;;  %vm4043_vm8 = vcmp.eq.s32.totalorder %v12529_v25, %v9507_v23  ;;  %v4831_v58 = vpop.permute.xlu1 %4830  ;;  %v639_v25 = vld [vmem:[%s8446_s9 + $0x268] sm:$0xff] }
 0x4b4   : > { %v4424_v52 = vsel %vm4040_vm7, %v8993_v34, %v9060_v0  ;;  %v4685_v27 = vmul.f32 %v9564_v5, %v4423_v7  ;;  %v4224_v1 = vsub.f32 1.0, %v9620_v40  ;;  %vm4042_vm9 = vcmp.eq.s32.totalorder %v12530_v35, %v9507_v23  ;;  %5175 = vperm.xlu0 %6235, %v635_v37   ;;  %v637_v34 = vld [vmem:[%s8446_s9 + $0x258] sm:$0xff]  ;;  %v632_v0 = vld [vmem:[%s8446_s9 + $0x230] sm:$0xff]  ;;  %v12531_v7 = vld [vmem:[#allocation164_spill] sm:$0xff] }
 0x4b5   : > { %v5965_v42 = vadd.f32 %v5964_v11, %v5451_v29  ;;  %v5452_v61 = vmul.f32 %v4831_v58, %v4684_v4  ;;  %5150 = vperm.xlu1 %6236, %v630_v43   ;;  %v9668_v33 = vmax.f32 %v4221_v15, 0.0  ;;  %v4223_v44 = vsub.f32 1.0, %v9640_v26  ;;  %v12534_v37 = vld [vmem:[#allocation9_spill] sm:$0xff]  ;;  %v12537_v4 = vld [vmem:[#allocation310_spill] sm:$0xff] }
 0x4b6   : > { %v3455_v18 = vmul.f32 %v3327_v22, %v3327_v22  ;;  %v1658_v10 = vmul.f32 %v1530_v41, %v1530_v41  ;;  %v9674_v21 = vadd.f32 %v12531_v7, %v2684_v9  ;;  %v5453_v2 = vmul.f32 %v4836_v55, %v4685_v27  ;;  %v4866_v30 = vpop.permute.xlu0 %4865  ;;  %v12535_v9 = vld [vmem:[#allocation60_spill] sm:$0xff]  ;;  %v12541_v7 = vld [vmem:[#allocation13_spill] sm:$0xff] }
 0x4b7   : > { %v5966_v16 = vadd.f32 %v5965_v42, %v5452_v61  ;;  %v4686_v51 = vmul.f32 %v9564_v5, %v4424_v52  ;;  %v4427_v15 = vsel %vm4043_vm8, %v9048_v53, %v9105_v47  ;;  %vm4045_vm10 = vcmp.eq.s32.totalorder %v12533_v45, %v9507_v23  ;;  %v4841_v41 = vpop.permute.xlu1 %4840  ;;  %v634_v52 = vld [vmem:[%s8446_s9 + $0x240] sm:$0xff]  ;;  %v12538_v42 = vld [vmem:[#allocation248_spill] sm:$0xff] }
 0x4b8   : > { %12532 = vst [vmem:[#allocation54_spill] sm:$0xff] %v9674_v21  ;;  %v4426_v55 = vsel %vm4042_vm9, %v9011_v28, %v9076_v8  ;;  %v4687_v22 = vmul.f32 %v9564_v5, %v4425_v13  ;;  %vm4044_vm11 = vcmp.eq.s32.totalorder %v12534_v37, %v9507_v23  ;;  %5185 = vperm.xlu0 %6235, %v637_v34   ;;  %v9692_v47 = vmax.f32 %v4224_v1, 0.0  ;;  %v12536_v28 = vld [vmem:[#allocation309_spill] sm:$0xff]  ;;  %v12539_v61 = vld [vmem:[#allocation7_spill] sm:$0xff] }
 0x4b9   : > { %v5967_v43 = vadd.f32 %v5966_v16, %v5453_v2  ;;  %v5454_v53 = vmul.f32 %v4841_v41, %v4686_v51  ;;  %5160 = vperm.xlu1 %6236, %v632_v0   ;;  %v9695_v29 = vadd.f32 %v3455_v18, %v12535_v9  ;;  %v2686_v11 = vadd.f32 %v8656_v60, %v1658_v10  ;;  %v12540_v18 = vld [vmem:[#allocation259_spill] sm:$0xff]  ;;  %v12542_v51 = vld [vmem:[#allocation165_spill] sm:$0xff] }
 0x4ba   : > { %v3329_v8 = vsub.f32 %v12536_v28, %v8115_v38  ;;  %v1532_v13 = vsub.f32 %v12537_v4, %v7785_v46  ;;  %v9704_v27 = vmax.f32 %v4223_v44, 0.0  ;;  %v5455_v58 = vmul.f32 %v4846_v24, %v4687_v22  ;;  %v4876_v10 = vpop.permute.xlu0 %4875  ;;  %v641_v22 = vld [vmem:[%s8446_s9 + $0x278] sm:$0xff]  ;;  %v12544_v41 = vld [vmem:[#allocation311_spill] sm:$0xff]  ;;  %v12545_v28 = vld [vmem:[#allocation16_spill] sm:$0xff] }
 0x4bb   : > { %v5968_v35 = vadd.f32 %v5967_v43, %v5454_v53  ;;  %v4688_v1 = vmul.f32 %v9564_v5, %v4426_v55  ;;  %v4429_v60 = vsel %vm4045_vm10, %v12538_v42, %v9130_v20  ;;  %vm4047_vm12 = vcmp.eq.s32.totalorder %v12539_v61, %v9507_v23  ;;  %v4851_v34 = vpop.permute.xlu1 %4850  ;;  %v12546_v4 = vld [vmem:[#allocation260_spill] sm:$0xff] }
 0x4bc   : > { %v4428_v24 = vsel %vm4044_vm11, %v12540_v18, %v9103_v62  ;;  %v4689_v44 = vmul.f32 %v9564_v5, %v4427_v15  ;;  %v4226_v0 = vsub.f32 1.0, %v9674_v21  ;;  %vm4046_vm13 = vcmp.eq.s32.totalorder %v12541_v7, %v9507_v23  ;;  %5195 = vperm.xlu0 %6235, %v639_v25   ;;  %v636_v15 = vld [vmem:[%s8446_s9 + $0x250] sm:$0xff]  ;;  %v12553_v7 = vld [vmem:[#allocation167_spill] sm:$0xff] }
 0x4bd   : > { %v5969_v20 = vadd.f32 %v5968_v35, %v5455_v58  ;;  %v5456_v2 = vmul.f32 %v4851_v34, %v4688_v1  ;;  %5170 = vperm.xlu1 %6236, %v634_v52   ;;  %v4225_v16 = vsub.f32 1.0, %v9695_v29  ;;  %v9725_v45 = vadd.f32 %v12542_v51, %v2686_v11  ;;  %v12547_v11 = vld [vmem:[#allocation4_spill] sm:$0xff]  ;;  %v12550_v1 = vld [vmem:[#allocation18_spill] sm:$0xff] }
 0x4be   : > { %v3457_v55 = vmul.f32 %v3329_v8, %v3329_v8  ;;  %v1660_v62 = vmul.f32 %v1532_v13, %v1532_v13  ;;  %v3331_v37 = vsub.f32 %v12544_v41, %v8115_v38  ;;  %v5457_v43 = vmul.f32 %v4856_v39, %v4689_v44  ;;  %v12548_v8 = vld [vmem:[#allocation14_spill] sm:$0xff]  ;;  %v12549_v13 = vld [vmem:[#allocation247_spill] sm:$0xff]  ;;  %v4886_v58 = vpop.permute.xlu0 %4885  ;;  %v12551_v44 = vld [vmem:[#allocation61_spill] sm:$0xff] }
 0x4bf   : > { %12543 = vst [vmem:[#allocation370_spill] sm:$0xff] %v9725_v45  ;;  %v5970_v53 = vadd.f32 %v5969_v20, %v5456_v2  ;;  %v4690_v9 = vmul.f32 %v9564_v5, %v4428_v24  ;;  %v4431_v25 = vsel %vm4047_vm12, %v12546_v4, %v12545_v28  ;;  %vm4049_vm14 = vcmp.eq.s32.totalorder %v12547_v11, %v9507_v23  ;;  %v4861_v35 = vpop.permute.xlu1 %4860  ;;  %v643_v51 = vld [vmem:[%s8446_s9 + $0x288] sm:$0xff]  ;;  %v638_v41 = vld [vmem:[%s8446_s9 + $0x260] sm:$0xff]  ;;  %v12560_v11 = vld [vmem:[#allocation21_spill] sm:$0xff] }
 0x4c0   : > { %v4430_v39 = vsel %vm4046_vm13, %v12549_v13, %v12548_v8  ;;  %v4691_v52 = vmul.f32 %v9564_v5, %v4429_v60  ;;  %vm4048_vm15 = vcmp.eq.s32.totalorder %v12550_v1, %v9507_v23  ;;  %5205 = vperm.xlu0 %6235, %v641_v22   ;;  %v9747_v18 = vmax.f32 %v4226_v0, 0.0  ;;  %v12554_v60 = vld [vmem:[#allocation312_spill] sm:$0xff]  ;;  %v12556_v0 = vld [vmem:[#allocation265_spill] sm:$0xff] }
 0x4c1   : > { %v5971_v42 = vadd.f32 %v5970_v53, %v5457_v43  ;;  %v5458_v61 = vmul.f32 %v4861_v35, %v4690_v9  ;;  %5180 = vperm.xlu1 %6236, %v636_v15   ;;  %v9749_v24 = vmax.f32 %v4225_v16, 0.0  ;;  %v9752_v34 = vadd.f32 %v3457_v55, %v12551_v44  ;;  %v12555_v15 = vld [vmem:[#allocation22_spill] sm:$0xff]  ;;  %v12557_v55 = vld [vmem:[#allocation12_spill] sm:$0xff]  ;;  %v12563_v44 = vld [vmem:[#allocation313_spill] sm:$0xff] }
 0x4c2   : > { %v2688_v20 = vadd.f32 %v12553_v7, %v1660_v62  ;;  %v1534_v2 = vsub.f32 %v12554_v60, %v7785_v46  ;;  %v3459_v28 = vmul.f32 %v3331_v37, %v3331_v37  ;;  %v5459_v4 = vmul.f32 %v4866_v30, %v4691_v52  ;;  %v12558_v62 = vld [vmem:[#allocation271_spill] sm:$0xff]  ;;  %v12559_v53 = vld [vmem:[#allocation10_spill] sm:$0xff]  ;;  %v4896_v9 = vpop.permute.xlu0 %4895  ;;  %v640_v60 = vld [vmem:[%s8446_s9 + $0x270] sm:$0xff] }
 0x4c3   : > { %12552 = vst [vmem:[#allocation55_spill] sm:$0xff] %v9752_v34  ;;  %v5972_v43 = vadd.f32 %v5971_v42, %v5458_v61  ;;  %v4692_v22 = vmul.f32 %v9564_v5, %v4430_v39  ;;  %v4433_v16 = vsel %vm4049_vm14, %v12556_v0, %v12555_v15  ;;  %vm4051_vm0 = vcmp.eq.s32.totalorder %v12557_v55, %v9507_v23  ;;  %v4871_v8 = vpop.permute.xlu1 %4870  ;;  %v12561_v42 = vld [vmem:[#allocation166_spill] sm:$0xff] }
 0x4c4   : > { %v4432_v30 = vsel %vm4048_vm15, %v12559_v53, %v12558_v62  ;;  %v4693_v37 = vmul.f32 %v9564_v5, %v4431_v25  ;;  %v4228_v13 = vsub.f32 1.0, %v9725_v45  ;;  %vm4050_vm1 = vcmp.eq.s32.totalorder %v12560_v11, %v9507_v23  ;;  %5215 = vperm.xlu0 %6235, %v643_v51   ;;  %v645_v7 = vld [vmem:[%s8446_s9 + $0x298] sm:$0xff]  ;;  %v12566_v51 = vld [vmem:[#allocation24_spill] sm:$0xff] }
 0x4c5   : > { %v5973_v39 = vadd.f32 %v5972_v43, %v5459_v4  ;;  %v5460_v52 = vmul.f32 %v4871_v8, %v4692_v22  ;;  %5190 = vperm.xlu1 %6236, %v638_v41   ;;  %v4227_v35 = vsub.f32 1.0, %v9752_v34  ;;  %v9778_v61 = vadd.f32 %v12561_v42, %v2688_v20  ;;  %v12564_v15 = vld [vmem:[#allocation66_spill] sm:$0xff]  ;;  %v12569_v43 = vld [vmem:[#allocation272_spill] sm:$0xff] }
 0x4c6   : > { %v1662_v1 = vmul.f32 %v1534_v2, %v1534_v2  ;;  %v3333_v25 = vsub.f32 %v12563_v44, %v8115_v38  ;;  %v9785_v0 = vadd.f32 %v3459_v28, %v12564_v15  ;;  %v5461_v62 = vmul.f32 %v4876_v10, %v4693_v37  ;;  %v12567_v41 = vld [vmem:[#allocation266_spill] sm:$0xff]  ;;  %v12568_v2 = vld [vmem:[#allocation17_spill] sm:$0xff]  ;;  %v12571_v8 = vld [vmem:[#allocation28_spill] sm:$0xff] }
 0x4c7   : > { %12562 = vst [vmem:[#allocation374_spill] sm:$0xff] %v9778_v61  ;;  %v5974_v53 = vadd.f32 %v5973_v39, %v5460_v52  ;;  %v4694_v4 = vmul.f32 %v9564_v5, %v4432_v30  ;;  %v4435_v20 = vsel %vm4051_vm0, %v12567_v41, %v12566_v51  ;;  %vm4053_vm2 = vcmp.eq.s32.totalorder %v12568_v2, %v9507_v23  ;;  %v12570_v22 = vld [vmem:[#allocation262_spill] sm:$0xff]  ;;  %v4906_v30 = vpop.permute.xlu0 %4905  ;;  %v4881_v37 = vpop.permute.xlu1 %4880  ;;  %v12574_v44 = vld [vmem:[#allocation171_spill] sm:$0xff] }
 0x4c8   : > { %12565 = vst [vmem:[#allocation372_spill] sm:$0xff] %v9785_v0  ;;  %v4434_v10 = vsel %vm4050_vm1, %v12570_v22, %v12569_v43  ;;  %v4695_v28 = vmul.f32 %v9564_v5, %v4433_v16  ;;  %vm4052_vm3 = vcmp.eq.s32.totalorder %v12571_v8, %v9507_v23  ;;  %5225 = vperm.xlu0 %6235, %v645_v7   ;;  %v9803_v52 = vmax.f32 %v4228_v13, 0.0  ;;  %v12575_v51 = vld [vmem:[#allocation314_spill] sm:$0xff]  ;;  %v647_v16 = vld [vmem:[%s8446_s9 + $0x2a8] sm:$0xff]  ;;  %v642_v43 = vld [vmem:[%s8446_s9 + $0x280] sm:$0xff] }
 0x4c9   : > { %v5975_v55 = vadd.f32 %v5974_v53, %v5461_v62  ;;  %v5462_v39 = vmul.f32 %v4881_v37, %v4694_v4  ;;  %5200 = vperm.xlu1 %6236, %v640_v60   ;;  %v9805_v42 = vmax.f32 %v4227_v35, 0.0  ;;  %v2690_v15 = vadd.f32 %v12574_v44, %v1662_v1  ;;  %v12576_v7 = vld [vmem:[#allocation120_spill] sm:$0xff]  ;;  %v12579_v1 = vld [vmem:[#allocation274_spill] sm:$0xff] }
 0x4ca   : > { %12572 = vst [vmem:[#allocation376_spill] sm:$0xff] %v9803_v52  ;;  %v3461_v11 = vmul.f32 %v3333_v25, %v3333_v25  ;;  %v1536_v41 = vsub.f32 %v12575_v51, %v7785_v46  ;;  %v4230_v22 = vsub.f32 1.0, %v9778_v61  ;;  %v5463_v45 = vmul.f32 %v4886_v58, %v4695_v28  ;;  %v12577_v60 = vld [vmem:[#allocation268_spill] sm:$0xff]  ;;  %v12581_v2 = vld [vmem:[#allocation30_spill] sm:$0xff]  ;;  %v12584_v51 = vld [vmem:[#allocation67_spill] sm:$0xff] }
 0x4cb   : > { %12573 = vst [vmem:[#allocation197_spill] sm:$0xff] %v9805_v42  ;;  %v5976_v34 = vadd.f32 %v5975_v55, %v5462_v39  ;;  %v4696_v62 = vmul.f32 %v9564_v5, %v4434_v10  ;;  %v4437_v13 = vsel %vm4053_vm2, %v12577_v60, %v12576_v7  ;;  %v12578_v35 = vld [vmem:[#allocation20_spill] sm:$0xff]  ;;  %v4697_v53 = vmul.f32 %v9564_v5, %v4435_v20  ;;  %v4916_v4 = vpop.permute.xlu0 %4915  ;;  %v4891_v10 = vpop.permute.xlu1 %4890  ;;  %v12582_v39 = vld [vmem:[#allocation170_spill] sm:$0xff]  ;;  %v12586_v20 = vld [vmem:[#allocation315_spill] sm:$0xff] }
 0x4cc   : > { %vm4055_vm4 = vcmp.eq.s32.totalorder %v12578_v35, %v9507_v23  ;;  %v12580_v25 = vld [vmem:[#allocation264_spill] sm:$0xff]  ;;  %v4229_v28 = vsub.f32 1.0, %v9785_v0  ;;  %vm4054_vm5 = vcmp.eq.s32.totalorder %v12581_v2, %v9507_v23  ;;  %5235 = vperm.xlu0 %6235, %v647_v16   ;;  %v9831_v44 = vadd.f32 %v12582_v39, %v2690_v15  ;;  %v12588_v16 = vld [vmem:[#allocation123_spill] sm:$0xff]  ;;  %v12596_v2 = vld [vmem:[#allocation173_spill] sm:$0xff] }
 0x4cd   : > { %v4436_v58 = vsel %vm4052_vm3, %v12580_v25, %v12579_v1  ;;  %v5977_v37 = vadd.f32 %v5976_v34, %v5463_v45  ;;  %v5464_v55 = vmul.f32 %v4891_v10, %v4696_v62  ;;  %5210 = vperm.xlu1 %6236, %v642_v43   ;;  %v9834_v8 = vadd.f32 %v3461_v11, %v12584_v51  ;;  %v649_v1 = vld [vmem:[%s8446_s9 + $0x2b8] sm:$0xff]  ;;  %v644_v25 = vld [vmem:[%s8446_s9 + $0x290] sm:$0xff]  ;;  %v12587_v61 = vld [vmem:[#allocation316_spill] sm:$0xff] }
 0x4ce   : > { %12583 = vst [vmem:[#allocation306_spill] sm:$0xff] %v9831_v44  ;;  %v1664_v7 = vmul.f32 %v1536_v41, %v1536_v41  ;;  %v3335_v60 = vsub.f32 %v12586_v20, %v8115_v38  ;;  %v1538_v0 = vsub.f32 %v12587_v61, %v7785_v46  ;;  %v5465_v52 = vmul.f32 %v4896_v9, %v4697_v53  ;;  %v12589_v43 = vld [vmem:[#allocation275_spill] sm:$0xff]  ;;  %v12591_v41 = vld [vmem:[#allocation25_spill] sm:$0xff]  ;;  %v12593_v10 = vld [vmem:[#allocation32_spill] sm:$0xff] }
 0x4cf   : > { %12585 = vst [vmem:[#allocation56_spill] sm:$0xff] %v9834_v8  ;;  %v5978_v45 = vadd.f32 %v5977_v37, %v5464_v55  ;;  %v4698_v34 = vmul.f32 %v9564_v5, %v4436_v58  ;;  %v4439_v15 = vsel %vm4055_vm4, %v12589_v43, %v12588_v16  ;;  %v12590_v11 = vld [vmem:[#allocation27_spill] sm:$0xff]  ;;  %v12592_v62 = vld [vmem:[#allocation269_spill] sm:$0xff]  ;;  %v4699_v61 = vmul.f32 %v9564_v5, %v4437_v13  ;;  %v4926_v58 = vpop.permute.xlu0 %4925  ;;  %v4901_v53 = vpop.permute.xlu1 %4900  ;;  %v651_v43 = vld [vmem:[%s8446_s9 + $0x2c8] sm:$0xff] }
 0x4d0   : > { %vm4057_vm6 = vcmp.eq.s32.totalorder %v12590_v11, %v9507_v23  ;;  %v4438_v9 = vsel %vm4054_vm5, %v12592_v62, %v12591_v41  ;;  %vm4056_vm7 = vcmp.eq.s32.totalorder %v12593_v10, %v9507_v23  ;;  %5245 = vperm.xlu0 %6235, %v649_v1   ;;  %v9858_v55 = vmax.f32 %v4230_v22, 0.0  ;;  %v646_v13 = vld [vmem:[%s8446_s9 + $0x2a0] sm:$0xff]  ;;  %v12600_v1 = vld [vmem:[#allocation278_spill] sm:$0xff] }
 0x4d1   : > { %v5979_v35 = vadd.f32 %v5978_v45, %v5465_v52  ;;  %v5466_v37 = vmul.f32 %v4901_v53, %v4698_v34  ;;  %5220 = vperm.xlu1 %6236, %v644_v25   ;;  %v9860_v39 = vmax.f32 %v4229_v28, 0.0  ;;  %v4232_v51 = vsub.f32 1.0, %v9831_v44  ;;  %v12597_v52 = vld [vmem:[#allocation128_spill] sm:$0xff]  ;;  %v12598_v45 = vld [vmem:[#allocation119_spill] sm:$0xff]  ;;  %v12599_v28 = vld [vmem:[#allocation29_spill] sm:$0xff] }
 0x4d2   : > { %12594 = vst [vmem:[#allocation373_spill] sm:$0xff] %v9858_v55  ;;  %v2692_v20 = vadd.f32 %v12596_v2, %v1664_v7  ;;  %v3463_v16 = vmul.f32 %v3335_v60, %v3335_v60  ;;  %v1666_v41 = vmul.f32 %v1538_v0, %v1538_v0  ;;  %v5467_v62 = vmul.f32 %v4906_v30, %v4699_v61  ;;  %v12601_v7 = vld [vmem:[#allocation273_spill] sm:$0xff]  ;;  %v12602_v11 = vld [vmem:[#allocation46_spill] sm:$0xff]  ;;  %v12603_v53 = vld [vmem:[#allocation172_spill] sm:$0xff] }
 0x4d3   : > { %12595 = vst [vmem:[#allocation378_spill] sm:$0xff] %v9860_v39  ;;  %v5980_v42 = vadd.f32 %v5979_v35, %v5466_v37  ;;  %v4700_v21 = vmul.f32 %v9564_v5, %v4438_v9  ;;  %v4441_v22 = vsel %vm4057_vm6, %v12598_v45, %v12597_v52  ;;  %vm4059_vm8 = vcmp.eq.s32.totalorder %v12599_v28, %v9507_v23  ;;  %v4936_v60 = vpop.permute.xlu0 %4935  ;;  %v4911_v25 = vpop.permute.xlu1 %4910  ;;  %v12605_v37 = vld [vmem:[#allocation68_spill] sm:$0xff]  ;;  %v12607_v2 = vld [vmem:[#allocation317_spill] sm:$0xff]  ;;  %v12608_v52 = vld [vmem:[#allocation318_spill] sm:$0xff] }
 0x4d4   : > { %v4440_v0 = vsel %vm4056_vm7, %v12601_v7, %v12600_v1  ;;  %v4701_v30 = vmul.f32 %v9564_v5, %v4439_v15  ;;  %v4231_v34 = vsub.f32 1.0, %v9834_v8  ;;  %vm4058_vm9 = vcmp.eq.s32.totalorder %v12602_v11, %v9507_v23  ;;  %5255 = vperm.xlu0 %6235, %v651_v43   ;;  %v653_v1 = vld [vmem:[%s8446_s9 + $0x2d8] sm:$0xff]  ;;  %v648_v7 = vld [vmem:[%s8446_s9 + $0x2b0] sm:$0xff]  ;;  %v12609_v44 = vld [vmem:[#allocation175_spill] sm:$0xff] }
 0x4d5   : > { %v5981_v9 = vadd.f32 %v5980_v42, %v5467_v62  ;;  %v5468_v61 = vmul.f32 %v4911_v25, %v4700_v21  ;;  %5230 = vperm.xlu1 %6236, %v646_v13   ;;  %v9884_v35 = vadd.f32 %v12603_v53, %v2692_v20  ;;  %v9887_v10 = vadd.f32 %v3463_v16, %v12605_v37  ;;  %v12610_v13 = vld [vmem:[#allocation34_spill] sm:$0xff]  ;;  %v12611_v20 = vld [vmem:[#allocation279_spill] sm:$0xff] }
 0x4d6   : > { %v3337_v15 = vsub.f32 %v12607_v2, %v8115_v38  ;;  %v1540_v45 = vsub.f32 %v12608_v52, %v7785_v46  ;;  %v2694_v8 = vadd.f32 %v12609_v44, %v1666_v41  ;;  %v5469_v42 = vmul.f32 %v4916_v4, %v4701_v30  ;;  %v12612_v62 = vld [vmem:[#allocation31_spill] sm:$0xff]  ;;  %v12615_v30 = vld [vmem:[#allocation48_spill] sm:$0xff] }
 0x4d7   : > { %12604 = vst [vmem:[#allocation161_spill] sm:$0xff] %v9884_v35  ;;  %12606 = vst [vmem:[#allocation375_spill] sm:$0xff] %v9887_v10  ;;  %v5982_v21 = vadd.f32 %v5981_v9, %v5468_v61  ;;  %v4702_v43 = vmul.f32 %v9564_v5, %v4440_v0  ;;  %v4443_v16 = vsel %vm4059_vm8, %v12611_v20, %v12610_v13  ;;  %v12613_v25 = vld [vmem:[#allocation283_spill] sm:$0xff]  ;;  %v4946_v41 = vpop.permute.xlu0 %4945  ;;  %v4921_v0 = vpop.permute.xlu1 %4920  ;;  %v9912_v61 = vmax.f32 %v4232_v51, 0.0  ;;  %v655_v13 = vld [vmem:[%s8446_s9 + $0x2e8] sm:$0xff] }
 0x4d8   : > { %vm4061_vm10 = vcmp.eq.s32.totalorder %v12612_v62, %v9507_v23  ;;  %v12614_v53 = vld [vmem:[#allocation23_spill] sm:$0xff]  ;;  %v4703_v44 = vmul.f32 %v9564_v5, %v4441_v22  ;;  %vm4060_vm11 = vcmp.eq.s32.totalorder %v12615_v30, %v9507_v23  ;;  %5265 = vperm.xlu0 %6235, %v653_v1   ;;  %v9914_v37 = vmax.f32 %v4231_v34, 0.0  ;;  %v12618_v22 = vld [vmem:[#allocation174_spill] sm:$0xff]  ;;  %v12622_v34 = vld [vmem:[#allocation45_spill] sm:$0xff] }
 0x4d9   : > { %v4442_v4 = vsel %vm4058_vm9, %v12614_v53, %v12613_v25  ;;  %v5983_v28 = vadd.f32 %v5982_v21, %v5469_v42  ;;  %v5470_v9 = vmul.f32 %v4921_v0, %v4702_v43  ;;  %5240 = vperm.xlu1 %6236, %v648_v7   ;;  %12616 = vst [vmem:[#allocation6_spill] sm:$0xff] %v9912_v61  ;;  %v4234_v2 = vsub.f32 1.0, %v9884_v35  ;;  %v650_v20 = vld [vmem:[%s8446_s9 + $0x2c0] sm:$0xff]  ;;  %v12621_v1 = vld [vmem:[#allocation126_spill] sm:$0xff]  ;;  %v12628_v30 = vld [vmem:[#allocation320_spill] sm:$0xff] }
 0x4da   : > { %12617 = vst [vmem:[#allocation57_spill] sm:$0xff] %v9914_v37  ;;  %v3465_v11 = vmul.f32 %v3337_v15, %v3337_v15  ;;  %v1668_v52 = vmul.f32 %v1540_v45, %v1540_v45  ;;  %v9920_v25 = vadd.f32 %v12618_v22, %v2694_v8  ;;  %v5471_v53 = vmul.f32 %v4926_v58, %v4703_v44  ;;  %v12620_v21 = vld [vmem:[#allocation35_spill] sm:$0xff]  ;;  %v12623_v15 = vld [vmem:[#allocation125_spill] sm:$0xff]  ;;  %v12624_v45 = vld [vmem:[#allocation124_spill] sm:$0xff] }
 0x4db   : > { %v5984_v55 = vadd.f32 %v5983_v28, %v5470_v9  ;;  %v4704_v42 = vmul.f32 %v9564_v5, %v4442_v4  ;;  %v4445_v51 = vsel %vm4061_vm10, %v12621_v1, %v12620_v21  ;;  %vm4063_vm12 = vcmp.eq.s32.totalorder %v12622_v34, %v9507_v23  ;;  %v4956_v7 = vpop.permute.xlu0 %4955  ;;  %v4931_v43 = vpop.permute.xlu1 %4930  ;;  %v12625_v62 = vld [vmem:[#allocation50_spill] sm:$0xff]  ;;  %v12627_v22 = vld [vmem:[#allocation319_spill] sm:$0xff]  ;;  %v12630_v35 = vld [vmem:[#allocation69_spill] sm:$0xff] }
 0x4dc   : > { %12619 = vst [vmem:[#allocation307_spill] sm:$0xff] %v9920_v25  ;;  %v4444_v8 = vsel %vm4060_vm11, %v12624_v45, %v12623_v15  ;;  %v4705_v58 = vmul.f32 %v9564_v5, %v4443_v16  ;;  %v4233_v4 = vsub.f32 1.0, %v9887_v10  ;;  %vm4062_vm13 = vcmp.eq.s32.totalorder %v12625_v62, %v9507_v23  ;;  %5275 = vperm.xlu0 %6235, %v655_v13   ;;  %v12626_v28 = vld [vmem:[#allocation178_spill] sm:$0xff]  ;;  %v652_v15 = vld [vmem:[%s8446_s9 + $0x2d0] sm:$0xff]  ;;  %v12638_v34 = vld [vmem:[#allocation59_spill] sm:$0xff] }
 0x4dd   : > { %v5985_v44 = vadd.f32 %v5984_v55, %v5471_v53  ;;  %v5472_v0 = vmul.f32 %v4931_v43, %v4704_v42  ;;  %5250 = vperm.xlu1 %6236, %v650_v20   ;;  %v2696_v9 = vadd.f32 %v12626_v28, %v1668_v52  ;;  %v3339_v21 = vsub.f32 %v12627_v22, %v8115_v38  ;;  %v657_v16 = vld [vmem:[%s8446_s9 + $0x2f8] sm:$0xff]  ;;  %v12632_v20 = vld [vmem:[#allocation132_spill] sm:$0xff]  ;;  %v12633_v53 = vld [vmem:[#allocation287_spill] sm:$0xff] }
 0x4de   : > { %v1542_v1 = vsub.f32 %v12628_v30, %v7785_v46  ;;  %v9946_v45 = vmax.f32 %v4234_v2, 0.0  ;;  %v9949_v10 = vadd.f32 %v3465_v11, %v12630_v35  ;;  %v5473_v61 = vmul.f32 %v4936_v60, %v4705_v58  ;;  %v12634_v42 = vld [vmem:[#allocation47_spill] sm:$0xff]  ;;  %v12635_v43 = vld [vmem:[#allocation286_spill] sm:$0xff]  ;;  %v12636_v2 = vld [vmem:[#allocation33_spill] sm:$0xff] }
 0x4df   : > { %v5986_v55 = vadd.f32 %v5985_v44, %v5472_v0  ;;  %v4706_v13 = vmul.f32 %v9564_v5, %v4444_v8  ;;  %v4447_v52 = vsel %vm4063_vm12, %v12633_v53, %v12632_v20  ;;  %vm4065_vm14 = vcmp.eq.s32.totalorder %v12634_v42, %v9507_v23  ;;  %v4966_v11 = vpop.permute.xlu0 %4965  ;;  %v4941_v8 = vpop.permute.xlu1 %4940  ;;  %v12639_v22 = vld [vmem:[#allocation176_spill] sm:$0xff] }
 0x4e0   : > { %12629 = vst [vmem:[#allocation308_spill] sm:$0xff] %v9946_v45  ;;  %12631 = vst [vmem:[#allocation377_spill] sm:$0xff] %v9949_v10  ;;  %v4446_v60 = vsel %vm4062_vm13, %v12636_v2, %v12635_v43  ;;  %v4707_v35 = vmul.f32 %v9564_v5, %v4445_v51  ;;  %v9965_v58 = vmax.f32 %v4233_v4, 0.0  ;;  %vm4064_vm15 = vcmp.eq.s32.totalorder %v12638_v34, %v9507_v23  ;;  %v659_v53 = vld [vmem:[%s8446_s9 + $0x308] sm:$0xff]  ;;  %v654_v51 = vld [vmem:[%s8446_s9 + $0x2e0] sm:$0xff] }
 0x4e1   : > { %v5987_v44 = vadd.f32 %v5986_v55, %v5473_v61  ;;  %v5474_v0 = vmul.f32 %v4941_v8, %v4706_v13  ;;  %5285 = vperm.xlu0 %6235, %v657_v16   ;;  %5260 = vperm.xlu1 %6236, %v652_v15   ;;  %v4236_v28 = vsub.f32 1.0, %v9920_v25  ;;  %v9971_v30 = vadd.f32 %v12639_v22, %v2696_v9  ;;  %v12641_v43 = vld [vmem:[#allocation321_spill] sm:$0xff]  ;;  %v12643_v16 = vld [vmem:[#allocation290_spill] sm:$0xff]  ;;  %v12646_v55 = vld [vmem:[#allocation127_spill] sm:$0xff] }
 0x4e2   : > { %12637 = vst [vmem:[#allocation8_spill] sm:$0xff] %v9965_v58  ;;  %v3467_v62 = vmul.f32 %v3339_v21, %v3339_v21  ;;  %v1670_v20 = vmul.f32 %v1542_v1, %v1542_v1  ;;  %v3341_v4 = vsub.f32 %v12641_v43, %v8115_v38  ;;  %v5475_v2 = vmul.f32 %v4946_v41, %v4707_v35  ;;  %v12642_v61 = vld [vmem:[#allocation49_spill] sm:$0xff]  ;;  %v12644_v15 = vld [vmem:[#allocation282_spill] sm:$0xff]  ;;  %v12645_v1 = vld [vmem:[#allocation292_spill] sm:$0xff] }
 0x4e3   : > { %12640 = vst [vmem:[#allocation164_spill] sm:$0xff] %v9971_v30  ;;  %v5988_v45 = vadd.f32 %v5987_v44, %v5474_v0  ;;  %v4708_v58 = vmul.f32 %v9564_v5, %v4446_v60  ;;  %vm4067_vm0 = vcmp.eq.s32.totalorder %v12642_v61, %v9507_v23  ;;  %v4448_v9 = vsel %vm4064_vm15, %v12644_v15, %v12643_v16  ;;  %v4976_v13 = vpop.permute.xlu0 %4975  ;;  %v4951_v60 = vpop.permute.xlu1 %4950  ;;  %v12647_v8 = vld [vmem:[#allocation63_spill] sm:$0xff]  ;;  %v12648_v34 = vld [vmem:[#allocation70_spill] sm:$0xff] }
 0x4e4   : > { %v4709_v21 = vmul.f32 %v9564_v5, %v4447_v52  ;;  %v4449_v41 = vsel %vm4065_vm14, %v12646_v55, %v12645_v1  ;;  %v4235_v35 = vsub.f32 1.0, %v9949_v10  ;;  %vm4066_vm1 = vcmp.eq.s32.totalorder %v12647_v8, %v9507_v23  ;;  %v12650_v52 = vld [vmem:[#allocation184_spill] sm:$0xff]  ;;  %v12651_v16 = vld [vmem:[#allocation322_spill] sm:$0xff]  ;;  %v656_v1 = vld [vmem:[%s8446_s9 + $0x2f0] sm:$0xff] }
 0x4e5   : > { %v5989_v44 = vadd.f32 %v5988_v45, %v5475_v2  ;;  %v5476_v0 = vmul.f32 %v4951_v60, %v4708_v58  ;;  %5295 = vperm.xlu0 %6235, %v659_v53   ;;  %5270 = vperm.xlu1 %6236, %v654_v51   ;;  %v9995_v22 = vadd.f32 %v3467_v62, %v12648_v34  ;;  %v661_v15 = vld [vmem:[%s8446_s9 + $0x318] sm:$0xff]  ;;  %v10002_v55 = vmax.f32 %v4236_v28, 0.0  ;;  %v12654_v53 = vld [vmem:[#allocation295_spill] sm:$0xff]  ;;  %v12658_v60 = vld [vmem:[#allocation65_spill] sm:$0xff] }
 0x4e6   : > { %v2698_v43 = vadd.f32 %v12650_v52, %v1670_v20  ;;  %v1544_v42 = vsub.f32 %v12651_v16, %v7785_v46  ;;  %v3469_v25 = vmul.f32 %v3341_v4, %v3341_v4  ;;  %v5477_v10 = vmul.f32 %v4956_v7, %v4709_v21  ;;  %v12653_v58 = vld [vmem:[#allocation58_spill] sm:$0xff]  ;;  %v12655_v20 = vld [vmem:[#allocation288_spill] sm:$0xff]  ;;  %v12660_v34 = vld [vmem:[#allocation179_spill] sm:$0xff] }
 0x4e7   : > { %12649 = vst [vmem:[#allocation5_spill] sm:$0xff] %v9995_v22  ;;  %12652 = vst [vmem:[#allocation9_spill] sm:$0xff] %v10002_v55  ;;  %v5990_v37 = vadd.f32 %v5989_v44, %v5476_v0  ;;  %v4710_v45 = vmul.f32 %v9564_v5, %v4448_v9  ;;  %vm4069_vm2 = vcmp.eq.s32.totalorder %v12653_v58, %v9507_v23  ;;  %v4986_v28 = vpop.permute.xlu0 %4985  ;;  %v4961_v2 = vpop.permute.xlu1 %4960  ;;  %v12656_v4 = vld [vmem:[#allocation38_spill] sm:$0xff]  ;;  %v4238_v21 = vsub.f32 1.0, %v9971_v30  ;;  %v658_v8 = vld [vmem:[%s8446_s9 + $0x300] sm:$0xff] }
 0x4e8   : > { %v4711_v62 = vmul.f32 %v9564_v5, %v4449_v41  ;;  %v4451_v51 = vsel %vm4067_vm0, %v12655_v20, %v12654_v53  ;;  %v12657_v7 = vld [vmem:[#allocation130_spill] sm:$0xff]  ;;  %vm4068_vm3 = vcmp.eq.s32.totalorder %v12658_v60, %v9507_v23  ;;  %v10021_v61 = vmax.f32 %v4235_v35, 0.0  ;;  %v663_v53 = vld [vmem:[%s8446_s9 + $0x328] sm:$0xff]  ;;  %v12662_v20 = vld [vmem:[#allocation71_spill] sm:$0xff] }
 0x4e9   : > { %v4450_v9 = vsel %vm4066_vm1, %v12657_v7, %v12656_v4  ;;  %v5991_v41 = vadd.f32 %v5990_v37, %v5477_v10  ;;  %v5478_v44 = vmul.f32 %v4961_v2, %v4710_v45  ;;  %5305 = vperm.xlu0 %6235, %v661_v15   ;;  %5280 = vperm.xlu1 %6236, %v656_v1   ;;  %v4237_v0 = vsub.f32 1.0, %v9995_v22  ;;  %v12664_v37 = vld [vmem:[#allocation62_spill] sm:$0xff]  ;;  %v12666_v1 = vld [vmem:[#allocation291_spill] sm:$0xff]  ;;  %v12669_v2 = vld [vmem:[#allocation73_spill] sm:$0xff] }
 0x4ea   : > { %12659 = vst [vmem:[#allocation60_spill] sm:$0xff] %v10021_v61  ;;  %v10025_v52 = vadd.f32 %v12660_v34, %v2698_v43  ;;  %v1672_v16 = vmul.f32 %v1544_v42, %v1544_v42  ;;  %v10030_v4 = vadd.f32 %v3469_v25, %v12662_v20  ;;  %v5479_v7 = vmul.f32 %v4966_v11, %v4711_v62  ;;  %v12665_v15 = vld [vmem:[#allocation146_spill] sm:$0xff]  ;;  %v12667_v45 = vld [vmem:[#allocation39_spill] sm:$0xff] }
 0x4eb   : > { %v5992_v30 = vadd.f32 %v5991_v41, %v5478_v44  ;;  %v4712_v10 = vmul.f32 %v9564_v5, %v4450_v9  ;;  %vm4071_vm4 = vcmp.eq.s32.totalorder %v12664_v37, %v9507_v23  ;;  %v4713_v35 = vmul.f32 %v9564_v5, %v4451_v51  ;;  %v4996_v42 = vpop.permute.xlu0 %4995  ;;  %v4971_v25 = vpop.permute.xlu1 %4970  ;;  %v12668_v11 = vld [vmem:[#allocation134_spill] sm:$0xff]  ;;  %v12672_v44 = vld [vmem:[#allocation187_spill] sm:$0xff]  ;;  %v12681_v37 = vld [vmem:[#allocation185_spill] sm:$0xff] }
 0x4ec   : > { %12661 = vst [vmem:[#allocation309_spill] sm:$0xff] %v10025_v52  ;;  %12663 = vst [vmem:[#allocation310_spill] sm:$0xff] %v10030_v4  ;;  %v4453_v43 = vsel %vm4069_vm2, %v12666_v1, %v12665_v15  ;;  %v4452_v62 = vsel %vm4068_vm3, %v12668_v11, %v12667_v45  ;;  %vm4070_vm5 = vcmp.eq.s32.totalorder %v12669_v2, %v9507_v23  ;;  %v10048_v41 = vmax.f32 %v4238_v21, 0.0  ;;  %v12673_v20 = vld [vmem:[#allocation323_spill] sm:$0xff]  ;;  %v12674_v1 = vld [vmem:[#allocation324_spill] sm:$0xff] }
 0x4ed   : > { %v5993_v9 = vadd.f32 %v5992_v30, %v5479_v7  ;;  %v5480_v51 = vmul.f32 %v4971_v25, %v4712_v10  ;;  %5315 = vperm.xlu0 %6235, %v663_v53   ;;  %5290 = vperm.xlu1 %6236, %v658_v8   ;;  %v10050_v58 = vmax.f32 %v4237_v0, 0.0  ;;  %v2700_v34 = vadd.f32 %v12672_v44, %v1672_v16  ;;  %v665_v45 = vld [vmem:[%s8446_s9 + $0x338] sm:$0xff]  ;;  %v660_v11 = vld [vmem:[%s8446_s9 + $0x310] sm:$0xff]  ;;  %v12675_v21 = vld [vmem:[#allocation64_spill] sm:$0xff] }
 0x4ee   : > { %12670 = vst [vmem:[#allocation248_spill] sm:$0xff] %v10048_v41  ;;  %v3343_v15 = vsub.f32 %v12673_v20, %v8115_v38  ;;  %v1546_v60 = vsub.f32 %v12674_v1, %v7785_v46  ;;  %v4240_v22 = vsub.f32 1.0, %v10025_v52  ;;  %v5481_v30 = vmul.f32 %v4976_v13, %v4713_v35  ;;  %v12676_v16 = vld [vmem:[#allocation143_spill] sm:$0xff]  ;;  %v12677_v8 = vld [vmem:[#allocation138_spill] sm:$0xff]  ;;  %v12678_v20 = vld [vmem:[#allocation144_spill] sm:$0xff] }
 0x4ef   : > { %12671 = vst [vmem:[#allocation7_spill] sm:$0xff] %v10050_v58  ;;  %v5994_v7 = vadd.f32 %v5993_v9, %v5480_v51  ;;  %v4714_v53 = vmul.f32 %v9564_v5, %v4452_v62  ;;  %vm4073_vm6 = vcmp.eq.s32.totalorder %v12675_v21, %v9507_v23  ;;  %v4715_v0 = vmul.f32 %v9564_v5, %v4453_v43  ;;  %v5006_v25 = vpop.permute.xlu0 %5005  ;;  %v4981_v44 = vpop.permute.xlu1 %4980  ;;  %v12679_v13 = vld [vmem:[#allocation129_spill] sm:$0xff]  ;;  %v12680_v9 = vld [vmem:[#allocation79_spill] sm:$0xff]  ;;  %v667_v58 = vld [vmem:[%s8446_s9 + $0x348] sm:$0xff] }
 0x4f0   : > { %v4455_v10 = vsel %vm4071_vm4, %v12677_v8, %v12676_v16  ;;  %v4454_v35 = vsel %vm4070_vm5, %v12679_v13, %v12678_v20  ;;  %v4239_v62 = vsub.f32 1.0, %v10030_v4  ;;  %vm4072_vm7 = vcmp.eq.s32.totalorder %v12680_v9, %v9507_v23  ;;  %v12682_v52 = vld [vmem:[#allocation325_spill] sm:$0xff]  ;;  %v662_v2 = vld [vmem:[%s8446_s9 + $0x320] sm:$0xff]  ;;  %v12683_v20 = vld [vmem:[#allocation326_spill] sm:$0xff] }
 0x4f1   : > { %v5995_v43 = vadd.f32 %v5994_v7, %v5481_v30  ;;  %v5482_v51 = vmul.f32 %v4981_v44, %v4714_v53  ;;  %5325 = vperm.xlu0 %6235, %v665_v45   ;;  %5300 = vperm.xlu1 %6236, %v660_v11   ;;  %v10078_v1 = vadd.f32 %v12681_v37, %v2700_v34  ;;  %v12684_v45 = vld [vmem:[#allocation72_spill] sm:$0xff]  ;;  %v12687_v53 = vld [vmem:[#allocation298_spill] sm:$0xff]  ;;  %v12689_v44 = vld [vmem:[#allocation81_spill] sm:$0xff] }
 0x4f2   : > { %v3471_v16 = vmul.f32 %v3343_v15, %v3343_v15  ;;  %v1674_v8 = vmul.f32 %v1546_v60, %v1546_v60  ;;  %v3345_v41 = vsub.f32 %v12682_v52, %v8115_v38  ;;  %v1548_v13 = vsub.f32 %v12683_v20, %v7785_v46  ;;  %v12685_v15 = vld [vmem:[#allocation148_spill] sm:$0xff]  ;;  %v12686_v60 = vld [vmem:[#allocation137_spill] sm:$0xff]  ;;  %v12691_v20 = vld [vmem:[#allocation190_spill] sm:$0xff] }
 0x4f3   : > { %v5483_v4 = vmul.f32 %v4986_v28, %v4715_v0  ;;  %v5996_v55 = vadd.f32 %v5995_v43, %v5482_v51  ;;  %v4716_v30 = vmul.f32 %v9564_v5, %v4454_v35  ;;  %vm4075_vm8 = vcmp.eq.s32.totalorder %v12684_v45, %v9507_v23  ;;  %v5016_v11 = vpop.permute.xlu0 %5015  ;;  %v4991_v7 = vpop.permute.xlu1 %4990  ;;  %v12688_v28 = vld [vmem:[#allocation293_spill] sm:$0xff]  ;;  %v12690_v51 = vld [vmem:[#allocation74_spill] sm:$0xff] }
 0x4f4   : > { %v4717_v34 = vmul.f32 %v9564_v5, %v4455_v10  ;;  %v4457_v52 = vsel %vm4073_vm6, %v12686_v60, %v12685_v15  ;;  %v4456_v0 = vsel %vm4072_vm7, %v12688_v28, %v12687_v53  ;;  %vm4074_vm9 = vcmp.eq.s32.totalorder %v12689_v44, %v9507_v23  ;;  %v669_v61 = vld [vmem:[%s8446_s9 + $0x358] sm:$0xff]  ;;  %v664_v9 = vld [vmem:[%s8446_s9 + $0x330] sm:$0xff]  ;;  %v12701_v44 = vld [vmem:[#allocation327_spill] sm:$0xff] }
 0x4f5   : > { %v5997_v35 = vadd.f32 %v5996_v55, %v5483_v4  ;;  %v5484_v10 = vmul.f32 %v4991_v7, %v4716_v30  ;;  %5335 = vperm.xlu0 %6235, %v667_v58   ;;  %5310 = vperm.xlu1 %6236, %v662_v2   ;;  %v10102_v43 = vmax.f32 %v4240_v22, 0.0  ;;  %v10104_v21 = vmax.f32 %v4239_v62, 0.0  ;;  %v12692_v4 = vld [vmem:[#allocation78_spill] sm:$0xff]  ;;  %v12693_v58 = vld [vmem:[#allocation297_spill] sm:$0xff]  ;;  %v12696_v30 = vld [vmem:[#allocation83_spill] sm:$0xff] }
 0x4f6   : > { %v10107_v37 = vadd.f32 %v3471_v16, %v12690_v51  ;;  %v2702_v15 = vadd.f32 %v12691_v20, %v1674_v8  ;;  %v3473_v60 = vmul.f32 %v3345_v41, %v3345_v41  ;;  %v1676_v53 = vmul.f32 %v1548_v13, %v1548_v13  ;;  %v12694_v8 = vld [vmem:[#allocation299_spill] sm:$0xff]  ;;  %v671_v51 = vld [vmem:[%s8446_s9 + $0x368] sm:$0xff] }
 0x4f7   : > { %v5485_v28 = vmul.f32 %v4996_v42, %v4717_v34  ;;  %v5998_v39 = vadd.f32 %v5997_v35, %v5484_v10  ;;  %v4718_v55 = vmul.f32 %v9564_v5, %v4456_v0  ;;  %vm4077_vm10 = vcmp.eq.s32.totalorder %v12692_v4, %v9507_v23  ;;  %v5026_v62 = vpop.permute.xlu0 %5025  ;;  %v5001_v16 = vpop.permute.xlu1 %5000  ;;  %v12695_v42 = vld [vmem:[#allocation37_spill] sm:$0xff]  ;;  %v12699_v0 = vld [vmem:[#allocation75_spill] sm:$0xff] }
 0x4f8   : > { %v4719_v22 = vmul.f32 %v9564_v5, %v4457_v52  ;;  %v4459_v41 = vsel %vm4075_vm8, %v12693_v58, %v9445_v6  ;;  %v4458_v2 = vsel %vm4074_vm9, %v12695_v42, %v12694_v8  ;;  %v4242_v13 = vsub.f32 1.0, %v10078_v1  ;;  %v12697_v6 = vld [vmem:[#allocation188_spill] sm:$0xff]  ;;  %v666_v20 = vld [vmem:[%s8446_s9 + $0x340] sm:$0xff] }
 0x4f9   : > { %vm4076_vm11 = vcmp.eq.s32.totalorder %v12696_v30, %v9507_v23  ;;  %v5999_v34 = vadd.f32 %v5998_v39, %v5485_v28  ;;  %v5486_v52 = vmul.f32 %v5001_v16, %v4718_v55  ;;  %5345 = vperm.xlu0 %6235, %v669_v61   ;;  %5320 = vperm.xlu1 %6236, %v664_v9   ;;  %v4241_v45 = vsub.f32 1.0, %v10107_v37  ;;  %v12702_v58 = vld [vmem:[#allocation195_spill] sm:$0xff]  ;;  %v12703_v9 = vld [vmem:[#allocation80_spill] sm:$0xff]  ;;  %v668_v30 = vld [vmem:[%s8446_s9 + $0x350] sm:$0xff] }
 0x4fa   : > { %v10131_v7 = vadd.f32 %v12697_v6, %v2702_v15  ;;  %v10134_v35 = vadd.f32 %v3473_v60, %v12699_v0  ;;  %v3347_v10 = vsub.f32 %v12701_v44, %v8115_v38  ;;  %v2704_v8 = vadd.f32 %v12702_v58, %v1676_v53  ;;  %v12704_v60 = vld [vmem:[#allocation177_spill] sm:$0xff]  ;;  %v12707_v6 = vld [vmem:[#allocation328_spill] sm:$0xff]  ;;  %v673_v44 = vld [vmem:[%s8446_s9 + $0x378] sm:$0xff] }
 0x4fb   : > { %v5487_v42 = vmul.f32 %v5006_v25, %v4719_v22  ;;  %v6000_v39 = vadd.f32 %v5999_v34, %v5486_v52  ;;  %v4720_v61 = vmul.f32 %v9564_v5, %v4458_v2  ;;  %vm4079_vm12 = vcmp.eq.s32.totalorder %v12703_v9, %v9507_v23  ;;  %v5036_v55 = vpop.permute.xlu0 %5035  ;;  %v5011_v16 = vpop.permute.xlu1 %5010  ;;  %v12705_v25 = vld [vmem:[#allocation294_spill] sm:$0xff]  ;;  %v12706_v22 = vld [vmem:[#allocation89_spill] sm:$0xff] }
 0x4fc   : > { %12698 = vst [vmem:[#allocation259_spill] sm:$0xff] %v10131_v7  ;;  %12700 = vst [vmem:[#allocation13_spill] sm:$0xff] %v10134_v35  ;;  %v4721_v15 = vmul.f32 %v9564_v5, %v4459_v41  ;;  %v4461_v28 = vsel %vm4077_vm10, %v12704_v60, %v9465_v56  ;;  %v4460_v53 = vsel %vm4076_vm11, %v12705_v25, %v9443_v3  ;;  %v10157_v34 = vmax.f32 %v4242_v13, 0.0  ;;  %v12708_v3 = vld [vmem:[#allocation191_spill] sm:$0xff]  ;;  %v12710_v13 = vld [vmem:[#allocation82_spill] sm:$0xff] }
 0x4fd   : > { %vm4078_vm13 = vcmp.eq.s32.totalorder %v12706_v22, %v9507_v23  ;;  %v6001_v2 = vadd.f32 %v6000_v39, %v5487_v42  ;;  %v5488_v41 = vmul.f32 %v5011_v16, %v4720_v61  ;;  %5355 = vperm.xlu0 %6235, %v671_v51   ;;  %5330 = vperm.xlu1 %6236, %v666_v20   ;;  %v10159_v4 = vmax.f32 %v4241_v45, 0.0  ;;  %v12712_v61 = vld [vmem:[#allocation152_spill] sm:$0xff] }
 0x4fe   : > { %v4244_v56 = vsub.f32 1.0, %v10131_v7  ;;  %v3475_v52 = vmul.f32 %v3347_v10, %v3347_v10  ;;  %v1550_v0 = vsub.f32 %v12707_v6, %v7785_v46  ;;  %v10167_v58 = vadd.f32 %v12708_v3, %v2704_v8  ;;  %v12711_v10 = vld [vmem:[#allocation42_spill] sm:$0xff]  ;;  %v12714_v25 = vld [vmem:[#allocation100_spill] sm:$0xff] }
 0x4ff   : > { %v5489_v60 = vmul.f32 %v5016_v11, %v4721_v15  ;;  %v6002_v42 = vadd.f32 %v6001_v2, %v5488_v41  ;;  %v4722_v51 = vmul.f32 %v9564_v5, %v4460_v53  ;;  %vm4081_vm14 = vcmp.eq.s32.totalorder %v12710_v13, %v9507_v23  ;;  %v5046_v39 = vpop.permute.xlu0 %5045  ;;  %v5021_v8 = vpop.permute.xlu1 %5020  ;;  %v12713_v11 = vld [vmem:[#allocation296_spill] sm:$0xff]  ;;  %v12716_v41 = vld [vmem:[#allocation330_spill] sm:$0xff] }
 0x500   : > { %12709 = vst [vmem:[#allocation165_spill] sm:$0xff] %v10167_v58  ;;  %v4723_v45 = vmul.f32 %v9564_v5, %v4461_v28  ;;  %v4463_v20 = vsel %vm4079_vm12, %v12711_v10, %v9491_v31  ;;  %v4462_v15 = vsel %vm4078_vm13, %v12713_v11, %v12712_v61  ;;  %v4243_v16 = vsub.f32 1.0, %v10134_v35  ;;  %v12715_v31 = vld [vmem:[#allocation329_spill] sm:$0xff]  ;;  %v675_v3 = vld [vmem:[%s8446_s9 + $0x388] sm:$0xff]  ;;  %v670_v10 = vld [vmem:[%s8446_s9 + $0x360] sm:$0xff] }
 0x501   : > { %vm4080_vm15 = vcmp.eq.s32.totalorder %v12714_v25, %v9507_v23  ;;  %v6003_v28 = vadd.f32 %v6002_v42, %v5489_v60  ;;  %v5490_v53 = vmul.f32 %v5021_v8, %v4722_v51  ;;  %5365 = vperm.xlu0 %6235, %v673_v44   ;;  %5340 = vperm.xlu1 %6236, %v668_v30   ;;  %v10192_v22 = vmax.f32 %v4244_v56, 0.0  ;;  %v12718_v61 = vld [vmem:[#allocation76_spill] sm:$0xff]  ;;  %v12721_v42 = vld [vmem:[#allocation149_spill] sm:$0xff]  ;;  %v12723_v8 = vld [vmem:[#allocation103_spill] sm:$0xff] }
 0x502   : > { %v1678_v2 = vmul.f32 %v1550_v0, %v1550_v0  ;;  %v3349_v9 = vsub.f32 %v12715_v31, %v8115_v38  ;;  %v1552_v6 = vsub.f32 %v12716_v41, %v7785_v46  ;;  %v10195_v11 = vadd.f32 %v3475_v52, %v12718_v61  ;;  %v12720_v44 = vld [vmem:[#allocation88_spill] sm:$0xff]  ;;  %v672_v31 = vld [vmem:[%s8446_s9 + $0x370] sm:$0xff]  ;;  %v12725_v25 = vld [vmem:[#allocation331_spill] sm:$0xff] }
 0x503   : > { %12717 = vst [vmem:[#allocation311_spill] sm:$0xff] %v10192_v22  ;;  %v5491_v7 = vmul.f32 %v5026_v62, %v4723_v45  ;;  %v6004_v35 = vadd.f32 %v6003_v28, %v5490_v53  ;;  %v4724_v60 = vmul.f32 %v9564_v5, %v4462_v15  ;;  %vm4083_vm0 = vcmp.eq.s32.totalorder %v12720_v44, %v9507_v23  ;;  %v5056_v30 = vpop.permute.xlu0 %5055  ;;  %v5031_v52 = vpop.permute.xlu1 %5030  ;;  %v12722_v62 = vld [vmem:[#allocation300_spill] sm:$0xff]  ;;  %v677_v53 = vld [vmem:[%s8446_s9 + $0x398] sm:$0xff] }
 0x504   : > { %12719 = vst [vmem:[#allocation16_spill] sm:$0xff] %v10195_v11  ;;  %v4725_v0 = vmul.f32 %v9564_v5, %v4463_v20  ;;  %v4465_v56 = vsel %vm4081_vm14, %v9458_v36, %v9521_v19  ;;  %v4464_v51 = vsel %vm4080_vm15, %v12722_v62, %v12721_v42  ;;  %v10211_v45 = vmax.f32 %v4243_v16, 0.0  ;;  %v12724_v36 = vld [vmem:[#allocation198_spill] sm:$0xff]  ;;  %v12731_v44 = vld [vmem:[#allocation196_spill] sm:$0xff] }
 0x505   : > { %vm4082_vm1 = vcmp.eq.s32.totalorder %v12723_v8, %v9507_v23  ;;  %v6005_v5 = vadd.f32 %v6004_v35, %v5491_v7  ;;  %v5492_v20 = vmul.f32 %v5031_v52, %v4724_v60  ;;  %5375 = vperm.xlu0 %6235, %v675_v3   ;;  %5350 = vperm.xlu1 %6236, %v670_v10   ;;  %v4246_v13 = vsub.f32 1.0, %v10167_v58  ;;  %v10224_v7 = vld [vmem:[%s11187_s4] ss:$0 sm:$0xff]  ;;  %v12730_v62 = vld [vmem:[#allocation106_spill] sm:$0xff]  ;;  %v12734_v8 = vld [vmem:[#allocation332_spill] sm:$0xff] }
 0x506   : > { %v2706_v19 = vadd.f32 %v12724_v36, %v1678_v2  ;;  %v3477_v15 = vmul.f32 %v3349_v9, %v3349_v9  ;;  %v1680_v28 = vmul.f32 %v1552_v6, %v1552_v6  ;;  %v3351_v41 = vsub.f32 %v12725_v25, %v8115_v38  ;;  %v12726_v3 = vld [vmem:[#allocation99_spill] sm:$0xff]  ;;  %v12727_v9 = vld [vmem:[#allocation154_spill] sm:$0xff]  ;;  %v12733_v36 = vld [vmem:[#allocation200_spill] sm:$0xff] }
 0x507   : > { %v5493_v16 = vmul.f32 %v5036_v55, %v4725_v0  ;;  %v6006_v61 = vadd.f32 %v6005_v5, %v5492_v20  ;;  %v4726_v35 = vmul.f32 %v10224_v7, %v4464_v51  ;;  %vm4085_vm2 = vcmp.eq.s32.totalorder %v12726_v3, %v9507_v23  ;;  %v5066_v6 = vpop.permute.xlu0 %5065  ;;  %v5041_v10 = vpop.permute.xlu1 %5040  ;;  %v12728_v60 = vld [vmem:[#allocation155_spill] sm:$0xff] }
 0x508   : > { %v4727_v2 = vmul.f32 %v10224_v7, %v4465_v56  ;;  %v4467_v55 = vsel %vm4083_vm0, %v12727_v9, %v9539_v12  ;;  %v12729_v0 = vld [vmem:[#allocation183_spill] sm:$0xff]  ;;  %v4245_v42 = vsub.f32 1.0, %v10195_v11  ;;  %vm4084_vm3 = vcmp.eq.s32.totalorder %v12730_v62, %v9507_v23  ;;  %v12732_v12 = vld [vmem:[#allocation77_spill] sm:$0xff] }
 0x509   : > { %v4466_v52 = vsel %vm4082_vm1, %v12729_v0, %v12728_v60  ;;  %v6007_v56 = vadd.f32 %v6006_v61, %v5493_v16  ;;  %v5494_v51 = vmul.f32 %v5041_v10, %v4726_v35  ;;  %5385 = vperm.xlu0 %6235, %v677_v53   ;;  %5360 = vperm.xlu1 %6236, %v672_v31   ;;  %v679_v60 = vld [vmem:[%s8446_s9 + $0x3a8] sm:$0xff]  ;;  %v674_v0 = vld [vmem:[%s8446_s9 + $0x380] sm:$0xff]  ;;  %v12735_v53 = vld [vmem:[#allocation102_spill] sm:$0xff]  ;;  %v10270_v10 = vmax.f32 %v4246_v13, 0.0 }
 0x50a   : > { %v10244_v5 = vadd.f32 %v12731_v44, %v2706_v19  ;;  %v10247_v20 = vadd.f32 %v3477_v15, %v12732_v12  ;;  %v2708_v25 = vadd.f32 %v12733_v36, %v1680_v28  ;;  %v1554_v9 = vsub.f32 %v12734_v8, %v7785_v46  ;;  %v12736_v15 = vld [vmem:[#allocation156_spill] sm:$0xff]  ;;  %v12738_v35 = vld [vmem:[#allocation114_spill] sm:$0xff]  ;;  %v676_v62 = vld [vmem:[%s8446_s9 + $0x390] sm:$0xff] }
 0x50b   : > { %v3479_v58 = vmul.f32 %v3351_v41, %v3351_v41  ;;  %v5495_v11 = vmul.f32 %v5046_v39, %v4727_v2  ;;  %v6008_v22 = vadd.f32 %v6007_v56, %v5494_v51  ;;  %v4728_v16 = vmul.f32 %v10224_v7, %v4466_v52  ;;  %v5076_v31 = vpop.permute.xlu0 %5075  ;;  %v5051_v61 = vpop.permute.xlu1 %5050  ;;  %v12737_v39 = vld [vmem:[#allocation186_spill] sm:$0xff]  ;;  %v12739_v52 = vld [vmem:[#allocation199_spill] sm:$0xff]  ;;  %v12743_v13 = vld [vmem:[#allocation105_spill] sm:$0xff] }
 0x50c   : > { %vm4087_vm4 = vcmp.eq.s32.totalorder %v12735_v53, %v9507_v23  ;;  %v4729_v19 = vmul.f32 %v10224_v7, %v4467_v55  ;;  %v4469_v28 = vsel %vm4085_vm2, %v12736_v15, %v9549_v32  ;;  %v4468_v41 = vsel %vm4084_vm3, %v12737_v39, %v9537_v17  ;;  %v681_v44 = vld [vmem:[%s8446_s9 + $0x3b8] sm:$0xff]  ;;  %v12741_v17 = vld [vmem:[#allocation84_spill] sm:$0xff] }
 0x50d   : > { %vm4086_vm5 = vcmp.eq.s32.totalorder %v12738_v35, %v9507_v23  ;;  %v6009_v2 = vadd.f32 %v6008_v22, %v5495_v11  ;;  %v5496_v55 = vmul.f32 %v5051_v61, %v4728_v16  ;;  %5395 = vperm.xlu0 %6235, %v679_v60   ;;  %5370 = vperm.xlu1 %6236, %v674_v0   ;;  %v10272_v3 = vmax.f32 %v4245_v42, 0.0  ;;  %v12746_v16 = vld [vmem:[#allocation116_spill] sm:$0xff]  ;;  %v12749_v39 = vld [vmem:[#allocation334_spill] sm:$0xff]  ;;  %v678_v35 = vld [vmem:[%s8446_s9 + $0x3a0] sm:$0xff] }
 0x50e   : > { %v4248_v32 = vsub.f32 1.0, %v10244_v5  ;;  %v10276_v56 = vadd.f32 %v12739_v52, %v2708_v25  ;;  %v1682_v51 = vmul.f32 %v1554_v9, %v1554_v9  ;;  %v10281_v12 = vadd.f32 %v3479_v58, %v12741_v17  ;;  %v12744_v25 = vld [vmem:[#allocation160_spill] sm:$0xff] }
 0x50f   : > { %v5497_v36 = vmul.f32 %v5056_v30, %v4729_v19  ;;  %v6010_v22 = vadd.f32 %v6009_v2, %v5496_v55  ;;  %v4730_v11 = vmul.f32 %v10224_v7, %v4468_v41  ;;  %vm4089_vm6 = vcmp.eq.s32.totalorder %v12743_v13, %v9507_v23  ;;  %v5086_v9 = vpop.permute.xlu0 %5085  ;;  %v5061_v58 = vpop.permute.xlu1 %5060  ;;  %v12745_v30 = vld [vmem:[#allocation302_spill] sm:$0xff]  ;;  %v683_v2 = vld [vmem:[%s8446_s9 + $0x3c8] sm:$0xff]  ;;  %v12755_v13 = vld [vmem:[#allocation201_spill] sm:$0xff] }
 0x510   : > { %12740 = vst [vmem:[#allocation260_spill] sm:$0xff] %v10276_v56  ;;  %12742 = vst [vmem:[#allocation4_spill] sm:$0xff] %v10281_v12  ;;  %v4731_v42 = vmul.f32 %v10224_v7, %v4469_v28  ;;  %v4471_v8 = vsel %vm4087_vm4, %v12744_v25, %v9554_v49  ;;  %v4470_v60 = vsel %vm4086_vm5, %v12745_v30, %v9547_v54  ;;  %v4247_v0 = vsub.f32 1.0, %v10247_v20  ;;  %v12747_v28 = vld [vmem:[#allocation202_spill] sm:$0xff]  ;;  %v12748_v49 = vld [vmem:[#allocation333_spill] sm:$0xff] }
 0x511   : > { %vm4088_vm7 = vcmp.eq.s32.totalorder %v12746_v16, %v9507_v23  ;;  %v6011_v19 = vadd.f32 %v6010_v22, %v5497_v36  ;;  %v5498_v15 = vmul.f32 %v5061_v58, %v4730_v11  ;;  %5405 = vperm.xlu0 %6235, %v681_v44   ;;  %5380 = vperm.xlu1 %6236, %v676_v62   ;;  %v10307_v54 = vmax.f32 %v4248_v32, 0.0  ;;  %v12750_v44 = vld [vmem:[#allocation113_spill] sm:$0xff]  ;;  %v12751_v62 = vld [vmem:[#allocation303_spill] sm:$0xff]  ;;  %v12754_v30 = vld [vmem:[#allocation118_spill] sm:$0xff] }
 0x512   : > { %v2710_v53 = vadd.f32 %v12747_v28, %v1682_v51  ;;  %v3353_v61 = vsub.f32 %v12748_v49, %v8115_v38  ;;  %v1556_v41 = vsub.f32 %v12749_v39, %v7785_v46  ;;  %v4250_v55 = vsub.f32 1.0, %v10276_v56  ;;  %v12752_v25 = vld [vmem:[#allocation305_spill] sm:$0xff]  ;;  %v12756_v28 = vld [vmem:[#allocation335_spill] sm:$0xff]  ;;  %v685_v39 = vld [vmem:[%s8446_s9 + $0x3d8] sm:$0xff] }
 0x513   : > { %v5499_v52 = vmul.f32 %v5066_v6, %v4731_v42  ;;  %v6012_v17 = vadd.f32 %v6011_v19, %v5498_v15  ;;  %v4732_v36 = vmul.f32 %v10224_v7, %v4470_v60  ;;  %vm4091_vm8 = vcmp.eq.s32.totalorder %v12750_v44, %v9507_v23  ;;  %v5096_v22 = vpop.permute.xlu0 %5095  ;;  %v5071_v11 = vpop.permute.xlu1 %5070  ;;  %v12753_v6 = vld [vmem:[#allocation44_spill] sm:$0xff]  ;;  %v680_v16 = vld [vmem:[%s8446_s9 + $0x3b0] sm:$0xff] }
 0x514   : > { %v4733_v51 = vmul.f32 %v10224_v7, %v4471_v8  ;;  %v4473_v32 = vsel %vm4089_vm6, %v12751_v62, %v9607_v14  ;;  %v4472_v42 = vsel %vm4088_vm7, %v12753_v6, %v12752_v25  ;;  %v4249_v58 = vsub.f32 1.0, %v10281_v12  ;;  %v12757_v62 = vld [vmem:[#allocation336_spill] sm:$0xff] }
 0x515   : > { %vm4090_vm9 = vcmp.eq.s32.totalorder %v12754_v30, %v9507_v23  ;;  %v6013_v8 = vadd.f32 %v6012_v17, %v5499_v52  ;;  %v5500_v60 = vmul.f32 %v5071_v11, %v4732_v36  ;;  %5415 = vperm.xlu0 %6235, %v683_v2   ;;  %5390 = vperm.xlu1 %6236, %v678_v35   ;;  %v12758_v2 = vld [vmem:[#allocation115_spill] sm:$0xff]  ;;  %v12760_v36 = vld [vmem:[#allocation304_spill] sm:$0xff]  ;;  %v10350_v11 = vmax.f32 %v4247_v0, 0.0 }
 0x516   : > { %v10328_v19 = vadd.f32 %v12755_v13, %v2710_v53  ;;  %v3481_v14 = vmul.f32 %v3353_v61, %v3353_v61  ;;  %v1684_v15 = vmul.f32 %v1556_v41, %v1556_v41  ;;  %v3355_v49 = vsub.f32 %v12756_v28, %v8115_v38  ;;  %v12759_v61 = vld [vmem:[#allocation157_spill] sm:$0xff] }
 0x517   : > { %v1558_v25 = vsub.f32 %v12757_v62, %v7785_v46  ;;  %v5501_v6 = vmul.f32 %v5076_v31, %v4733_v51  ;;  %v6014_v56 = vadd.f32 %v6013_v8, %v5500_v60  ;;  %v4734_v52 = vmul.f32 %v10224_v7, %v4472_v42  ;;  %v5106_v35 = vpop.permute.xlu0 %5105  ;;  %v5081_v17 = vpop.permute.xlu1 %5080  ;;  %v12761_v31 = vld [vmem:[#allocation51_spill] sm:$0xff]  ;;  %v12762_v42 = vld [vmem:[#allocation122_spill] sm:$0xff]  ;;  %v12763_v60 = vld [vmem:[#allocation85_spill] sm:$0xff] }
 0x518   : > { %vm4093_vm10 = vcmp.eq.s32.totalorder %v12758_v2, %v9507_v23  ;;  %v4735_v53 = vmul.f32 %v10224_v7, %v4473_v32  ;;  %v4475_v41 = vsel %vm4091_vm8, %v12759_v61, %v9612_v57  ;;  %v4474_v51 = vsel %vm4090_vm9, %v12761_v31, %v12760_v36  ;;  %v12764_v57 = vld [vmem:[#allocation204_spill] sm:$0xff]  ;;  %v682_v61 = vld [vmem:[%s8446_s9 + $0x3c0] sm:$0xff]  ;;  %v12768_v2 = vld [vmem:[#allocation86_spill] sm:$0xff] }
 0x519   : > { %vm4092_vm11 = vcmp.eq.s32.totalorder %v12762_v42, %v9507_v23  ;;  %v6015_v32 = vadd.f32 %v6014_v56, %v5501_v6  ;;  %v5502_v8 = vmul.f32 %v5081_v17, %v4734_v52  ;;  %5425 = vperm.xlu0 %6235, %v685_v39   ;;  %5400 = vperm.xlu1 %6236, %v680_v16   ;;  %v687_v62 = vld [vmem:[%s8446_s9 + $0x3e8] sm:$0xff]  ;;  %v10360_v12 = vmax.f32 %v4250_v55, 0.0  ;;  %v12766_v16 = vld [vmem:[#allocation131_spill] sm:$0xff]  ;;  %v689_v17 = vld [vmem:[%s8446_s9 + $0x3f8] sm:$0xff] }
 0x51a   : > { %v10355_v44 = vadd.f32 %v3481_v14, %v12763_v60  ;;  %v2712_v13 = vadd.f32 %v12764_v57, %v1684_v15  ;;  %v3483_v28 = vmul.f32 %v3355_v49, %v3355_v49  ;;  %v10362_v30 = vmax.f32 %v4249_v58, 0.0  ;;  %v12765_v58 = vld [vmem:[#allocation52_spill] sm:$0xff]  ;;  %v12770_v42 = vld [vmem:[#allocation117_spill] sm:$0xff] }
 0x51b   : > { %v5503_v0 = vmul.f32 %v5086_v9, %v4735_v53  ;;  %v6016_v36 = vadd.f32 %v6015_v32, %v5502_v8  ;;  %v4736_v31 = vmul.f32 %v10224_v7, %v4474_v51  ;;  %v1686_v56 = vmul.f32 %v1558_v25, %v1558_v25  ;;  %v5116_v15 = vpop.permute.xlu0 %5115  ;;  %v5091_v55 = vpop.permute.xlu1 %5090  ;;  %v684_v51 = vld [vmem:[%s8446_s9 + $0x3d0] sm:$0xff]  ;;  %v12771_v57 = vld [vmem:[#allocation208_spill] sm:$0xff] }
 0x51c   : > { %v4737_v39 = vmul.f32 %v10224_v7, %v4475_v41  ;;  %v4477_v14 = vsel %vm4093_vm10, %v9596_v59, %v9668_v33  ;;  %v4476_v9 = vsel %vm4092_vm11, %v12765_v58, %v9617_v50  ;;  %v4252_v49 = vsub.f32 1.0, %v10328_v19  ;;  %v12767_v59 = vld [vmem:[#allocation203_spill] sm:$0xff]  ;;  %v12769_v41 = vld [vmem:[#allocation337_spill] sm:$0xff] }
 0x51d   : > { %vm4094_vm12 = vcmp.eq.s32.totalorder %v12766_v16, %v9507_v23  ;;  %v6017_v25 = vadd.f32 %v6016_v36, %v5503_v0  ;;  %v5504_v6 = vmul.f32 %v5091_v55, %v4736_v31  ;;  %5435 = vperm.xlu0 %6235, %v687_v62   ;;  %5410 = vperm.xlu1 %6236, %v682_v61   ;;  %v4251_v52 = vsub.f32 1.0, %v10355_v44  ;;  %v12774_v16 = vld [vmem:[#allocation121_spill] sm:$0xff] }
 0x51e   : > { %v10381_v33 = vadd.f32 %v12767_v59, %v2712_v13  ;;  %v10384_v53 = vadd.f32 %v3483_v28, %v12768_v2  ;;  %v3357_v50 = vsub.f32 %v12769_v41, %v8115_v38  ;;  %vm4095_vm13 = vcmp.eq.s32.totalorder %v12770_v42, %v9507_v23  ;;  %v12772_v13 = vld [vmem:[#allocation338_spill] sm:$0xff]  ;;  %v12775_v59 = vld [vmem:[#allocation207_spill] sm:$0xff] }
 0x51f   : > { %v5505_v32 = vmul.f32 %v5096_v22, %v4737_v39  ;;  %v6018_v8 = vadd.f32 %v6017_v25, %v5504_v6  ;;  %v4738_v60 = vmul.f32 %v10224_v7, %v4476_v9  ;;  %v2714_v62 = vadd.f32 %v12771_v57, %v1686_v56  ;;  %v5126_v0 = vpop.permute.xlu0 %5125  ;;  %v5101_v36 = vpop.permute.xlu1 %5100  ;;  %v12773_v22 = vld [vmem:[#allocation140_spill] sm:$0xff] }
 0x520   : > { %v1560_v61 = vsub.f32 %v12772_v13, %v7785_v46  ;;  %v4739_v28 = vmul.f32 %v10224_v7, %v4477_v14  ;;  %v4478_v31 = vsel %vm4094_vm12, %v9578_v63, %v9648_v48  ;;  %vm4096_vm14 = vcmp.eq.s32.totalorder %v12773_v22, %v9507_v23  ;;  %v686_v48 = vld [vmem:[%s8446_s9 + $0x3e0] sm:$0xff]  ;;  %v12779_v13 = vld [vmem:[#allocation133_spill] sm:$0xff]  ;;  %v12780_v22 = vld [vmem:[#allocation210_spill] sm:$0xff] }
 0x521   : > { %v6019_v39 = vadd.f32 %v6018_v8, %v5505_v32  ;;  %v5506_v55 = vmul.f32 %v5101_v36, %v4738_v60  ;;  %5445 = vperm.xlu0 %6235, %v689_v17   ;;  %5420 = vperm.xlu1 %6236, %v684_v51   ;;  %v10404_v56 = vmax.f32 %v4252_v49, 0.0  ;;  %v10406_v58 = vmax.f32 %v4251_v52, 0.0  ;;  %v12777_v32 = vld [vmem:[#allocation87_spill] sm:$0xff] }
 0x522   : > { %v4254_v14 = vsub.f32 1.0, %v10381_v33  ;;  %v3485_v9 = vmul.f32 %v3357_v50, %v3357_v50  ;;  %v4479_v63 = vsel %vm4095_vm13, %v9640_v26, %v9704_v27  ;;  %vm4097_vm15 = vcmp.eq.s32.totalorder %v12774_v16, %v9507_v23  ;;  %v12776_v27 = vld [vmem:[#allocation151_spill] sm:$0xff] }
 0x523   : > { %v5507_v25 = vmul.f32 %v5106_v35, %v4739_v28  ;;  %v6020_v6 = vadd.f32 %v6019_v39, %v5506_v55  ;;  %v4740_v49 = vmul.f32 %v10224_v7, %v4478_v31  ;;  %v4253_v52 = vsub.f32 1.0, %v10384_v53  ;;  %v5136_v50 = vpop.permute.xlu0 %5135  ;;  %v12778_v60 = vld [vmem:[#allocation339_spill] sm:$0xff]  ;;  %v12781_v55 = vld [vmem:[#allocation340_spill] sm:$0xff] }
 0x524   : > { %v10420_v2 = vadd.f32 %v12775_v59, %v2714_v62  ;;  %v1688_v41 = vmul.f32 %v1560_v61, %v1560_v61  ;;  %v5111_v17 = vpop.permute.xlu1 %5110  ;;  %v4480_v26 = vsel %vm4096_vm14, %v9620_v40, %v9692_v47  ;;  %vm4098_vm0 = vcmp.eq.s32.totalorder %v12776_v27, %v9507_v23  ;;  %v688_v47 = vld [vmem:[%s8446_s9 + $0x3f0] sm:$0xff] }
 0x525   : > { %v4741_v35 = vmul.f32 %v10224_v7, %v4479_v63  ;;  %v6021_v51 = vadd.f32 %v6020_v6, %v5507_v25  ;;  %v5508_v42 = vmul.f32 %v5111_v17, %v4740_v49  ;;  %5430 = vperm.xlu1 %6236, %v686_v48   ;;  %v10431_v8 = vadd.f32 %v3485_v9, %v12777_v32  ;;  %v12785_v17 = vld [vmem:[#allocation55_spill] sm:$0xff] }
 0x526   : > { %v3359_v57 = vsub.f32 %v12778_v60, %v8115_v38  ;;  %v4481_v40 = vsel %vm4097_vm15, %v9695_v29, %v9749_v24  ;;  %v10441_v62 = vmax.f32 %v4254_v14, 0.0  ;;  %vm4099_vm1 = vcmp.eq.s32.totalorder %v12779_v13, %v9507_v23  ;;  %v12782_v29 = vld [vmem:[#allocation54_spill] sm:$0xff] }
 0x527   : > { %v5509_v61 = vmul.f32 %v5116_v15, %v4741_v35  ;;  %v6022_v28 = vadd.f32 %v6021_v51, %v5508_v42  ;;  %v4742_v36 = vmul.f32 %v10224_v7, %v4480_v26  ;;  %v4256_v31 = vsub.f32 1.0, %v10420_v2  ;;  %v5146_v63 = vpop.permute.xlu0 %5145  ;;  %v12783_v15 = vld [vmem:[#allocation159_spill] sm:$0xff]  ;;  %v12787_v42 = vld [vmem:[#allocation209_spill] sm:$0xff] }
 0x528   : > { %v2716_v39 = vadd.f32 %v12780_v22, %v1688_v41  ;;  %v1562_v9 = vsub.f32 %v12781_v55, %v7785_v46  ;;  %v5121_v48 = vpop.permute.xlu1 %5120  ;;  %v4482_v24 = vsel %vm4098_vm0, %v12782_v29, %v9747_v18  ;;  %vm4100_vm2 = vcmp.eq.s32.totalorder %v12783_v15, %v9507_v23  ;;  %v12784_v41 = vld [vmem:[#allocation197_spill] sm:$0xff]  ;;  %v12786_v18 = vld [vmem:[#allocation139_spill] sm:$0xff]  ;;  %v12794_v29 = vld [vmem:[#allocation342_spill] sm:$0xff] }
 0x529   : > { %v4743_v14 = vmul.f32 %v10224_v7, %v4481_v40  ;;  %v6023_v16 = vadd.f32 %v6022_v28, %v5509_v61  ;;  %v5510_v25 = vmul.f32 %v5121_v48, %v4742_v36  ;;  %5440 = vperm.xlu1 %6236, %v688_v47   ;;  %v10458_v6 = vmax.f32 %v4253_v52, 0.0  ;;  %v12790_v47 = vld [vmem:[#allocation370_spill] sm:$0xff]  ;;  %v12791_v28 = vld [vmem:[#allocation163_spill] sm:$0xff] }
 0x52a   : > { %v4255_v49 = vsub.f32 1.0, %v10431_v8  ;;  %v3487_v59 = vmul.f32 %v3359_v57, %v3359_v57  ;;  %v4483_v26 = vsel %vm4099_vm1, %v12785_v17, %v12784_v41  ;;  %vm4101_vm3 = vcmp.eq.s32.totalorder %v12786_v18, %v9507_v23  ;;  %v12789_v57 = vld [vmem:[#allocation376_spill] sm:$0xff]  ;;  %v12795_v15 = vld [vmem:[#allocation378_spill] sm:$0xff] }
 0x52b   : > { %v5511_v27 = vmul.f32 %v5126_v0, %v4743_v14  ;;  %v6024_v35 = vadd.f32 %v6023_v16, %v5510_v25  ;;  %v4744_v51 = vmul.f32 %v10224_v7, %v4482_v24  ;;  %v10470_v32 = vadd.f32 %v12787_v42, %v2716_v39  ;;  %v5156_v60 = vpop.permute.xlu0 %5155  ;;  %v12792_v39 = vld [vmem:[#allocation90_spill] sm:$0xff]  ;;  %v12796_v14 = vld [vmem:[#allocation372_spill] sm:$0xff] }
 0x52c   : > { %v1690_v52 = vmul.f32 %v1562_v9, %v1562_v9  ;;  %v5131_v40 = vpop.permute.xlu1 %5130  ;;  %v4484_v13 = vsel %vm4100_vm2, %v12790_v47, %v12789_v57  ;;  %v10477_v61 = vmax.f32 %v4256_v31, 0.0  ;;  %vm4102_vm4 = vcmp.eq.s32.totalorder %v12791_v28, %v9507_v23  ;;  %v12793_v9 = vld [vmem:[#allocation341_spill] sm:$0xff]  ;;  %v12797_v16 = vld [vmem:[#allocation150_spill] sm:$0xff] }
 0x52d   : > { %12788 = vst [vmem:[#allocation14_spill] sm:$0xff] %v10470_v32  ;;  %v4745_v0 = vmul.f32 %v10224_v7, %v4483_v26  ;;  %v6025_v36 = vadd.f32 %v6024_v35, %v5511_v27  ;;  %v5512_v22 = vmul.f32 %v5131_v40, %v4744_v51  ;;  %v10483_v55 = vadd.f32 %v3487_v59, %v12792_v39  ;;  %v12798_v27 = vld [vmem:[#allocation212_spill] sm:$0xff]  ;;  %v12799_v40 = vld [vmem:[#allocation373_spill] sm:$0xff]  ;;  %v12800_v57 = vld [vmem:[#allocation374_spill] sm:$0xff] }
 0x52e   : > { %v3361_v48 = vsub.f32 %v12793_v9, %v8115_v38  ;;  %v1564_v24 = vsub.f32 %v12794_v29, %v7785_v46  ;;  %v4485_v31 = vsel %vm4101_vm3, %v12796_v14, %v12795_v15  ;;  %vm4103_vm5 = vcmp.eq.s32.totalorder %v12797_v16, %v9507_v23  ;;  %v12801_v47 = vld [vmem:[#allocation169_spill] sm:$0xff]  ;;  %v12803_v39 = vld [vmem:[#allocation56_spill] sm:$0xff]  ;;  %v12804_v28 = vld [vmem:[#allocation158_spill] sm:$0xff] }
 0x52f   : > { %v5513_v25 = vmul.f32 %v5136_v50, %v4745_v0  ;;  %v6026_v41 = vadd.f32 %v6025_v36, %v5512_v22  ;;  %v4746_v59 = vmul.f32 %v10224_v7, %v4484_v13  ;;  %v10497_v17 = vmax.f32 %v4255_v49, 0.0  ;;  %v5166_v51 = vpop.permute.xlu0 %5165 }
 0x530   : > { %v4258_v26 = vsub.f32 1.0, %v10470_v32  ;;  %v2718_v35 = vadd.f32 %v12798_v27, %v1690_v52  ;;  %v5141_v42 = vpop.permute.xlu1 %5140  ;;  %v4486_v18 = vsel %vm4102_vm4, %v12800_v57, %v12799_v40  ;;  %vm4104_vm6 = vcmp.eq.s32.totalorder %v12801_v47, %v9507_v23  ;;  %v12802_v52 = vld [vmem:[#allocation57_spill] sm:$0xff]  ;;  %v12808_v27 = vld [vmem:[#allocation6_spill] sm:$0xff]  ;;  %v12817_v47 = vld [vmem:[#allocation375_spill] sm:$0xff] }
 0x531   : > { %v4747_v50 = vmul.f32 %v10224_v7, %v4485_v31  ;;  %v6027_v13 = vadd.f32 %v6026_v41, %v5513_v25  ;;  %v5514_v49 = vmul.f32 %v5141_v42, %v4746_v59  ;;  %v4257_v0 = vsub.f32 1.0, %v10483_v55  ;;  %v12805_v31 = vld [vmem:[#allocation211_spill] sm:$0xff]  ;;  %v12809_v42 = vld [vmem:[#allocation306_spill] sm:$0xff] }
 0x532   : > { %v3489_v36 = vmul.f32 %v3361_v48, %v3361_v48  ;;  %v1692_v22 = vmul.f32 %v1564_v24, %v1564_v24  ;;  %v4487_v9 = vsel %vm4103_vm5, %v12803_v39, %v12802_v52  ;;  %vm4105_vm7 = vcmp.eq.s32.totalorder %v12804_v28, %v9507_v23  ;;  %v12807_v41 = vld [vmem:[#allocation343_spill] sm:$0xff]  ;;  %v12815_v39 = vld [vmem:[#allocation344_spill] sm:$0xff] }
 0x533   : > { %v5515_v29 = vmul.f32 %v5146_v63, %v4747_v50  ;;  %v6028_v15 = vadd.f32 %v6027_v13, %v5514_v49  ;;  %v4748_v14 = vmul.f32 %v10224_v7, %v4486_v18  ;;  %v10519_v25 = vadd.f32 %v12805_v31, %v2718_v35  ;;  %v5176_v24 = vpop.permute.xlu0 %5175  ;;  %v12811_v63 = vld [vmem:[#allocation182_spill] sm:$0xff]  ;;  %v12812_v50 = vld [vmem:[#allocation91_spill] sm:$0xff]  ;;  %v12814_v49 = vld [vmem:[#allocation216_spill] sm:$0xff] }
 0x534   : > { %v3363_v48 = vsub.f32 %v12807_v41, %v8115_v38  ;;  %v5151_v59 = vpop.permute.xlu1 %5150  ;;  %v4488_v16 = vsel %vm4104_vm6, %v12809_v42, %v12808_v27  ;;  %v10528_v40 = vmax.f32 %v4258_v26, 0.0  ;;  %vm4106_vm8 = vcmp.eq.s32.totalorder %v12811_v63, %v9507_v23  ;;  %v12816_v41 = vld [vmem:[#allocation8_spill] sm:$0xff]  ;;  %v12818_v27 = vld [vmem:[#allocation162_spill] sm:$0xff]  ;;  %v12834_v32 = vld [vmem:[#allocation7_spill] sm:$0xff] }
 0x535   : > { %12806 = vst [vmem:[#allocation247_spill] sm:$0xff] %v10519_v25  ;;  %v4749_v57 = vmul.f32 %v10224_v7, %v4487_v9  ;;  %v6029_v35 = vadd.f32 %v6028_v15, %v5515_v29  ;;  %v5516_v18 = vmul.f32 %v5151_v59, %v4748_v14  ;;  %v10534_v13 = vadd.f32 %v3489_v36, %v12812_v50  ;;  %v12819_v50 = vld [vmem:[#allocation308_spill] sm:$0xff] }
 0x536   : > { %12810 = vst [vmem:[#allocation18_spill] sm:$0xff] %v10528_v40  ;;  %v2720_v52 = vadd.f32 %v12814_v49, %v1692_v22  ;;  %v1566_v31 = vsub.f32 %v12815_v39, %v7785_v46  ;;  %v4489_v26 = vsel %vm4105_vm7, %v12817_v47, %v12816_v41  ;;  %vm4107_vm9 = vcmp.eq.s32.totalorder %v12818_v27, %v9507_v23  ;;  %v12820_v49 = vld [vmem:[#allocation161_spill] sm:$0xff]  ;;  %v12821_v39 = vld [vmem:[#allocation194_spill] sm:$0xff]  ;;  %v12824_v41 = vld [vmem:[#allocation60_spill] sm:$0xff] }
 0x537   : > { %12813 = vst [vmem:[#allocation61_spill] sm:$0xff] %v10534_v13  ;;  %v5517_v9 = vmul.f32 %v5156_v60, %v4749_v57  ;;  %v6030_v29 = vadd.f32 %v6029_v35, %v5516_v18  ;;  %v4750_v15 = vmul.f32 %v10224_v7, %v4488_v16  ;;  %v10547_v36 = vmax.f32 %v4257_v0, 0.0  ;;  %v5186_v59 = vpop.permute.xlu0 %5185  ;;  %v12822_v35 = vld [vmem:[#allocation215_spill] sm:$0xff]  ;;  %v12825_v47 = vld [vmem:[#allocation377_spill] sm:$0xff] }
 0x538   : > { %v4260_v22 = vsub.f32 1.0, %v10519_v25  ;;  %v3491_v14 = vmul.f32 %v3363_v48, %v3363_v48  ;;  %v5161_v42 = vpop.permute.xlu1 %5160  ;;  %v4490_v28 = vsel %vm4106_vm8, %v12820_v49, %v12819_v50  ;;  %vm4108_vm10 = vcmp.eq.s32.totalorder %v12821_v39, %v9507_v23  ;;  %v12826_v50 = vld [vmem:[#allocation168_spill] sm:$0xff]  ;;  %v12835_v40 = vld [vmem:[#allocation5_spill] sm:$0xff] }
 0x539   : > { %v4751_v60 = vmul.f32 %v10224_v7, %v4489_v26  ;;  %v5518_v57 = vmul.f32 %v5161_v42, %v4750_v15  ;;  %v6031_v16 = vadd.f32 %v6030_v29, %v5517_v9  ;;  %v4259_v0 = vsub.f32 1.0, %v10534_v13  ;;  %v12827_v9 = vld [vmem:[#allocation92_spill] sm:$0xff]  ;;  %v12830_v13 = vld [vmem:[#allocation307_spill] sm:$0xff] }
 0x53a   : > { %v10560_v18 = vadd.f32 %v12822_v35, %v2720_v52  ;;  %v1694_v48 = vmul.f32 %v1566_v31, %v1566_v31  ;;  %v4491_v63 = vsel %vm4107_vm9, %v12825_v47, %v12824_v41  ;;  %vm4109_vm11 = vcmp.eq.s32.totalorder %v12826_v50, %v9507_v23  ;;  %v12828_v52 = vld [vmem:[#allocation345_spill] sm:$0xff] }
 0x53b   : > { %v5519_v49 = vmul.f32 %v5166_v51, %v4751_v60  ;;  %v6032_v25 = vadd.f32 %v6031_v16, %v5518_v57  ;;  %v4752_v26 = vmul.f32 %v10224_v7, %v4490_v28  ;;  %v10571_v29 = vadd.f32 %v3491_v14, %v12827_v9  ;;  %v5196_v31 = vpop.permute.xlu0 %5195  ;;  %v12829_v35 = vld [vmem:[#allocation9_spill] sm:$0xff]  ;;  %v12831_v51 = vld [vmem:[#allocation206_spill] sm:$0xff] }
 0x53c   : > { %12823 = vst [vmem:[#allocation167_spill] sm:$0xff] %v10560_v18  ;;  %v3365_v15 = vsub.f32 %v12828_v52, %v8115_v38  ;;  %v5171_v42 = vpop.permute.xlu1 %5170  ;;  %v4492_v27 = vsel %vm4108_vm10, %v12830_v13, %v12829_v35  ;;  %v10580_v41 = vmax.f32 %v4260_v22, 0.0  ;;  %vm4110_vm12 = vcmp.eq.s32.totalorder %v12831_v51, %v9507_v23  ;;  %v12832_v16 = vld [vmem:[#allocation218_spill] sm:$0xff]  ;;  %v12836_v22 = vld [vmem:[#allocation181_spill] sm:$0xff] }
 0x53d   : > { %v4753_v28 = vmul.f32 %v10224_v7, %v4491_v63  ;;  %v5520_v14 = vmul.f32 %v5171_v42, %v4752_v26  ;;  %v6033_v60 = vadd.f32 %v6032_v25, %v5519_v49  ;;  %v4262_v57 = vsub.f32 1.0, %v10560_v18  ;;  %v12833_v9 = vld [vmem:[#allocation346_spill] sm:$0xff]  ;;  %v12842_v51 = vld [vmem:[#allocation193_spill] sm:$0xff] }
 0x53e   : > { %v2722_v47 = vadd.f32 %v12832_v16, %v1694_v48  ;;  %v1568_v52 = vsub.f32 %v12833_v9, %v7785_v46  ;;  %v4493_v13 = vsel %vm4109_vm11, %v12835_v40, %v12834_v32  ;;  %vm4111_vm13 = vcmp.eq.s32.totalorder %v12836_v22, %v9507_v23  ;;  %v12837_v16 = vld [vmem:[#allocation248_spill] sm:$0xff]  ;;  %v12839_v40 = vld [vmem:[#allocation214_spill] sm:$0xff] }
 0x53f   : > { %v5521_v39 = vmul.f32 %v5176_v24, %v4753_v28  ;;  %v6034_v63 = vadd.f32 %v6033_v60, %v5520_v14  ;;  %v4754_v25 = vmul.f32 %v10224_v7, %v4492_v27  ;;  %v10597_v49 = vmax.f32 %v4259_v0, 0.0  ;;  %v5206_v42 = vpop.permute.xlu0 %5205  ;;  %v12838_v9 = vld [vmem:[#allocation164_spill] sm:$0xff]  ;;  %v12840_v0 = vld [vmem:[#allocation217_spill] sm:$0xff] }
 0x540   : > { %v4261_v48 = vsub.f32 1.0, %v10571_v29  ;;  %v3493_v26 = vmul.f32 %v3365_v15, %v3365_v15  ;;  %v5181_v35 = vpop.permute.xlu1 %5180  ;;  %v4494_v32 = vsel %vm4110_vm12, %v12838_v9, %v12837_v16  ;;  %vm4112_vm14 = vcmp.eq.s32.totalorder %v12839_v40, %v9507_v23  ;;  %v12841_v15 = vld [vmem:[#allocation310_spill] sm:$0xff] }
 0x541   : > { %v4755_v24 = vmul.f32 %v10224_v7, %v4493_v13  ;;  %v5522_v50 = vmul.f32 %v5181_v35, %v4754_v25  ;;  %v6035_v27 = vadd.f32 %v6034_v63, %v5521_v39  ;;  %v10609_v28 = vadd.f32 %v12840_v0, %v2722_v47  ;;  %v12843_v39 = vld [vmem:[#allocation93_spill] sm:$0xff]  ;;  %v12844_v47 = vld [vmem:[#allocation347_spill] sm:$0xff]  ;;  %v12845_v25 = vld [vmem:[#allocation348_spill] sm:$0xff] }
 0x542   : > { %v1696_v14 = vmul.f32 %v1568_v52, %v1568_v52  ;;  %v4495_v60 = vsel %vm4111_vm13, %v12841_v15, %v10104_v21  ;;  %v10616_v18 = vmax.f32 %v4262_v57, 0.0  ;;  %vm4113_vm15 = vcmp.eq.s32.totalorder %v12842_v51, %v9507_v23  ;;  %v12846_v57 = vld [vmem:[#allocation309_spill] sm:$0xff]  ;;  %v12848_v15 = vld [vmem:[#allocation220_spill] sm:$0xff] }
 0x543   : > { %v5523_v16 = vmul.f32 %v5186_v59, %v4755_v24  ;;  %v6036_v9 = vadd.f32 %v6035_v27, %v5522_v50  ;;  %v4756_v13 = vmul.f32 %v10224_v7, %v4494_v32  ;;  %v10622_v63 = vadd.f32 %v3493_v26, %v12843_v39  ;;  %v5216_v22 = vpop.permute.xlu0 %5215  ;;  %v12847_v24 = vld [vmem:[#allocation225_spill] sm:$0xff] }
 0x544   : > { %v3367_v52 = vsub.f32 %v12844_v47, %v8115_v38  ;;  %v1570_v35 = vsub.f32 %v12845_v25, %v7785_v46  ;;  %v5191_v21 = vpop.permute.xlu1 %5190  ;;  %v4496_v59 = vsel %vm4112_vm14, %v12846_v57, %v10102_v43  ;;  %vm4114_vm0 = vcmp.eq.s32.totalorder %v12847_v24, %v9507_v23  ;;  %v12849_v43 = vld [vmem:[#allocation205_spill] sm:$0xff]  ;;  %v12851_v57 = vld [vmem:[#allocation219_spill] sm:$0xff] }
 0x545   : > { %v4757_v26 = vmul.f32 %v10224_v7, %v4495_v60  ;;  %v5524_v32 = vmul.f32 %v5191_v21, %v4756_v13  ;;  %v6037_v50 = vadd.f32 %v6036_v9, %v5523_v16  ;;  %v10636_v27 = vmax.f32 %v4261_v48, 0.0 }
 0x546   : > { %v4264_v0 = vsub.f32 1.0, %v10609_v28  ;;  %v2724_v39 = vadd.f32 %v12848_v15, %v1696_v14  ;;  %v4497_v40 = vsel %vm4113_vm15, %v10107_v37, %v10159_v4  ;;  %vm4115_vm1 = vcmp.eq.s32.totalorder %v12849_v43, %v9507_v23  ;;  %v12850_v37 = vld [vmem:[#allocation233_spill] sm:$0xff] }
 0x547   : > { %v5525_v47 = vmul.f32 %v5196_v31, %v4757_v26  ;;  %v6038_v25 = vadd.f32 %v6037_v50, %v5524_v32  ;;  %v4758_v60 = vmul.f32 %v10224_v7, %v4496_v59  ;;  %v4263_v48 = vsub.f32 1.0, %v10622_v63  ;;  %v5226_v13 = vpop.permute.xlu0 %5225  ;;  %v12853_v26 = vld [vmem:[#allocation13_spill] sm:$0xff] }
 0x548   : > { %v3495_v16 = vmul.f32 %v3367_v52, %v3367_v52  ;;  %v1698_v9 = vmul.f32 %v1570_v35, %v1570_v35  ;;  %v5201_v21 = vpop.permute.xlu1 %5200  ;;  %v4498_v14 = vsel %vm4114_vm0, %v10078_v1, %v10157_v34  ;;  %vm4116_vm2 = vcmp.eq.s32.totalorder %v12850_v37, %v9507_v23  ;;  %v12852_v52 = vld [vmem:[#allocation349_spill] sm:$0xff]  ;;  %v12862_v37 = vld [vmem:[#allocation224_spill] sm:$0xff] }
 0x549   : > { %v4759_v4 = vmul.f32 %v10224_v7, %v4497_v40  ;;  %v5526_v31 = vmul.f32 %v5201_v21, %v4758_v60  ;;  %v6039_v51 = vadd.f32 %v6038_v25, %v5525_v47  ;;  %v10658_v59 = vadd.f32 %v12851_v57, %v2724_v39  ;;  %v12854_v34 = vld [vmem:[#allocation213_spill] sm:$0xff]  ;;  %v12855_v39 = vld [vmem:[#allocation94_spill] sm:$0xff] }
 0x54a   : > { %v3369_v35 = vsub.f32 %v12852_v52, %v8115_v38  ;;  %v4499_v24 = vsel %vm4115_vm1, %v12853_v26, %v10211_v45  ;;  %v10667_v1 = vmax.f32 %v4264_v0, 0.0  ;;  %vm4117_vm3 = vcmp.eq.s32.totalorder %v12854_v34, %v9507_v23  ;;  %v12856_v47 = vld [vmem:[#allocation222_spill] sm:$0xff]  ;;  %v12858_v45 = vld [vmem:[#allocation311_spill] sm:$0xff]  ;;  %v12861_v26 = vld [vmem:[#allocation16_spill] sm:$0xff] }
 0x54b   : > { %v5527_v32 = vmul.f32 %v5206_v42, %v4759_v4  ;;  %v6040_v50 = vadd.f32 %v6039_v51, %v5526_v31  ;;  %v4760_v15 = vmul.f32 %v10224_v7, %v4498_v14  ;;  %v10673_v40 = vadd.f32 %v3495_v16, %v12855_v39  ;;  %v12857_v60 = vld [vmem:[#allocation350_spill] sm:$0xff]  ;;  %v5236_v57 = vpop.permute.xlu0 %5235  ;;  %v12859_v0 = vld [vmem:[#allocation259_spill] sm:$0xff] }
 0x54c   : > { %v2726_v25 = vadd.f32 %v12856_v47, %v1698_v9  ;;  %v1572_v21 = vsub.f32 %v12857_v60, %v7785_v46  ;;  %v5211_v43 = vpop.permute.xlu1 %5210  ;;  %v4500_v52 = vsel %vm4116_vm2, %v12859_v0, %v12858_v45  ;;  %v12860_v42 = vld [vmem:[#allocation239_spill] sm:$0xff]  ;;  %v4761_v14 = vmul.f32 %v10224_v7, %v4499_v24  ;;  %v12864_v45 = vld [vmem:[#allocation165_spill] sm:$0xff]  ;;  %v12865_v34 = vld [vmem:[#allocation242_spill] sm:$0xff] }
 0x54d   : > { %vm4118_vm4 = vcmp.eq.s32.totalorder %v12860_v42, %v9507_v23  ;;  %v5528_v16 = vmul.f32 %v5211_v43, %v4760_v15  ;;  %v6041_v4 = vadd.f32 %v6040_v50, %v5527_v32  ;;  %v10686_v31 = vmax.f32 %v4263_v48, 0.0  ;;  %v12863_v48 = vld [vmem:[#allocation221_spill] sm:$0xff] }
 0x54e   : > { %v4266_v9 = vsub.f32 1.0, %v10658_v59  ;;  %v3497_v51 = vmul.f32 %v3369_v35, %v3369_v35  ;;  %v4501_v39 = vsel %vm4117_vm3, %v12861_v26, %v10272_v3  ;;  %vm4119_vm5 = vcmp.eq.s32.totalorder %v12862_v37, %v9507_v23 }
 0x54f   : > { %v5529_v47 = vmul.f32 %v5216_v22, %v4761_v14  ;;  %v6042_v60 = vadd.f32 %v6041_v4, %v5528_v16  ;;  %v4762_v24 = vmul.f32 %v10224_v7, %v4500_v52  ;;  %v4265_v32 = vsub.f32 1.0, %v10673_v40  ;;  %v5246_v35 = vpop.permute.xlu0 %5245  ;;  %v12866_v14 = vld [vmem:[#allocation95_spill] sm:$0xff]  ;;  %v12868_v4 = vld [vmem:[#allocation232_spill] sm:$0xff] }
 0x550   : > { %v10699_v50 = vadd.f32 %v12863_v48, %v2726_v25  ;;  %v1700_v15 = vmul.f32 %v1572_v21, %v1572_v21  ;;  %v5221_v43 = vpop.permute.xlu1 %5220  ;;  %v4502_v3 = vsel %vm4118_vm4, %v12864_v45, %v10270_v10  ;;  %vm4120_vm6 = vcmp.eq.s32.totalorder %v12865_v34, %v9507_v23  ;;  %v12867_v25 = vld [vmem:[#allocation351_spill] sm:$0xff]  ;;  %v12870_v48 = vld [vmem:[#allocation352_spill] sm:$0xff] }
 0x551   : > { %v4763_v22 = vmul.f32 %v10224_v7, %v4501_v39  ;;  %v5530_v0 = vmul.f32 %v5221_v43, %v4762_v24  ;;  %v6043_v52 = vadd.f32 %v6042_v60, %v5529_v47  ;;  %v10710_v16 = vadd.f32 %v3497_v51, %v12866_v14  ;;  %v12869_v60 = vld [vmem:[#allocation226_spill] sm:$0xff] }
 0x552   : > { %v3371_v21 = vsub.f32 %v12867_v25, %v8115_v38  ;;  %v4503_v42 = vsel %vm4119_vm5, %v10247_v20, %v10350_v11  ;;  %v10719_v10 = vmax.f32 %v4266_v9, 0.0  ;;  %vm4121_vm7 = vcmp.eq.s32.totalorder %v12868_v4, %v9507_v23  ;;  %v12871_v11 = vld [vmem:[#allocation244_spill] sm:$0xff] }
 0x553   : > { %v5531_v26 = vmul.f32 %v5226_v13, %v4763_v22  ;;  %v6044_v39 = vadd.f32 %v6043_v52, %v5530_v0  ;;  %v4764_v47 = vmul.f32 %v10224_v7, %v4502_v3  ;;  %v4268_v51 = vsub.f32 1.0, %v10699_v50  ;;  %v5256_v45 = vpop.permute.xlu0 %5255  ;;  %v12872_v0 = vld [vmem:[#allocation4_spill] sm:$0xff] }
 0x554   : > { %v2728_v24 = vadd.f32 %v12869_v60, %v1700_v15  ;;  %v1574_v43 = vsub.f32 %v12870_v48, %v7785_v46  ;;  %v5231_v14 = vpop.permute.xlu1 %5230  ;;  %v4504_v20 = vsel %vm4120_vm6, %v10244_v5, %v10307_v54  ;;  %vm4122_vm8 = vcmp.eq.s32.totalorder %v12871_v11, %v9507_v23  ;;  %v12873_v5 = vld [vmem:[#allocation249_spill] sm:$0xff]  ;;  %v12876_v60 = vld [vmem:[#allocation3_spill] sm:$0xff] }
 0x555   : > { %v4765_v13 = vmul.f32 %v10224_v7, %v4503_v42  ;;  %v5532_v9 = vmul.f32 %v5231_v14, %v4764_v47  ;;  %v6045_v37 = vadd.f32 %v6044_v39, %v5531_v26  ;;  %v10736_v3 = vmax.f32 %v4265_v32, 0.0  ;;  %v12874_v42 = vld [vmem:[#allocation223_spill] sm:$0xff] }
 0x556   : > { %v4267_v15 = vsub.f32 1.0, %v10710_v16  ;;  %v3499_v22 = vmul.f32 %v3371_v21, %v3371_v21  ;;  %v4505_v52 = vsel %vm4121_vm7, %v12872_v0, %v10362_v30  ;;  %vm4123_vm9 = vcmp.eq.s32.totalorder %v12873_v5, %v9507_v23  ;;  %v12875_v21 = vld [vmem:[#allocation260_spill] sm:$0xff] }
 0x557   : > { %v5533_v54 = vmul.f32 %v5236_v57, %v4765_v13  ;;  %v6046_v34 = vadd.f32 %v6045_v37, %v5532_v9  ;;  %v4766_v25 = vmul.f32 %v10224_v7, %v4504_v20  ;;  %v10748_v26 = vadd.f32 %v12874_v42, %v2728_v24  ;;  %v5266_v39 = vpop.permute.xlu0 %5265  ;;  %v12877_v24 = vld [vmem:[#allocation96_spill] sm:$0xff]  ;;  %v12879_v9 = vld [vmem:[#allocation354_spill] sm:$0xff] }
 0x558   : > { %v1702_v32 = vmul.f32 %v1574_v43, %v1574_v43  ;;  %v5241_v47 = vpop.permute.xlu1 %5240  ;;  %v4506_v4 = vsel %vm4122_vm8, %v12875_v21, %v10360_v12  ;;  %v10755_v30 = vmax.f32 %v4268_v51, 0.0  ;;  %vm4124_vm10 = vcmp.eq.s32.totalorder %v12876_v60, %v9507_v23  ;;  %v12878_v43 = vld [vmem:[#allocation353_spill] sm:$0xff]  ;;  %v12883_v60 = vld [vmem:[#allocation255_spill] sm:$0xff] }
 0x559   : > { %v4767_v57 = vmul.f32 %v10224_v7, %v4505_v52  ;;  %v5534_v48 = vmul.f32 %v5241_v47, %v4766_v25  ;;  %v6047_v14 = vadd.f32 %v6046_v34, %v5533_v54  ;;  %v10761_v20 = vadd.f32 %v3499_v22, %v12877_v24  ;;  %v12880_v51 = vld [vmem:[#allocation241_spill] sm:$0xff]  ;;  %v12881_v34 = vld [vmem:[#allocation228_spill] sm:$0xff] }
 0x55a   : > { %v3373_v13 = vsub.f32 %v12878_v43, %v8115_v38  ;;  %v1576_v37 = vsub.f32 %v12879_v9, %v7785_v46  ;;  %v4507_v12 = vsel %vm4123_vm9, %v10355_v44, %v10406_v58  ;;  %vm4125_vm11 = vcmp.eq.s32.totalorder %v12880_v51, %v9507_v23  ;;  %v12882_v58 = vld [vmem:[#allocation256_spill] sm:$0xff]  ;;  %v12885_v43 = vld [vmem:[#allocation355_spill] sm:$0xff] }
 0x55b   : > { %v5535_v11 = vmul.f32 %v5246_v35, %v4767_v57  ;;  %v6048_v0 = vadd.f32 %v6047_v14, %v5534_v48  ;;  %v4768_v22 = vmul.f32 %v10224_v7, %v4506_v4  ;;  %v10775_v52 = vmax.f32 %v4267_v15, 0.0  ;;  %v5276_v42 = vpop.permute.xlu0 %5275  ;;  %v12884_v14 = vld [vmem:[#allocation227_spill] sm:$0xff] }
 0x55c   : > { %v4270_v54 = vsub.f32 1.0, %v10748_v26  ;;  %v2730_v25 = vadd.f32 %v12881_v34, %v1702_v32  ;;  %v5251_v47 = vpop.permute.xlu1 %5250  ;;  %v4508_v44 = vsel %vm4124_vm10, %v10328_v19, %v10404_v56  ;;  %vm4126_vm12 = vcmp.eq.s32.totalorder %v12882_v58, %v9507_v23  ;;  %v12888_v34 = vld [vmem:[#allocation230_spill] sm:$0xff] }
 0x55d   : > { %v4769_v35 = vmul.f32 %v10224_v7, %v4507_v12  ;;  %v5536_v5 = vmul.f32 %v5251_v47, %v4768_v22  ;;  %v6049_v15 = vadd.f32 %v6048_v0, %v5535_v11  ;;  %v4269_v21 = vsub.f32 1.0, %v10761_v20  ;;  %v12887_v0 = vld [vmem:[#allocation97_spill] sm:$0xff]  ;;  %v12889_v47 = vld [vmem:[#allocation356_spill] sm:$0xff] }
 0x55e   : > { %v3501_v4 = vmul.f32 %v3373_v13, %v3373_v13  ;;  %v1704_v57 = vmul.f32 %v1576_v37, %v1576_v37  ;;  %v4509_v32 = vsel %vm4125_vm11, %v10384_v53, %v10458_v6  ;;  %vm4127_vm13 = vcmp.eq.s32.totalorder %v12883_v60, %v9507_v23 }
 0x55f   : > { %v5537_v19 = vmul.f32 %v5256_v45, %v4769_v35  ;;  %v6050_v56 = vadd.f32 %v6049_v15, %v5536_v5  ;;  %v4770_v48 = vmul.f32 %v10224_v7, %v4508_v44  ;;  %v10797_v24 = vadd.f32 %v12884_v14, %v2730_v25  ;;  %v12886_v45 = vld [vmem:[#allocation261_spill] sm:$0xff] }
 0x560   : > { %v3375_v13 = vsub.f32 %v12885_v43, %v8115_v38  ;;  %v5286_v9 = vpop.permute.xlu0 %5285  ;;  %v5261_v37 = vpop.permute.xlu1 %5260  ;;  %v4510_v53 = vsel %vm4126_vm12, %v10381_v33, %v10441_v62  ;;  %v10806_v6 = vmax.f32 %v4270_v54, 0.0  ;;  %vm4128_vm14 = vcmp.eq.s32.totalorder %v12886_v45, %v9507_v23  ;;  %v12890_v62 = vld [vmem:[#allocation245_spill] sm:$0xff] }
 0x561   : > { %v4771_v12 = vmul.f32 %v10224_v7, %v4509_v32  ;;  %v5538_v51 = vmul.f32 %v5261_v37, %v4770_v48  ;;  %v6051_v11 = vadd.f32 %v6050_v56, %v5537_v19  ;;  %v10812_v22 = vadd.f32 %v3501_v4, %v12887_v0  ;;  %v12892_v56 = vld [vmem:[#allocation229_spill] sm:$0xff] }
 0x562   : > { %v2732_v25 = vadd.f32 %v12888_v34, %v1704_v57  ;;  %v1578_v44 = vsub.f32 %v12889_v47, %v7785_v46  ;;  %v4511_v33 = vsel %vm4127_vm13, %v10431_v8, %v10497_v17  ;;  %vm4129_vm15 = vcmp.eq.s32.totalorder %v12890_v62, %v9507_v23  ;;  %v12891_v17 = vld [vmem:[#allocation11_spill] sm:$0xff]  ;;  %v12896_v34 = vld [vmem:[#allocation18_spill] sm:$0xff] }
 0x563   : > { %v5539_v54 = vmul.f32 %v5266_v39, %v4771_v12  ;;  %v6052_v58 = vadd.f32 %v6051_v11, %v5538_v51  ;;  %v4772_v35 = vmul.f32 %v10224_v7, %v4510_v53  ;;  %v10825_v5 = vmax.f32 %v4269_v21, 0.0  ;;  %v12894_v53 = vld [vmem:[#allocation98_spill] sm:$0xff]  ;;  %v12895_v12 = vld [vmem:[#allocation357_spill] sm:$0xff] }
 0x564   : > { %v4272_v15 = vsub.f32 1.0, %v10797_v24  ;;  %v3503_v4 = vmul.f32 %v3375_v13, %v3375_v13  ;;  %v5296_v57 = vpop.permute.xlu0 %5295  ;;  %v5271_v32 = vpop.permute.xlu1 %5270  ;;  %v4512_v8 = vsel %vm4128_vm14, %v10420_v2, %v10477_v61  ;;  %vm4130_vm0 = vcmp.eq.s32.totalorder %v12891_v17, %v9507_v23  ;;  %v12893_v2 = vld [vmem:[#allocation246_spill] sm:$0xff] }
 0x565   : > { %v4773_v39 = vmul.f32 %v10224_v7, %v4511_v33  ;;  %v5540_v60 = vmul.f32 %v5271_v32, %v4772_v35  ;;  %v6053_v19 = vadd.f32 %v6052_v58, %v5539_v54  ;;  %v4271_v21 = vsub.f32 1.0, %v10812_v22  ;;  %v12899_v54 = vld [vmem:[#allocation234_spill] sm:$0xff]  ;;  %v12901_v32 = vld [vmem:[#allocation61_spill] sm:$0xff] }
 0x566   : > { %v10838_v48 = vadd.f32 %v12892_v56, %v2732_v25  ;;  %v1706_v14 = vmul.f32 %v1578_v44, %v1578_v44  ;;  %v4513_v43 = vsel %vm4129_vm15, %v10483_v55, %v10547_v36  ;;  %vm4131_vm1 = vcmp.eq.s32.totalorder %v12893_v2, %v9507_v23  ;;  %v12897_v25 = vld [vmem:[#allocation14_spill] sm:$0xff] }
 0x567   : > { %v5541_v61 = vmul.f32 %v5276_v42, %v4773_v39  ;;  %v6054_v13 = vadd.f32 %v6053_v19, %v5540_v60  ;;  %v4774_v37 = vmul.f32 %v10224_v7, %v4512_v8  ;;  %v10849_v45 = vadd.f32 %v3503_v4, %v12894_v53  ;;  %v12898_v42 = vld [vmem:[#allocation15_spill] sm:$0xff]  ;;  %v12900_v35 = vld [vmem:[#allocation358_spill] sm:$0xff] }
 0x568   : > { %v3377_v51 = vsub.f32 %v12895_v12, %v8115_v38  ;;  %v5306_v11 = vpop.permute.xlu0 %5305  ;;  %v5281_v0 = vpop.permute.xlu1 %5280  ;;  %v4514_v55 = vsel %vm4130_vm0, %v12897_v25, %v12896_v34  ;;  %v10858_v36 = vmax.f32 %v4272_v15, 0.0  ;;  %vm4132_vm2 = vcmp.eq.s32.totalorder %v12898_v42, %v9507_v23  ;;  %v12902_v8 = vld [vmem:[#allocation258_spill] sm:$0xff]  ;;  %v12905_v53 = vld [vmem:[#allocation231_spill] sm:$0xff] }
 0x569   : > { %v4775_v47 = vmul.f32 %v10224_v7, %v4513_v43  ;;  %v5542_v44 = vmul.f32 %v5281_v0, %v4774_v37  ;;  %v6055_v33 = vadd.f32 %v6054_v13, %v5541_v61  ;;  %v10863_v62 = vmax.f32 %v4271_v21, 0.0  ;;  %v12903_v61 = vld [vmem:[#allocation247_spill] sm:$0xff]  ;;  %v12904_v2 = vld [vmem:[#allocation270_spill] sm:$0xff] }
 0x56a   : > { %v2734_v58 = vadd.f32 %v12899_v54, %v1706_v14  ;;  %v1580_v4 = vsub.f32 %v12900_v35, %v7785_v46  ;;  %v4515_v15 = vsel %vm4131_vm1, %v12901_v32, %v10597_v49  ;;  %vm4133_vm3 = vcmp.eq.s32.totalorder %v12902_v8, %v9507_v23  ;;  %v12907_v25 = vld [vmem:[#allocation263_spill] sm:$0xff]  ;;  %v12909_v54 = vld [vmem:[#allocation360_spill] sm:$0xff] }
 0x56b   : > { %v5543_v17 = vmul.f32 %v5286_v9, %v4775_v47  ;;  %v6056_v39 = vadd.f32 %v6055_v33, %v5542_v44  ;;  %v4776_v60 = vmul.f32 %v10224_v7, %v4514_v55  ;;  %v4274_v19 = vsub.f32 1.0, %v10838_v48  ;;  %v12908_v44 = vld [vmem:[#allocation101_spill] sm:$0xff]  ;;  %v12910_v32 = vld [vmem:[#allocation167_spill] sm:$0xff] }
 0x56c   : > { %v4273_v21 = vsub.f32 1.0, %v10849_v45  ;;  %v3505_v56 = vmul.f32 %v3377_v51, %v3377_v51  ;;  %v5316_v14 = vpop.permute.xlu0 %5315  ;;  %v5291_v43 = vpop.permute.xlu1 %5290  ;;  %v4516_v49 = vsel %vm4132_vm2, %v12903_v61, %v10580_v41  ;;  %vm4134_vm4 = vcmp.eq.s32.totalorder %v12904_v2, %v9507_v23  ;;  %v12906_v51 = vld [vmem:[#allocation359_spill] sm:$0xff] }
 0x56d   : > { %v4777_v9 = vmul.f32 %v10224_v7, %v4515_v15  ;;  %v5544_v13 = vmul.f32 %v5291_v43, %v4776_v60  ;;  %v6057_v37 = vadd.f32 %v6056_v39, %v5543_v17  ;;  %v10887_v12 = vadd.f32 %v12905_v53, %v2734_v58  ;;  %v12912_v60 = vld [vmem:[#allocation236_spill] sm:$0xff] }
 0x56e   : > { %v1708_v0 = vmul.f32 %v1580_v4, %v1580_v4  ;;  %v3379_v34 = vsub.f32 %v12906_v51, %v8115_v38  ;;  %v4517_v41 = vsel %vm4133_vm3, %v10571_v29, %v10636_v27  ;;  %vm4135_vm5 = vcmp.eq.s32.totalorder %v12907_v25, %v9507_v23  ;;  %v12916_v25 = vld [vmem:[#allocation104_spill] sm:$0xff] }
 0x56f   : > { %v5545_v55 = vmul.f32 %v5296_v57, %v4777_v9  ;;  %v6058_v42 = vadd.f32 %v6057_v37, %v5544_v13  ;;  %v4778_v47 = vmul.f32 %v10224_v7, %v4516_v49  ;;  %v10900_v33 = vadd.f32 %v3505_v56, %v12908_v44  ;;  %v12911_v57 = vld [vmem:[#allocation277_spill] sm:$0xff] }
 0x570   : > { %v1582_v58 = vsub.f32 %v12909_v54, %v7785_v46  ;;  %v5326_v35 = vpop.permute.xlu0 %5325  ;;  %v5301_v4 = vpop.permute.xlu1 %5300  ;;  %v4518_v29 = vsel %vm4134_vm4, %v12910_v32, %v10616_v18  ;;  %v10909_v27 = vmax.f32 %v4274_v19, 0.0  ;;  %vm4136_vm6 = vcmp.eq.s32.totalorder %v12911_v57, %v9507_v23  ;;  %v12913_v19 = vld [vmem:[#allocation267_spill] sm:$0xff]  ;;  %v12919_v32 = vld [vmem:[#allocation361_spill] sm:$0xff]  ;;  %v12920_v57 = vld [vmem:[#allocation362_spill] sm:$0xff] }
 0x571   : > { %v4779_v15 = vmul.f32 %v10224_v7, %v4517_v41  ;;  %v5546_v8 = vmul.f32 %v5301_v4, %v4778_v47  ;;  %v6059_v17 = vadd.f32 %v6058_v42, %v5545_v55  ;;  %v4276_v39 = vsub.f32 1.0, %v10887_v12  ;;  %v10926_v7 = vld [vmem:[%s11187_s4] ss:$0 sm:$0xff] }
 0x572   : > { %v2736_v56 = vadd.f32 %v12912_v60, %v1708_v0  ;;  %v3507_v43 = vmul.f32 %v3379_v34, %v3379_v34  ;;  %v4519_v18 = vsel %vm4135_vm5, %v10622_v63, %v10686_v31  ;;  %vm4137_vm7 = vcmp.eq.s32.totalorder %v12913_v19, %v9507_v23  ;;  %v12914_v31 = vld [vmem:[#allocation26_spill] sm:$0xff] }
 0x573   : > { %v5547_v61 = vmul.f32 %v5306_v11, %v4779_v15  ;;  %v6060_v49 = vadd.f32 %v6059_v17, %v5546_v8  ;;  %v4780_v2 = vmul.f32 %v10926_v7, %v4518_v29  ;;  %v10929_v9 = vmax.f32 %v4273_v21, 0.0  ;;  %v12915_v21 = vld [vmem:[#allocation235_spill] sm:$0xff] }
 0x574   : > { %v4275_v13 = vsub.f32 1.0, %v10900_v33  ;;  %v1710_v37 = vmul.f32 %v1582_v58, %v1582_v58  ;;  %v5336_v53 = vpop.permute.xlu0 %5335  ;;  %v5311_v0 = vpop.permute.xlu1 %5310  ;;  %v4520_v63 = vsel %vm4136_vm6, %v10609_v28, %v10667_v1  ;;  %vm4138_vm8 = vcmp.eq.s32.totalorder %v12914_v31, %v9507_v23  ;;  %v12917_v1 = vld [vmem:[#allocation19_spill] sm:$0xff]  ;;  %v12918_v58 = vld [vmem:[#allocation238_spill] sm:$0xff] }
 0x575   : > { %v4781_v11 = vmul.f32 %v10926_v7, %v4519_v18  ;;  %v5548_v51 = vmul.f32 %v5311_v0, %v4780_v2  ;;  %v6061_v34 = vadd.f32 %v6060_v49, %v5547_v61  ;;  %v10941_v41 = vadd.f32 %v12915_v21, %v2736_v56  ;;  %v12923_v2 = vld [vmem:[#allocation237_spill] sm:$0xff] }
 0x576   : > { %v10944_v55 = vadd.f32 %v3507_v43, %v12916_v25  ;;  %v4521_v42 = vsel %vm4137_vm7, %v10673_v40, %v10736_v3  ;;  %v10951_v28 = vmax.f32 %v4276_v39, 0.0  ;;  %vm4139_vm9 = vcmp.eq.s32.totalorder %v12917_v1, %v9507_v23  ;;  %v12921_v3 = vld [vmem:[#allocation285_spill] sm:$0xff]  ;;  %v12926_v25 = vld [vmem:[#allocation364_spill] sm:$0xff] }
 0x577   : > { %v5549_v47 = vmul.f32 %v5316_v14, %v4781_v11  ;;  %v6062_v44 = vadd.f32 %v6061_v34, %v5548_v51  ;;  %v4782_v54 = vmul.f32 %v10926_v7, %v4520_v63  ;;  %v2738_v4 = vadd.f32 %v12918_v58, %v1710_v37  ;;  %v12925_v34 = vld [vmem:[#allocation363_spill] sm:$0xff] }
 0x578   : > { %v3381_v29 = vsub.f32 %v12919_v32, %v8115_v38  ;;  %v1584_v15 = vsub.f32 %v12920_v57, %v7785_v46  ;;  %v5346_v8 = vpop.permute.xlu0 %5345  ;;  %v5321_v17 = vpop.permute.xlu1 %5320  ;;  %v4522_v40 = vsel %vm4138_vm8, %v10658_v59, %v10719_v10  ;;  %vm4140_vm10 = vcmp.eq.s32.totalorder %v12921_v3, %v9507_v23  ;;  %v12922_v59 = vld [vmem:[#allocation276_spill] sm:$0xff] }
 0x579   : > { %v4783_v14 = vmul.f32 %v10926_v7, %v4521_v42  ;;  %v5550_v39 = vmul.f32 %v5321_v17, %v4782_v54  ;;  %v6063_v60 = vadd.f32 %v6062_v44, %v5549_v47  ;;  %v10969_v56 = vmax.f32 %v4275_v13, 0.0 }
 0x57a   : > { %v4278_v43 = vsub.f32 1.0, %v10941_v41  ;;  %v4277_v18 = vsub.f32 1.0, %v10944_v55  ;;  %v4523_v19 = vsel %vm4139_vm9, %v10710_v16, %v10775_v52  ;;  %vm4141_vm11 = vcmp.eq.s32.totalorder %v12922_v59, %v9507_v23  ;;  %v12924_v52 = vld [vmem:[#allocation289_spill] sm:$0xff] }
 0x57b   : > { %v5551_v10 = vmul.f32 %v5326_v35, %v4783_v14  ;;  %v6064_v61 = vadd.f32 %v6063_v60, %v5550_v39  ;;  %v4784_v49 = vmul.f32 %v10926_v7, %v4522_v40  ;;  %v10982_v13 = vadd.f32 %v12923_v2, %v2738_v4  ;;  %v12928_v4 = vld [vmem:[#allocation107_spill] sm:$0xff] }
 0x57c   : > { %v3509_v37 = vmul.f32 %v3381_v29, %v3381_v29  ;;  %v1712_v0 = vmul.f32 %v1584_v15, %v1584_v15  ;;  %v5356_v63 = vpop.permute.xlu0 %5355  ;;  %v5331_v31 = vpop.permute.xlu1 %5330  ;;  %v4524_v16 = vsel %vm4140_vm10, %v10699_v50, %v10755_v30  ;;  %vm4142_vm12 = vcmp.eq.s32.totalorder %v12924_v52, %v9507_v23  ;;  %v12927_v30 = vld [vmem:[#allocation281_spill] sm:$0xff]  ;;  %v12929_v29 = vld [vmem:[#allocation240_spill] sm:$0xff] }
 0x57d   : > { %v4785_v35 = vmul.f32 %v10926_v7, %v4523_v19  ;;  %v5552_v11 = vmul.f32 %v5331_v31, %v4784_v49  ;;  %v6065_v51 = vadd.f32 %v6064_v61, %v5551_v10  ;;  %v3383_v21 = vsub.f32 %v12925_v34, %v8115_v38  ;;  %v12931_v19 = vld [vmem:[#allocation280_spill] sm:$0xff]  ;;  %v12932_v61 = vld [vmem:[#allocation251_spill] sm:$0xff] }
 0x57e   : > { %v1586_v42 = vsub.f32 %v12926_v25, %v7785_v46  ;;  %v4525_v1 = vsel %vm4141_vm11, %v10761_v20, %v10825_v5  ;;  %v11001_v50 = vmax.f32 %v4278_v43, 0.0  ;;  %vm4143_vm13 = vcmp.eq.s32.totalorder %v12927_v30, %v9507_v23  ;;  %v12930_v5 = vld [vmem:[#allocation36_spill] sm:$0xff] }
 0x57f   : > { %v5553_v47 = vmul.f32 %v5336_v53, %v4785_v35  ;;  %v6066_v44 = vadd.f32 %v6065_v51, %v5552_v11  ;;  %v4786_v54 = vmul.f32 %v10926_v7, %v4524_v16  ;;  %v4280_v58 = vsub.f32 1.0, %v10982_v13  ;;  %v12934_v16 = vld [vmem:[#allocation108_spill] sm:$0xff]  ;;  %v12935_v35 = vld [vmem:[#allocation253_spill] sm:$0xff] }
 0x580   : > { %v11008_v32 = vadd.f32 %v3509_v37, %v12928_v4  ;;  %v2740_v57 = vadd.f32 %v12929_v29, %v1712_v0  ;;  %v5366_v15 = vpop.permute.xlu0 %5365  ;;  %v5341_v17 = vpop.permute.xlu1 %5340  ;;  %v4526_v20 = vsel %vm4142_vm12, %v10748_v26, %v10806_v6  ;;  %vm4144_vm14 = vcmp.eq.s32.totalorder %v12930_v5, %v9507_v23  ;;  %v12936_v51 = vld [vmem:[#allocation365_spill] sm:$0xff] }
 0x581   : > { %v4787_v53 = vmul.f32 %v10926_v7, %v4525_v1  ;;  %v5554_v40 = vmul.f32 %v5341_v17, %v4786_v54  ;;  %v6067_v3 = vadd.f32 %v6066_v44, %v5553_v47  ;;  %v4405_v14 = vmax.f32 %v4277_v18, 0.0  ;;  %v12938_v47 = vld [vmem:[#allocation366_spill] sm:$0xff] }
 0x582   : > { %v3511_v39 = vmul.f32 %v3383_v21, %v3383_v21  ;;  %v1714_v60 = vmul.f32 %v1586_v42, %v1586_v42  ;;  %v4527_v43 = vsel %vm4143_vm13, %v10812_v22, %v10863_v62  ;;  %vm4145_vm15 = vcmp.eq.s32.totalorder %v12931_v19, %v9507_v23  ;;  %v12940_v17 = vld [vmem:[#allocation250_spill] sm:$0xff] }
 0x583   : > { %v5555_v26 = vmul.f32 %v5346_v8, %v4787_v53  ;;  %v6068_v6 = vadd.f32 %v6067_v3, %v5554_v40  ;;  %v4788_v59 = vmul.f32 %v10926_v7, %v4526_v20  ;;  %v4279_v10 = vsub.f32 1.0, %v11008_v32  ;;  %v12933_v8 = vld [vmem:[#allocation142_spill] sm:$0xff] }
 0x584   : > { %v11029_v49 = vadd.f32 %v12932_v61, %v2740_v57  ;;  %v5376_v18 = vpop.permute.xlu0 %5375  ;;  %v5351_v2 = vpop.permute.xlu1 %5350  ;;  %v4528_v22 = vsel %vm4144_vm14, %v10797_v24, %v10858_v36  ;;  %v11036_v62 = vmax.f32 %v4280_v58, 0.0  ;;  %vm4146_vm0 = vcmp.eq.s32.totalorder %v12933_v8, %v9507_v23  ;;  %v12937_v36 = vld [vmem:[#allocation284_spill] sm:$0xff] }
 0x585   : > { %v4789_v37 = vmul.f32 %v10926_v7, %v4527_v43  ;;  %v5556_v0 = vmul.f32 %v5351_v2, %v4788_v59  ;;  %v6069_v31 = vadd.f32 %v6068_v6, %v5555_v26  ;;  %v11042_v52 = vadd.f32 %v3511_v39, %v12934_v16  ;;  %v12944_v2 = vld [vmem:[#allocation109_spill] sm:$0xff]  ;;  %v12945_v8 = vld [vmem:[#allocation368_spill] sm:$0xff] }
 0x586   : > { %v2742_v11 = vadd.f32 %v12935_v35, %v1714_v60  ;;  %v3385_v34 = vsub.f32 %v12936_v51, %v8115_v38  ;;  %v4529_v24 = vsel %vm4145_vm15, %v10849_v45, %v10929_v9  ;;  %vm4147_vm1 = vcmp.eq.s32.totalorder %v12937_v36, %v9507_v23  ;;  %v12939_v9 = vld [vmem:[#allocation40_spill] sm:$0xff]  ;;  %v12942_v60 = vld [vmem:[#allocation367_spill] sm:$0xff]  ;;  %v12947_v51 = vld [vmem:[#allocation369_spill] sm:$0xff] }
 0x587   : > { %v5557_v21 = vmul.f32 %v5356_v63, %v4789_v37  ;;  %v6070_v25 = vadd.f32 %v6069_v31, %v5556_v0  ;;  %v4790_v42 = vmul.f32 %v10926_v7, %v4528_v22  ;;  %v4407_v1 = vmax.f32 %v4279_v10, 0.0 }
 0x588   : > { %v4282_v30 = vsub.f32 1.0, %v11029_v49  ;;  %v1588_v44 = vsub.f32 %v12938_v47, %v7785_v46  ;;  %v5386_v54 = vpop.permute.xlu0 %5385  ;;  %v5361_v58 = vpop.permute.xlu1 %5360  ;;  %v4530_v45 = vsel %vm4146_vm0, %v10838_v48, %v10909_v27  ;;  %vm4148_vm2 = vcmp.eq.s32.totalorder %v12939_v9, %v9507_v23  ;;  %v12941_v48 = vld [vmem:[#allocation136_spill] sm:$0xff]  ;;  %v12951_v9 = vld [vmem:[#allocation110_spill] sm:$0xff] }
 0x589   : > { %v4791_v63 = vmul.f32 %v10926_v7, %v4529_v24  ;;  %v5558_v4 = vmul.f32 %v5361_v58, %v4790_v42  ;;  %v6071_v29 = vadd.f32 %v6070_v25, %v5557_v21  ;;  %v4281_v57 = vsub.f32 1.0, %v11042_v52  ;;  %v12949_v42 = vld [vmem:[#allocation252_spill] sm:$0xff]  ;;  %v12950_v58 = vld [vmem:[#allocation141_spill] sm:$0xff] }
 0x58a   : > { %v11068_v20 = vadd.f32 %v12940_v17, %v2742_v11  ;;  %v3513_v5 = vmul.f32 %v3385_v34, %v3385_v34  ;;  %v4531_v53 = vsel %vm4147_vm1, %v10900_v33, %v10969_v56  ;;  %vm4149_vm3 = vcmp.eq.s32.totalorder %v12941_v48, %v9507_v23  ;;  %v12943_v56 = vld [vmem:[#allocation145_spill] sm:$0xff] }
 0x58b   : > { %v5559_v27 = vmul.f32 %v5366_v15, %v4791_v63  ;;  %v6072_v40 = vadd.f32 %v6071_v29, %v5558_v4  ;;  %v4792_v3 = vmul.f32 %v10926_v7, %v4530_v45  ;;  %v1716_v39 = vmul.f32 %v1588_v44, %v1588_v44  ;;  %v12952_v29 = vld [vmem:[#allocation371_spill] sm:$0xff] }
 0x58c   : > { %v3387_v43 = vsub.f32 %v12942_v60, %v8115_v38  ;;  %v5396_v19 = vpop.permute.xlu0 %5395  ;;  %v5371_v26 = vpop.permute.xlu1 %5370  ;;  %v4532_v6 = vsel %vm4148_vm2, %v10887_v12, %v10951_v28  ;;  %v4410_v33 = vmax.f32 %v4282_v30, 0.0  ;;  %vm4150_vm4 = vcmp.eq.s32.totalorder %v12943_v56, %v9507_v23  ;;  %v12946_v12 = vld [vmem:[#allocation135_spill] sm:$0xff] }
 0x58d   : > { %v4793_v15 = vmul.f32 %v10926_v7, %v4531_v53  ;;  %v5560_v59 = vmul.f32 %v5371_v26, %v4792_v3  ;;  %v6073_v10 = vadd.f32 %v6072_v40, %v5559_v27  ;;  %v4409_v61 = vmax.f32 %v4281_v57, 0.0  ;;  %v12954_v27 = vld [vmem:[#allocation243_spill] sm:$0xff]  ;;  %v12955_v3 = vld [vmem:[#allocation257_spill] sm:$0xff] }
 0x58e   : > { %v3641_v22 = vadd.f32 %v3513_v5, %v12944_v2  ;;  %v1590_v37 = vsub.f32 %v12945_v8, %v7785_v46  ;;  %v4533_v0 = vsel %vm4149_vm3, %v10944_v55, %v4405_v14  ;;  %vm4151_vm5 = vcmp.eq.s32.totalorder %v12946_v12, %v9507_v23  ;;  %v12948_v14 = vld [vmem:[#allocation147_spill] sm:$0xff] }
 0x58f   : > { %v5561_v28 = vmul.f32 %v5376_v18, %v4793_v15  ;;  %v6074_v31 = vadd.f32 %v6073_v10, %v5560_v59  ;;  %v4794_v16 = vmul.f32 %v10926_v7, %v4532_v6  ;;  %v4284_v35 = vsub.f32 1.0, %v11068_v20  ;;  %v12957_v56 = vld [vmem:[#allocation111_spill] sm:$0xff] }
 0x590   : > { %v3515_v11 = vmul.f32 %v3387_v43, %v3387_v43  ;;  %v3389_v34 = vsub.f32 %v12947_v51, %v8115_v38  ;;  %v5406_v24 = vpop.permute.xlu0 %5405  ;;  %v5381_v46 = vpop.permute.xlu1 %5380  ;;  %v4534_v55 = vsel %vm4150_vm4, %v10941_v41, %v11001_v50  ;;  %vm4152_vm6 = vcmp.eq.s32.totalorder %v12948_v14, %v9507_v23 }
 0x591   : > { %v4795_v18 = vmul.f32 %v10926_v7, %v4533_v0  ;;  %v5562_v36 = vmul.f32 %v5381_v46, %v4794_v16  ;;  %v6075_v21 = vadd.f32 %v6074_v31, %v5561_v28  ;;  %v4283_v25 = vsub.f32 1.0, %v3641_v22  ;;  %v12959_v0 = vld [vmem:[#allocation254_spill] sm:$0xff]  ;;  %v12960_v16 = vld [vmem:[#allocation180_spill] sm:$0xff] }
 0x592   : > { %v2744_v30 = vadd.f32 %v12949_v42, %v1716_v39  ;;  %v1718_v47 = vmul.f32 %v1590_v37, %v1590_v37  ;;  %v4535_v44 = vsel %vm4151_vm5, %v11008_v32, %v4407_v1  ;;  %vm4153_vm7 = vcmp.eq.s32.totalorder %v12950_v58, %v9507_v23  ;;  %v12953_v1 = vld [vmem:[#allocation43_spill] sm:$0xff]  ;;  %v12961_v46 = vld [vmem:[#allocation112_spill] sm:$0xff] }
 0x593   : > { %v5563_v41 = vmul.f32 %v5386_v54, %v4795_v18  ;;  %v6076_v50 = vadd.f32 %v6075_v21, %v5562_v36  ;;  %v4796_v45 = vmul.f32 %v10926_v7, %v4534_v55  ;;  %v3643_v63 = vadd.f32 %v3515_v11, %v12951_v9 }
 0x594   : > { %v3517_v4 = vmul.f32 %v3389_v34, %v3389_v34  ;;  %v3391_v57 = vsub.f32 %v12952_v29, %v8115_v38  ;;  %v5391_v17 = vpop.permute.xlu1 %5390  ;;  %v4536_v32 = vsel %vm4152_vm6, %v10982_v13, %v11036_v62  ;;  %vm4154_vm8 = vcmp.eq.s32.totalorder %v12953_v1, %v9507_v23  ;;  %v5416_v60 = vpop.permute.xlu0 %5415  ;;  %v12956_v13 = vld [vmem:[#allocation41_spill] sm:$0xff] }
 0x595   : > { %v4797_v54 = vmul.f32 %v10926_v7, %v4535_v44  ;;  %v5564_v5 = vmul.f32 %v5391_v17, %v4796_v45  ;;  %v6077_v53 = vadd.f32 %v6076_v50, %v5563_v41  ;;  %v4411_v48 = vmax.f32 %v4283_v25, 0.0 }
 0x596   : > { %v3644_v40 = vadd.f32 %v12954_v27, %v2744_v30  ;;  %v2746_v39 = vadd.f32 %v12955_v3, %v1718_v47  ;;  %v4537_v38 = vsel %vm4153_vm7, %v11042_v52, %v4409_v61  ;;  %vm4155_vm9 = vcmp.eq.s32.totalorder %v12956_v13, %v9507_v23  ;;  %v12958_v52 = vld [vmem:[#allocation189_spill] sm:$0xff] }
 0x597   : > { %v5565_v62 = vmul.f32 %v5396_v19, %v4797_v54  ;;  %v6078_v43 = vadd.f32 %v6077_v53, %v5564_v5  ;;  %v4798_v26 = vmul.f32 %v10926_v7, %v4536_v32  ;;  %v4285_v6 = vsub.f32 1.0, %v3643_v63  ;;  %v12963_v47 = vld [vmem:[#allocation301_spill] sm:$0xff] }
 0x598   : > { %v3645_v15 = vadd.f32 %v3517_v4, %v12957_v56  ;;  %v3519_v59 = vmul.f32 %v3391_v57, %v3391_v57  ;;  %v5401_v10 = vpop.permute.xlu1 %5400  ;;  %v4538_v2 = vsel %vm4154_vm8, %v11029_v49, %v4410_v33  ;;  %vm4156_vm10 = vcmp.eq.s32.totalorder %v12958_v52, %v9507_v23  ;;  %v5426_v14 = vpop.permute.xlu0 %5425  ;;  %v12964_v4 = vld [vmem:[#allocation53_spill] sm:$0xff] }
 0x599   : > { %v4799_v61 = vmul.f32 %v10926_v7, %v4537_v38  ;;  %v5566_v8 = vmul.f32 %v5401_v10, %v4798_v26  ;;  %v6079_v19 = vadd.f32 %v6078_v43, %v5565_v62  ;;  %v4286_v37 = vsub.f32 1.0, %v3644_v40  ;;  %v12965_v54 = vld [vmem:[#allocation153_spill] sm:$0xff] }
 0x59a   : > { %v3646_v12 = vadd.f32 %v12959_v0, %v2746_v39  ;;  %v4539_v28 = vsel %vm4155_vm9, %v3641_v22, %v4411_v48  ;;  %v4412_v31 = vmax.f32 %v4284_v35, 0.0  ;;  %vm4157_vm11 = vcmp.eq.s32.totalorder %v12960_v16, %v9507_v23  ;;  %v12962_v22 = vld [vmem:[#allocation192_spill] sm:$0xff] }
 0x59b   : > { %v5567_v11 = vmul.f32 %v5406_v24, %v4799_v61  ;;  %v6080_v51 = vadd.f32 %v6079_v19, %v5566_v8  ;;  %v4800_v34 = vmul.f32 %v10926_v7, %v4538_v2  ;;  %v4413_v49 = vmax.f32 %v4285_v6, 0.0 }
 0x59c   : > { %v4287_v33 = vsub.f32 1.0, %v3645_v15  ;;  %v3647_v55 = vadd.f32 %v3519_v59, %v12961_v46  ;;  %v5411_v18 = vpop.permute.xlu1 %5410  ;;  %v4540_v36 = vsel %vm4156_vm10, %v11068_v20, %v4412_v31  ;;  %vm4158_vm12 = vcmp.eq.s32.totalorder %v12962_v22, %v9507_v23  ;;  %v5436_v32 = vpop.permute.xlu0 %5435 }
 0x59d   : > { %v4801_v35 = vmul.f32 %v10926_v7, %v4539_v28  ;;  %v5568_v24 = vmul.f32 %v5411_v18, %v4800_v34  ;;  %v6081_v21 = vadd.f32 %v6080_v51, %v5567_v11  ;;  %v4288_v25 = vsub.f32 1.0, %v3646_v12 }
 0x59e   : > { %v4541_v42 = vsel %vm4157_vm11, %v3643_v63, %v4413_v49  ;;  %v4414_v30 = vmax.f32 %v4286_v37, 0.0  ;;  %vm4159_vm13 = vcmp.eq.s32.totalorder %v12963_v47, %v9507_v23  ;;  %v4802_v41 = vmul.f32 %v10926_v7, %v4540_v36 }
 0x59f   : > { %v5569_v44 = vmul.f32 %v5416_v60, %v4801_v35  ;;  %v6082_v58 = vadd.f32 %v6081_v21, %v5568_v24  ;;  %v4415_v50 = vmax.f32 %v4287_v33, 0.0  ;;  %v4289_v45 = vsub.f32 1.0, %v3647_v55 }
 0x5a0   : > { %v5421_v20 = vpop.permute.xlu1 %5420  ;;  %v4542_v9 = vsel %vm4158_vm12, %v3644_v40, %v4414_v30  ;;  %vm4160_vm14 = vcmp.eq.s32.totalorder %v12964_v4, %v9507_v23  ;;  %v4803_v29 = vmul.f32 %v10926_v7, %v4541_v42  ;;  %v4416_v1 = vmax.f32 %v4288_v25, 0.0  ;;  %v5446_v6 = vpop.permute.xlu0 %5445 }
 0x5a1   : > { %v5570_v57 = vmul.f32 %v5421_v20, %v4802_v41  ;;  %v6083_v17 = vadd.f32 %v6082_v58, %v5569_v44  ;;  %v4543_v63 = vsel %vm4159_vm13, %v3645_v15, %v4415_v50  ;;  %vm4161_vm15 = vcmp.eq.s32.totalorder %v12965_v54, %v9507_v23 }
 0x5a2   : > { %v5571_v5 = vmul.f32 %v5426_v14, %v4803_v29  ;;  %v4804_v48 = vmul.f32 %v10926_v7, %v4542_v9  ;;  %v4417_v27 = vmax.f32 %v4289_v45, 0.0  ;;  %v4544_v40 = vsel %vm4160_vm14, %v3646_v12, %v4416_v1 }
 0x5a3   : > { %v6084_v53 = vadd.f32 %v6083_v17, %v5570_v57  ;;  %v4805_v39 = vmul.f32 %v10926_v7, %v4543_v63  ;;  %v4806_v26 = vmul.f32 %v10926_v7, %v4544_v40 }
 0x5a4   : > { %v5431_v3 = vpop.permute.xlu1 %5430  ;;  %v4545_v13 = vsel %vm4161_vm15, %v3647_v55, %v4417_v27 }
 0x5a5   : > { %v5572_v38 = vmul.f32 %v5431_v3, %v4804_v48  ;;  %v6085_v60 = vadd.f32 %v6084_v53, %v5571_v5  ;;  %v5573_v62 = vmul.f32 %v5436_v32, %v4805_v39  ;;  %v4807_v23 = vmul.f32 %v10926_v7, %v4545_v13 }
 0x5a7   : > { %v6086_v43 = vadd.f32 %v6085_v60, %v5572_v38  ;;  %v5575_v10 = vmul.f32 %v5446_v6, %v4807_v23 }
 0x5a8   : > { %v5441_v56 = vpop.permute.xlu1 %5440 }
 0x5a9   : > { %v5574_v15 = vmul.f32 %v5441_v56, %v4806_v26  ;;  %v6087_v59 = vadd.f32 %v6086_v43, %v5573_v62 }
 0x5ab   : > { %v6088_v2 = vadd.f32 %v6087_v59, %v5574_v15 }
 0x5ad   : > { %v6089_v52 = vadd.f32 %v6088_v2, %v5575_v10 }
 0x5af   : > { %6090 = vadd.xlane.f32.xlu1 %v6089_v52 }
 0x63c   : > { %v6091_v61 = vpop.xlane.xlu1 %6090 }
 0x63d   : > { %v6092_v8 = vrot.slane %v6091_v61, 4 }
 0x63f   : > { %v6093_v19 = vadd.f32 %v6092_v8, %v6091_v61 }
 0x641   : > { %v6094_v37 = vrot.slane %v6093_v19, 2 }
 0x643   : > { %v6095_v0 = vadd.f32 %v6094_v37, %v6093_v19 }
 0x645   : > { %v6096_v12 = vrot.slane %v6095_v0, 1 }
 0x647   : > { %v6097_v28 = vadd.f32 %v6096_v12, %v6095_v0 }
 0x649   : > { %6201 = vpush %v6097_v28 }
 0x67a   : > { %s6202_s24 = spop %6201 }
 0x67b   : > { %v6099_v7 = vstv %s6202_s24 }
 0x67c   : > { %6100 = vst [vmem:[%s301_s23] sm:$0xff] %v6099_v7 }
 0x67d PF: > { %s15_s20 = sadd.s32 1, %s6326_s20   ;;  %s12966_s18 = smov %s6322_s19 }
 0x67e   : > { %p12_p6 = scmp.ge.s32.totalorder %s15_s20, 4   ;;  %s12967_s19 = smov %s12969_s21 }
 0x680   :  { %14 = sbr.rel (!%p12_p6) target bundleno = 2 (0x2), region = 84 }

</bundles_post_ra>
